<compile_context>
chip_gen: v7x
topology: tpu7x:2x2x1
jax: 0.10.0
libtpu: 0.0.40
codegen_flags: <defaults>
</compile_context>

<pallas_src>
import jax
import jax.numpy as jnp
import numpy as np
from jax import lax
from jax.experimental import pallas as pl
from jax.experimental.pallas import tpu as pltpu

EPS = 1e-5
NEG_SLOPE = 0.1


def _leaky(y):
    return jnp.where(y > 0, y, NEG_SLOPE * y)


def _pick_row_tile(rows, target=256):
    """Largest row-tile <= target that divides `rows` and is a multiple of 8."""
    if rows <= target:
        return rows
    t = (target // 8) * 8
    while t >= 8:
        if rows % t == 0:
            return t
        t -= 8
    return rows


# ---------------- Pallas kernels ----------------

def conv1_stats_kernel(x_ref, w_ref, st_ref):
    # Pass 1 of stage-1 BN: 1x1 conv on this row tile, emit per-tile partial
    # per-channel sum and sum-of-squares of the pre-BN activations.
    # x_ref: (TR, Cin) bf16, w_ref: (Cin, Cmid) bf16, st_ref: (1, 2, Cmid) f32
    y = jnp.dot(x_ref[...], w_ref[...], preferred_element_type=jnp.float32)
    st_ref[:, 0:1, :] = jnp.sum(y, axis=0, keepdims=True)[None]
    st_ref[:, 1:2, :] = jnp.sum(y * y, axis=0, keepdims=True)[None]


def conv1_bn_lrelu_kernel(x_ref, w_ref, s_ref, b_ref, o_ref):
    # Pass 2 of stage 1: 1x1 conv + folded BN (scale/bias) + LeakyReLU.
    # x_ref: (TR, Cin) bf16, w_ref: (Cin, Cmid) bf16, s/b: (1, Cmid) f32,
    # o_ref: (TR, Cmid) bf16
    y = jnp.dot(x_ref[...], w_ref[...], preferred_element_type=jnp.float32)
    y = y * s_ref[...] + b_ref[...]
    o_ref[...] = _leaky(y).astype(o_ref.dtype)


def conv2_stats_kernel(xp_ref, w_ref, y_ref, st_ref, acc_ref):
    # Pass 1 of stage 2: 3x3 conv (pad 1) for one image, write pre-BN output
    # and per-image partial BN statistics.  Accumulates into a VMEM scratch.
    # xp_ref: (1, H+2, W+2, Cmid) bf16 (zero-padded stage-1 output)
    # w_ref : (3, 3, Cmid, Cout) bf16 (HWIO)
    # y_ref : (1, H, W, Cout) bf16, st_ref: (1, 2, Cout) f32
    # acc_ref: VMEM (H*W, Cout) f32 scratch
    _, hp2, wp2, cmid = xp_ref.shape
    h, w = hp2 - 2, wp2 - 2
    cout = acc_ref.shape[-1]
    acc_ref[...] = jnp.zeros_like(acc_ref)
    for dy in range(3):                       # static 3x3 tap loop -> 9 MXU matmuls
        for dx in range(3):
            patch = xp_ref[:, dy:dy + h, dx:dx + w, :].reshape(h * w, cmid)
            acc_ref[...] += jnp.dot(patch, w_ref[dy, dx],
                                    preferred_element_type=jnp.float32)
    y = acc_ref[...]
    y_ref[...] = y.reshape(1, h, w, cout).astype(y_ref.dtype)
    st_ref[:, 0:1, :] = jnp.sum(y, axis=0, keepdims=True)[None]
    st_ref[:, 1:2, :] = jnp.sum(y * y, axis=0, keepdims=True)[None]


def bn2_lrelu_res_kernel(y_ref, r_ref, s_ref, b_ref, o_ref):
    # Pass 2 of stage 2: apply BN2 (folded) + LeakyReLU + residual add.
    # y_ref: (TR, Cout) bf16, r_ref: (TR, Cout) f32 residual,
    # s/b: (1, Cout) f32, o_ref: (TR, Cout) f32
    y = y_ref[...].astype(jnp.float32) * s_ref[...] + b_ref[...]
    o_ref[...] = _leaky(y) + r_ref[...]


# ---------------- wrapper ----------------

def basic_block_forward(x_nchw, w1, w2, gamma1, beta1, gamma2, beta2):
    N, Cin, H, W = x_nchw.shape
    Cmid = w1.shape[0]
    Cout = w2.shape[0]
    assert Cout == Cin, "residual add requires planes[1] == inplanes"
    R = N * H * W

    x_nhwc = jnp.transpose(x_nchw, (0, 2, 3, 1)).astype(jnp.float32)   # NHWC
    x_flat = x_nhwc.reshape(R, Cin)
    x_bf16 = x_flat.astype(jnp.bfloat16)

    # Conv weights: bf16 for the MXU, f32 accumulation inside the kernels.
    w1_b = jnp.transpose(w1[:, :, 0, 0], (1, 0)).astype(jnp.bfloat16)  # (Cin, Cmid)
    w2_b = jnp.transpose(w2, (2, 3, 1, 0)).astype(jnp.bfloat16)        # (3,3,Cmid,Cout)

    tr = _pick_row_tile(R)
    n_tiles = R // tr
    cparams = pltpu.CompilerParams(
        dimension_semantics=("parallel",),
        vmem_limit_bytes=32 * 1024 * 1024,
    )

    # ---- stage 1, pass 1: 1x1 conv + per-tile partial BN1 stats ----
    stats1 = pl.pallas_call(
        conv1_stats_kernel,
        out_shape=jax.ShapeDtypeStruct((n_tiles, 2, Cmid), jnp.float32),
        grid=(n_tiles,),
        in_specs=[
            pl.BlockSpec((tr, Cin), lambda i: (i, 0)),
            pl.BlockSpec((Cin, Cmid), lambda i: (0, 0)),
        ],
        out_specs=pl.BlockSpec((1, 2, Cmid), lambda i: (i, 0, 0)),
        compiler_params=cparams,
    )(x_bf16, w1_b)

    sums1 = jnp.sum(stats1[:, 0, :], axis=0)
    sqs1 = jnp.sum(stats1[:, 1, :], axis=0)
    mean1 = sums1 / R
    var1 = jnp.maximum(sqs1 / R - mean1 * mean1, 0.0)   # biased variance (training BN)
    inv1 = gamma1 * lax.rsqrt(var1 + EPS)
    scale1 = inv1.reshape(1, Cmid).astype(jnp.float32)
    bias1 = (beta1 - mean1 * inv1).reshape(1, Cmid).astype(jnp.float32)

    # ---- stage 1, pass 2: conv1 + folded BN1 + LeakyReLU -> out1 (bf16) ----
    out1 = pl.pallas_call(
        conv1_bn_lrelu_kernel,
        out_shape=jax.ShapeDtypeStruct((R, Cmid), jnp.bfloat16),
        grid=(n_tiles,),
        in_specs=[
            pl.BlockSpec((tr, Cin), lambda i: (i, 0)),
            pl.BlockSpec((Cin, Cmid), lambda i: (0, 0)),
            pl.BlockSpec((1, Cmid), lambda i: (0, 0)),
            pl.BlockSpec((1, Cmid), lambda i: (0, 0)),
        ],
        out_specs=pl.BlockSpec((tr, Cmid), lambda i: (i, 0)),
        compiler_params=cparams,
    )(x_bf16, w1_b, scale1, bias1)

    # Zero-pad the post-activation stage-1 output for the 3x3 conv (bf16).
    o1p = jnp.pad(out1.reshape(N, H, W, Cmid), ((0, 0), (1, 1), (1, 1), (0, 0)))

    # ---- stage 2, pass 1: 3x3 conv + per-image partial BN2 stats ----
    y2, stats2 = pl.pallas_call(
        conv2_stats_kernel,
        out_shape=(
            jax.ShapeDtypeStruct((N, H, W, Cout), jnp.bfloat16),
            jax.ShapeDtypeStruct((N, 2, Cout), jnp.float32),
        ),
        grid=(N,),
        in_specs=[
            pl.BlockSpec((1, H + 2, W + 2, Cmid), lambda n: (n, 0, 0, 0)),
            pl.BlockSpec((3, 3, Cmid, Cout), lambda n: (0, 0, 0, 0)),
        ],
        out_specs=(
            pl.BlockSpec((1, H, W, Cout), lambda n: (n, 0, 0, 0)),
            pl.BlockSpec((1, 2, Cout), lambda n: (n, 0, 0)),
        ),
        scratch_shapes=[pltpu.VMEM((H * W, Cout), jnp.float32)],
        compiler_params=cparams,
    )(o1p, w2_b)

    sums2 = jnp.sum(stats2[:, 0, :], axis=0)
    sqs2 = jnp.sum(stats2[:, 1, :], axis=0)
    mean2 = sums2 / R
    var2 = jnp.maximum(sqs2 / R - mean2 * mean2, 0.0)
    inv2 = gamma2 * lax.rsqrt(var2 + EPS)
    scale2 = inv2.reshape(1, Cout).astype(jnp.float32)
    bias2 = (beta2 - mean2 * inv2).reshape(1, Cout).astype(jnp.float32)

    # ---- stage 2, pass 2: BN2 + LeakyReLU + residual ----
    y2_flat = y2.reshape(R, Cout)
    out2 = pl.pallas_call(
        bn2_lrelu_res_kernel,
        out_shape=jax.ShapeDtypeStruct((R, Cout), jnp.float32),
        grid=(n_tiles,),
        in_specs=[
            pl.BlockSpec((tr, Cout), lambda i: (i, 0)),
            pl.BlockSpec((tr, Cout), lambda i: (i, 0)),
            pl.BlockSpec((1, Cout), lambda i: (0, 0)),
            pl.BlockSpec((1, Cout), lambda i: (0, 0)),
        ],
        out_specs=pl.BlockSpec((tr, Cout), lambda i: (i, 0)),
        compiler_params=cparams,
    )(y2_flat, x_flat, scale2, bias2)

    return jnp.transpose(out2.reshape(N, H, W, Cout), (0, 3, 1, 2))  # NCHW


# ---------------- pure-JAX reference (sanity check) ----------------

def reference(x_nchw, w1, w2, g1, b1, g2, b2):
    x = jnp.transpose(x_nchw, (0, 2, 3, 1))

    def conv(y, w_oihw, pad):
        w_hwio = jnp.transpose(w_oihw, (2, 3, 1, 0))
        return lax.conv_general_dilated(
            y, w_hwio, (1, 1), pad, dimension_numbers=("NHWC", "HWIO", "NHWC"))

    def bn(y, g, b):
        mean = jnp.mean(y, axis=(0, 1, 2), keepdims=True)
        var = jnp.mean((y - mean) ** 2, axis=(0, 1, 2), keepdims=True)
        return (y - mean) * lax.rsqrt(var + EPS) * g + b

    y = _leaky(bn(conv(x, w1, [(0, 0), (0, 0)]), g1, b1))
    y = _leaky(bn(conv(y, w2, [(1, 1), (1, 1)]), g2, b2))
    y = y + x
    return jnp.transpose(y, (0, 3, 1, 2))


if __name__ == "__main__":
    key = jax.random.PRNGKey(0)
    k1, k2, k3, k4, k5, k6, k7 = jax.random.split(key, 7)

    N, Cin, H, W = 2, 4, 16, 16           # x: NCHW, like the PyTorch module
    planes = (2, 4)                        # darknet-style: (inplanes//2, inplanes)
    Cmid, Cout = planes

    x = jax.random.normal(k1, (N, Cin, H, W), jnp.float32)
    # Conv weights in PyTorch OIHW layout (bias=False).
    w1 = jax.random.normal(k2, (Cmid, Cin, 1, 1), jnp.float32) / np.sqrt(Cin)
    w2 = jax.random.normal(k3, (Cout, Cmid, 3, 3), jnp.float32) / np.sqrt(Cmid * 9)
    # BatchNorm affine params, deterministic and non-trivial.
    gamma1 = 1.0 + 0.1 * jax.random.normal(k4, (Cmid,), jnp.float32)
    beta1 = 0.1 * jax.random.normal(k5, (Cmid,), jnp.float32)
    gamma2 = 1.0 + 0.1 * jax.random.normal(k6, (Cout,), jnp.float32)
    beta2 = 0.1 * jax.random.normal(k7, (Cout,), jnp.float32)

    fwd = jax.jit(basic_block_forward)
    out = fwd(x, w1, w2, gamma1, beta1, gamma2, beta2)
    out = jax.block_until_ready(out)

    ref = reference(x, w1, w2, gamma1, beta1, gamma2, beta2)
    # Tolerance covers bf16 matmul operands (f32 accumulation throughout).
    np.testing.assert_allclose(np.asarray(out), np.asarray(ref),
                               rtol=4e-2, atol=4e-2)
    print("KERNEL_OK")
</pallas_src>

<mosaic_0001>
module attributes {stable_mosaic.version = 11 : i64} {
  func.func @conv1_stats_kernel(%arg0: i32, %arg1: memref<256x4xbf16, #tpu.memory_space<vmem>>, %arg2: memref<4x2xbf16, #tpu.memory_space<vmem>>, %arg3: memref<1x2x2xf32, #tpu.memory_space<vmem>>) attributes {dimension_semantics = [#tpu.dimension_semantics<parallel>], iteration_bounds = array<i64: 2>, scalar_prefetch = 0 : i64, scratch_operands = 0 : i64, tpu.core_type = #tpu.core_type<tc>, window_params = [{transform_indices = @transform_0, window_bounds = array<i64: 256, 4>}, {pipeline_mode = #tpu.pipeline_mode<synchronous>, transform_indices = @transform_1, window_bounds = array<i64: 4, 2>}, {transform_indices = @transform_2, window_bounds = array<i64: 1, 2, 2>}]} {
    %c0 = arith.constant 0 : index
    %c0_0 = arith.constant 0 : index
    %0 = vector.load %arg1[%c0, %c0_0] : memref<256x4xbf16, #tpu.memory_space<vmem>>, vector<256x4xbf16>
    %c0_1 = arith.constant 0 : index
    %c0_2 = arith.constant 0 : index
    %1 = vector.load %arg2[%c0_1, %c0_2] : memref<4x2xbf16, #tpu.memory_space<vmem>>, vector<4x2xbf16>
    %cst = arith.constant dense<0.000000e+00> : vector<256x2xf32>
    %2 = tpu.matmul %0, %1, %cst {dimension_numbers = #tpu.dot_dimension_numbers<[1], [0], [0], [1], [0, 0, 1, 1], [], []>} : vector<256x4xbf16>, vector<4x2xbf16>, vector<256x2xf32> -> vector<256x2xf32>
    %cst_3 = arith.constant dense<0.000000e+00> : vector<2xf32>
    %3 = vector.multi_reduction <add>, %2, %cst_3 [0] : vector<256x2xf32> to vector<2xf32>
    %4 = vector.shape_cast %3 : vector<2xf32> to vector<1x2xf32>
    %5 = vector.shape_cast %4 : vector<1x2xf32> to vector<1x1x2xf32>
    %c0_4 = arith.constant 0 : index
    %c0_5 = arith.constant 0 : index
    %c0_6 = arith.constant 0 : index
    %6 = vector.load %arg3[%c0_4, %c0_5, %c0_6] : memref<1x2x2xf32, #tpu.memory_space<vmem>>, vector<1x1x2xf32>
    tpu.vector_store %arg3[%c0_4, %c0_5, %c0_6], %5 {strides = array<i32>} : memref<1x2x2xf32, #tpu.memory_space<vmem>>, vector<1x1x2xf32>,
    %7 = arith.mulf %2, %2 : vector<256x2xf32>
    %cst_7 = arith.constant dense<0.000000e+00> : vector<2xf32>
    %8 = vector.multi_reduction <add>, %7, %cst_7 [0] : vector<256x2xf32> to vector<2xf32>
    %9 = vector.shape_cast %8 : vector<2xf32> to vector<1x2xf32>
    %10 = vector.shape_cast %9 : vector<1x2xf32> to vector<1x1x2xf32>
    %c0_8 = arith.constant 0 : index
    %c1 = arith.constant 1 : index
    %c0_9 = arith.constant 0 : index
    %11 = vector.load %arg3[%c0_8, %c1, %c0_9] : memref<1x2x2xf32, #tpu.memory_space<vmem>>, vector<1x1x2xf32>
    tpu.vector_store %arg3[%c0_8, %c1, %c0_9], %10 {strides = array<i32>} : memref<1x2x2xf32, #tpu.memory_space<vmem>>, vector<1x1x2xf32>,
    return
  }
  func.func @transform_0(%arg0: i32) -> (i32, i32) {
    %c0_i32 = arith.constant 0 : i32
    %c0_i32_0 = arith.constant 0 : i32
    return %arg0, %c0_i32 : i32, i32
  }
  func.func @transform_1(%arg0: i32) -> (i32, i32) {
    %c0_i32 = arith.constant 0 : i32
    %c0_i32_0 = arith.constant 0 : i32
    %c0_i32_1 = arith.constant 0 : i32
    return %c0_i32, %c0_i32_0 : i32, i32
  }
  func.func @transform_2(%arg0: i32) -> (i32, i32, i32) {
    %c0_i32 = arith.constant 0 : i32
    %c0_i32_0 = arith.constant 0 : i32
    %c0_i32_1 = arith.constant 0 : i32
    return %arg0, %c0_i32, %c0_i32_0 : i32, i32, i32
  }
}

module attributes {stable_mosaic.version = 11 : i64} {
  func.func @conv1_bn_lrelu_kernel(%arg0: i32, %arg1: memref<256x4xbf16, #tpu.memory_space<vmem>>, %arg2: memref<4x2xbf16, #tpu.memory_space<vmem>>, %arg3: memref<1x2xf32, #tpu.memory_space<vmem>>, %arg4: memref<1x2xf32, #tpu.memory_space<vmem>>, %arg5: memref<256x2xbf16, #tpu.memory_space<vmem>>) attributes {dimension_semantics = [#tpu.dimension_semantics<parallel>], iteration_bounds = array<i64: 2>, scalar_prefetch = 0 : i64, scratch_operands = 0 : i64, tpu.core_type = #tpu.core_type<tc>, window_params = [{transform_indices = @transform_0, window_bounds = array<i64: 256, 4>}, {pipeline_mode = #tpu.pipeline_mode<synchronous>, transform_indices = @transform_1, window_bounds = array<i64: 4, 2>}, {pipeline_mode = #tpu.pipeline_mode<synchronous>, transform_indices = @transform_2, window_bounds = array<i64: 1, 2>}, {pipeline_mode = #tpu.pipeline_mode<synchronous>, transform_indices = @transform_3, window_bounds = array<i64: 1, 2>}, {transform_indices = @transform_4, window_bounds = array<i64: 256, 2>}]} {
    %c0 = arith.constant 0 : index
    %c0_0 = arith.constant 0 : index
    %0 = vector.load %arg1[%c0, %c0_0] : memref<256x4xbf16, #tpu.memory_space<vmem>>, vector<256x4xbf16>
    %c0_1 = arith.constant 0 : index
    %c0_2 = arith.constant 0 : index
    %1 = vector.load %arg2[%c0_1, %c0_2] : memref<4x2xbf16, #tpu.memory_space<vmem>>, vector<4x2xbf16>
    %cst = arith.constant dense<0.000000e+00> : vector<256x2xf32>
    %2 = tpu.matmul %0, %1, %cst {dimension_numbers = #tpu.dot_dimension_numbers<[1], [0], [0], [1], [0, 0, 1, 1], [], []>} : vector<256x4xbf16>, vector<4x2xbf16>, vector<256x2xf32> -> vector<256x2xf32>
    %c0_3 = arith.constant 0 : index
    %c0_4 = arith.constant 0 : index
    %3 = vector.load %arg3[%c0_3, %c0_4] : memref<1x2xf32, #tpu.memory_space<vmem>>, vector<1x2xf32>
    %4 = vector.broadcast %3 : vector<1x2xf32> to vector<256x2xf32>
    %5 = arith.mulf %2, %4 : vector<256x2xf32>
    %c0_5 = arith.constant 0 : index
    %c0_6 = arith.constant 0 : index
    %6 = vector.load %arg4[%c0_5, %c0_6] : memref<1x2xf32, #tpu.memory_space<vmem>>, vector<1x2xf32>
    %7 = vector.broadcast %6 : vector<1x2xf32> to vector<256x2xf32>
    %8 = arith.addf %5, %7 : vector<256x2xf32>
    %cst_7 = arith.constant 0.000000e+00 : f32
    %9 = vector.broadcast %cst_7 : f32 to vector<256x2xf32>
    %10 = arith.cmpf ogt, %8, %9 : vector<256x2xf32>
    %cst_8 = arith.constant 1.000000e-01 : f32
    %11 = vector.broadcast %cst_8 : f32 to vector<256x2xf32>
    %12 = arith.mulf %11, %8 : vector<256x2xf32>
    %13 = arith.select %10, %8, %12 : vector<256x2xi1>, vector<256x2xf32>
    %14 = arith.truncf %13 : vector<256x2xf32> to vector<256x2xbf16>
    %c0_9 = arith.constant 0 : index
    %c0_10 = arith.constant 0 : index
    %15 = vector.load %arg5[%c0_9, %c0_10] : memref<256x2xbf16, #tpu.memory_space<vmem>>, vector<256x2xbf16>
    tpu.vector_store %arg5[%c0_9, %c0_10], %14 {strides = array<i32>} : memref<256x2xbf16, #tpu.memory_space<vmem>>, vector<256x2xbf16>,
    return
  }
  func.func @transform_0(%arg0: i32) -> (i32, i32) {
    %c0_i32 = arith.constant 0 : i32
    %c0_i32_0 = arith.constant 0 : i32
    return %arg0, %c0_i32 : i32, i32
  }
  func.func @transform_1(%arg0: i32) -> (i32, i32) {
    %c0_i32 = arith.constant 0 : i32
    %c0_i32_0 = arith.constant 0 : i32
    %c0_i32_1 = arith.constant 0 : i32
    return %c0_i32, %c0_i32_0 : i32, i32
  }
  func.func @transform_2(%arg0: i32) -> (i32, i32) {
    %c0_i32 = arith.constant 0 : i32
    %c0_i32_0 = arith.constant 0 : i32
    %c0_i32_1 = arith.constant 0 : i32
    return %c0_i32, %c0_i32_0 : i32, i32
  }
  func.func @transform_3(%arg0: i32) -> (i32, i32) {
    %c0_i32 = arith.constant 0 : i32
    %c0_i32_0 = arith.constant 0 : i32
    %c0_i32_1 = arith.constant 0 : i32
    return %c0_i32, %c0_i32_0 : i32, i32
  }
  func.func @transform_4(%arg0: i32) -> (i32, i32) {
    %c0_i32 = arith.constant 0 : i32
    %c0_i32_0 = arith.constant 0 : i32
    return %arg0, %c0_i32 : i32, i32
  }
}

module attributes {stable_mosaic.version = 11 : i64} {
  func.func @conv2_stats_kernel(%arg0: i32, %arg1: memref<1x18x18x2xbf16, #tpu.memory_space<vmem>>, %arg2: memref<3x3x2x4xbf16, #tpu.memory_space<vmem>>, %arg3: memref<1x16x16x4xbf16, #tpu.memory_space<vmem>>, %arg4: memref<1x2x4xf32, #tpu.memory_space<vmem>>, %arg5: memref<256x4xf32, #tpu.memory_space<vmem>>) attributes {dimension_semantics = [#tpu.dimension_semantics<parallel>], iteration_bounds = array<i64: 2>, scalar_prefetch = 0 : i64, scratch_operands = 1 : i64, tpu.core_type = #tpu.core_type<tc>, window_params = [{transform_indices = @transform_0, window_bounds = array<i64: 1, 18, 18, 2>}, {pipeline_mode = #tpu.pipeline_mode<synchronous>, transform_indices = @transform_1, window_bounds = array<i64: 3, 3, 2, 4>}, {transform_indices = @transform_2, window_bounds = array<i64: 1, 16, 16, 4>}, {transform_indices = @transform_3, window_bounds = array<i64: 1, 2, 4>}]} {
    %cst = arith.constant 0.000000e+00 : f32
    %0 = vector.broadcast %cst : f32 to vector<256x4xf32>
    %c0 = arith.constant 0 : index
    %c0_0 = arith.constant 0 : index
    %1 = vector.load %arg5[%c0, %c0_0] : memref<256x4xf32, #tpu.memory_space<vmem>>, vector<256x4xf32>
    tpu.vector_store %arg5[%c0, %c0_0], %0 {strides = array<i32>} : memref<256x4xf32, #tpu.memory_space<vmem>>, vector<256x4xf32>,
    %c0_1 = arith.constant 0 : index
    %c0_2 = arith.constant 0 : index
    %c0_3 = arith.constant 0 : index
    %c0_4 = arith.constant 0 : index
    %2 = vector.load %arg1[%c0_1, %c0_2, %c0_3, %c0_4] : memref<1x18x18x2xbf16, #tpu.memory_space<vmem>>, vector<1x16x16x2xbf16>
    %3 = vector.shape_cast %2 : vector<1x16x16x2xbf16> to vector<256x2xbf16>
    %c0_5 = arith.constant 0 : index
    %c0_6 = arith.constant 0 : index
    %4 = vector.load %arg5[%c0_5, %c0_6] : memref<256x4xf32, #tpu.memory_space<vmem>>, vector<256x4xf32>
    %c0_7 = arith.constant 0 : index
    %c0_8 = arith.constant 0 : index
    %c0_9 = arith.constant 0 : index
    %c0_10 = arith.constant 0 : index
    %5 = vector.load %arg2[%c0_7, %c0_8, %c0_9, %c0_10] : memref<3x3x2x4xbf16, #tpu.memory_space<vmem>>, vector<1x1x2x4xbf16>
    %6 = vector.shape_cast %5 : vector<1x1x2x4xbf16> to vector<2x4xbf16>
    %cst_11 = arith.constant dense<0.000000e+00> : vector<256x4xf32>
    %7 = tpu.matmul %3, %6, %cst_11 {dimension_numbers = #tpu.dot_dimension_numbers<[1], [0], [0], [1], [0, 0, 1, 1], [], []>} : vector<256x2xbf16>, vector<2x4xbf16>, vector<256x4xf32> -> vector<256x4xf32>
    %8 = arith.addf %4, %7 : vector<256x4xf32>
    %c0_12 = arith.constant 0 : index
    %c0_13 = arith.constant 0 : index
    %9 = vector.load %arg5[%c0_12, %c0_13] : memref<256x4xf32, #tpu.memory_space<vmem>>, vector<256x4xf32>
    tpu.vector_store %arg5[%c0_12, %c0_13], %8 {strides = array<i32>} : memref<256x4xf32, #tpu.memory_space<vmem>>, vector<256x4xf32>,
    %c0_14 = arith.constant 0 : index
    %c0_15 = arith.constant 0 : index
    %c1 = arith.constant 1 : index
    %c0_16 = arith.constant 0 : index
    %10 = vector.load %arg1[%c0_14, %c0_15, %c1, %c0_16] : memref<1x18x18x2xbf16, #tpu.memory_space<vmem>>, vector<1x16x16x2xbf16>
    %11 = vector.shape_cast %10 : vector<1x16x16x2xbf16> to vector<256x2xbf16>
    %c0_17 = arith.constant 0 : index
    %c0_18 = arith.constant 0 : index
    %12 = vector.load %arg5[%c0_17, %c0_18] : memref<256x4xf32, #tpu.memory_space<vmem>>, vector<256x4xf32>
    %c0_19 = arith.constant 0 : index
    %c1_20 = arith.constant 1 : index
    %c0_21 = arith.constant 0 : index
    %c0_22 = arith.constant 0 : index
    %13 = vector.load %arg2[%c0_19, %c1_20, %c0_21, %c0_22] : memref<3x3x2x4xbf16, #tpu.memory_space<vmem>>, vector<1x1x2x4xbf16>
    %14 = vector.shape_cast %13 : vector<1x1x2x4xbf16> to vector<2x4xbf16>
    %cst_23 = arith.constant dense<0.000000e+00> : vector<256x4xf32>
    %15 = tpu.matmul %11, %14, %cst_23 {dimension_numbers = #tpu.dot_dimension_numbers<[1], [0], [0], [1], [0, 0, 1, 1], [], []>} : vector<256x2xbf16>, vector<2x4xbf16>, vector<256x4xf32> -> vector<256x4xf32>
    %16 = arith.addf %12, %15 : vector<256x4xf32>
    %c0_24 = arith.constant 0 : index
    %c0_25 = arith.constant 0 : index
    %17 = vector.load %arg5[%c0_24, %c0_25] : memref<256x4xf32, #tpu.memory_space<vmem>>, vector<256x4xf32>
    tpu.vector_store %arg5[%c0_24, %c0_25], %16 {strides = array<i32>} : memref<256x4xf32, #tpu.memory_space<vmem>>, vector<256x4xf32>,
    %c0_26 = arith.constant 0 : index
    %c0_27 = arith.constant 0 : index
    %c2 = arith.constant 2 : index
    %c0_28 = arith.constant 0 : index
    %18 = vector.load %arg1[%c0_26, %c0_27, %c2, %c0_28] : memref<1x18x18x2xbf16, #tpu.memory_space<vmem>>, vector<1x16x16x2xbf16>
    %19 = vector.shape_cast %18 : vector<1x16x16x2xbf16> to vector<256x2xbf16>
    %c0_29 = arith.constant 0 : index
    %c0_30 = arith.constant 0 : index
    %20 = vector.load %arg5[%c0_29, %c0_30] : memref<256x4xf32, #tpu.memory_space<vmem>>, vector<256x4xf32>
    %c0_31 = arith.constant 0 : index
    %c2_32 = arith.constant 2 : index
    %c0_33 = arith.constant 0 : index
    %c0_34 = arith.constant 0 : index
    %21 = vector.load %arg2[%c0_31, %c2_32, %c0_33, %c0_34] : memref<3x3x2x4xbf16, #tpu.memory_space<vmem>>, vector<1x1x2x4xbf16>
    %22 = vector.shape_cast %21 : vector<1x1x2x4xbf16> to vector<2x4xbf16>
    %cst_35 = arith.constant dense<0.000000e+00> : vector<256x4xf32>
    %23 = tpu.matmul %19, %22, %cst_35 {dimension_numbers = #tpu.dot_dimension_numbers<[1], [0], [0], [1], [0, 0, 1, 1], [], []>} : vector<256x2xbf16>, vector<2x4xbf16>, vector<256x4xf32> -> vector<256x4xf32>
    %24 = arith.addf %20, %23 : vector<256x4xf32>
    %c0_36 = arith.constant 0 : index
    %c0_37 = arith.constant 0 : index
    %25 = vector.load %arg5[%c0_36, %c0_37] : memref<256x4xf32, #tpu.memory_space<vmem>>, vector<256x4xf32>
    tpu.vector_store %arg5[%c0_36, %c0_37], %24 {strides = array<i32>} : memref<256x4xf32, #tpu.memory_space<vmem>>, vector<256x4xf32>,
    %c0_38 = arith.constant 0 : index
    %c1_39 = arith.constant 1 : index
    %c0_40 = arith.constant 0 : index
    %c0_41 = arith.constant 0 : index
    %26 = vector.load %arg1[%c0_38, %c1_39, %c0_40, %c0_41] : memref<1x18x18x2xbf16, #tpu.memory_space<vmem>>, vector<1x16x16x2xbf16>
    %27 = vector.shape_cast %26 : vector<1x16x16x2xbf16> to vector<256x2xbf16>
    %c0_42 = arith.constant 0 : index
    %c0_43 = arith.constant 0 : index
    %28 = vector.load %arg5[%c0_42, %c0_43] : memref<256x4xf32, #tpu.memory_space<vmem>>, vector<256x4xf32>
    %c1_44 = arith.constant 1 : index
    %c0_45 = arith.constant 0 : index
    %c0_46 = arith.constant 0 : index
    %c0_47 = arith.constant 0 : index
    %29 = vector.load %arg2[%c1_44, %c0_45, %c0_46, %c0_47] : memref<3x3x2x4xbf16, #tpu.memory_space<vmem>>, vector<1x1x2x4xbf16>
    %30 = vector.shape_cast %29 : vector<1x1x2x4xbf16> to vector<2x4xbf16>
    %cst_48 = arith.constant dense<0.000000e+00> : vector<256x4xf32>
    %31 = tpu.matmul %27, %30, %cst_48 {dimension_numbers = #tpu.dot_dimension_numbers<[1], [0], [0], [1], [0, 0, 1, 1], [], []>} : vector<256x2xbf16>, vector<2x4xbf16>, vector<256x4xf32> -> vector<256x4xf32>
    %32 = arith.addf %28, %31 : vector<256x4xf32>
    %c0_49 = arith.constant 0 : index
    %c0_50 = arith.constant 0 : index
    %33 = vector.load %arg5[%c0_49, %c0_50] : memref<256x4xf32, #tpu.memory_space<vmem>>, vector<256x4xf32>
    tpu.vector_store %arg5[%c0_49, %c0_50], %32 {strides = array<i32>} : memref<256x4xf32, #tpu.memory_space<vmem>>, vector<256x4xf32>,
    %c0_51 = arith.constant 0 : index
    %c1_52 = arith.constant 1 : index
    %c1_53 = arith.constant 1 : index
    %c0_54 = arith.constant 0 : index
    %34 = vector.load %arg1[%c0_51, %c1_52, %c1_53, %c0_54] : memref<1x18x18x2xbf16, #tpu.memory_space<vmem>>, vector<1x16x16x2xbf16>
    %35 = vector.shape_cast %34 : vector<1x16x16x2xbf16> to vector<256x2xbf16>
    %c0_55 = arith.constant 0 : index
    %c0_56 = arith.constant 0 : index
    %36 = vector.load %arg5[%c0_55, %c0_56] : memref<256x4xf32, #tpu.memory_space<vmem>>, vector<256x4xf32>
    %c1_57 = arith.constant 1 : index
    %c1_58 = arith.constant 1 : index
    %c0_59 = arith.constant 0 : index
    %c0_60 = arith.constant 0 : index
    %37 = vector.load %arg2[%c1_57, %c1_58, %c0_59, %c0_60] : memref<3x3x2x4xbf16, #tpu.memory_space<vmem>>, vector<1x1x2x4xbf16>
    %38 = vector.shape_cast %37 : vector<1x1x2x4xbf16> to vector<2x4xbf16>
    %cst_61 = arith.constant dense<0.000000e+00> : vector<256x4xf32>
    %39 = tpu.matmul %35, %38, %cst_61 {dimension_numbers = #tpu.dot_dimension_numbers<[1], [0], [0], [1], [0, 0, 1, 1], [], []>} : vector<256x2xbf16>, vector<2x4xbf16>, vector<256x4xf32> -> vector<256x4xf32>
    %40 = arith.addf %36, %39 : vector<256x4xf32>
    %c0_62 = arith.constant 0 : index
    %c0_63 = arith.constant 0 : index
    %41 = vector.load %arg5[%c0_62, %c0_63] : memref<256x4xf32, #tpu.memory_space<vmem>>, vector<256x4xf32>
    tpu.vector_store %arg5[%c0_62, %c0_63], %40 {strides = array<i32>} : memref<256x4xf32, #tpu.memory_space<vmem>>, vector<256x4xf32>,
    %c0_64 = arith.constant 0 : index
    %c1_65 = arith.constant 1 : index
    %c2_66 = arith.constant 2 : index
    %c0_67 = arith.constant 0 : index
    %42 = vector.load %arg1[%c0_64, %c1_65, %c2_66, %c0_67] : memref<1x18x18x2xbf16, #tpu.memory_space<vmem>>, vector<1x16x16x2xbf16>
    %43 = vector.shape_cast %42 : vector<1x16x16x2xbf16> to vector<256x2xbf16>
    %c0_68 = arith.constant 0 : index
    %c0_69 = arith.constant 0 : index
    %44 = vector.load %arg5[%c0_68, %c0_69] : memref<256x4xf32, #tpu.memory_space<vmem>>, vector<256x4xf32>
    %c1_70 = arith.constant 1 : index
    %c2_71 = arith.constant 2 : index
    %c0_72 = arith.constant 0 : index
    %c0_73 = arith.constant 0 : index
    %45 = vector.load %arg2[%c1_70, %c2_71, %c0_72, %c0_73] : memref<3x3x2x4xbf16, #tpu.memory_space<vmem>>, vector<1x1x2x4xbf16>
    %46 = vector.shape_cast %45 : vector<1x1x2x4xbf16> to vector<2x4xbf16>
    %cst_74 = arith.constant dense<0.000000e+00> : vector<256x4xf32>
    %47 = tpu.matmul %43, %46, %cst_74 {dimension_numbers = #tpu.dot_dimension_numbers<[1], [0], [0], [1], [0, 0, 1, 1], [], []>} : vector<256x2xbf16>, vector<2x4xbf16>, vector<256x4xf32> -> vector<256x4xf32>
    %48 = arith.addf %44, %47 : vector<256x4xf32>
    %c0_75 = arith.constant 0 : index
    %c0_76 = arith.constant 0 : index
    %49 = vector.load %arg5[%c0_75, %c0_76] : memref<256x4xf32, #tpu.memory_space<vmem>>, vector<256x4xf32>
    tpu.vector_store %arg5[%c0_75, %c0_76], %48 {strides = array<i32>} : memref<256x4xf32, #tpu.memory_space<vmem>>, vector<256x4xf32>,
    %c0_77 = arith.constant 0 : index
    %c2_78 = arith.constant 2 : index
    %c0_79 = arith.constant 0 : index
    %c0_80 = arith.constant 0 : index
    %50 = vector.load %arg1[%c0_77, %c2_78, %c0_79, %c0_80] : memref<1x18x18x2xbf16, #tpu.memory_space<vmem>>, vector<1x16x16x2xbf16>
    %51 = vector.shape_cast %50 : vector<1x16x16x2xbf16> to vector<256x2xbf16>
    %c0_81 = arith.constant 0 : index
    %c0_82 = arith.constant 0 : index
    %52 = vector.load %arg5[%c0_81, %c0_82] : memref<256x4xf32, #tpu.memory_space<vmem>>, vector<256x4xf32>
    %c2_83 = arith.constant 2 : index
    %c0_84 = arith.constant 0 : index
    %c0_85 = arith.constant 0 : index
    %c0_86 = arith.constant 0 : index
    %53 = vector.load %arg2[%c2_83, %c0_84, %c0_85, %c0_86] : memref<3x3x2x4xbf16, #tpu.memory_space<vmem>>, vector<1x1x2x4xbf16>
    %54 = vector.shape_cast %53 : vector<1x1x2x4xbf16> to vector<2x4xbf16>
    %cst_87 = arith.constant dense<0.000000e+00> : vector<256x4xf32>
    %55 = tpu.matmul %51, %54, %cst_87 {dimension_numbers = #tpu.dot_dimension_numbers<[1], [0], [0], [1], [0, 0, 1, 1], [], []>} : vector<256x2xbf16>, vector<2x4xbf16>, vector<256x4xf32> -> vector<256x4xf32>
    %56 = arith.addf %52, %55 : vector<256x4xf32>
    %c0_88 = arith.constant 0 : index
    %c0_89 = arith.constant 0 : index
    %57 = vector.load %arg5[%c0_88, %c0_89] : memref<256x4xf32, #tpu.memory_space<vmem>>, vector<256x4xf32>
    tpu.vector_store %arg5[%c0_88, %c0_89], %56 {strides = array<i32>} : memref<256x4xf32, #tpu.memory_space<vmem>>, vector<256x4xf32>,
    %c0_90 = arith.constant 0 : index
    %c2_91 = arith.constant 2 : index
    %c1_92 = arith.constant 1 : index
    %c0_93 = arith.constant 0 : index
    %58 = vector.load %arg1[%c0_90, %c2_91, %c1_92, %c0_93] : memref<1x18x18x2xbf16, #tpu.memory_space<vmem>>, vector<1x16x16x2xbf16>
    %59 = vector.shape_cast %58 : vector<1x16x16x2xbf16> to vector<256x2xbf16>
    %c0_94 = arith.constant 0 : index
    %c0_95 = arith.constant 0 : index
    %60 = vector.load %arg5[%c0_94, %c0_95] : memref<256x4xf32, #tpu.memory_space<vmem>>, vector<256x4xf32>
    %c2_96 = arith.constant 2 : index
    %c1_97 = arith.constant 1 : index
    %c0_98 = arith.constant 0 : index
    %c0_99 = arith.constant 0 : index
    %61 = vector.load %arg2[%c2_96, %c1_97, %c0_98, %c0_99] : memref<3x3x2x4xbf16, #tpu.memory_space<vmem>>, vector<1x1x2x4xbf16>
    %62 = vector.shape_cast %61 : vector<1x1x2x4xbf16> to vector<2x4xbf16>
    %cst_100 = arith.constant dense<0.000000e+00> : vector<256x4xf32>
    %63 = tpu.matmul %59, %62, %cst_100 {dimension_numbers = #tpu.dot_dimension_numbers<[1], [0], [0], [1], [0, 0, 1, 1], [], []>} : vector<256x2xbf16>, vector<2x4xbf16>, vector<256x4xf32> -> vector<256x4xf32>
    %64 = arith.addf %60, %63 : vector<256x4xf32>
    %c0_101 = arith.constant 0 : index
    %c0_102 = arith.constant 0 : index
    %65 = vector.load %arg5[%c0_101, %c0_102] : memref<256x4xf32, #tpu.memory_space<vmem>>, vector<256x4xf32>
    tpu.vector_store %arg5[%c0_101, %c0_102], %64 {strides = array<i32>} : memref<256x4xf32, #tpu.memory_space<vmem>>, vector<256x4xf32>,
    %c0_103 = arith.constant 0 : index
    %c2_104 = arith.constant 2 : index
    %c2_105 = arith.constant 2 : index
    %c0_106 = arith.constant 0 : index
    %66 = vector.load %arg1[%c0_103, %c2_104, %c2_105, %c0_106] : memref<1x18x18x2xbf16, #tpu.memory_space<vmem>>, vector<1x16x16x2xbf16>
    %67 = vector.shape_cast %66 : vector<1x16x16x2xbf16> to vector<256x2xbf16>
    %c0_107 = arith.constant 0 : index
    %c0_108 = arith.constant 0 : index
    %68 = vector.load %arg5[%c0_107, %c0_108] : memref<256x4xf32, #tpu.memory_space<vmem>>, vector<256x4xf32>
    %c2_109 = arith.constant 2 : index
    %c2_110 = arith.constant 2 : index
    %c0_111 = arith.constant 0 : index
    %c0_112 = arith.constant 0 : index
    %69 = vector.load %arg2[%c2_109, %c2_110, %c0_111, %c0_112] : memref<3x3x2x4xbf16, #tpu.memory_space<vmem>>, vector<1x1x2x4xbf16>
    %70 = vector.shape_cast %69 : vector<1x1x2x4xbf16> to vector<2x4xbf16>
    %cst_113 = arith.constant dense<0.000000e+00> : vector<256x4xf32>
    %71 = tpu.matmul %67, %70, %cst_113 {dimension_numbers = #tpu.dot_dimension_numbers<[1], [0], [0], [1], [0, 0, 1, 1], [], []>} : vector<256x2xbf16>, vector<2x4xbf16>, vector<256x4xf32> -> vector<256x4xf32>
    %72 = arith.addf %68, %71 : vector<256x4xf32>
    %c0_114 = arith.constant 0 : index
    %c0_115 = arith.constant 0 : index
    %73 = vector.load %arg5[%c0_114, %c0_115] : memref<256x4xf32, #tpu.memory_space<vmem>>, vector<256x4xf32>
    tpu.vector_store %arg5[%c0_114, %c0_115], %72 {strides = array<i32>} : memref<256x4xf32, #tpu.memory_space<vmem>>, vector<256x4xf32>,
    %c0_116 = arith.constant 0 : index
    %c0_117 = arith.constant 0 : index
    %74 = vector.load %arg5[%c0_116, %c0_117] : memref<256x4xf32, #tpu.memory_space<vmem>>, vector<256x4xf32>
    %75 = vector.shape_cast %74 : vector<256x4xf32> to vector<1x16x16x4xf32>
    %76 = arith.truncf %75 : vector<1x16x16x4xf32> to vector<1x16x16x4xbf16>
    %c0_118 = arith.constant 0 : index
    %c0_119 = arith.constant 0 : index
    %c0_120 = arith.constant 0 : index
    %c0_121 = arith.constant 0 : index
    %77 = vector.load %arg3[%c0_118, %c0_119, %c0_120, %c0_121] : memref<1x16x16x4xbf16, #tpu.memory_space<vmem>>, vector<1x16x16x4xbf16>
    tpu.vector_store %arg3[%c0_118, %c0_119, %c0_120, %c0_121], %76 {strides = array<i32>} : memref<1x16x16x4xbf16, #tpu.memory_space<vmem>>, vector<1x16x16x4xbf16>,
    %cst_122 = arith.constant dense<0.000000e+00> : vector<4xf32>
    %78 = vector.multi_reduction <add>, %74, %cst_122 [0] : vector<256x4xf32> to vector<4xf32>
    %79 = vector.shape_cast %78 : vector<4xf32> to vector<1x4xf32>
    %80 = vector.shape_cast %79 : vector<1x4xf32> to vector<1x1x4xf32>
    %c0_123 = arith.constant 0 : index
    %c0_124 = arith.constant 0 : index
    %c0_125 = arith.constant 0 : index
    %81 = vector.load %arg4[%c0_123, %c0_124, %c0_125] : memref<1x2x4xf32, #tpu.memory_space<vmem>>, vector<1x1x4xf32>
    tpu.vector_store %arg4[%c0_123, %c0_124, %c0_125], %80 {strides = array<i32>} : memref<1x2x4xf32, #tpu.memory_space<vmem>>, vector<1x1x4xf32>,
    %82 = arith.mulf %74, %74 : vector<256x4xf32>
    %cst_126 = arith.constant dense<0.000000e+00> : vector<4xf32>
    %83 = vector.multi_reduction <add>, %82, %cst_126 [0] : vector<256x4xf32> to vector<4xf32>
    %84 = vector.shape_cast %83 : vector<4xf32> to vector<1x4xf32>
    %85 = vector.shape_cast %84 : vector<1x4xf32> to vector<1x1x4xf32>
    %c0_127 = arith.constant 0 : index
    %c1_128 = arith.constant 1 : index
    %c0_129 = arith.constant 0 : index
    %86 = vector.load %arg4[%c0_127, %c1_128, %c0_129] : memref<1x2x4xf32, #tpu.memory_space<vmem>>, vector<1x1x4xf32>
    tpu.vector_store %arg4[%c0_127, %c1_128, %c0_129], %85 {strides = array<i32>} : memref<1x2x4xf32, #tpu.memory_space<vmem>>, vector<1x1x4xf32>,
    return
  }
  func.func @transform_0(%arg0: i32) -> (i32, i32, i32, i32) {
    %c0_i32 = arith.constant 0 : i32
    %c0_i32_0 = arith.constant 0 : i32
    %c0_i32_1 = arith.constant 0 : i32
    %c0_i32_2 = arith.constant 0 : i32
    return %arg0, %c0_i32, %c0_i32_0, %c0_i32_1 : i32, i32, i32, i32
  }
  func.func @transform_1(%arg0: i32) -> (i32, i32, i32, i32) {
    %c0_i32 = arith.constant 0 : i32
    %c0_i32_0 = arith.constant 0 : i32
    %c0_i32_1 = arith.constant 0 : i32
    %c0_i32_2 = arith.constant 0 : i32
    %c0_i32_3 = arith.constant 0 : i32
    return %c0_i32, %c0_i32_0, %c0_i32_1, %c0_i32_2 : i32, i32, i32, i32
  }
  func.func @transform_2(%arg0: i32) -> (i32, i32, i32, i32) {
    %c0_i32 = arith.constant 0 : i32
    %c0_i32_0 = arith.constant 0 : i32
    %c0_i32_1 = arith.constant 0 : i32
    %c0_i32_2 = arith.constant 0 : i32
    return %arg0, %c0_i32, %c0_i32_0, %c0_i32_1 : i32, i32, i32, i32
  }
  func.func @transform_3(%arg0: i32) -> (i32, i32, i32) {
    %c0_i32 = arith.constant 0 : i32
    %c0_i32_0 = arith.constant 0 : i32
    %c0_i32_1 = arith.constant 0 : i32
    return %arg0, %c0_i32, %c0_i32_0 : i32, i32, i32
  }
}

module attributes {stable_mosaic.version = 11 : i64} {
  func.func @bn2_lrelu_res_kernel(%arg0: i32, %arg1: memref<256x4xbf16, #tpu.memory_space<vmem>>, %arg2: memref<256x4xf32, #tpu.memory_space<vmem>>, %arg3: memref<1x4xf32, #tpu.memory_space<vmem>>, %arg4: memref<1x4xf32, #tpu.memory_space<vmem>>, %arg5: memref<256x4xf32, #tpu.memory_space<vmem>>) attributes {dimension_semantics = [#tpu.dimension_semantics<parallel>], iteration_bounds = array<i64: 2>, scalar_prefetch = 0 : i64, scratch_operands = 0 : i64, tpu.core_type = #tpu.core_type<tc>, window_params = [{transform_indices = @transform_0, window_bounds = array<i64: 256, 4>}, {transform_indices = @transform_1, window_bounds = array<i64: 256, 4>}, {pipeline_mode = #tpu.pipeline_mode<synchronous>, transform_indices = @transform_2, window_bounds = array<i64: 1, 4>}, {pipeline_mode = #tpu.pipeline_mode<synchronous>, transform_indices = @transform_3, window_bounds = array<i64: 1, 4>}, {transform_indices = @transform_4, window_bounds = array<i64: 256, 4>}]} {
    %c0 = arith.constant 0 : index
    %c0_0 = arith.constant 0 : index
    %0 = vector.load %arg1[%c0, %c0_0] : memref<256x4xbf16, #tpu.memory_space<vmem>>, vector<256x4xbf16>
    %1 = arith.extf %0 : vector<256x4xbf16> to vector<256x4xf32>
    %c0_1 = arith.constant 0 : index
    %c0_2 = arith.constant 0 : index
    %2 = vector.load %arg3[%c0_1, %c0_2] : memref<1x4xf32, #tpu.memory_space<vmem>>, vector<1x4xf32>
    %3 = vector.broadcast %2 : vector<1x4xf32> to vector<256x4xf32>
    %4 = arith.mulf %1, %3 : vector<256x4xf32>
    %c0_3 = arith.constant 0 : index
    %c0_4 = arith.constant 0 : index
    %5 = vector.load %arg4[%c0_3, %c0_4] : memref<1x4xf32, #tpu.memory_space<vmem>>, vector<1x4xf32>
    %6 = vector.broadcast %5 : vector<1x4xf32> to vector<256x4xf32>
    %7 = arith.addf %4, %6 : vector<256x4xf32>
    %cst = arith.constant 0.000000e+00 : f32
    %8 = vector.broadcast %cst : f32 to vector<256x4xf32>
    %9 = arith.cmpf ogt, %7, %8 : vector<256x4xf32>
    %cst_5 = arith.constant 1.000000e-01 : f32
    %10 = vector.broadcast %cst_5 : f32 to vector<256x4xf32>
    %11 = arith.mulf %10, %7 : vector<256x4xf32>
    %12 = arith.select %9, %7, %11 : vector<256x4xi1>, vector<256x4xf32>
    %c0_6 = arith.constant 0 : index
    %c0_7 = arith.constant 0 : index
    %13 = vector.load %arg2[%c0_6, %c0_7] : memref<256x4xf32, #tpu.memory_space<vmem>>, vector<256x4xf32>
    %14 = arith.addf %12, %13 : vector<256x4xf32>
    %c0_8 = arith.constant 0 : index
    %c0_9 = arith.constant 0 : index
    %15 = vector.load %arg5[%c0_8, %c0_9] : memref<256x4xf32, #tpu.memory_space<vmem>>, vector<256x4xf32>
    tpu.vector_store %arg5[%c0_8, %c0_9], %14 {strides = array<i32>} : memref<256x4xf32, #tpu.memory_space<vmem>>, vector<256x4xf32>,
    return
  }
  func.func @transform_0(%arg0: i32) -> (i32, i32) {
    %c0_i32 = arith.constant 0 : i32
    %c0_i32_0 = arith.constant 0 : i32
    return %arg0, %c0_i32 : i32, i32
  }
  func.func @transform_1(%arg0: i32) -> (i32, i32) {
    %c0_i32 = arith.constant 0 : i32
    %c0_i32_0 = arith.constant 0 : i32
    return %arg0, %c0_i32 : i32, i32
  }
  func.func @transform_2(%arg0: i32) -> (i32, i32) {
    %c0_i32 = arith.constant 0 : i32
    %c0_i32_0 = arith.constant 0 : i32
    %c0_i32_1 = arith.constant 0 : i32
    return %c0_i32, %c0_i32_0 : i32, i32
  }
  func.func @transform_3(%arg0: i32) -> (i32, i32) {
    %c0_i32 = arith.constant 0 : i32
    %c0_i32_0 = arith.constant 0 : i32
    %c0_i32_1 = arith.constant 0 : i32
    return %c0_i32, %c0_i32_0 : i32, i32
  }
  func.func @transform_4(%arg0: i32) -> (i32, i32) {
    %c0_i32 = arith.constant 0 : i32
    %c0_i32_0 = arith.constant 0 : i32
    return %arg0, %c0_i32 : i32, i32
  }
}

</mosaic_0001>

<bundles_post_ra>
// kernel: basic_block_forward.5
= control target key start
LH: loop header
LB: loop body
LE: loop exit
PB: predicated region body
PF: predicated region fallthrough
CT: control target
= control target key end

     0   :  { %s1141_s15 = smov 0   ;;  %s1365_s0 = inlined_call_operand.vmem [shape: bf16[512,4], index: 0, kind: input, shape index: {}]   ;;  %s1366_s1 = inlined_call_operand.vmem [shape: bf16[4,2], index: 1, kind: input, shape index: {}]   ;;  %s1367_s2 = inlined_call_operand.vmem [shape: f32[1,2], index: 2, kind: input, shape index: {}]   ;;  %s1368_s3 = inlined_call_operand.vmem [shape: f32[1,2], index: 3, kind: input, shape index: {}]   ;;  %s1369_s4 = inlined_call_operand.vmem [shape: bf16[512,2], index: 4, kind: output, shape index: {}]  }
   0x1 LB: > { %s920_s16 = sadd.s32 4294967295, %s1114_s15   ;;  %p924_p0 = scmp.ge.s32.totalorder %s1114_s15, 1  ;;  %s1114_s15 = sphi %s1141_s15, %s14_s15  }
   0x2   : > { %p163_p1 = scmp.lt.s32.totalorder %s1114_s15, 3 }
   0x4   : > { %p164_p2 = pnand %p924_p0, %p163_p1 }
   0x5   : > { %v234_v0 = vld [vmem:[%s1366_s1] sm:$0x3] (!%p164_p2)  ;;  %vm364_vm0 = vcmask (!%p164_p2), 1041408   ;;  %s925_s19 = sshll.u32 (!%p164_p2), %s920_s16, 5  ;;  %vm315_vm1 = vcmask (!%p164_p2), 31744   ;;  %vm831_vm2 = vcmask (!%p164_p2), 11264  }
   0x6   : > { %167 = sbr.rel (%p164_p2) target bundleno = 284 (0x11c), region = 36  ;;  %1082 = vmatprep.subr.msk.bf16.mxu0 (!%p164_p2), %vm364_vm0, %v234_v0  ;;  %1083 = vmatprep.subr.msk.bf16.mxu1 (!%p164_p2), %vm364_vm0, %v234_v0  ;;  %v366_v1 = vsel (!%p164_p2), %vm364_vm0, %v234_v0, 0  ;;  %p190_p3 = scmp.lt.s32.totalorder (!%p164_p2), %s925_s19, 63  ;;  %v1197_v18 = vld [vmem:[%s1367_s2] ss:$0 sm:$0xff] (!%p164_p2) }
   0x7   : > { %1047 = vmatpush3.bf16.msra.mxu0 (!%p164_p2), %v366_v1  ;;  %1081 = vmatpush3.bf16.msra.mxu1 (!%p164_p2), %v366_v1  ;;  %v1202_v20 = vld [vmem:[%s1368_s3] ss:$0 sm:$0xff] (!%p164_p2) }
   0xd   : > { %s1371_s19 = smov (!%p190_p3, %s925_s19), 63 }
   0xe   : > { %s926_s20 = sshll.u32 %s1371_s19, 2 }
   0xf   : > { %s1160_s23 = scalar_lea.vmem %s1365_s0, %s926_s20  ;;  %s1221_s30 = scalar_lea.vmem %s1369_s4, %s926_s20 }
  0x10   : > { %v1092_v2 = vld [vmem:[%s1160_s23] sm:$0xff]   ;;  %v1094_v4 = vld [vmem:[%s1160_s23 + $0x8] sm:$0xff]   ;;  %v1096_v6 = vld [vmem:[%s1160_s23 + $0x10] sm:$0xff]  }
  0x11   : > { %v1093_v3 = vld [vmem:[%s1160_s23 + $0x40] sm:$0xff]   ;;  %1048 = vmatprep.mubr.msk.bf16.mxu0 %vm315_vm1, %v1092_v2  ;;  %v1095_v5 = vld [vmem:[%s1160_s23 + $0x48] sm:$0xff]   ;;  %v1097_v7 = vld [vmem:[%s1160_s23 + $0x50] sm:$0xff]  }
  0x12   : > { %1064 = vmatprep.mubr.msk.bf16.mxu1 %vm315_vm1, %v1093_v3  ;;  %1049 = vmatmul.mubr.msk.bf16.vlgmr.msra.gmra.mrb[0].mxu0 %vm315_vm1, %v1094_v4  ;;  %v1098_v8 = vld [vmem:[%s1160_s23 + $0x18] sm:$0xff]   ;;  %v1100_v10 = vld [vmem:[%s1160_s23 + $0x20] sm:$0xff]   ;;  %v1102_v12 = vld [vmem:[%s1160_s23 + $0x28] sm:$0xff]  }
  0x13   : > { %1065 = vmatmul.mubr.msk.bf16.vlgmr.msra.gmra.mrb[0].mxu1 %vm315_vm1, %v1095_v5  ;;  %1052 = vmatprep.mubr.msk.bf16.mxu0 %vm315_vm1, %v1096_v6  ;;  %v1099_v9 = vld [vmem:[%s1160_s23 + $0x58] sm:$0xff]   ;;  %v1101_v11 = vld [vmem:[%s1160_s23 + $0x60] sm:$0xff]   ;;  %v1103_v13 = vld [vmem:[%s1160_s23 + $0x68] sm:$0xff]  }
  0x14   : > { %1068 = vmatprep.mubr.msk.bf16.mxu1 %vm315_vm1, %v1097_v7  ;;  %v1104_v14 = vld [vmem:[%s1160_s23 + $0x30] sm:$0xff]   ;;  %v1106_v16 = vld [vmem:[%s1160_s23 + $0x38] sm:$0xff]  }
  0x15   : > { %v1105_v15 = vld [vmem:[%s1160_s23 + $0x70] sm:$0xff]   ;;  %v1107_v17 = vld [vmem:[%s1160_s23 + $0x78] sm:$0xff]  }
  0x1a   : > { %1053 = vmatmul.mubr.msk.bf16.gmra.mrb[4].mxu0 %vm315_vm1, %v1098_v8 }
  0x1b   : > { %1069 = vmatmul.mubr.msk.bf16.gmra.mrb[4].mxu1 %vm315_vm1, %v1099_v9  ;;  %1056 = vmatprep.mubr.msk.bf16.mxu0 %vm315_vm1, %v1100_v10 }
  0x1c   : > { %1072 = vmatprep.mubr.msk.bf16.mxu1 %vm315_vm1, %v1101_v11 }
  0x22   : > { %1057 = vmatmul.mubr.msk.bf16.gmra.mrb[8].mxu0 %vm315_vm1, %v1102_v12 }
  0x23   : > { %1073 = vmatmul.mubr.msk.bf16.gmra.mrb[8].mxu1 %vm315_vm1, %v1103_v13  ;;  %1060 = vmatprep.mubr.msk.bf16.mxu0 %vm315_vm1, %v1104_v14 }
  0x24   : > { %1076 = vmatprep.mubr.msk.bf16.mxu1 %vm315_vm1, %v1105_v15 }
  0x2a   : > { %1061 = vmatmul.mubr.msk.bf16.gmra.mrb[12].mxu0 %vm315_vm1, %v1106_v16 }
  0x2b   : > { %1077 = vmatmul.mubr.msk.bf16.gmra.mrb[12].mxu1 %vm315_vm1, %v1107_v17 }
  0xe5   : > { %v1050_v19 = vpop.f32.mrb[0].mxu0 }
  0xe6   : > { %v538_v21 = vmul.f32 %v1050_v19, %v1197_v18  ;;  %v1066_v22 = vpop.f32.mrb[0].mxu1  ;;  %v402_v23 = vpop.f32.mrb[1].mxu0 }
  0xe7   : > { %v554_v24 = vmul.f32 %v1066_v22, %v1197_v18  ;;  %v536_v25 = vmul.f32 %v1197_v18, %v402_v23  ;;  %v466_v26 = vpop.f32.mrb[1].mxu1  ;;  %v1051_v27 = vpop.f32.mrb[2].mxu0 }
  0xe8   : > { %v577_v28 = vadd.f32 %v1202_v20, %v538_v21  ;;  %v552_v29 = vmul.f32 %v1197_v18, %v466_v26  ;;  %v539_v30 = vmul.f32 %v1051_v27, %v1197_v18  ;;  %v1067_v31 = vpop.f32.mrb[2].mxu1  ;;  %v405_v32 = vpop.f32.mrb[3].mxu0 }
  0xe9   : > { %v593_v33 = vadd.f32 %v1202_v20, %v554_v24  ;;  %v575_v34 = vadd.f32 %v1202_v20, %v536_v25  ;;  %v555_v35 = vmul.f32 %v1067_v31, %v1197_v18  ;;  %v537_v36 = vmul.f32 %v1197_v18, %v405_v32  ;;  %v469_v37 = vpop.f32.mrb[3].mxu1 }
  0xea   : > { %vm609_vm3 = vcmp.gt.f32.partialorder %v577_v28, 0.0  ;;  %v641_v38 = vmul.f32 0.1, %v577_v28  ;;  %v591_v39 = vadd.f32 %v1202_v20, %v552_v29  ;;  %v578_v40 = vadd.f32 %v1202_v20, %v539_v30 }
  0xeb   : > { %vm625_vm4 = vcmp.gt.f32.partialorder %v593_v33, 0.0  ;;  %v657_v41 = vmul.f32 0.1, %v593_v33  ;;  %vm607_vm5 = vcmp.gt.f32.partialorder %v575_v34, 0.0  ;;  %v639_v42 = vmul.f32 0.1, %v575_v34 }
  0xec   : > { %v673_v43 = vsel %vm609_vm3, %v577_v28, %v641_v38  ;;  %vm623_vm6 = vcmp.gt.f32.partialorder %v591_v39, 0.0  ;;  %v655_v44 = vmul.f32 0.1, %v591_v39  ;;  %vm610_vm7 = vcmp.gt.f32.partialorder %v578_v40, 0.0 }
  0xed   : > { %v999_v45 = vpack.c.bf16 %v673_v43, %v673_v43  ;;  %v689_v46 = vsel %vm625_vm4, %v593_v33, %v657_v41  ;;  %v671_v47 = vsel %vm607_vm5, %v575_v34, %v639_v42  ;;  %v642_v48 = vmul.f32 0.1, %v578_v40  ;;  %v1054_v49 = vpop.f32.mrb[4].mxu0 }
  0xee   : > { %v1015_v50 = vpack.c.bf16 %v689_v46, %v689_v46  ;;  %v997_v51 = vpack.c.bf16 %v671_v47, %v671_v47  ;;  %v687_v52 = vsel %vm623_vm6, %v591_v39, %v655_v44  ;;  %v594_v53 = vadd.f32 %v1202_v20, %v555_v35  ;;  %v1070_v54 = vpop.f32.mrb[4].mxu1  ;;  %v418_v55 = vpop.f32.mrb[5].mxu0 }
  0xef   : > { %834 = vst.msk [vmem:[%s1221_s30 + $0x8] sm:$0xf] %vm831_vm2, %v999_v45  ;;  %v1013_v56 = vpack.c.bf16 %v687_v52, %v687_v52  ;;  %v674_v57 = vsel %vm610_vm7, %v578_v40, %v642_v48  ;;  %v576_v58 = vadd.f32 %v1202_v20, %v537_v36  ;;  %v553_v59 = vmul.f32 %v1197_v18, %v469_v37  ;;  %v482_v60 = vpop.f32.mrb[5].mxu1  ;;  %v1055_v61 = vpop.f32.mrb[6].mxu0 }
  0xf0   : > { %850 = vst.msk [vmem:[%s1221_s30 + $0x48] sm:$0xf] %vm831_vm2, %v1015_v50  ;;  %832 = vst.msk [vmem:[%s1221_s30] sm:$0xf] %vm831_vm2, %v997_v51  ;;  %v1000_v62 = vpack.c.bf16 %v674_v57, %v674_v57  ;;  %vm626_vm8 = vcmp.gt.f32.partialorder %v594_v53, 0.0  ;;  %v542_v0 = vmul.f32 %v1054_v49, %v1197_v18  ;;  %v1071_v1 = vpop.f32.mrb[6].mxu1  ;;  %v558_v5 = vmul.f32 %v1070_v54, %v1197_v18 }
  0xf1   : > { %v658_v63 = vmul.f32 0.1, %v594_v53  ;;  %v421_v2 = vpop.f32.mrb[7].mxu0  ;;  %848 = vst.msk [vmem:[%s1221_s30 + $0x40] sm:$0xf] %vm831_vm2, %v1013_v56  ;;  %vm608_vm9 = vcmp.gt.f32.partialorder %v576_v58, 0.0  ;;  %v592_v4 = vadd.f32 %v1202_v20, %v553_v59  ;;  %v540_v9 = vmul.f32 %v1197_v18, %v418_v55 }
  0xf2   : > { %v640_v3 = vmul.f32 0.1, %v576_v58  ;;  %v485_v6 = vpop.f32.mrb[7].mxu1  ;;  %835 = vst.msk [vmem:[%s1221_s30 + $0xc] sm:$0xf] %vm831_vm2, %v1000_v62  ;;  %v581_v8 = vadd.f32 %v1202_v20, %v542_v0  ;;  %v556_v10 = vmul.f32 %v1197_v18, %v482_v60  ;;  %v597_v16 = vadd.f32 %v1202_v20, %v558_v5 }
  0xf3   : > { %v690_v7 = vsel %vm626_vm8, %v594_v53, %v658_v63  ;;  %vm624_vm10 = vcmp.gt.f32.partialorder %v592_v4, 0.0  ;;  %v656_v13 = vmul.f32 0.1, %v592_v4  ;;  %v579_v19 = vadd.f32 %v1202_v20, %v540_v9 }
  0xf4   : > { %v1016_v11 = vpack.c.bf16 %v690_v7, %v690_v7  ;;  %v672_v12 = vsel %vm608_vm9, %v576_v58, %v640_v3  ;;  %vm613_vm11 = vcmp.gt.f32.partialorder %v581_v8, 0.0  ;;  %v645_v15 = vmul.f32 0.1, %v581_v8 }
  0xf5   : > { %v998_v14 = vpack.c.bf16 %v672_v12, %v672_v12  ;;  %v688_v17 = vsel %vm624_vm10, %v592_v4, %v656_v13  ;;  %v595_v21 = vadd.f32 %v1202_v20, %v556_v10  ;;  %v543_v22 = vmul.f32 %v1055_v61, %v1197_v18  ;;  %v1058_v23 = vpop.f32.mrb[8].mxu0 }
  0xf6   : > { %851 = vst.msk [vmem:[%s1221_s30 + $0x4c] sm:$0xf] %vm831_vm2, %v1016_v11  ;;  %v1014_v24 = vpack.c.bf16 %v688_v17, %v688_v17  ;;  %v677_v25 = vsel %vm613_vm11, %v581_v8, %v645_v15  ;;  %vm629_vm12 = vcmp.gt.f32.partialorder %v597_v16, 0.0  ;;  %v661_v26 = vmul.f32 0.1, %v597_v16  ;;  %v1074_v27 = vpop.f32.mrb[8].mxu1 }
  0xf7   : > { %833 = vst.msk [vmem:[%s1221_s30 + $0x4] sm:$0xf] %vm831_vm2, %v998_v14  ;;  %v434_v28 = vpop.f32.mrb[9].mxu0  ;;  %v1003_v29 = vpack.c.bf16 %v677_v25, %v677_v25  ;;  %vm611_vm13 = vcmp.gt.f32.partialorder %v579_v19, 0.0  ;;  %v643_v30 = vmul.f32 0.1, %v579_v19  ;;  %v582_v35 = vadd.f32 %v1202_v20, %v543_v22 }
  0xf8   : > { %vm627_vm14 = vcmp.gt.f32.partialorder %v595_v21, 0.0  ;;  %v498_v31 = vpop.f32.mrb[9].mxu1  ;;  %v1250_v32 = vpop.f32.mrb[10].mxu0  ;;  %849 = vst.msk [vmem:[%s1221_s30 + $0x44] sm:$0xf] %vm831_vm2, %v1014_v24  ;;  %v693_v33 = vsel %vm629_vm12, %v597_v16, %v661_v26  ;;  %v559_v36 = vmul.f32 %v1071_v1, %v1197_v18  ;;  %v541_v41 = vmul.f32 %v1197_v18, %v421_v2 }
  0xf9   : > { %v659_v34 = vmul.f32 0.1, %v595_v21  ;;  %v1075_v37 = vpop.f32.mrb[10].mxu1  ;;  %v437_v38 = vpop.f32.mrb[11].mxu0  ;;  %838 = vst.msk [vmem:[%s1221_s30 + $0x18] sm:$0xf] %vm831_vm2, %v1003_v29  ;;  %v1019_v39 = vpack.c.bf16 %v693_v33, %v693_v33  ;;  %v675_v40 = vsel %vm611_vm13, %v579_v19, %v643_v30  ;;  %v557_v42 = vmul.f32 %v1197_v18, %v485_v6 }
  0xfa   : > { %v1260_v43 = vpop.f32.mrb[11].mxu1  ;;  %v1001_v44 = vpack.c.bf16 %v675_v40, %v675_v40  ;;  %vm614_vm15 = vcmp.gt.f32.partialorder %v582_v35, 0.0  ;;  %v646_v46 = vmul.f32 0.1, %v582_v35  ;;  %v598_v48 = vadd.f32 %v1202_v20, %v559_v36 }
  0xfb   : > { %v691_v45 = vsel %vm627_vm14, %v595_v21, %v659_v34  ;;  %854 = vst.msk [vmem:[%s1221_s30 + $0x58] sm:$0xf] %vm831_vm2, %v1019_v39  ;;  %v580_v49 = vadd.f32 %v1202_v20, %v541_v41  ;;  %v596_v50 = vadd.f32 %v1202_v20, %v557_v42  ;;  %v546_v52 = vmul.f32 %v1058_v23, %v1197_v18 }
  0xfc   : > { %v1017_v47 = vpack.c.bf16 %v691_v45, %v691_v45  ;;  %836 = vst.msk [vmem:[%s1221_s30 + $0x10] sm:$0xf] %vm831_vm2, %v1001_v44  ;;  %v678_v51 = vsel %vm614_vm15, %v582_v35, %v646_v46  ;;  %v562_v53 = vmul.f32 %v1074_v27, %v1197_v18  ;;  %v544_v54 = vmul.f32 %v1197_v18, %v434_v28 }
  0xfd   : > { %v1004_v55 = vpack.c.bf16 %v678_v51, %v678_v51  ;;  %vm630_vm0 = vcmp.gt.f32.partialorder %v598_v48, 0.0  ;;  %v662_v56 = vmul.f32 0.1, %v598_v48  ;;  %vm612_vm1 = vcmp.gt.f32.partialorder %v580_v49, 0.0  ;;  %v1062_v57 = vpop.f32.mrb[12].mxu0 }
  0xfe   : > { %852 = vst.msk [vmem:[%s1221_s30 + $0x50] sm:$0xf] %vm831_vm2, %v1017_v47  ;;  %v644_v58 = vmul.f32 0.1, %v580_v49  ;;  %vm628_vm3 = vcmp.gt.f32.partialorder %v596_v50, 0.0  ;;  %v585_v60 = vadd.f32 %v1202_v20, %v546_v52  ;;  %v1078_v61 = vpop.f32.mrb[12].mxu1  ;;  %v601_v63 = vadd.f32 %v1202_v20, %v562_v53 }
  0xff   : > { %v660_v59 = vmul.f32 0.1, %v596_v50  ;;  %839 = vst.msk [vmem:[%s1221_s30 + $0x1c] sm:$0xf] %vm831_vm2, %v1004_v55  ;;  %v694_v62 = vsel %vm630_vm0, %v598_v48, %v662_v56  ;;  %v583_v0 = vadd.f32 %v1202_v20, %v544_v54  ;;  %v560_v1 = vmul.f32 %v1197_v18, %v498_v31  ;;  %v450_v2 = vpop.f32.mrb[13].mxu0  ;;  %v1281_v3 = vpop.f32.mrb[13].mxu1 }
 0x100   : > { %v1020_v4 = vpack.c.bf16 %v694_v62, %v694_v62  ;;  %v676_v5 = vsel %vm612_vm1, %v580_v49, %v644_v58  ;;  %vm617_vm4 = vcmp.gt.f32.partialorder %v585_v60, 0.0  ;;  %v1283_v7 = vpop.f32.mrb[14].mxu0  ;;  %v1285_v8 = vpop.f32.mrb[14].mxu1  ;;  %v649_v11 = vmul.f32 0.1, %v585_v60 }
 0x101   : > { %v692_v6 = vsel %vm628_vm3, %v596_v50, %v660_v59  ;;  %v1002_v9 = vpack.c.bf16 %v676_v5, %v676_v5  ;;  %vm633_vm5 = vcmp.gt.f32.partialorder %v601_v63, 0.0  ;;  %v1287_v12 = vpop.f32.mrb[15].mxu0  ;;  %v1289_v13 = vpop.f32.mrb[15].mxu1  ;;  %v665_v14 = vmul.f32 0.1, %v601_v63 }
 0x102   : > { %v1018_v10 = vpack.c.bf16 %v692_v6, %v692_v6  ;;  %855 = vst.msk [vmem:[%s1221_s30 + $0x5c] sm:$0xf] %vm831_vm2, %v1020_v4  ;;  %vm615_vm6 = vcmp.gt.f32.partialorder %v583_v0, 0.0  ;;  %v647_v15 = vmul.f32 0.1, %v583_v0  ;;  %v599_v16 = vadd.f32 %v1202_v20, %v560_v1 }
 0x103   : > { %837 = vst.msk [vmem:[%s1221_s30 + $0x14] sm:$0xf] %vm831_vm2, %v1002_v9  ;;  %v681_v17 = vsel %vm617_vm4, %v585_v60, %v649_v11  ;;  %v547_v19 = vmul.f32 %v1250_v32, %v1197_v18  ;;  %v563_v21 = vmul.f32 %v1075_v37, %v1197_v18  ;;  %v545_v22 = vmul.f32 %v1197_v18, %v437_v38 }
 0x104   : > { %853 = vst.msk [vmem:[%s1221_s30 + $0x54] sm:$0xf] %vm831_vm2, %v1018_v10  ;;  %v1007_v23 = vpack.c.bf16 %v681_v17, %v681_v17  ;;  %v697_v24 = vsel %vm633_vm5, %v601_v63, %v665_v14  ;;  %v679_v25 = vsel %vm615_vm6, %v583_v0, %v647_v15  ;;  %vm631_vm7 = vcmp.gt.f32.partialorder %v599_v16, 0.0 }
 0x105   : > { %v1023_v26 = vpack.c.bf16 %v697_v24, %v697_v24  ;;  %v1005_v27 = vpack.c.bf16 %v679_v25, %v679_v25  ;;  %v663_v28 = vmul.f32 0.1, %v599_v16  ;;  %v586_v29 = vadd.f32 %v1202_v20, %v547_v19 }
 0x106   : > { %842 = vst.msk [vmem:[%s1221_s30 + $0x28] sm:$0xf] %vm831_vm2, %v1007_v23  ;;  %v602_v30 = vadd.f32 %v1202_v20, %v563_v21  ;;  %v584_v31 = vadd.f32 %v1202_v20, %v545_v22  ;;  %v561_v32 = vmul.f32 %v1197_v18, %v1260_v43  ;;  %v550_v33 = vmul.f32 %v1062_v57, %v1197_v18 }
 0x107   : > { %858 = vst.msk [vmem:[%s1221_s30 + $0x68] sm:$0xf] %vm831_vm2, %v1023_v26  ;;  %840 = vst.msk [vmem:[%s1221_s30 + $0x20] sm:$0xf] %vm831_vm2, %v1005_v27  ;;  %v695_v34 = vsel %vm631_vm7, %v599_v16, %v663_v28  ;;  %vm618_vm8 = vcmp.gt.f32.partialorder %v586_v29, 0.0  ;;  %v566_v36 = vmul.f32 %v1078_v61, %v1197_v18  ;;  %v548_v46 = vmul.f32 %v1197_v18, %v450_v2 }
 0x108   : > { %v650_v35 = vmul.f32 0.1, %v586_v29  ;;  %v1021_v37 = vpack.c.bf16 %v695_v34, %v695_v34  ;;  %vm634_vm9 = vcmp.gt.f32.partialorder %v602_v30, 0.0  ;;  %v666_v38 = vmul.f32 0.1, %v602_v30 }
 0x109   : > { %vm616_vm10 = vcmp.gt.f32.partialorder %v584_v31, 0.0  ;;  %v648_v40 = vmul.f32 0.1, %v584_v31  ;;  %v600_v41 = vadd.f32 %v1202_v20, %v561_v32  ;;  %v589_v42 = vadd.f32 %v1202_v20, %v550_v33 }
 0x10a   : > { %v682_v39 = vsel %vm618_vm8, %v586_v29, %v650_v35  ;;  %856 = vst.msk [vmem:[%s1221_s30 + $0x60] sm:$0xf] %vm831_vm2, %v1021_v37  ;;  %v698_v44 = vsel %vm634_vm9, %v602_v30, %v666_v38  ;;  %v605_v45 = vadd.f32 %v1202_v20, %v566_v36  ;;  %v587_v54 = vadd.f32 %v1202_v20, %v548_v46 }
 0x10b   : > { %v1008_v43 = vpack.c.bf16 %v682_v39, %v682_v39  ;;  %v1024_v47 = vpack.c.bf16 %v698_v44, %v698_v44  ;;  %v680_v48 = vsel %vm616_vm10, %v584_v31, %v648_v40  ;;  %vm632_vm11 = vcmp.gt.f32.partialorder %v600_v41, 0.0 }
 0x10c   : > { %v664_v49 = vmul.f32 0.1, %v600_v41  ;;  %v1006_v50 = vpack.c.bf16 %v680_v48, %v680_v48  ;;  %vm621_vm12 = vcmp.gt.f32.partialorder %v589_v42, 0.0  ;;  %v653_v51 = vmul.f32 0.1, %v589_v42 }
 0x10d   : > { %843 = vst.msk [vmem:[%s1221_s30 + $0x2c] sm:$0xf] %vm831_vm2, %v1008_v43  ;;  %vm637_vm13 = vcmp.gt.f32.partialorder %v605_v45, 0.0  ;;  %859 = vst.msk [vmem:[%s1221_s30 + $0x6c] sm:$0xf] %vm831_vm2, %v1024_v47  ;;  %v564_v55 = vmul.f32 %v1197_v18, %v1281_v3  ;;  %v551_v58 = vmul.f32 %v1283_v7, %v1197_v18  ;;  %v567_v59 = vmul.f32 %v1285_v8, %v1197_v18 }
 0x10e   : > { %v696_v52 = vsel %vm632_vm11, %v600_v41, %v664_v49  ;;  %v669_v53 = vmul.f32 0.1, %v605_v45  ;;  %841 = vst.msk [vmem:[%s1221_s30 + $0x24] sm:$0xf] %vm831_vm2, %v1006_v50  ;;  %v685_v57 = vsel %vm621_vm12, %v589_v42, %v653_v51  ;;  %vm619_vm14 = vcmp.gt.f32.partialorder %v587_v54, 0.0 }
 0x10f   : > { %v1022_v56 = vpack.c.bf16 %v696_v52, %v696_v52  ;;  %v1011_v60 = vpack.c.bf16 %v685_v57, %v685_v57  ;;  %v651_v62 = vmul.f32 0.1, %v587_v54  ;;  %v603_v0 = vadd.f32 %v1202_v20, %v564_v55 }
 0x110   : > { %v701_v61 = vsel %vm637_vm13, %v605_v45, %v669_v53  ;;  %v590_v1 = vadd.f32 %v1202_v20, %v551_v58  ;;  %v606_v2 = vadd.f32 %v1202_v20, %v567_v59  ;;  %v549_v4 = vmul.f32 %v1197_v18, %v1287_v12 }
 0x111   : > { %857 = vst.msk [vmem:[%s1221_s30 + $0x64] sm:$0xf] %vm831_vm2, %v1022_v56  ;;  %v1027_v63 = vpack.c.bf16 %v701_v61, %v701_v61  ;;  %846 = vst.msk [vmem:[%s1221_s30 + $0x38] sm:$0xf] %vm831_vm2, %v1011_v60  ;;  %v683_v3 = vsel %vm619_vm14, %v587_v54, %v651_v62  ;;  %v565_v5 = vmul.f32 %v1197_v18, %v1289_v13  ;;  %vm635_vm15 = vcmp.gt.f32.partialorder %v603_v0, 0.0 }
 0x112   : > { %v1009_v6 = vpack.c.bf16 %v683_v3, %v683_v3  ;;  %v667_v7 = vmul.f32 0.1, %v603_v0  ;;  %vm622_vm0 = vcmp.gt.f32.partialorder %v590_v1, 0.0  ;;  %v654_v8 = vmul.f32 0.1, %v590_v1 }
 0x113   : > { %862 = vst.msk [vmem:[%s1221_s30 + $0x78] sm:$0xf] %vm831_vm2, %v1027_v63  ;;  %vm638_vm1 = vcmp.gt.f32.partialorder %v606_v2, 0.0  ;;  %v670_v9 = vmul.f32 0.1, %v606_v2  ;;  %v588_v10 = vadd.f32 %v1202_v20, %v549_v4  ;;  %v604_v12 = vadd.f32 %v1202_v20, %v565_v5 }
 0x114   : > { %844 = vst.msk [vmem:[%s1221_s30 + $0x30] sm:$0xf] %vm831_vm2, %v1009_v6  ;;  %v699_v11 = vsel %vm635_vm15, %v603_v0, %v667_v7  ;;  %v686_v13 = vsel %vm622_vm0, %v590_v1, %v654_v8 }
 0x115   : > { %v1025_v18 = vpack.c.bf16 %v699_v11, %v699_v11  ;;  %v702_v14 = vsel %vm638_vm1, %v606_v2, %v670_v9  ;;  %vm620_vm3 = vcmp.gt.f32.partialorder %v588_v10, 0.0  ;;  %v1012_v15 = vpack.c.bf16 %v686_v13, %v686_v13 }
 0x116   : > { %v1028_v16 = vpack.c.bf16 %v702_v14, %v702_v14  ;;  %v652_v17 = vmul.f32 0.1, %v588_v10  ;;  %vm636_vm4 = vcmp.gt.f32.partialorder %v604_v12, 0.0  ;;  %v668_v19 = vmul.f32 0.1, %v604_v12 }
 0x117   : > { %860 = vst.msk [vmem:[%s1221_s30 + $0x70] sm:$0xf] %vm831_vm2, %v1025_v18  ;;  %847 = vst.msk [vmem:[%s1221_s30 + $0x3c] sm:$0xf] %vm831_vm2, %v1012_v15 }
 0x118   : > { %863 = vst.msk [vmem:[%s1221_s30 + $0x7c] sm:$0xf] %vm831_vm2, %v1028_v16  ;;  %v684_v21 = vsel %vm620_vm3, %v588_v10, %v652_v17  ;;  %v700_v20 = vsel %vm636_vm4, %v604_v12, %v668_v19 }
 0x119   : > { %v1010_v22 = vpack.c.bf16 %v684_v21, %v684_v21  ;;  %v1026_v23 = vpack.c.bf16 %v700_v20, %v700_v20 }
 0x11b   : > { %845 = vst.msk [vmem:[%s1221_s30 + $0x34] sm:$0xf] %vm831_vm2, %v1010_v22  ;;  %861 = vst.msk [vmem:[%s1221_s30 + $0x74] sm:$0xf] %vm831_vm2, %v1026_v23 }
 0x11c PF: > { %s14_s15 = sadd.s32 1, %s1114_s15  }
 0x11d   : > { %p11_p4 = scmp.ge.s32.totalorder %s14_s15, 4  }
 0x11f   :  { %13 = sbr.rel (!%p11_p4) target bundleno = 1 (0x1), region = 66 }

// kernel: basic_block_forward.4
= control target key start
LH: loop header
LB: loop body
LE: loop exit
PB: predicated region body
PF: predicated region fallthrough
CT: control target
= control target key end

     0   :  { %s843_s9 = smov 0   ;;  %s1036_s0 = inlined_call_operand.vmem [shape: bf16[512,4], index: 0, kind: input, shape index: {}]   ;;  %s1037_s1 = inlined_call_operand.vmem [shape: bf16[4,2], index: 1, kind: input, shape index: {}]   ;;  %s1038_s2 = inlined_call_operand.vmem [shape: f32[2,2,2], index: 2, kind: output, shape index: {}]  }
   0x1 LB: > { %s849_s10 = sadd.s32 4294967295, %s826_s9   ;;  %p703_p0 = scmp.ge.s32.totalorder %s826_s9, 1  ;;  %s826_s9 = sphi %s843_s9, %s12_s9  }
   0x2   : > { %p113_p1 = scmp.lt.s32.totalorder %s826_s9, 3 }
   0x4   : > { %p114_p2 = pnand %p703_p0, %p113_p1 }
   0x5   : > { %v177_v0 = vld [vmem:[%s1037_s1] sm:$0x3] (!%p114_p2)  ;;  %vm307_vm0 = vcmask (!%p114_p2), 1041408   ;;  %s704_s13 = sshll.u32 (!%p114_p2), %s849_s10, 5  ;;  %vm258_vm1 = vcmask (!%p114_p2), 31744   ;;  %vm472_vm2 = vcmask (!%p114_p2), 15360  }
   0x6   : > { %117 = sbr.rel (%p114_p2) target bundleno = 311 (0x137), region = 28  ;;  %794 = vmatprep.subr.msk.bf16.mxu0 (!%p114_p2), %vm307_vm0, %v177_v0  ;;  %v309_v1 = vsel (!%p114_p2), %vm307_vm0, %v177_v0, 0  ;;  %p135_p3 = scmp.lt.s32.totalorder (!%p114_p2), %s704_s13, 63  ;;  %795 = vmatprep.subr.msk.bf16.mxu1 (!%p114_p2), %vm307_vm0, %v177_v0  ;;  %vm542_vm3 = vcmask (!%p114_p2), 8192  }
   0x7   : > { %759 = vmatpush3.bf16.msra.mxu0 (!%p114_p2), %v309_v1  ;;  %793 = vmatpush3.bf16.msra.mxu1 (!%p114_p2), %v309_v1  ;;  %p140_p4 = scmp.lt.s32.totalorder (!%p114_p2), %s849_s10, 1 }
   0xd   : > { %s1040_s13 = smov (!%p135_p3, %s704_s13), 63  ;;  %s1042_s10 = smov (!%p140_p4, %s849_s10), 1 }
   0xe   : > { %s705_s14 = sshll.u32 %s1040_s13, 2  ;;  %s706_s18 = sshll.u32 %s1042_s10, 1 }
   0xf   : > { %s860_s17 = scalar_lea.vmem %s1036_s0, %s705_s14  ;;  %s143_s21 = scalar_lea.vmem %s1038_s2, %s706_s18 }
  0x10   : > { %v804_v2 = vld [vmem:[%s860_s17] sm:$0xff]   ;;  %v805_v3 = vld [vmem:[%s860_s17 + $0x8] sm:$0xff]   ;;  %v806_v4 = vld [vmem:[%s860_s17 + $0x10] sm:$0xff]  }
  0x11   : > { %760 = vmatprep.mubr.msk.bf16.mxu0 %vm258_vm1, %v804_v2  ;;  %v807_v5 = vld [vmem:[%s860_s17 + $0x18] sm:$0xff]   ;;  %v808_v6 = vld [vmem:[%s860_s17 + $0x20] sm:$0xff]   ;;  %v813_v8 = vld [vmem:[%s860_s17 + $0x48] sm:$0xff]  }
  0x12   : > { %761 = vmatmul.mubr.msk.bf16.vlgmr.msra.gmra.mrb[0].mxu0 %vm258_vm1, %v805_v3  ;;  %v812_v7 = vld [vmem:[%s860_s17 + $0x40] sm:$0xff]   ;;  %v814_v9 = vld [vmem:[%s860_s17 + $0x50] sm:$0xff]   ;;  %v809_v10 = vld [vmem:[%s860_s17 + $0x28] sm:$0xff]  }
  0x13   : > { %764 = vmatprep.mubr.msk.bf16.mxu0 %vm258_vm1, %v806_v4  ;;  %776 = vmatprep.mubr.msk.bf16.mxu1 %vm258_vm1, %v812_v7  ;;  %v815_v11 = vld [vmem:[%s860_s17 + $0x58] sm:$0xff]   ;;  %v810_v12 = vld [vmem:[%s860_s17 + $0x30] sm:$0xff]   ;;  %v816_v13 = vld [vmem:[%s860_s17 + $0x60] sm:$0xff]  }
  0x14   : > { %777 = vmatmul.mubr.msk.bf16.vlgmr.msra.gmra.mrb[0].mxu1 %vm258_vm1, %v813_v8  ;;  %v811_v14 = vld [vmem:[%s860_s17 + $0x38] sm:$0xff]   ;;  %v817_v15 = vld [vmem:[%s860_s17 + $0x68] sm:$0xff]   ;;  %v818_v16 = vld [vmem:[%s860_s17 + $0x70] sm:$0xff]  }
  0x15   : > { %780 = vmatprep.mubr.msk.bf16.mxu1 %vm258_vm1, %v814_v9  ;;  %v819_v17 = vld [vmem:[%s860_s17 + $0x78] sm:$0xff]  }
  0x1a   : > { %765 = vmatmul.mubr.msk.bf16.gmra.mrb[4].mxu0 %vm258_vm1, %v807_v5 }
  0x1b   : > { %768 = vmatprep.mubr.msk.bf16.mxu0 %vm258_vm1, %v808_v6 }
  0x1c   : > { %781 = vmatmul.mubr.msk.bf16.gmra.mrb[4].mxu1 %vm258_vm1, %v815_v11 }
  0x1d   : > { %784 = vmatprep.mubr.msk.bf16.mxu1 %vm258_vm1, %v816_v13 }
  0x22   : > { %769 = vmatmul.mubr.msk.bf16.gmra.mrb[8].mxu0 %vm258_vm1, %v809_v10 }
  0x23   : > { %772 = vmatprep.mubr.msk.bf16.mxu0 %vm258_vm1, %v810_v12 }
  0x24   : > { %785 = vmatmul.mubr.msk.bf16.gmra.mrb[8].mxu1 %vm258_vm1, %v817_v15 }
  0x25   : > { %788 = vmatprep.mubr.msk.bf16.mxu1 %vm258_vm1, %v818_v16 }
  0x2a   : > { %773 = vmatmul.mubr.msk.bf16.gmra.mrb[12].mxu0 %vm258_vm1, %v811_v14 }
  0x2c   : > { %789 = vmatmul.mubr.msk.bf16.gmra.mrb[12].mxu1 %vm258_vm1, %v819_v17 }
  0xe5   : > { %v762_v18 = vpop.f32.mrb[0].mxu0 }
  0xe6   : > { %v345_v19 = vpop.f32.mrb[1].mxu0  ;;  %v546_v23 = vmul.f32 %v762_v18, %v762_v18  ;;  %v476_v28 = vsel %vm472_vm2, %v762_v18, 0.0 }
  0xe7   : > { %v544_v20 = vmul.f32 %v345_v19, %v345_v19  ;;  %v763_v21 = vpop.f32.mrb[2].mxu0  ;;  %v473_v24 = vsel %vm472_vm2, %v345_v19, 0.0  ;;  %v901_v37 = vpop.f32.mrb[0].mxu1 }
  0xe8   : > { %v348_v22 = vpop.f32.mrb[3].mxu0  ;;  %v547_v30 = vmul.f32 %v763_v21, %v763_v21  ;;  %v579_v34 = vsel %vm472_vm2, %v546_v23, 0.0  ;;  %v478_v35 = vsel %vm472_vm2, %v763_v21, 0.0  ;;  %v903_v41 = vpop.f32.mrb[1].mxu1 }
  0xe9   : > { %v474_v25 = vsel %vm472_vm2, %v348_v22, 0.0  ;;  %v545_v26 = vmul.f32 %v348_v22, %v348_v22  ;;  %v576_v29 = vsel %vm472_vm2, %v544_v20, 0.0  ;;  %v907_v46 = vpop.f32.mrb[2].mxu1 }
  0xea   : > { %v475_v27 = vadd.f32 %v474_v25, %v473_v24  ;;  %v581_v42 = vsel %vm472_vm2, %v547_v30, 0.0  ;;  %v909_v50 = vpop.f32.mrb[3].mxu1 }
  0xeb   : > { %v577_v31 = vsel %vm472_vm2, %v545_v26, 0.0 }
  0xec   : > { %v477_v32 = vadd.f32 %v476_v28, %v475_v27  ;;  %v578_v33 = vadd.f32 %v577_v31, %v576_v29 }
  0xed   : > { %v766_v36 = vpop.f32.mrb[4].mxu0 }
  0xee   : > { %v580_v38 = vadd.f32 %v579_v34, %v578_v33  ;;  %v361_v39 = vpop.f32.mrb[5].mxu0  ;;  %v479_v40 = vadd.f32 %v478_v35, %v477_v32  ;;  %v550_v51 = vmul.f32 %v766_v36, %v766_v36  ;;  %v484_v57 = vsel %vm472_vm2, %v766_v36, 0.0 }
  0xef   : > { %v480_v43 = vsel %vm472_vm2, %v361_v39, 0.0  ;;  %v548_v44 = vmul.f32 %v361_v39, %v361_v39  ;;  %v767_v45 = vpop.f32.mrb[6].mxu0  ;;  %v917_v1 = vpop.f32.mrb[4].mxu1 }
  0xf0   : > { %v481_v47 = vadd.f32 %v480_v43, %v479_v40  ;;  %v582_v48 = vadd.f32 %v581_v42, %v580_v38  ;;  %v364_v49 = vpop.f32.mrb[7].mxu0  ;;  %v551_v58 = vmul.f32 %v767_v45, %v767_v45  ;;  %v587_v62 = vsel %vm472_vm2, %v550_v51, 0.0  ;;  %v919_v5 = vpop.f32.mrb[5].mxu1 }
  0xf1   : > { %v583_v52 = vsel %vm472_vm2, %v548_v44, 0.0  ;;  %v482_v53 = vsel %vm472_vm2, %v364_v49, 0.0  ;;  %v549_v54 = vmul.f32 %v364_v49, %v364_v49  ;;  %v486_v63 = vsel %vm472_vm2, %v767_v45, 0.0  ;;  %v923_v10 = vpop.f32.mrb[6].mxu1 }
  0xf2   : > { %v584_v55 = vadd.f32 %v583_v52, %v582_v48  ;;  %v483_v56 = vadd.f32 %v482_v53, %v481_v47  ;;  %v589_v6 = vsel %vm472_vm2, %v551_v58, 0.0  ;;  %v925_v14 = vpop.f32.mrb[7].mxu1 }
  0xf3   : > { %v585_v59 = vsel %vm472_vm2, %v549_v54, 0.0 }
  0xf4   : > { %v485_v60 = vadd.f32 %v484_v57, %v483_v56  ;;  %v586_v61 = vadd.f32 %v585_v59, %v584_v55  ;;  %v560_v56 = vmul.f32 %v903_v41, %v903_v41 }
  0xf5   : > { %v770_v0 = vpop.f32.mrb[8].mxu0 }
  0xf6   : > { %v588_v2 = vadd.f32 %v587_v62, %v586_v61  ;;  %v377_v3 = vpop.f32.mrb[9].mxu0  ;;  %v487_v4 = vadd.f32 %v486_v63, %v485_v60  ;;  %v554_v15 = vmul.f32 %v770_v0, %v770_v0  ;;  %v492_v21 = vsel %vm472_vm2, %v770_v0, 0.0 }
  0xf7   : > { %v488_v7 = vsel %vm472_vm2, %v377_v3, 0.0  ;;  %v552_v8 = vmul.f32 %v377_v3, %v377_v3  ;;  %v771_v9 = vpop.f32.mrb[10].mxu0  ;;  %v933_v29 = vpop.f32.mrb[8].mxu1  ;;  %v504_v61 = vsel %vm472_vm2, %v903_v41, 0.0  ;;  %v562_v41 = vmul.f32 %v901_v37, %v901_v37 }
  0xf8   : > { %v489_v11 = vadd.f32 %v488_v7, %v487_v4  ;;  %v590_v12 = vadd.f32 %v589_v6, %v588_v2  ;;  %v380_v13 = vpop.f32.mrb[11].mxu0  ;;  %v555_v22 = vmul.f32 %v771_v9, %v771_v9  ;;  %v595_v26 = vsel %vm472_vm2, %v554_v15, 0.0  ;;  %v935_v33 = vpop.f32.mrb[9].mxu1 }
  0xf9   : > { %v591_v16 = vsel %vm472_vm2, %v552_v8, 0.0  ;;  %v490_v17 = vsel %vm472_vm2, %v380_v13, 0.0  ;;  %v553_v18 = vmul.f32 %v380_v13, %v380_v13  ;;  %v494_v27 = vsel %vm472_vm2, %v771_v9, 0.0  ;;  %v939_v39 = vpop.f32.mrb[10].mxu1 }
  0xfa   : > { %v592_v19 = vadd.f32 %v591_v16, %v590_v12  ;;  %v491_v20 = vadd.f32 %v490_v17, %v489_v11  ;;  %v597_v34 = vsel %vm472_vm2, %v555_v22, 0.0  ;;  %v941_v44 = vpop.f32.mrb[11].mxu1  ;;  %v607_v4 = vsel %vm472_vm2, %v560_v56, 0.0 }
  0xfb   : > { %v593_v23 = vsel %vm472_vm2, %v553_v18, 0.0  ;;  %v561_v6 = vmul.f32 %v909_v50, %v909_v50  ;;  %v506_v12 = vsel %vm472_vm2, %v909_v50, 0.0  ;;  %v508_v16 = vsel %vm472_vm2, %v901_v37, 0.0 }
  0xfc   : > { %v493_v24 = vadd.f32 %v492_v21, %v491_v20  ;;  %v594_v25 = vadd.f32 %v593_v23, %v592_v19  ;;  %v563_v17 = vmul.f32 %v907_v46, %v907_v46  ;;  %v564_v19 = vmul.f32 %v919_v5, %v919_v5 }
  0xfd   : > { %v774_v28 = vpop.f32.mrb[12].mxu0  ;;  %v609_v18 = vsel %vm472_vm2, %v561_v6, 0.0  ;;  %v611_v22 = vsel %vm472_vm2, %v562_v41, 0.0  ;;  %v510_v50 = vsel %vm472_vm2, %v907_v46, 0.0  ;;  %v512_v23 = vsel %vm472_vm2, %v919_v5, 0.0 }
  0xfe   : > { %v596_v30 = vadd.f32 %v595_v26, %v594_v25  ;;  %v393_v31 = vpop.f32.mrb[13].mxu0  ;;  %v495_v32 = vadd.f32 %v494_v27, %v493_v24  ;;  %v558_v45 = vmul.f32 %v774_v28, %v774_v28  ;;  %v500_v53 = vsel %vm472_vm2, %v774_v28, 0.0 }
  0xff   : > { %v496_v35 = vsel %vm472_vm2, %v393_v31, 0.0  ;;  %v556_v36 = vmul.f32 %v393_v31, %v393_v31  ;;  %v775_v38 = vpop.f32.mrb[14].mxu0  ;;  %v953_v62 = vpop.f32.mrb[12].mxu1  ;;  %v613_v25 = vsel %vm472_vm2, %v563_v17, 0.0  ;;  %v615_v26 = vsel %vm472_vm2, %v564_v19, 0.0 }
 0x100   : > { %v497_v40 = vadd.f32 %v496_v35, %v495_v32  ;;  %v598_v42 = vadd.f32 %v597_v34, %v596_v30  ;;  %v396_v43 = vpop.f32.mrb[15].mxu0  ;;  %v559_v54 = vmul.f32 %v775_v38, %v775_v38  ;;  %v603_v59 = vsel %vm472_vm2, %v558_v45, 0.0  ;;  %v457_v2 = vpop.f32.mrb[13].mxu1 }
 0x101   : > { %v599_v47 = vsel %vm472_vm2, %v556_v36, 0.0  ;;  %v498_v48 = vsel %vm472_vm2, %v396_v43, 0.0  ;;  %v557_v49 = vmul.f32 %v396_v43, %v396_v43  ;;  %v502_v60 = vsel %vm472_vm2, %v775_v38, 0.0  ;;  %v959_v7 = vpop.f32.mrb[14].mxu1 }
 0x102   : > { %v600_v51 = vadd.f32 %v599_v47, %v598_v42  ;;  %v499_v52 = vadd.f32 %v498_v48, %v497_v40  ;;  %v605_v3 = vsel %vm472_vm2, %v559_v54, 0.0  ;;  %v460_v11 = vpop.f32.mrb[15].mxu1  ;;  %v565_v27 = vmul.f32 %v925_v14, %v925_v14 }
 0x103   : > { %v601_v55 = vsel %vm472_vm2, %v557_v49, 0.0  ;;  %v566_v31 = vmul.f32 %v917_v1, %v917_v1  ;;  %v514_v46 = vsel %vm472_vm2, %v925_v14, 0.0  ;;  %v516_v5 = vsel %vm472_vm2, %v917_v1, 0.0 }
 0x104   : > { %v501_v57 = vadd.f32 %v500_v53, %v499_v52  ;;  %v602_v58 = vadd.f32 %v601_v55, %v600_v51  ;;  %v567_v35 = vmul.f32 %v923_v10, %v923_v10  ;;  %v617_v36 = vsel %vm472_vm2, %v565_v27, 0.0 }
 0x105   : > { %v568_v38 = vmul.f32 %v935_v33, %v935_v33  ;;  %v619_v43 = vsel %vm472_vm2, %v566_v31, 0.0  ;;  %v518_v14 = vsel %vm472_vm2, %v923_v10, 0.0  ;;  %v520_v45 = vsel %vm472_vm2, %v935_v33, 0.0 }
 0x106   : > { %v604_v63 = vadd.f32 %v603_v59, %v602_v58  ;;  %v503_v0 = vadd.f32 %v502_v60, %v501_v57  ;;  %v621_v48 = vsel %vm472_vm2, %v567_v35, 0.0  ;;  %v569_v51 = vmul.f32 %v941_v44, %v941_v44 }
 0x107   : > { %v623_v49 = vsel %vm472_vm2, %v568_v38, 0.0  ;;  %v570_v54 = vmul.f32 %v933_v29, %v933_v29  ;;  %v522_v10 = vsel %vm472_vm2, %v941_v44, 0.0  ;;  %v524_v33 = vsel %vm472_vm2, %v933_v29, 0.0 }
 0x108   : > { %v505_v8 = vadd.f32 %v504_v61, %v503_v0  ;;  %v606_v9 = vadd.f32 %v605_v3, %v604_v63  ;;  %v571_v57 = vmul.f32 %v939_v39, %v939_v39  ;;  %v625_v58 = vsel %vm472_vm2, %v569_v51, 0.0 }
 0x109   : > { %v572_v59 = vmul.f32 %v457_v2, %v457_v2  ;;  %v627_v63 = vsel %vm472_vm2, %v570_v54, 0.0  ;;  %v526_v0 = vsel %vm472_vm2, %v939_v39, 0.0  ;;  %v528_v44 = vsel %vm472_vm2, %v457_v2, 0.0 }
 0x10a   : > { %v608_v13 = vadd.f32 %v607_v4, %v606_v9  ;;  %v507_v15 = vadd.f32 %v506_v12, %v505_v8  ;;  %v629_v6 = vsel %vm472_vm2, %v571_v57, 0.0  ;;  %v573_v8 = vmul.f32 %v460_v11, %v460_v11 }
 0x10b   : > { %v631_v29 = vsel %vm472_vm2, %v572_v59, 0.0  ;;  %v574_v12 = vmul.f32 %v953_v62, %v953_v62  ;;  %v532_v2 = vsel %vm472_vm2, %v953_v62, 0.0 }
 0x10c   : > { %v509_v20 = vadd.f32 %v508_v16, %v507_v15  ;;  %v610_v21 = vadd.f32 %v609_v18, %v608_v13  ;;  %v530_v13 = vsel %vm472_vm2, %v460_v11, 0.0  ;;  %v575_v16 = vmul.f32 %v959_v7, %v959_v7 }
 0x10d   : > { %v633_v17 = vsel %vm472_vm2, %v573_v8, 0.0 }
 0x10e   : > { %v612_v24 = vadd.f32 %v611_v22, %v610_v21  ;;  %v511_v37 = vadd.f32 %v510_v50, %v509_v20  ;;  %v635_v20 = vsel %vm472_vm2, %v574_v12, 0.0  ;;  %v534_v21 = vsel %vm472_vm2, %v959_v7, 0.0 }
 0x10f   : > { %v637_v50 = vsel %vm472_vm2, %v575_v16, 0.0 }
 0x110   : > { %v513_v28 = vadd.f32 %v512_v23, %v511_v37  ;;  %v614_v30 = vadd.f32 %v613_v25, %v612_v24 }
 0x112   : > { %v616_v32 = vadd.f32 %v615_v26, %v614_v30  ;;  %v515_v34 = vadd.f32 %v514_v46, %v513_v28 }
 0x114   : > { %v517_v40 = vadd.f32 %v516_v5, %v515_v34  ;;  %v618_v42 = vadd.f32 %v617_v36, %v616_v32 }
 0x116   : > { %v620_v47 = vadd.f32 %v619_v43, %v618_v42  ;;  %v519_v1 = vadd.f32 %v518_v14, %v517_v40 }
 0x118   : > { %v521_v52 = vadd.f32 %v520_v45, %v519_v1  ;;  %v622_v53 = vadd.f32 %v621_v48, %v620_v47 }
 0x11a   : > { %v624_v55 = vadd.f32 %v623_v49, %v622_v53  ;;  %v523_v56 = vadd.f32 %v522_v10, %v521_v52 }
 0x11c   : > { %v525_v60 = vadd.f32 %v524_v33, %v523_v56  ;;  %v626_v61 = vadd.f32 %v625_v58, %v624_v55 }
 0x11e   : > { %v628_v3 = vadd.f32 %v627_v63, %v626_v61  ;;  %v527_v4 = vadd.f32 %v526_v0, %v525_v60 }
 0x120   : > { %v529_v9 = vadd.f32 %v528_v44, %v527_v4  ;;  %v630_v41 = vadd.f32 %v629_v6, %v628_v3 }
 0x122   : > { %v632_v15 = vadd.f32 %v631_v29, %v630_v41  ;;  %v531_v39 = vadd.f32 %v530_v13, %v529_v9 }
 0x124   : > { %v533_v18 = vadd.f32 %v532_v2, %v531_v39  ;;  %v634_v19 = vadd.f32 %v633_v17, %v632_v15 }
 0x126   : > { %v535_v11 = vadd.f32 %v534_v21, %v533_v18  ;;  %v636_v22 = vadd.f32 %v635_v20, %v634_v19 }
 0x128   : > { %v536_v23 = vrot.slane %v535_v11, 4  ;;  %v638_v24 = vadd.f32 %v637_v50, %v636_v22 }
 0x12a   : > { %v537_v62 = vadd.f32 %v536_v23, %v535_v11  ;;  %v639_v37 = vrot.slane %v638_v24, 4 }
 0x12c   : > { %v538_v25 = vrot.slane %v537_v62, 2  ;;  %v640_v26 = vadd.f32 %v639_v37, %v638_v24 }
 0x12e   : > { %v539_v27 = vadd.f32 %v538_v25, %v537_v62  ;;  %v641_v28 = vrot.slane %v640_v26, 2 }
 0x130   : > { %v540_v30 = vrot.slane %v539_v27, 1  ;;  %v642_v31 = vadd.f32 %v641_v28, %v640_v26 }
 0x132   : > { %v541_v7 = vadd.f32 %v540_v30, %v539_v27  ;;  %v643_v46 = vrot.slane %v642_v31, 1 }
 0x134   : > { %543 = vst.msk [vmem:[%s143_s21] sm:$0x1] %vm542_vm3, %v541_v7  ;;  %v644_v32 = vadd.f32 %v643_v46, %v642_v31 }
 0x136   : > { %645 = vst.msk [vmem:[%s143_s21 + $0x1] sm:$0x1] %vm542_vm3, %v644_v32 }
 0x137 PF: > { %s12_s9 = sadd.s32 1, %s826_s9  }
 0x138   : > { %p9_p5 = scmp.ge.s32.totalorder %s12_s9, 4  }
 0x13a   :  { %11 = sbr.rel (!%p9_p5) target bundleno = 1 (0x1), region = 58 }

// kernel: basic_block_forward.7
= control target key start
LH: loop header
LB: loop body
LE: loop exit
PB: predicated region body
PF: predicated region fallthrough
CT: control target
= control target key end

     0   :  { %s761_s15 = smov 0   ;;  %s981_s0 = inlined_call_operand.vmem [shape: bf16[512,4], index: 0, kind: input, shape index: {}]   ;;  %s982_s1 = inlined_call_operand.vmem [shape: f32[512,4], index: 1, kind: input, shape index: {}]   ;;  %s983_s2 = inlined_call_operand.vmem [shape: f32[1,4], index: 2, kind: input, shape index: {}]   ;;  %s984_s3 = inlined_call_operand.vmem [shape: f32[1,4], index: 3, kind: input, shape index: {}]   ;;  %s985_s4 = inlined_call_operand.vmem [shape: f32[512,4], index: 4, kind: output, shape index: {}]  }
   0x1 LB: > { %s626_s16 = sadd.s32 4294967295, %s734_s15   ;;  %p630_p0 = scmp.ge.s32.totalorder %s734_s15, 1  ;;  %s734_s15 = sphi %s761_s15, %s14_s15  }
   0x2   : > { %p174_p1 = scmp.lt.s32.totalorder %s734_s15, 3 }
   0x4   : > { %p175_p2 = pnand %p630_p0, %p174_p1 }
   0x5   : > { %s631_s17 = sshll.u32 (!%p175_p2), %s626_s16, 5  ;;  %v782_v1 = vld [vmem:[%s983_s2] ss:$0 sm:$0xff] (!%p175_p2)  ;;  %vm525_vm0 = vcmask (!%p175_p2), 31744  }
   0x6   : > { %178 = sbr.rel (%p175_p2) target bundleno = 80 (0x50), region = 36  ;;  %p206_p3 = scmp.lt.s32.totalorder (!%p175_p2), %s631_s17, 63  ;;  %v795_v5 = vld [vmem:[%s984_s3] ss:$0 sm:$0xff] (!%p175_p2) }
   0xd   : > { %s987_s17 = smov (!%p206_p3, %s631_s17), 63 }
   0xe   : > { %s632_s18 = sshll.u32 %s987_s17, 2  ;;  %s634_s22 = sshll.u32 %s987_s17, 3 }
   0xf   : > { %s775_s21 = scalar_lea.vmem %s981_s0, %s632_s18  ;;  %s790_s27 = scalar_lea.vmem %s982_s1, %s634_s22 }
  0x10   : > { %v642_v0 = vld [vmem:[%s775_s21] sm:$0xff]   ;;  %v705_v4 = vld [vmem:[%s775_s21 + $0x8] sm:$0xff]   ;;  %v706_v8 = vld [vmem:[%s775_s21 + $0x10] sm:$0xff]   ;;  %s820_s6 = scalar_lea.vmem %s985_s4, %s634_s22 }
  0x11   : > { %v643_v2 = vunpack.c.l.bf16 %v642_v0  ;;  %v644_v3 = vunpack.c.h.bf16 %v642_v0  ;;  %v647_v6 = vunpack.c.l.bf16 %v705_v4  ;;  %v648_v7 = vunpack.c.h.bf16 %v705_v4  ;;  %v707_v13 = vld [vmem:[%s775_s21 + $0x18] sm:$0xff]   ;;  %v461_v19 = vld [vmem:[%s790_s27] sm:$0xff]  ;;  %v462_v23 = vld [vmem:[%s790_s27 + $0x8] sm:$0xff] }
  0x12   : > { %v651_v11 = vunpack.c.l.bf16 %v706_v8  ;;  %v652_v12 = vunpack.c.h.bf16 %v706_v8  ;;  %v655_v16 = vunpack.c.l.bf16 %v707_v13  ;;  %v656_v17 = vunpack.c.h.bf16 %v707_v13  ;;  %v463_v25 = vld [vmem:[%s790_s27 + $0x10] sm:$0xff]  ;;  %v464_v27 = vld [vmem:[%s790_s27 + $0x18] sm:$0xff]  ;;  %v708_v42 = vld [vmem:[%s775_s21 + $0x20] sm:$0xff]  }
  0x13   : > { %v294_v9 = vmul.f32 %v643_v2, %v782_v1  ;;  %v295_v10 = vmul.f32 %v644_v3, %v782_v1  ;;  %v296_v14 = vmul.f32 %v647_v6, %v782_v1  ;;  %v297_v15 = vmul.f32 %v648_v7, %v782_v1  ;;  %v709_v43 = vld [vmem:[%s775_s21 + $0x28] sm:$0xff]   ;;  %v465_v47 = vld [vmem:[%s790_s27 + $0x20] sm:$0xff]  ;;  %v467_v59 = vld [vmem:[%s790_s27 + $0x30] sm:$0xff] }
  0x14   : > { %v298_v21 = vmul.f32 %v651_v11, %v782_v1  ;;  %v299_v22 = vmul.f32 %v652_v12, %v782_v1  ;;  %v300_v28 = vmul.f32 %v655_v16, %v782_v1  ;;  %v301_v29 = vmul.f32 %v656_v17, %v782_v1  ;;  %v466_v49 = vld [vmem:[%s790_s27 + $0x28] sm:$0xff]  ;;  %v710_v60 = vld [vmem:[%s775_s21 + $0x30] sm:$0xff]   ;;  %v468_v63 = vld [vmem:[%s790_s27 + $0x38] sm:$0xff] }
  0x15   : > { %v333_v18 = vadd.f32 %v795_v5, %v294_v9  ;;  %v334_v20 = vadd.f32 %v795_v5, %v295_v10  ;;  %v335_v24 = vadd.f32 %v795_v5, %v296_v14  ;;  %v336_v26 = vadd.f32 %v795_v5, %v297_v15  ;;  %v469_v12 = vld [vmem:[%s790_s27 + $0x40] sm:$0xff]  ;;  %v470_v17 = vld [vmem:[%s790_s27 + $0x48] sm:$0xff] }
  0x16   : > { %v337_v36 = vadd.f32 %v795_v5, %v298_v21  ;;  %v338_v37 = vadd.f32 %v795_v5, %v299_v22  ;;  %v339_v50 = vadd.f32 %v795_v5, %v300_v28  ;;  %v340_v51 = vadd.f32 %v795_v5, %v301_v29  ;;  %v711_v21 = vld [vmem:[%s775_s21 + $0x38] sm:$0xff]  }
  0x17   : > { %vm365_vm1 = vcmp.gt.f32.partialorder %v333_v18, 0.0  ;;  %v397_v30 = vmul.f32 0.1, %v333_v18  ;;  %vm366_vm2 = vcmp.gt.f32.partialorder %v334_v20, 0.0  ;;  %v398_v31 = vmul.f32 0.1, %v334_v20 }
  0x18   : > { %vm367_vm3 = vcmp.gt.f32.partialorder %v335_v24, 0.0  ;;  %v399_v32 = vmul.f32 0.1, %v335_v24  ;;  %vm368_vm4 = vcmp.gt.f32.partialorder %v336_v26, 0.0  ;;  %v400_v33 = vmul.f32 0.1, %v336_v26 }
  0x19   : > { %v429_v34 = vsel %vm365_vm1, %v333_v18, %v397_v30  ;;  %v430_v35 = vsel %vm366_vm2, %v334_v20, %v398_v31  ;;  %vm369_vm5 = vcmp.gt.f32.partialorder %v337_v36, 0.0  ;;  %v401_v46 = vmul.f32 0.1, %v337_v36  ;;  %v471_v18 = vld [vmem:[%s790_s27 + $0x50] sm:$0xff] }
  0x1a   : > { %v493_v38 = vadd.f32 %v461_v19, %v429_v34  ;;  %v494_v39 = vadd.f32 %v462_v23, %v430_v35  ;;  %v431_v40 = vsel %vm367_vm3, %v335_v24, %v399_v32  ;;  %v432_v41 = vsel %vm368_vm4, %v336_v26, %v400_v33  ;;  %v712_v32 = vld [vmem:[%s775_s21 + $0x40] sm:$0xff]  }
  0x1b   : > { %v495_v44 = vadd.f32 %v463_v25, %v431_v40  ;;  %v496_v45 = vadd.f32 %v464_v27, %v432_v41  ;;  %vm370_vm6 = vcmp.gt.f32.partialorder %v338_v37, 0.0  ;;  %v402_v48 = vmul.f32 0.1, %v338_v37 }
  0x1c   : > { %526 = vst.msk [vmem:[%s820_s6] sm:$0xff] %vm525_vm0, %v493_v38  ;;  %527 = vst.msk [vmem:[%s820_s6 + $0x8] sm:$0xff] %vm525_vm0, %v494_v39  ;;  %v433_v52 = vsel %vm369_vm5, %v337_v36, %v401_v46  ;;  %v659_v53 = vunpack.c.l.bf16 %v708_v42  ;;  %v660_v54 = vunpack.c.h.bf16 %v708_v42  ;;  %v663_v55 = vunpack.c.l.bf16 %v709_v43  ;;  %v472_v36 = vld [vmem:[%s790_s27 + $0x58] sm:$0xff]  ;;  %v473_v38 = vld [vmem:[%s790_s27 + $0x60] sm:$0xff] }
  0x1d   : > { %528 = vst.msk [vmem:[%s820_s6 + $0x10] sm:$0xff] %vm525_vm0, %v495_v44  ;;  %529 = vst.msk [vmem:[%s820_s6 + $0x18] sm:$0xff] %vm525_vm0, %v496_v45  ;;  %v497_v56 = vadd.f32 %v465_v47, %v433_v52  ;;  %v434_v57 = vsel %vm370_vm6, %v338_v37, %v402_v48  ;;  %vm371_vm7 = vcmp.gt.f32.partialorder %v339_v50, 0.0  ;;  %v403_v58 = vmul.f32 0.1, %v339_v50  ;;  %v713_v45 = vld [vmem:[%s775_s21 + $0x48] sm:$0xff]  }
  0x1e   : > { %v498_v61 = vadd.f32 %v466_v49, %v434_v57  ;;  %vm372_vm8 = vcmp.gt.f32.partialorder %v340_v51, 0.0  ;;  %v404_v62 = vmul.f32 0.1, %v340_v51  ;;  %v302_v0 = vmul.f32 %v659_v53, %v782_v1  ;;  %v474_v49 = vld [vmem:[%s790_s27 + $0x68] sm:$0xff] }
  0x1f   : > { %530 = vst.msk [vmem:[%s820_s6 + $0x20] sm:$0xff] %vm525_vm0, %v497_v56  ;;  %v435_v2 = vsel %vm371_vm7, %v339_v50, %v403_v58  ;;  %v303_v3 = vmul.f32 %v660_v54, %v782_v1  ;;  %v304_v4 = vmul.f32 %v663_v55, %v782_v1  ;;  %v664_v6 = vunpack.c.h.bf16 %v709_v43  ;;  %v714_v58 = vld [vmem:[%s775_s21 + $0x50] sm:$0xff]  }
  0x20   : > { %531 = vst.msk [vmem:[%s820_s6 + $0x28] sm:$0xff] %vm525_vm0, %v498_v61  ;;  %v499_v7 = vadd.f32 %v467_v59, %v435_v2  ;;  %v436_v8 = vsel %vm372_vm8, %v340_v51, %v404_v62  ;;  %v341_v9 = vadd.f32 %v795_v5, %v302_v0  ;;  %v667_v10 = vunpack.c.l.bf16 %v710_v60  ;;  %v475_v61 = vld [vmem:[%s790_s27 + $0x70] sm:$0xff] }
  0x21   : > { %v500_v11 = vadd.f32 %v468_v63, %v436_v8  ;;  %v342_v13 = vadd.f32 %v795_v5, %v303_v3  ;;  %v343_v14 = vadd.f32 %v795_v5, %v304_v4  ;;  %v305_v15 = vmul.f32 %v664_v6, %v782_v1 }
  0x22   : > { %532 = vst.msk [vmem:[%s820_s6 + $0x30] sm:$0xff] %vm525_vm0, %v499_v7  ;;  %vm373_vm9 = vcmp.gt.f32.partialorder %v341_v9, 0.0  ;;  %v405_v16 = vmul.f32 0.1, %v341_v9  ;;  %v306_v19 = vmul.f32 %v667_v10, %v782_v1  ;;  %v668_v20 = vunpack.c.h.bf16 %v710_v60  ;;  %v476_v7 = vld [vmem:[%s790_s27 + $0x78] sm:$0xff] }
  0x23   : > { %533 = vst.msk [vmem:[%s820_s6 + $0x38] sm:$0xff] %vm525_vm0, %v500_v11  ;;  %vm374_vm10 = vcmp.gt.f32.partialorder %v342_v13, 0.0  ;;  %v406_v22 = vmul.f32 0.1, %v342_v13  ;;  %vm375_vm11 = vcmp.gt.f32.partialorder %v343_v14, 0.0  ;;  %v344_v25 = vadd.f32 %v795_v5, %v305_v15  ;;  %v477_v11 = vld [vmem:[%s790_s27 + $0x80] sm:$0xff] }
  0x24   : > { %v407_v23 = vmul.f32 0.1, %v343_v14  ;;  %v437_v24 = vsel %vm373_vm9, %v341_v9, %v405_v16  ;;  %v345_v26 = vadd.f32 %v795_v5, %v306_v19  ;;  %v307_v27 = vmul.f32 %v668_v20, %v782_v1 }
  0x25   : > { %v501_v28 = vadd.f32 %v469_v12, %v437_v24  ;;  %v438_v29 = vsel %vm374_vm10, %v342_v13, %v406_v22  ;;  %v671_v31 = vunpack.c.l.bf16 %v711_v21  ;;  %vm376_vm12 = vcmp.gt.f32.partialorder %v344_v25, 0.0 }
  0x26   : > { %v439_v30 = vsel %vm375_vm11, %v343_v14, %v407_v23  ;;  %v502_v33 = vadd.f32 %v470_v17, %v438_v29  ;;  %v408_v35 = vmul.f32 0.1, %v344_v25  ;;  %vm377_vm13 = vcmp.gt.f32.partialorder %v345_v26, 0.0  ;;  %v478_v14 = vld [vmem:[%s790_s27 + $0x88] sm:$0xff] }
  0x27   : > { %v503_v34 = vadd.f32 %v471_v18, %v439_v30  ;;  %534 = vst.msk [vmem:[%s820_s6 + $0x40] sm:$0xff] %vm525_vm0, %v501_v28  ;;  %v409_v37 = vmul.f32 0.1, %v345_v26  ;;  %v346_v39 = vadd.f32 %v795_v5, %v307_v27  ;;  %v308_v40 = vmul.f32 %v671_v31, %v782_v1  ;;  %v480_v28 = vld [vmem:[%s790_s27 + $0x98] sm:$0xff] }
  0x28   : > { %535 = vst.msk [vmem:[%s820_s6 + $0x48] sm:$0xff] %vm525_vm0, %v502_v33  ;;  %v440_v41 = vsel %vm376_vm12, %v344_v25, %v408_v35  ;;  %v672_v42 = vunpack.c.h.bf16 %v711_v21  ;;  %v675_v43 = vunpack.c.l.bf16 %v712_v32  ;;  %v676_v44 = vunpack.c.h.bf16 %v712_v32  ;;  %v715_v21 = vld [vmem:[%s775_s21 + $0x58] sm:$0xff]   ;;  %v479_v25 = vld [vmem:[%s790_s27 + $0x90] sm:$0xff]  ;;  %v717_v35 = vld [vmem:[%s775_s21 + $0x68] sm:$0xff]  }
  0x29   : > { %536 = vst.msk [vmem:[%s820_s6 + $0x50] sm:$0xff] %vm525_vm0, %v503_v34  ;;  %v504_v46 = vadd.f32 %v472_v36, %v440_v41  ;;  %v441_v47 = vsel %vm377_vm13, %v345_v26, %v409_v37  ;;  %vm378_vm14 = vcmp.gt.f32.partialorder %v346_v39, 0.0  ;;  %v410_v48 = vmul.f32 0.1, %v346_v39  ;;  %v716_v34 = vld [vmem:[%s775_s21 + $0x60] sm:$0xff]  }
  0x2a   : > { %v505_v50 = vadd.f32 %v473_v38, %v441_v47  ;;  %v347_v51 = vadd.f32 %v795_v5, %v308_v40  ;;  %v309_v52 = vmul.f32 %v672_v42, %v782_v1  ;;  %v310_v53 = vmul.f32 %v675_v43, %v782_v1 }
  0x2b   : > { %537 = vst.msk [vmem:[%s820_s6 + $0x58] sm:$0xff] %vm525_vm0, %v504_v46  ;;  %v442_v54 = vsel %vm378_vm14, %v346_v39, %v410_v48  ;;  %v311_v55 = vmul.f32 %v676_v44, %v782_v1  ;;  %v679_v56 = vunpack.c.l.bf16 %v713_v45  ;;  %v680_v57 = vunpack.c.h.bf16 %v713_v45  ;;  %v481_v39 = vld [vmem:[%s790_s27 + $0xa0] sm:$0xff] }
  0x2c   : > { %538 = vst.msk [vmem:[%s820_s6 + $0x60] sm:$0xff] %vm525_vm0, %v505_v50  ;;  %v506_v59 = vadd.f32 %v474_v49, %v442_v54  ;;  %vm379_vm15 = vcmp.gt.f32.partialorder %v347_v51, 0.0  ;;  %v411_v60 = vmul.f32 0.1, %v347_v51  ;;  %v348_v62 = vadd.f32 %v795_v5, %v309_v52  ;;  %v482_v50 = vld [vmem:[%s790_s27 + $0xa8] sm:$0xff] }
  0x2d   : > { %v349_v63 = vadd.f32 %v795_v5, %v310_v53  ;;  %v350_v0 = vadd.f32 %v795_v5, %v311_v55  ;;  %v312_v2 = vmul.f32 %v679_v56, %v782_v1  ;;  %v313_v3 = vmul.f32 %v680_v57, %v782_v1 }
  0x2e   : > { %539 = vst.msk [vmem:[%s820_s6 + $0x68] sm:$0xff] %vm525_vm0, %v506_v59  ;;  %v443_v4 = vsel %vm379_vm15, %v347_v51, %v411_v60  ;;  %vm380_vm1 = vcmp.gt.f32.partialorder %v348_v62, 0.0  ;;  %v412_v6 = vmul.f32 0.1, %v348_v62  ;;  %v683_v8 = vunpack.c.l.bf16 %v714_v58 }
  0x2f   : > { %v507_v9 = vadd.f32 %v475_v61, %v443_v4  ;;  %vm381_vm2 = vcmp.gt.f32.partialorder %v349_v63, 0.0  ;;  %v413_v10 = vmul.f32 0.1, %v349_v63  ;;  %vm382_vm3 = vcmp.gt.f32.partialorder %v350_v0, 0.0 }
  0x30   : > { %v444_v12 = vsel %vm380_vm1, %v348_v62, %v412_v6  ;;  %v414_v13 = vmul.f32 0.1, %v350_v0  ;;  %v351_v15 = vadd.f32 %v795_v5, %v312_v2  ;;  %v352_v16 = vadd.f32 %v795_v5, %v313_v3  ;;  %v484_v62 = vld [vmem:[%s790_s27 + $0xb8] sm:$0xff]  ;;  %v718_v6 = vld [vmem:[%s775_s21 + $0x70] sm:$0xff]  }
  0x31   : > { %540 = vst.msk [vmem:[%s820_s6 + $0x70] sm:$0xff] %vm525_vm0, %v507_v9  ;;  %v508_v17 = vadd.f32 %v476_v7, %v444_v12  ;;  %v445_v18 = vsel %vm381_vm2, %v349_v63, %v413_v10  ;;  %v314_v19 = vmul.f32 %v683_v8, %v782_v1  ;;  %v684_v20 = vunpack.c.h.bf16 %v714_v58  ;;  %v483_v58 = vld [vmem:[%s790_s27 + $0xb0] sm:$0xff]  ;;  %v485_v10 = vld [vmem:[%s790_s27 + $0xc0] sm:$0xff] }
  0x32   : > { %v509_v22 = vadd.f32 %v477_v11, %v445_v18  ;;  %v446_v23 = vsel %vm382_vm3, %v350_v0, %v414_v13  ;;  %vm383_vm4 = vcmp.gt.f32.partialorder %v351_v15, 0.0  ;;  %v415_v24 = vmul.f32 0.1, %v351_v15  ;;  %v719_v11 = vld [vmem:[%s775_s21 + $0x78] sm:$0xff]  }
  0x33   : > { %541 = vst.msk [vmem:[%s820_s6 + $0x78] sm:$0xff] %vm525_vm0, %v508_v17  ;;  %v510_v26 = vadd.f32 %v478_v14, %v446_v23  ;;  %vm384_vm5 = vcmp.gt.f32.partialorder %v352_v16, 0.0  ;;  %v416_v27 = vmul.f32 0.1, %v352_v16  ;;  %v353_v29 = vadd.f32 %v795_v5, %v314_v19  ;;  %v486_v14 = vld [vmem:[%s790_s27 + $0xc8] sm:$0xff]  ;;  %v487_v17 = vld [vmem:[%s790_s27 + $0xd0] sm:$0xff] }
  0x34   : > { %542 = vst.msk [vmem:[%s820_s6 + $0x80] sm:$0xff] %vm525_vm0, %v509_v22  ;;  %v447_v30 = vsel %vm383_vm4, %v351_v15, %v415_v24  ;;  %v315_v31 = vmul.f32 %v684_v20, %v782_v1  ;;  %v687_v32 = vunpack.c.l.bf16 %v715_v21  ;;  %v688_v33 = vunpack.c.h.bf16 %v715_v21 }
  0x35   : > { %543 = vst.msk [vmem:[%s820_s6 + $0x88] sm:$0xff] %vm525_vm0, %v510_v26  ;;  %v511_v36 = vadd.f32 %v479_v25, %v447_v30  ;;  %v448_v37 = vsel %vm384_vm5, %v352_v16, %v416_v27  ;;  %vm385_vm6 = vcmp.gt.f32.partialorder %v353_v29, 0.0  ;;  %v417_v38 = vmul.f32 0.1, %v353_v29  ;;  %v488_v27 = vld [vmem:[%s790_s27 + $0xd8] sm:$0xff] }
  0x36   : > { %v512_v40 = vadd.f32 %v480_v28, %v448_v37  ;;  %v354_v41 = vadd.f32 %v795_v5, %v315_v31  ;;  %v316_v42 = vmul.f32 %v687_v32, %v782_v1  ;;  %v317_v43 = vmul.f32 %v688_v33, %v782_v1 }
  0x37   : > { %544 = vst.msk [vmem:[%s820_s6 + $0x90] sm:$0xff] %vm525_vm0, %v511_v36  ;;  %v449_v44 = vsel %vm385_vm6, %v353_v29, %v417_v38  ;;  %v691_v45 = vunpack.c.l.bf16 %v716_v34  ;;  %v692_v46 = vunpack.c.h.bf16 %v716_v34  ;;  %v695_v47 = vunpack.c.l.bf16 %v717_v35  ;;  %v489_v38 = vld [vmem:[%s790_s27 + $0xe0] sm:$0xff] }
  0x38   : > { %545 = vst.msk [vmem:[%s820_s6 + $0x98] sm:$0xff] %vm525_vm0, %v512_v40  ;;  %v513_v48 = vadd.f32 %v481_v39, %v449_v44  ;;  %vm386_vm7 = vcmp.gt.f32.partialorder %v354_v41, 0.0  ;;  %v418_v49 = vmul.f32 0.1, %v354_v41  ;;  %v355_v51 = vadd.f32 %v795_v5, %v316_v42  ;;  %v490_v39 = vld [vmem:[%s790_s27 + $0xe8] sm:$0xff]  ;;  %v491_v44 = vld [vmem:[%s790_s27 + $0xf0] sm:$0xff] }
  0x39   : > { %v356_v52 = vadd.f32 %v795_v5, %v317_v43  ;;  %v318_v53 = vmul.f32 %v691_v45, %v782_v1  ;;  %v319_v54 = vmul.f32 %v692_v46, %v782_v1  ;;  %v320_v55 = vmul.f32 %v695_v47, %v782_v1 }
  0x3a   : > { %546 = vst.msk [vmem:[%s820_s6 + $0xa0] sm:$0xff] %vm525_vm0, %v513_v48  ;;  %v450_v56 = vsel %vm386_vm7, %v354_v41, %v418_v49  ;;  %vm387_vm8 = vcmp.gt.f32.partialorder %v355_v51, 0.0  ;;  %v419_v57 = vmul.f32 0.1, %v355_v51  ;;  %v696_v59 = vunpack.c.h.bf16 %v717_v35 }
  0x3b   : > { %v514_v60 = vadd.f32 %v482_v50, %v450_v56  ;;  %vm388_vm9 = vcmp.gt.f32.partialorder %v356_v52, 0.0  ;;  %v420_v61 = vmul.f32 0.1, %v356_v52  ;;  %v357_v63 = vadd.f32 %v795_v5, %v318_v53 }
  0x3c   : > { %v451_v0 = vsel %vm387_vm8, %v355_v51, %v419_v57  ;;  %v358_v2 = vadd.f32 %v795_v5, %v319_v54  ;;  %v359_v3 = vadd.f32 %v795_v5, %v320_v55  ;;  %v321_v4 = vmul.f32 %v696_v59, %v782_v1 }
  0x3d   : > { %547 = vst.msk [vmem:[%s820_s6 + $0xa8] sm:$0xff] %vm525_vm0, %v514_v60  ;;  %v515_v7 = vadd.f32 %v483_v58, %v451_v0  ;;  %v452_v8 = vsel %vm388_vm9, %v356_v52, %v420_v61  ;;  %vm389_vm10 = vcmp.gt.f32.partialorder %v357_v63, 0.0  ;;  %v421_v9 = vmul.f32 0.1, %v357_v63  ;;  %v492_v52 = vld [vmem:[%s790_s27 + $0xf8] sm:$0xff] }
  0x3e   : > { %v516_v12 = vadd.f32 %v484_v62, %v452_v8  ;;  %vm390_vm11 = vcmp.gt.f32.partialorder %v358_v2, 0.0  ;;  %v422_v13 = vmul.f32 0.1, %v358_v2  ;;  %vm391_vm12 = vcmp.gt.f32.partialorder %v359_v3, 0.0 }
  0x3f   : > { %548 = vst.msk [vmem:[%s820_s6 + $0xb0] sm:$0xff] %vm525_vm0, %v515_v7  ;;  %v453_v15 = vsel %vm389_vm10, %v357_v63, %v421_v9  ;;  %v423_v16 = vmul.f32 0.1, %v359_v3  ;;  %v360_v18 = vadd.f32 %v795_v5, %v321_v4  ;;  %v699_v19 = vunpack.c.l.bf16 %v718_v6 }
  0x40   : > { %549 = vst.msk [vmem:[%s820_s6 + $0xb8] sm:$0xff] %vm525_vm0, %v516_v12  ;;  %v517_v20 = vadd.f32 %v485_v10, %v453_v15  ;;  %v454_v21 = vsel %vm390_vm11, %v358_v2, %v422_v13  ;;  %v700_v22 = vunpack.c.h.bf16 %v718_v6  ;;  %v703_v23 = vunpack.c.l.bf16 %v719_v11 }
  0x41   : > { %v518_v24 = vadd.f32 %v486_v14, %v454_v21  ;;  %v455_v25 = vsel %vm391_vm12, %v359_v3, %v423_v16  ;;  %vm392_vm13 = vcmp.gt.f32.partialorder %v360_v18, 0.0  ;;  %v424_v26 = vmul.f32 0.1, %v360_v18 }
  0x42   : > { %550 = vst.msk [vmem:[%s820_s6 + $0xc0] sm:$0xff] %vm525_vm0, %v517_v20  ;;  %v519_v28 = vadd.f32 %v487_v17, %v455_v25  ;;  %v322_v29 = vmul.f32 %v699_v19, %v782_v1  ;;  %v323_v30 = vmul.f32 %v700_v22, %v782_v1  ;;  %v324_v31 = vmul.f32 %v703_v23, %v782_v1 }
  0x43   : > { %551 = vst.msk [vmem:[%s820_s6 + $0xc8] sm:$0xff] %vm525_vm0, %v518_v24  ;;  %v456_v32 = vsel %vm392_vm13, %v360_v18, %v424_v26  ;;  %v704_v33 = vunpack.c.h.bf16 %v719_v11 }
  0x44   : > { %552 = vst.msk [vmem:[%s820_s6 + $0xd0] sm:$0xff] %vm525_vm0, %v519_v28  ;;  %v520_v34 = vadd.f32 %v488_v27, %v456_v32  ;;  %v361_v35 = vadd.f32 %v795_v5, %v322_v29  ;;  %v362_v36 = vadd.f32 %v795_v5, %v323_v30  ;;  %v363_v37 = vadd.f32 %v795_v5, %v324_v31 }
  0x45   : > { %v325_v40 = vmul.f32 %v704_v33, %v782_v1 }
  0x46   : > { %553 = vst.msk [vmem:[%s820_s6 + $0xd8] sm:$0xff] %vm525_vm0, %v520_v34  ;;  %vm393_vm14 = vcmp.gt.f32.partialorder %v361_v35, 0.0  ;;  %v425_v41 = vmul.f32 0.1, %v361_v35  ;;  %vm394_vm15 = vcmp.gt.f32.partialorder %v362_v36, 0.0  ;;  %vm395_vm1 = vcmp.gt.f32.partialorder %v363_v37, 0.0 }
  0x47   : > { %v426_v42 = vmul.f32 0.1, %v362_v36  ;;  %v427_v43 = vmul.f32 0.1, %v363_v37  ;;  %v364_v45 = vadd.f32 %v795_v5, %v325_v40 }
  0x48   : > { %v457_v46 = vsel %vm393_vm14, %v361_v35, %v425_v41 }
  0x49   : > { %v458_v47 = vsel %vm394_vm15, %v362_v36, %v426_v42  ;;  %v521_v48 = vadd.f32 %v489_v38, %v457_v46  ;;  %v459_v49 = vsel %vm395_vm1, %v363_v37, %v427_v43  ;;  %vm396_vm2 = vcmp.gt.f32.partialorder %v364_v45, 0.0 }
  0x4a   : > { %v522_v1 = vadd.f32 %v490_v39, %v458_v47  ;;  %v523_v50 = vadd.f32 %v491_v44, %v459_v49  ;;  %v428_v51 = vmul.f32 0.1, %v364_v45 }
  0x4b   : > { %554 = vst.msk [vmem:[%s820_s6 + $0xe0] sm:$0xff] %vm525_vm0, %v521_v48 }
  0x4c   : > { %555 = vst.msk [vmem:[%s820_s6 + $0xe8] sm:$0xff] %vm525_vm0, %v522_v1  ;;  %556 = vst.msk [vmem:[%s820_s6 + $0xf0] sm:$0xff] %vm525_vm0, %v523_v50  ;;  %v460_v53 = vsel %vm396_vm2, %v364_v45, %v428_v51 }
  0x4d   : > { %v524_v54 = vadd.f32 %v492_v52, %v460_v53 }
  0x4f   : > { %557 = vst.msk [vmem:[%s820_s6 + $0xf8] sm:$0xff] %vm525_vm0, %v524_v54 }
  0x50 PF: > { %s14_s15 = sadd.s32 1, %s734_s15  }
  0x51   : > { %p11_p4 = scmp.ge.s32.totalorder %s14_s15, 4  }
  0x53   :  { %13 = sbr.rel (!%p11_p4) target bundleno = 1 (0x1), region = 69 }

// kernel: basic_block_forward.6
= control target key start
LH: loop header
LB: loop body
LE: loop exit
PB: predicated region body
PF: predicated region fallthrough
CT: control target
= control target key end

     0   :  { %s7245_s12 = smov 0   ;;  %s9057_s0 = inlined_call_operand.vmem [shape: bf16[2,18,18,2], index: 0, kind: input, shape index: {}]   ;;  %s9058_s1 = inlined_call_operand.vmem [shape: bf16[3,3,2,4], index: 1, kind: input, shape index: {}]   ;;  %s9059_s2 = inlined_call_operand.vmem [shape: bf16[2,16,16,4], index: 2, kind: output, shape index: {0}]   ;;  %s9060_s3 = inlined_call_operand.vmem [shape: f32[2,2,4], index: 3, kind: output, shape index: {1}]  }
   0x1 LB: > { %s6011_s13 = sadd.s32 4294967295, %s7222_s12   ;;  %p6015_p0 = scmp.ge.s32.totalorder %s7222_s12, 1  ;;  %s7222_s12 = sphi %s7245_s12, %s14_s12  }
   0x2   : > { %p140_p1 = scmp.lt.s32.totalorder %s7222_s12, 3 }
   0x4   : > { %p141_p2 = pnand %p6015_p0, %p140_p1 }
   0x5   : > { %v280_v0 = vld [vmem:[%s9058_s1] sm:$0x1] (!%p141_p2)  ;;  %vm410_vm0 = vcmask (!%p141_p2), 1040384   ;;  %p168_p3 = scmp.lt.s32.totalorder (!%p141_p2), %s6011_s13, 1  ;;  %v6052_v2 = vld [vmem:[%s9058_s1 + $0x1] sm:$0x1] (!%p141_p2) }
   0x6   : > { %144 = sbr.rel (%p141_p2) target bundleno = 600 (0x258), region = 28  ;;  %7149 = vmatprep.subr.msk.bf16.mxu1 (!%p141_p2), %vm410_vm0, %v280_v0  ;;  %v412_v1 = vsel (!%p141_p2), %vm410_vm0, %v280_v0, 0  ;;  %7148 = vmatprep.subr.msk.bf16.mxu0 (!%p141_p2), %vm410_vm0, %v280_v0  ;;  %v6101_v3 = vld [vmem:[%s9058_s1 + $0x2] sm:$0x1] (!%p141_p2)  ;;  %vm361_vm1 = vcmask (!%p141_p2), 15360   ;;  %v1205_v7 = vsel (!%p141_p2), %vm410_vm0, %v6052_v2, 0 }
   0x7   : > { %7147 = vmatpush3.bf16.msra.mxu1 (!%p141_p2), %v412_v1  ;;  %6841 = vmatpush3.bf16.msra.mxu0 (!%p141_p2), %v412_v1  ;;  %v6166_v5 = vld [vmem:[%s9058_s1 + $0x3] sm:$0x1] (!%p141_p2)  ;;  %v6247_v9 = vld [vmem:[%s9058_s1 + $0x4] sm:$0x1] (!%p141_p2)  ;;  %v1774_v11 = vsel (!%p141_p2), %vm410_vm0, %v6101_v3, 0  ;;  %vm1528_vm2 = vcmask (!%p141_p2), 1042432  }
   0x8   : > { %7150 = vmatprep.subr.msk.bf16.mxu1 (!%p141_p2), %vm410_vm0, %v6052_v2  ;;  %7151 = vmatprep.subr.msk.bf16.mxu0 (!%p141_p2), %vm410_vm0, %v6101_v3  ;;  %vm687_vm3 = vsmask.f32 (!%p141_p2), 3328  ;;  %vm688_vm4 = vsmask.f32 (!%p141_p2), 7440  ;;  %v7306_v18 = vld [vmem:[%s9058_s1 + $0x5] sm:$0x1] (!%p141_p2) }
   0x9   : > { %v7310_v19 = vsel (!%p141_p2), %vm410_vm0, %v6166_v5, 0  ;;  %vm1529_vm5 = vcmask (!%p141_p2), 1046532   ;;  %v7315_v21 = vsel (!%p141_p2), %vm410_vm0, %v6247_v9, 0  ;;  %v7321_v24 = vsel (!%p141_p2), %vm410_vm0, %v7306_v18, 0  ;;  %vm7345_vm7 = vmor (!%p141_p2), %vm687_vm3, %vm688_vm4 }
   0xa   : > { %vm7338_vm6 = vmor (!%p141_p2), %vm1528_vm2, %vm1529_vm5  ;;  %vm183_vm8 = vcmask (!%p141_p2), 31744   ;;  %vm5719_vm9 = vcmask (!%p141_p2), 27648   ;;  %vm5821_vm10 = vcmask (!%p141_p2), 24576  }
   0xd   : > { %s9066_s13 = smov (!%p168_p3, %s6011_s13), 1 }
   0xe   : > { %s7158_s20 = smul.u32 216, %s9066_s13  ;;  %s6654_s9 = sshll.u32 %s9066_s13, 7 }
   0xf   : > { %s8856_s14 = scalar_lea.vmem %s9059_s2, %s6654_s9  ;;  %s6019_s15 = sshll.u32 %s9066_s13, 1 }
  0x10   : > { %s7273_s23 = scalar_lea.vmem %s9057_s0, %s7158_s20  ;;  %s181_s18 = scalar_lea.vmem %s9060_s3, %s6019_s15 }
  0x11   : > { %v7168_v4 = vld [vmem:[%s7273_s23 + $0x60] sm:$0xff]   ;;  %v7169_v6 = vld [vmem:[%s7273_s23 + $0x6c] sm:$0xff]   ;;  %v7172_v12 = vld [vmem:[%s7273_s23 + $0x78] sm:$0xff]  }
  0x12   : > { %6858 = vmatprep.mubr.msk.bf16.mxu1 %vm361_vm1, %v7168_v4  ;;  %v7170_v8 = vld [vmem:[%s7273_s23] sm:$0xff]   ;;  %v7171_v10 = vld [vmem:[%s7273_s23 + $0xc] sm:$0xff]   ;;  %v7174_v13 = vld [vmem:[%s7273_s23 + $0x18] sm:$0xff]  }
  0x13   : > { %6859 = vmatmul.mubr.msk.bf16.vlgmr.msra.gmra.mrb[0].mxu1 %vm361_vm1, %v7169_v6  ;;  %6842 = vmatprep.mubr.msk.bf16.mxu0 %vm361_vm1, %v7170_v8  ;;  %v7173_v14 = vld [vmem:[%s7273_s23 + $0x84] sm:$0xff]   ;;  %v7176_v15 = vld [vmem:[%s7273_s23 + $0x90] sm:$0xff]   ;;  %v7177_v20 = vld [vmem:[%s7273_s23 + $0x9c] sm:$0xff]  }
  0x14   : > { %6875 = vmatpush3.bf16.msra.mxu1 %v1205_v7  ;;  %6843 = vmatmul.mubr.msk.bf16.vlgmr.msra.gmra.mrb[0].mxu0 %vm361_vm1, %v7171_v10  ;;  %v7175_v16 = vld [vmem:[%s7273_s23 + $0x24] sm:$0xff]   ;;  %v7178_v17 = vld [vmem:[%s7273_s23 + $0x30] sm:$0xff]   ;;  %v7179_v22 = vld [vmem:[%s7273_s23 + $0x3c] sm:$0xff]  }
  0x15   : > { %7152 = vmatprep.subr.msk.bf16.mxu1 %vm410_vm0, %v6166_v5  ;;  %6862 = vmatprep.mubr.msk.bf16.mxu1 %vm361_vm1, %v7172_v12  ;;  %v7180_v23 = vld [vmem:[%s7273_s23 + $0xa8] sm:$0xff]   ;;  %v639_v26 = vld [vmem:[%s7273_s23] sm:$0xf]  ;;  %v640_v27 = vld [vmem:[%s7273_s23 + $0x4] sm:$0xf] }
  0x16   : > { %6909 = vmatpush3.bf16.msra.mxu0 %v1774_v11  ;;  %6846 = vmatprep.mubr.msk.bf16.mxu0 %vm361_vm1, %v7174_v13  ;;  %v7182_v25 = vld [vmem:[%s7273_s23 + $0x48] sm:$0xff]   ;;  %v691_v29 = vshrl.u32 %v639_v26, 16  ;;  %v694_v30 = vshll.u32 %v639_v26, 16  ;;  %v700_v31 = vshll.u32 %v640_v27, 16  ;;  %v704_v32 = vshrl.u32 %v640_v27, 16  ;;  %v7181_v60 = vld [vmem:[%s7273_s23 + $0xb4] sm:$0xff]  }
  0x17   : > { %7153 = vmatprep.subr.msk.bf16.mxu0 %vm410_vm0, %v6247_v9  ;;  %v641_v28 = vld [vmem:[%s7273_s23 + $0x8] sm:$0x1]  ;;  %v642_v33 = vld [vmem:[%s7273_s23 + $0xc] sm:$0xf]  ;;  %v643_v35 = vld [vmem:[%s7273_s23 + $0x10] sm:$0xf] }
  0x18   : > { %v710_v34 = vshll.u32 %v641_v28, 16  ;;  %v644_v36 = vld [vmem:[%s7273_s23 + $0x14] sm:$0x1]  ;;  %v715_v37 = vshrl.u32 %v642_v33, 16  ;;  %v693_v38 = vrot.slane %v691_v29, 4  ;;  %v696_v39 = vrot.slane %v694_v30, 5 }
  0x19   : > { %v702_v40 = vrot.slane %v700_v31, 5  ;;  %v706_v41 = vrot.slane %v704_v32, 4  ;;  %v1432_v42 = vld [vmem:[%s7273_s23] sm:$0xe]  ;;  %v718_v45 = vshll.u32 %v642_v33, 16  ;;  %v724_v46 = vshll.u32 %v643_v35, 16 }
  0x1a   : > { %v712_v43 = vrot.slane %v710_v34, 5  ;;  %v717_v44 = vrot.slane %v715_v37, 4  ;;  %v1433_v47 = vld [vmem:[%s7273_s23 + $0x4] sm:$0xf]  ;;  %v697_v48 = vor.u32 %v696_v39, %v693_v38  ;;  %v728_v50 = vshrl.u32 %v643_v35, 16  ;;  %v7183_v6 = vld [vmem:[%s7273_s23 + $0x54] sm:$0xff]  }
  0x1b   : > { %6863 = vmatmul.mubr.msk.bf16.gmra.mrb[4].mxu1 %vm361_vm1, %v7173_v14  ;;  %v707_v49 = vor.u32 %v706_v41, %v702_v40  ;;  %v734_v51 = vshll.u32 %v644_v36, 16  ;;  %v1434_v52 = vld [vmem:[%s7273_s23 + $0x8] sm:$0x1]  ;;  %v720_v55 = vrot.slane %v718_v45, 5  ;;  %v726_v56 = vrot.slane %v724_v46, 5 }
  0x1c   : > { %6866 = vmatprep.mubr.msk.bf16.mxu1 %vm361_vm1, %v7176_v15  ;;  %6847 = vmatmul.mubr.msk.bf16.gmra.mrb[4].mxu0 %vm361_vm1, %v7175_v16  ;;  %v6085_v57 = vrot.slane %v1432_v42, 9  ;;  %v1533_v58 = vrot.slane %v1433_v47, 5  ;;  %v645_v59 = vld [vmem:[%s7273_s23 + $0x18] sm:$0xf]  ;;  %v698_v61 = vrot.slane %v697_v48, 4  ;;  %v730_v63 = vrot.slane %v728_v50, 4 }
  0x1d   : > { %6850 = vmatprep.mubr.msk.bf16.mxu0 %vm361_vm1, %v7178_v17  ;;  %v708_v62 = vrot.slane %v707_v49, 4  ;;  %v736_v0 = vrot.slane %v734_v51, 5  ;;  %v721_v1 = vor.u32 %v720_v55, %v717_v44  ;;  %v1536_v4 = vrot.slane %v1434_v52, 5  ;;  %v646_v5 = vld [vmem:[%s7273_s23 + $0x1c] sm:$0xf] }
  0x1e   : > { %v1534_v2 = vsel %vm7338_vm6, %v6085_v57, %v1533_v58  ;;  %v1535_v3 = vrot.slane %v1533_v58, 4  ;;  %v703_v7 = vsel %vm7345_vm7, %v698_v61, %v702_v40  ;;  %v731_v9 = vor.u32 %v730_v63, %v726_v56  ;;  %v647_v10 = vld [vmem:[%s7273_s23 + $0x20] sm:$0x1]  ;;  %v1435_v16 = vld [vmem:[%s7273_s23 + $0xc] sm:$0xe] }
  0x1f   : > { %v713_v8 = vsel %vm7345_vm7, %v708_v62, %v712_v43  ;;  %v739_v11 = vshrl.u32 %v645_v59, 16  ;;  %v722_v13 = vrot.slane %v721_v1, 4  ;;  %v742_v15 = vshll.u32 %v645_v59, 16  ;;  %v1436_v17 = vld [vmem:[%s7273_s23 + $0x10] sm:$0xf] }
  0x20   : > { %v6053_v12 = vcombine.low %v703_v7, %v713_v8  ;;  %v1537_v14 = vsel %vm7338_vm6, %v1535_v3, %v1536_v4  ;;  %v1437_v26 = vld [vmem:[%s7273_s23 + $0x14] sm:$0x1]  ;;  %v752_v29 = vshrl.u32 %v646_v5, 16  ;;  %v758_v30 = vshll.u32 %v647_v10, 16  ;;  %v648_v31 = vld [vmem:[%s7273_s23 + $0x24] sm:$0xf] }
  0x21   : > { %v727_v27 = vsel %vm7345_vm7, %v722_v13, %v726_v56  ;;  %v744_v28 = vrot.slane %v742_v15, 5  ;;  %v6086_v34 = vrot.slane %v1435_v16, 9  ;;  %v1540_v35 = vrot.slane %v1436_v17, 5  ;;  %v649_v36 = vld [vmem:[%s7273_s23 + $0x28] sm:$0xf] }
  0x22   : > { %v754_v39 = vrot.slane %v752_v29, 4  ;;  %v760_v40 = vrot.slane %v758_v30, 5  ;;  %v650_v41 = vld [vmem:[%s7273_s23 + $0x2c] sm:$0x1]  ;;  %v1543_v44 = vrot.slane %v1437_v26, 5  ;;  %v763_v45 = vshrl.u32 %v648_v31, 16 }
  0x23   : > { %6867 = vmatmul.mubr.msk.bf16.gmra.mrb[8].mxu1 %vm361_vm1, %v7177_v20  ;;  %v732_v20 = vrot.slane %v731_v9, 4  ;;  %v1541_v42 = vsel %vm7338_vm6, %v6086_v34, %v1540_v35  ;;  %v1542_v43 = vrot.slane %v1540_v35, 4  ;;  %v1438_v46 = vld [vmem:[%s7273_s23 + $0x18] sm:$0xe]  ;;  %v766_v49 = vshll.u32 %v648_v31, 16 }
  0x24   : > { %6870 = vmatprep.mubr.msk.bf16.mxu1 %vm361_vm1, %v7180_v23  ;;  %6851 = vmatmul.mubr.msk.bf16.gmra.mrb[8].mxu0 %vm361_vm1, %v7179_v22  ;;  %v6102_v22 = vcombine.low %v1534_v2, %v1537_v14  ;;  %v741_v23 = vrot.slane %v739_v11, 4  ;;  %v772_v50 = vshll.u32 %v649_v36, 16  ;;  %v1439_v51 = vld [vmem:[%s7273_s23 + $0x1c] sm:$0xf]  ;;  %v765_v55 = vrot.slane %v763_v45, 4 }
  0x25   : > { %6854 = vmatprep.mubr.msk.bf16.mxu0 %vm361_vm1, %v7182_v25  ;;  %v748_v25 = vshll.u32 %v646_v5, 16  ;;  %v737_v32 = vsel %vm7345_vm7, %v732_v20, %v736_v0  ;;  %v1544_v52 = vsel %vm7338_vm6, %v1542_v43, %v1543_v44  ;;  %v776_v56 = vshrl.u32 %v649_v36, 16  ;;  %v1440_v58 = vld [vmem:[%s7273_s23 + $0x20] sm:$0x1]  ;;  %v651_v63 = vld [vmem:[%s7273_s23 + $0x30] sm:$0xf] }
  0x26   : > { %v6054_v37 = vcombine.low %v727_v27, %v737_v32  ;;  %v745_v38 = vor.u32 %v744_v28, %v741_v23  ;;  %v782_v57 = vshll.u32 %v650_v41, 16  ;;  %v6103_v61 = vcombine.low %v1541_v42, %v1544_v52  ;;  %v652_v4 = vld [vmem:[%s7273_s23 + $0x34] sm:$0xf]  ;;  %v653_v11 = vld [vmem:[%s7273_s23 + $0x38] sm:$0x1] }
  0x27   : > { %v750_v33 = vrot.slane %v748_v25, 5  ;;  %v768_v62 = vrot.slane %v766_v49, 5  ;;  %v774_v0 = vrot.slane %v772_v50, 5  ;;  %v778_v1 = vrot.slane %v776_v56, 4  ;;  %v1441_v17 = vld [vmem:[%s7273_s23 + $0x24] sm:$0xe] }
  0x28   : > { %v746_v47 = vrot.slane %v745_v38, 4  ;;  %v784_v2 = vrot.slane %v782_v57, 5  ;;  %v6087_v3 = vrot.slane %v1438_v46, 9  ;;  %v1547_v7 = vrot.slane %v1439_v51, 5  ;;  %v1442_v26 = vld [vmem:[%s7273_s23 + $0x28] sm:$0xf] }
  0x29   : > { %v755_v48 = vor.u32 %v754_v39, %v750_v33  ;;  %v1550_v8 = vrot.slane %v1440_v58, 5  ;;  %v779_v10 = vor.u32 %v778_v1, %v774_v0  ;;  %v790_v13 = vshll.u32 %v651_v63, 16  ;;  %v1443_v29 = vld [vmem:[%s7273_s23 + $0x2c] sm:$0x1]  ;;  %v654_v30 = vld [vmem:[%s7273_s23 + $0x3c] sm:$0xf] }
  0x2a   : > { %v751_v59 = vsel %vm7345_vm7, %v746_v47, %v750_v33  ;;  %v1549_v15 = vrot.slane %v1547_v7, 4  ;;  %v796_v16 = vshll.u32 %v652_v4, 16  ;;  %v800_v25 = vshrl.u32 %v652_v4, 16  ;;  %v655_v35 = vld [vmem:[%s7273_s23 + $0x40] sm:$0xf] }
  0x2b   : > { %6871 = vmatmul.mubr.msk.bf16.gmra.mrb[12].mxu1 %vm361_vm1, %v7181_v60  ;;  %v756_v60 = vrot.slane %v755_v48, 4  ;;  %v780_v20 = vrot.slane %v779_v10, 4  ;;  %v792_v23 = vrot.slane %v790_v13, 5  ;;  %v806_v28 = vshll.u32 %v653_v11, 16  ;;  %v1444_v45 = vld [vmem:[%s7273_s23 + $0x30] sm:$0xe] }
  0x2c   : > { %6876 = vmatprep.mubr.msk.bf16.mxu1 %vm361_vm1, %v6053_v12  ;;  %6855 = vmatmul.mubr.msk.bf16.gmra.mrb[12].mxu0 %vm361_vm1, %v7183_v6  ;;  %v769_v6 = vor.u32 %v768_v62, %v765_v55  ;;  %v787_v12 = vshrl.u32 %v651_v63, 16  ;;  %v798_v27 = vrot.slane %v796_v16, 5  ;;  %v802_v34 = vrot.slane %v800_v25, 4  ;;  %v1445_v50 = vld [vmem:[%s7273_s23 + $0x34] sm:$0xf] }
  0x2d   : > { %6910 = vmatprep.mubr.msk.bf16.mxu0 %vm361_vm1, %v6102_v22  ;;  %v761_v5 = vsel %vm7345_vm7, %v756_v60, %v760_v40  ;;  %v785_v31 = vsel %vm7345_vm7, %v780_v20, %v784_v2  ;;  %v6088_v38 = vrot.slane %v1441_v17, 9  ;;  %v1554_v39 = vrot.slane %v1442_v26, 5  ;;  %v656_v40 = vld [vmem:[%s7273_s23 + $0x44] sm:$0x1]  ;;  %v1446_v57 = vld [vmem:[%s7273_s23 + $0x38] sm:$0x1] }
  0x2e   : > { %v6055_v9 = vcombine.low %v751_v59, %v761_v5  ;;  %v770_v14 = vrot.slane %v769_v6, 4  ;;  %v789_v22 = vrot.slane %v787_v12, 4  ;;  %v803_v42 = vor.u32 %v802_v34, %v798_v27  ;;  %v657_v62 = vld [vmem:[%s7273_s23 + $0x48] sm:$0xf]  ;;  %v659_v10 = vld [vmem:[%s7273_s23 + $0x50] sm:$0x1] }
  0x2f   : > { %v1557_v43 = vrot.slane %v1443_v29, 5  ;;  %v811_v44 = vshrl.u32 %v654_v30, 16  ;;  %v1555_v46 = vsel %vm7338_vm6, %v6088_v38, %v1554_v39  ;;  %v1556_v47 = vrot.slane %v1554_v39, 4  ;;  %v1447_v16 = vld [vmem:[%s7273_s23 + $0x3c] sm:$0xe] }
  0x30   : > { %v793_v33 = vor.u32 %v792_v23, %v789_v22  ;;  %v814_v48 = vshll.u32 %v654_v30, 16  ;;  %v820_v49 = vshll.u32 %v655_v35, 16  ;;  %v804_v52 = vrot.slane %v803_v42, 4  ;;  %v1448_v25 = vld [vmem:[%s7273_s23 + $0x40] sm:$0xf] }
  0x31   : > { %v813_v55 = vrot.slane %v811_v44, 4  ;;  %v824_v56 = vshrl.u32 %v655_v35, 16  ;;  %v1558_v58 = vsel %vm7338_vm6, %v1556_v47, %v1557_v43  ;;  %v6089_v2 = vrot.slane %v1444_v45, 9  ;;  %v660_v29 = vld [vmem:[%s7273_s23 + $0x54] sm:$0xf] }
  0x32   : > { %v794_v41 = vrot.slane %v793_v33, 4  ;;  %v816_v59 = vrot.slane %v814_v48, 5  ;;  %v822_v60 = vrot.slane %v820_v49, 5  ;;  %v835_v11 = vshrl.u32 %v657_v62, 16  ;;  %v661_v34 = vld [vmem:[%s7273_s23 + $0x58] sm:$0xf] }
  0x33   : > { %6877 = vmatmul.mubr.msk.bf16.vlgmr.msra.gmra.mrb[16].mxu1 %vm361_vm1, %v6054_v37  ;;  %v808_v37 = vrot.slane %v806_v28, 5  ;;  %v826_v1 = vrot.slane %v824_v56, 4  ;;  %v838_v12 = vshll.u32 %v657_v62, 16  ;;  %v1449_v28 = vld [vmem:[%s7273_s23 + $0x44] sm:$0x1]  ;;  %v1568_v38 = vrot.slane %v1448_v25, 5 }
  0x34   : > { %6943 = vmatpush3.bf16.msra.mxu1 %v7310_v19  ;;  %6911 = vmatmul.mubr.msk.bf16.vlgmr.msra.gmra.mrb[16].mxu0 %vm361_vm1, %v6103_v61  ;;  %v1548_v19 = vsel %vm7338_vm6, %v6087_v3, %v1547_v7  ;;  %v799_v51 = vsel %vm7345_vm7, %v794_v41, %v798_v27  ;;  %v830_v61 = vshll.u32 %v656_v40, 16  ;;  %v658_v3 = vld [vmem:[%s7273_s23 + $0x4c] sm:$0xf]  ;;  %v817_v5 = vor.u32 %v816_v59, %v813_v55  ;;  %v662_v39 = vld [vmem:[%s7273_s23 + $0x5c] sm:$0x1] }
  0x35   : > { %7154 = vmatprep.subr.msk.bf16.mxu1 %vm410_vm0, %v7306_v18  ;;  %6977 = vmatpush3.bf16.msra.mxu0 %v7315_v21  ;;  %v775_v18 = vsel %vm7345_vm7, %v770_v14, %v774_v0  ;;  %v1551_v21 = vsel %vm7338_vm6, %v1549_v15, %v1550_v8  ;;  %v809_v63 = vsel %vm7345_vm7, %v804_v52, %v808_v37  ;;  %v1561_v7 = vrot.slane %v1445_v50, 5  ;;  %v1450_v44 = vld [vmem:[%s7273_s23 + $0x48] sm:$0xe]  ;;  %v1451_v49 = vld [vmem:[%s7273_s23 + $0x4c] sm:$0xf] }
  0x36   : > { %6880 = vmatprep.mubr.msk.bf16.mxu1 %vm361_vm1, %v6055_v9  ;;  %v6104_v32 = vcombine.low %v1548_v19, %v1551_v21  ;;  %v6056_v36 = vcombine.low %v775_v18, %v785_v31  ;;  %v6105_v0 = vcombine.low %v1555_v46, %v1558_v58  ;;  %v6057_v4 = vcombine.low %v799_v51, %v809_v63  ;;  %v1452_v56 = vld [vmem:[%s7273_s23 + $0x50] sm:$0x1] }
  0x37   : > { %v832_v6 = vrot.slane %v830_v61, 5  ;;  %v827_v8 = vor.u32 %v826_v1, %v822_v60  ;;  %v1564_v9 = vrot.slane %v1446_v57, 5  ;;  %v818_v13 = vrot.slane %v817_v5, 4  ;;  %v663_v61 = vld [vmem:[%s7273_s23 + $0x60] sm:$0xf] }
  0x38   : > { %6914 = vmatprep.mubr.msk.bf16.mxu0 %vm361_vm1, %v6104_v32  ;;  %v1562_v14 = vsel %vm7338_vm6, %v6089_v2, %v1561_v7  ;;  %v1563_v19 = vrot.slane %v1561_v7, 4  ;;  %v844_v15 = vshll.u32 %v658_v3, 16  ;;  %v837_v20 = vrot.slane %v835_v11, 4  ;;  %v664_v2 = vld [vmem:[%s7273_s23 + $0x64] sm:$0xf] }
  0x39   : > { %v828_v17 = vrot.slane %v827_v8, 4  ;;  %v840_v22 = vrot.slane %v838_v12, 5  ;;  %v848_v23 = vshrl.u32 %v658_v3, 16  ;;  %v823_v26 = vsel %vm7345_vm7, %v818_v13, %v822_v60 }
  0x3a   : > { %v1565_v18 = vsel %vm7338_vm6, %v1563_v19, %v1564_v9  ;;  %v846_v21 = vrot.slane %v844_v15, 5  ;;  %v854_v27 = vshll.u32 %v659_v10, 16  ;;  %v6090_v37 = vrot.slane %v1447_v16, 9  ;;  %v665_v9 = vld [vmem:[%s7273_s23 + $0x68] sm:$0x1] }
  0x3b   : > { %6881 = vmatmul.mubr.msk.bf16.gmra.mrb[20].mxu1 %vm361_vm1, %v6056_v36  ;;  %v833_v30 = vsel %vm7345_vm7, %v828_v17, %v832_v6  ;;  %v6106_v31 = vcombine.low %v1562_v14, %v1565_v18  ;;  %v841_v32 = vor.u32 %v840_v22, %v837_v20  ;;  %v850_v33 = vrot.slane %v848_v23, 4  ;;  %v1453_v15 = vld [vmem:[%s7273_s23 + $0x54] sm:$0xe]  ;;  %v1454_v23 = vld [vmem:[%s7273_s23 + $0x58] sm:$0xf] }
  0x3c   : > { %6915 = vmatmul.mubr.msk.bf16.gmra.mrb[20].mxu0 %vm361_vm1, %v6105_v0  ;;  %6884 = vmatprep.mubr.msk.bf16.mxu1 %vm361_vm1, %v6057_v4  ;;  %v6058_v35 = vcombine.low %v823_v26, %v833_v30  ;;  %v856_v36 = vrot.slane %v854_v27, 5  ;;  %v1571_v42 = vrot.slane %v1449_v28, 5  ;;  %v859_v43 = vshrl.u32 %v660_v29, 16  ;;  %v1455_v27 = vld [vmem:[%s7273_s23 + $0x5c] sm:$0x1] }
  0x3d   : > { %6918 = vmatprep.mubr.msk.bf16.mxu0 %vm361_vm1, %v6106_v31  ;;  %v842_v40 = vrot.slane %v841_v32, 4  ;;  %v851_v41 = vor.u32 %v850_v33, %v846_v21  ;;  %v1569_v45 = vsel %vm7338_vm6, %v6090_v37, %v1568_v38  ;;  %v1570_v46 = vrot.slane %v1568_v38, 4  ;;  %v666_v28 = vld [vmem:[%s7273_s23 + $0x6c] sm:$0xf]  ;;  %v667_v33 = vld [vmem:[%s7273_s23 + $0x70] sm:$0xf] }
  0x3e   : > { %v862_v47 = vshll.u32 %v660_v29, 16  ;;  %v868_v48 = vshll.u32 %v661_v34, 16  ;;  %v861_v52 = vrot.slane %v859_v43, 4  ;;  %v872_v55 = vshrl.u32 %v661_v34, 16  ;;  %v668_v38 = vld [vmem:[%s7273_s23 + $0x74] sm:$0x1] }
  0x3f   : > { %v847_v50 = vsel %vm7345_vm7, %v842_v40, %v846_v21  ;;  %v852_v51 = vrot.slane %v851_v41, 4  ;;  %v1572_v57 = vsel %vm7338_vm6, %v1570_v46, %v1571_v42  ;;  %v878_v60 = vshll.u32 %v662_v39, 16  ;;  %v1456_v43 = vld [vmem:[%s7273_s23 + $0x60] sm:$0xe] }
  0x40   : > { %v864_v58 = vrot.slane %v862_v47, 5  ;;  %v870_v59 = vrot.slane %v868_v48, 5  ;;  %v6107_v63 = vcombine.low %v1569_v45, %v1572_v57  ;;  %v874_v0 = vrot.slane %v872_v55, 4  ;;  %v1457_v48 = vld [vmem:[%s7273_s23 + $0x64] sm:$0xf] }
  0x41   : > { %v857_v62 = vsel %vm7345_vm7, %v852_v51, %v856_v36  ;;  %v6091_v1 = vrot.slane %v1450_v44, 9  ;;  %v880_v5 = vrot.slane %v878_v60, 5  ;;  %v1575_v6 = vrot.slane %v1451_v49, 5  ;;  %v1458_v55 = vld [vmem:[%s7273_s23 + $0x68] sm:$0x1] }
  0x42   : > { %v6059_v3 = vcombine.low %v847_v50, %v857_v62  ;;  %v865_v4 = vor.u32 %v864_v58, %v861_v52  ;;  %v875_v7 = vor.u32 %v874_v0, %v870_v59  ;;  %v1578_v8 = vrot.slane %v1452_v56, 5  ;;  %v669_v60 = vld [vmem:[%s7273_s23 + $0x78] sm:$0xf] }
  0x43   : > { %6885 = vmatmul.mubr.msk.bf16.gmra.mrb[24].mxu1 %vm361_vm1, %v6058_v35  ;;  %v883_v10 = vshrl.u32 %v663_v61, 16  ;;  %v886_v11 = vshll.u32 %v663_v61, 16  ;;  %v1576_v13 = vsel %vm7338_vm6, %v6091_v1, %v1575_v6  ;;  %v1577_v14 = vrot.slane %v1575_v6, 4  ;;  %v670_v1 = vld [vmem:[%s7273_s23 + $0x7c] sm:$0xf] }
  0x44   : > { %6919 = vmatmul.mubr.msk.bf16.gmra.mrb[24].mxu0 %vm361_vm1, %v6107_v63  ;;  %6888 = vmatprep.mubr.msk.bf16.mxu1 %vm361_vm1, %v6059_v3  ;;  %v866_v12 = vrot.slane %v865_v4, 4  ;;  %v892_v19 = vshll.u32 %v664_v2, 16  ;;  %v876_v16 = vrot.slane %v875_v7, 4  ;;  %v896_v22 = vshrl.u32 %v664_v2, 16 }
  0x45   : > { %v885_v17 = vrot.slane %v883_v10, 4  ;;  %v888_v20 = vrot.slane %v886_v11, 5  ;;  %v1579_v26 = vsel %vm7338_vm6, %v1577_v14, %v1578_v8  ;;  %v902_v21 = vshll.u32 %v665_v9, 16  ;;  %v671_v8 = vld [vmem:[%s7273_s23 + $0x80] sm:$0x1] }
  0x46   : > { %v871_v25 = vsel %vm7345_vm7, %v866_v12, %v870_v59  ;;  %v894_v18 = vrot.slane %v892_v19, 5  ;;  %v881_v29 = vsel %vm7345_vm7, %v876_v16, %v880_v5  ;;  %v6108_v30 = vcombine.low %v1576_v13, %v1579_v26  ;;  %v1459_v19 = vld [vmem:[%s7273_s23 + $0x6c] sm:$0xe] }
  0x47   : > { %v889_v31 = vor.u32 %v888_v20, %v885_v17  ;;  %v898_v32 = vrot.slane %v896_v22, 4  ;;  %v6060_v34 = vcombine.low %v871_v25, %v881_v29  ;;  %v904_v35 = vrot.slane %v902_v21, 5  ;;  %v1460_v22 = vld [vmem:[%s7273_s23 + $0x70] sm:$0xf]  ;;  %v1461_v21 = vld [vmem:[%s7273_s23 + $0x74] sm:$0x1] }
  0x48   : > { %v6092_v36 = vrot.slane %v1453_v15, 9  ;;  %v1582_v37 = vrot.slane %v1454_v23, 5  ;;  %6922 = vmatprep.mubr.msk.bf16.mxu0 %vm361_vm1, %v6108_v30  ;;  %v1585_v41 = vrot.slane %v1455_v27, 5  ;;  %v907_v42 = vshrl.u32 %v666_v28, 16  ;;  %v672_v27 = vld [vmem:[%s7273_s23 + $0x84] sm:$0xf] }
  0x49   : > { %v890_v39 = vrot.slane %v889_v31, 4  ;;  %v899_v40 = vor.u32 %v898_v32, %v894_v18  ;;  %v910_v46 = vshll.u32 %v666_v28, 16  ;;  %v916_v47 = vshll.u32 %v667_v33, 16  ;;  %v673_v32 = vld [vmem:[%s7273_s23 + $0x88] sm:$0xf] }
  0x4a   : > { %v1583_v44 = vsel %vm7338_vm6, %v6092_v36, %v1582_v37  ;;  %v1584_v45 = vrot.slane %v1582_v37, 4  ;;  %v909_v51 = vrot.slane %v907_v42, 4  ;;  %v920_v52 = vshrl.u32 %v667_v33, 16  ;;  %v674_v37 = vld [vmem:[%s7273_s23 + $0x8c] sm:$0x1] }
  0x4b   : > { %6889 = vmatmul.mubr.msk.bf16.gmra.mrb[28].mxu1 %vm361_vm1, %v6060_v34  ;;  %v895_v49 = vsel %vm7345_vm7, %v890_v39, %v894_v18  ;;  %v900_v50 = vrot.slane %v899_v40, 4  ;;  %v912_v57 = vrot.slane %v910_v46, 5  ;;  %v918_v58 = vrot.slane %v916_v47, 5  ;;  %v1462_v42 = vld [vmem:[%s7273_s23 + $0x78] sm:$0xe] }
  0x4c   : > { %v1586_v56 = vsel %vm7338_vm6, %v1584_v45, %v1585_v41  ;;  %v926_v59 = vshll.u32 %v668_v38, 16  ;;  %v922_v63 = vrot.slane %v920_v52, 4  ;;  %v6093_v0 = vrot.slane %v1456_v43, 9  ;;  %v1463_v47 = vld [vmem:[%s7273_s23 + $0x7c] sm:$0xf] }
  0x4d   : > { %v905_v61 = vsel %vm7345_vm7, %v900_v50, %v904_v35  ;;  %v6109_v62 = vcombine.low %v1583_v44, %v1586_v56  ;;  %v913_v3 = vor.u32 %v912_v57, %v909_v51  ;;  %v1589_v5 = vrot.slane %v1457_v48, 5  ;;  %v1464_v52 = vld [vmem:[%s7273_s23 + $0x80] sm:$0x1] }
  0x4e   : > { %v6061_v2 = vcombine.low %v895_v49, %v905_v61  ;;  %v928_v4 = vrot.slane %v926_v59, 5  ;;  %v923_v6 = vor.u32 %v922_v63, %v918_v58  ;;  %v1592_v7 = vrot.slane %v1458_v55, 5  ;;  %v675_v59 = vld [vmem:[%s7273_s23 + $0x90] sm:$0xf] }
  0x4f   : > { %6923 = vmatmul.mubr.msk.bf16.gmra.mrb[28].mxu0 %vm361_vm1, %v6109_v62  ;;  %v931_v9 = vshrl.u32 %v669_v60, 16  ;;  %v934_v10 = vshll.u32 %v669_v60, 16  ;;  %v914_v11 = vrot.slane %v913_v3, 4  ;;  %v1590_v12 = vsel %vm7338_vm6, %v6093_v0, %v1589_v5  ;;  %v676_v0 = vld [vmem:[%s7273_s23 + $0x94] sm:$0xf] }
  0x50   : > { %6892 = vmatprep.mubr.msk.bf16.mxu1 %vm361_vm1, %v6061_v2  ;;  %v1591_v13 = vrot.slane %v1589_v5, 4  ;;  %v940_v14 = vshll.u32 %v670_v1, 16  ;;  %v924_v15 = vrot.slane %v923_v6, 4  ;;  %v944_v20 = vshrl.u32 %v670_v1, 16  ;;  %v677_v5 = vld [vmem:[%s7273_s23 + $0x98] sm:$0x1] }
  0x51   : > { %v933_v16 = vrot.slane %v931_v9, 4  ;;  %v936_v17 = vrot.slane %v934_v10, 5  ;;  %v919_v23 = vsel %vm7345_vm7, %v914_v11, %v918_v58  ;;  %v950_v18 = vshll.u32 %v671_v8, 16  ;;  %v1465_v10 = vld [vmem:[%s7273_s23 + $0x84] sm:$0xe] }
  0x52   : > { %v1593_v25 = vsel %vm7338_vm6, %v1591_v13, %v1592_v7  ;;  %v942_v26 = vrot.slane %v940_v14, 5  ;;  %v929_v28 = vsel %vm7345_vm7, %v924_v15, %v928_v4  ;;  %v946_v31 = vrot.slane %v944_v20, 4  ;;  %v1466_v11 = vld [vmem:[%s7273_s23 + $0x88] sm:$0xf]  ;;  %v1467_v15 = vld [vmem:[%s7273_s23 + $0x8c] sm:$0x1] }
  0x53   : > { %v6110_v29 = vcombine.low %v1590_v12, %v1593_v25  ;;  %v937_v30 = vor.u32 %v936_v17, %v933_v16  ;;  %v6062_v33 = vcombine.low %v919_v23, %v929_v28  ;;  %v952_v34 = vrot.slane %v950_v18, 5 }
  0x54   : > { %v6094_v35 = vrot.slane %v1459_v19, 9  ;;  %v1596_v36 = vrot.slane %v1460_v22, 5  ;;  %v947_v39 = vor.u32 %v946_v31, %v942_v26  ;;  %v1599_v40 = vrot.slane %v1461_v21, 5  ;;  %v678_v21 = vld [vmem:[%s7273_s23 + $0x9c] sm:$0xf] }
  0x55   : > { %6926 = vmatprep.mubr.msk.bf16.mxu0 %vm361_vm1, %v6110_v29  ;;  %v938_v38 = vrot.slane %v937_v30, 4  ;;  %v955_v41 = vshrl.u32 %v672_v27, 16  ;;  %6893 = vmatmul.mubr.msk.bf16.gmra.mrb[32].mxu1 %vm361_vm1, %v6062_v33  ;;  %v958_v45 = vshll.u32 %v672_v27, 16  ;;  %v964_v46 = vshll.u32 %v673_v32, 16  ;;  %v679_v31 = vld [vmem:[%s7273_s23 + $0xa0] sm:$0xf] }
  0x56   : > { %v1597_v43 = vsel %vm7338_vm6, %v6094_v35, %v1596_v36  ;;  %v1598_v44 = vrot.slane %v1596_v36, 4  ;;  %v948_v49 = vrot.slane %v947_v39, 4  ;;  %v968_v51 = vshrl.u32 %v673_v32, 16  ;;  %v680_v32 = vld [vmem:[%s7273_s23 + $0xa4] sm:$0x1] }
  0x57   : > { %v943_v48 = vsel %vm7345_vm7, %v938_v38, %v942_v26  ;;  %v957_v50 = vrot.slane %v955_v41, 4  ;;  %v960_v56 = vrot.slane %v958_v45, 5  ;;  %v966_v57 = vrot.slane %v964_v46, 5 }
  0x58   : > { %v1600_v55 = vsel %vm7338_vm6, %v1598_v44, %v1599_v40  ;;  %v974_v58 = vshll.u32 %v674_v37, 16  ;;  %v953_v60 = vsel %vm7345_vm7, %v948_v49, %v952_v34  ;;  %v970_v62 = vrot.slane %v968_v51, 4  ;;  %v1468_v37 = vld [vmem:[%s7273_s23 + $0x90] sm:$0xe] }
  0x59   : > { %v6111_v61 = vcombine.low %v1597_v43, %v1600_v55  ;;  %v6095_v63 = vrot.slane %v1462_v42, 9  ;;  %v6063_v1 = vcombine.low %v943_v48, %v953_v60  ;;  %v961_v2 = vor.u32 %v960_v56, %v957_v50  ;;  %v1469_v42 = vld [vmem:[%s7273_s23 + $0x94] sm:$0xf] }
  0x5a   : > { %v976_v3 = vrot.slane %v974_v58, 5  ;;  %v1603_v4 = vrot.slane %v1463_v47, 5  ;;  %v971_v6 = vor.u32 %v970_v62, %v966_v57  ;;  %v1606_v7 = vrot.slane %v1464_v52, 5  ;;  %v1470_v47 = vld [vmem:[%s7273_s23 + $0x98] sm:$0x1] }
  0x5b   : > { %6927 = vmatmul.mubr.msk.bf16.gmra.mrb[32].mxu0 %vm361_vm1, %v6111_v61  ;;  %v979_v8 = vshrl.u32 %v675_v59, 16  ;;  %v982_v9 = vshll.u32 %v675_v59, 16  ;;  %6896 = vmatprep.mubr.msk.bf16.mxu1 %vm361_vm1, %v6063_v1  ;;  %v962_v12 = vrot.slane %v961_v2, 4  ;;  %v988_v19 = vshll.u32 %v676_v0, 16  ;;  %v681_v52 = vld [vmem:[%s7273_s23 + $0xa8] sm:$0xf] }
  0x5c   : > { %v1604_v13 = vsel %vm7338_vm6, %v6095_v63, %v1603_v4  ;;  %v1605_v14 = vrot.slane %v1603_v4, 4  ;;  %v972_v16 = vrot.slane %v971_v6, 4  ;;  %v992_v22 = vshrl.u32 %v676_v0, 16  ;;  %v682_v59 = vld [vmem:[%s7273_s23 + $0xac] sm:$0xf] }
  0x5d   : > { %v981_v17 = vrot.slane %v979_v8, 4  ;;  %v984_v20 = vrot.slane %v982_v9, 5  ;;  %v967_v23 = vsel %vm7345_vm7, %v962_v12, %v966_v57  ;;  %v990_v26 = vrot.slane %v988_v19, 5  ;;  %v683_v4 = vld [vmem:[%s7273_s23 + $0xb0] sm:$0x1] }
  0x5e   : > { %v1607_v25 = vsel %vm7338_vm6, %v1605_v14, %v1606_v7  ;;  %v998_v18 = vshll.u32 %v677_v5, 16  ;;  %v977_v27 = vsel %vm7345_vm7, %v972_v16, %v976_v3  ;;  %v994_v30 = vrot.slane %v992_v22, 4  ;;  %v7558_v5 = vld [vmem:[%s9058_s1 + $0x6] sm:$0x1] }
  0x5f   : > { %v6112_v28 = vcombine.low %v1604_v13, %v1607_v25  ;;  %v985_v29 = vor.u32 %v984_v20, %v981_v17  ;;  %v6064_v33 = vcombine.low %v967_v23, %v977_v27  ;;  %v6096_v35 = vrot.slane %v1465_v10, 9  ;;  %v1471_v10 = vld [vmem:[%s7273_s23 + $0x9c] sm:$0xe]  ;;  %7155 = vmatprep.subr.msk.bf16.mxu0 %vm410_vm0, %v7558_v5 }
  0x60   : > { %v1000_v34 = vrot.slane %v998_v18, 5  ;;  %v1610_v36 = vrot.slane %v1466_v11, 5  ;;  %v995_v39 = vor.u32 %v994_v30, %v990_v26  ;;  %v1613_v40 = vrot.slane %v1467_v15, 5  ;;  %v1472_v11 = vld [vmem:[%s7273_s23 + $0xa0] sm:$0xf] }
  0x61   : > { %6930 = vmatprep.mubr.msk.bf16.mxu0 %vm361_vm1, %v6112_v28  ;;  %v986_v38 = vrot.slane %v985_v29, 4  ;;  %v1003_v41 = vshrl.u32 %v678_v21, 16  ;;  %6897 = vmatmul.mubr.msk.bf16.gmra.mrb[36].mxu1 %vm361_vm1, %v6064_v33  ;;  %v1006_v45 = vshll.u32 %v678_v21, 16  ;;  %v1012_v46 = vshll.u32 %v679_v31, 16  ;;  %v1473_v15 = vld [vmem:[%s7273_s23 + $0xa4] sm:$0x1] }
  0x62   : > { %v1611_v43 = vsel %vm7338_vm6, %v6096_v35, %v1610_v36  ;;  %v1612_v44 = vrot.slane %v1610_v36, 4  ;;  %v996_v49 = vrot.slane %v995_v39, 4  ;;  %v1016_v51 = vshrl.u32 %v679_v31, 16  ;;  %v684_v21 = vld [vmem:[%s7273_s23 + $0xb4] sm:$0xf] }
  0x63   : > { %v991_v48 = vsel %vm7345_vm7, %v986_v38, %v990_v26  ;;  %v1005_v50 = vrot.slane %v1003_v41, 4  ;;  %v1008_v56 = vrot.slane %v1006_v45, 5  ;;  %v1014_v57 = vrot.slane %v1012_v46, 5  ;;  %v685_v31 = vld [vmem:[%s7273_s23 + $0xb8] sm:$0xf] }
  0x64   : > { %v1614_v55 = vsel %vm7338_vm6, %v1612_v44, %v1613_v40  ;;  %v1022_v58 = vshll.u32 %v680_v32, 16  ;;  %v1001_v60 = vsel %vm7345_vm7, %v996_v49, %v1000_v34  ;;  %v1018_v62 = vrot.slane %v1016_v51, 4  ;;  %v686_v32 = vld [vmem:[%s7273_s23 + $0xbc] sm:$0x1] }
  0x65   : > { %v6113_v61 = vcombine.low %v1611_v43, %v1614_v55  ;;  %v6097_v63 = vrot.slane %v1468_v37, 9  ;;  %v6065_v0 = vcombine.low %v991_v48, %v1001_v60  ;;  %v1009_v1 = vor.u32 %v1008_v56, %v1005_v50  ;;  %v1474_v37 = vld [vmem:[%s7273_s23 + $0xa8] sm:$0xe]  ;;  %v1477_v48 = vld [vmem:[%s7273_s23 + $0xb4] sm:$0xe] }
  0x66   : > { %v1024_v2 = vrot.slane %v1022_v58, 5  ;;  %v1617_v3 = vrot.slane %v1469_v42, 5  ;;  %v1019_v6 = vor.u32 %v1018_v62, %v1014_v57  ;;  %v1620_v7 = vrot.slane %v1470_v47, 5  ;;  %v1475_v42 = vld [vmem:[%s7273_s23 + $0xac] sm:$0xf] }
  0x67   : > { %6931 = vmatmul.mubr.msk.bf16.gmra.mrb[36].mxu0 %vm361_vm1, %v6113_v61  ;;  %v1027_v8 = vshrl.u32 %v681_v52, 16  ;;  %v1030_v9 = vshll.u32 %v681_v52, 16  ;;  %6900 = vmatprep.mubr.msk.bf16.mxu1 %vm361_vm1, %v6065_v0  ;;  %v1010_v12 = vrot.slane %v1009_v1, 4  ;;  %v1036_v19 = vshll.u32 %v682_v59, 16  ;;  %v1476_v47 = vld [vmem:[%s7273_s23 + $0xb0] sm:$0x1] }
  0x68   : > { %v1618_v13 = vsel %vm7338_vm6, %v6097_v63, %v1617_v3  ;;  %v1619_v14 = vrot.slane %v1617_v3, 4  ;;  %v1020_v16 = vrot.slane %v1019_v6, 4  ;;  %v1040_v22 = vshrl.u32 %v682_v59, 16  ;;  %v1478_v55 = vld [vmem:[%s7273_s23 + $0xb8] sm:$0xf] }
  0x69   : > { %v1029_v17 = vrot.slane %v1027_v8, 4  ;;  %v1032_v20 = vrot.slane %v1030_v9, 5  ;;  %v1015_v23 = vsel %vm7345_vm7, %v1010_v12, %v1014_v57  ;;  %v1038_v26 = vrot.slane %v1036_v19, 5  ;;  %v1479_v60 = vld [vmem:[%s7273_s23 + $0xbc] sm:$0x1] }
  0x6a   : > { %v1621_v25 = vsel %vm7338_vm6, %v1619_v14, %v1620_v7  ;;  %v1046_v18 = vshll.u32 %v683_v4, 16  ;;  %v1025_v27 = vsel %vm7345_vm7, %v1020_v16, %v1024_v2  ;;  %v1042_v30 = vrot.slane %v1040_v22, 4  ;;  %v6199_v6 = vld [vmem:[%s7273_s23 + $0xc] sm:$0xf] }
  0x6b   : > { %v6114_v28 = vcombine.low %v1618_v13, %v1621_v25  ;;  %v1033_v29 = vor.u32 %v1032_v20, %v1029_v17  ;;  %v6066_v33 = vcombine.low %v1015_v23, %v1025_v27  ;;  %v6098_v35 = vrot.slane %v1471_v10, 9  ;;  %v6203_v27 = vld [vmem:[%s7273_s23 + $0x1c] sm:$0xf] }
  0x6c   : > { %v1048_v34 = vrot.slane %v1046_v18, 5  ;;  %v1624_v36 = vrot.slane %v1472_v11, 5  ;;  %v1043_v39 = vor.u32 %v1042_v30, %v1038_v26  ;;  %v1627_v40 = vrot.slane %v1473_v15, 5  ;;  %v6200_v11 = vld [vmem:[%s7273_s23 + $0x10] sm:$0xf] }
  0x6d   : > { %6934 = vmatprep.mubr.msk.bf16.mxu0 %vm361_vm1, %v6114_v28  ;;  %v1034_v38 = vrot.slane %v1033_v29, 4  ;;  %v1051_v41 = vshrl.u32 %v684_v21, 16  ;;  %6901 = vmatmul.mubr.msk.bf16.gmra.mrb[40].mxu1 %vm361_vm1, %v6066_v33  ;;  %v1054_v45 = vshll.u32 %v684_v21, 16  ;;  %v1060_v46 = vshll.u32 %v685_v31, 16  ;;  %v6201_v15 = vld [vmem:[%s7273_s23 + $0x14] sm:$0x1] }
  0x6e   : > { %v1625_v43 = vsel %vm7338_vm6, %v6098_v35, %v1624_v36  ;;  %v1626_v44 = vrot.slane %v1624_v36, 4  ;;  %v1044_v50 = vrot.slane %v1043_v39, 4  ;;  %v1064_v52 = vshrl.u32 %v685_v31, 16  ;;  %v6202_v21 = vld [vmem:[%s7273_s23 + $0x18] sm:$0xf]  ;;  %v7184_v31 = vld [vmem:[%s7273_s23 + $0xc] sm:$0xff]  }
  0x6f   : > { %v1039_v49 = vsel %vm7345_vm7, %v1034_v38, %v1038_v26  ;;  %v1053_v51 = vrot.slane %v1051_v41, 4  ;;  %v1056_v57 = vrot.slane %v1054_v45, 5  ;;  %v1062_v58 = vrot.slane %v1060_v46, 5  ;;  %v6204_v33 = vld [vmem:[%s7273_s23 + $0x20] sm:$0x1] }
  0x70   : > { %v1628_v56 = vsel %vm7338_vm6, %v1626_v44, %v1627_v40  ;;  %v1070_v59 = vshll.u32 %v686_v32, 16  ;;  %v1049_v61 = vsel %vm7345_vm7, %v1044_v50, %v1048_v34  ;;  %v1066_v63 = vrot.slane %v1064_v52, 4 }
  0x71   : > { %v6115_v62 = vcombine.low %v1625_v43, %v1628_v56  ;;  %v6099_v0 = vrot.slane %v1474_v37, 9  ;;  %v6067_v1 = vcombine.low %v1039_v49, %v1049_v61  ;;  %v1057_v2 = vor.u32 %v1056_v57, %v1053_v51 }
  0x72   : > { %v1072_v3 = vrot.slane %v1070_v59, 5  ;;  %v1631_v4 = vrot.slane %v1475_v42, 5  ;;  %v1067_v7 = vor.u32 %v1066_v63, %v1062_v58  ;;  %v1634_v8 = vrot.slane %v1476_v47, 5  ;;  %v6205_v42 = vld [vmem:[%s7273_s23 + $0x24] sm:$0xf] }
  0x73   : > { %6935 = vmatmul.mubr.msk.bf16.gmra.mrb[40].mxu0 %vm361_vm1, %v6115_v62  ;;  %v6100_v9 = vrot.slane %v1477_v48, 9  ;;  %v1638_v10 = vrot.slane %v1478_v55, 5  ;;  %6904 = vmatprep.mubr.msk.bf16.mxu1 %vm361_vm1, %v6067_v1  ;;  %v1058_v12 = vrot.slane %v1057_v2, 4  ;;  %v1641_v19 = vrot.slane %v1479_v60, 5  ;;  %v6206_v47 = vld [vmem:[%s7273_s23 + $0x28] sm:$0xf] }
  0x74   : > { %v1632_v13 = vsel %vm7338_vm6, %v6099_v0, %v1631_v4  ;;  %v1633_v14 = vrot.slane %v1631_v4, 4  ;;  %v1068_v16 = vrot.slane %v1067_v7, 4  ;;  %v2473_v22 = vshrl.u32 %v6199_v6, 16  ;;  %v7186_v60 = vld [vmem:[%s7273_s23 + $0x24] sm:$0xff]   ;;  %v6207_v63 = vld [vmem:[%s7273_s23 + $0x2c] sm:$0x1] }
  0x75   : > { %v1639_v17 = vsel %vm7338_vm6, %v6100_v9, %v1638_v10  ;;  %v1640_v20 = vrot.slane %v1638_v10, 4  ;;  %v1063_v23 = vsel %vm7345_vm7, %v1058_v12, %v1062_v58  ;;  %v2476_v26 = vshll.u32 %v6199_v6, 16  ;;  %v7185_v58 = vld [vmem:[%s7273_s23 + $0x18] sm:$0xff]   ;;  %v6208_v6 = vld [vmem:[%s7273_s23 + $0x30] sm:$0xf] }
  0x76   : > { %v1635_v25 = vsel %vm7338_vm6, %v1633_v14, %v1634_v8  ;;  %v2482_v18 = vshll.u32 %v6200_v11, 16  ;;  %v1073_v28 = vsel %vm7345_vm7, %v1068_v16, %v1072_v3  ;;  %v2475_v32 = vrot.slane %v2473_v22, 4  ;;  %v6209_v14 = vld [vmem:[%s7273_s23 + $0x34] sm:$0xf]  ;;  %v6211_v22 = vld [vmem:[%s7273_s23 + $0x3c] sm:$0xf] }
  0x77   : > { %v6116_v29 = vcombine.low %v1632_v13, %v1635_v25  ;;  %v1642_v30 = vsel %vm7338_vm6, %v1640_v20, %v1641_v19  ;;  %v6068_v34 = vcombine.low %v1063_v23, %v1073_v28  ;;  %v2478_v36 = vrot.slane %v2476_v26, 5 }
  0x78   : > { %v6117_v35 = vcombine.low %v1639_v17, %v1642_v30  ;;  %v2484_v37 = vrot.slane %v2482_v18, 5  ;;  %v2486_v38 = vshrl.u32 %v6200_v11, 16  ;;  %v2492_v39 = vshll.u32 %v6201_v15, 16  ;;  %v6210_v17 = vld [vmem:[%s7273_s23 + $0x38] sm:$0x1] }
  0x79   : > { %6938 = vmatprep.mubr.msk.bf16.mxu0 %vm361_vm1, %v6116_v29  ;;  %v2497_v40 = vshrl.u32 %v6202_v21, 16  ;;  %v2500_v41 = vshll.u32 %v6202_v21, 16  ;;  %6905 = vmatmul.mubr.msk.bf16.gmra.mrb[44].mxu1 %vm361_vm1, %v6068_v34  ;;  %v2479_v43 = vor.u32 %v2478_v36, %v2475_v32  ;;  %v2506_v44 = vshll.u32 %v6203_v27, 16  ;;  %v6212_v30 = vld [vmem:[%s7273_s23 + $0x40] sm:$0xf] }
  0x7a   : > { %v2510_v45 = vshrl.u32 %v6203_v27, 16  ;;  %v2516_v46 = vshll.u32 %v6204_v33, 16  ;;  %6944 = vmatprep.mubr.msk.bf16.mxu1 %vm361_vm1, %v7184_v31  ;;  %v2488_v48 = vrot.slane %v2486_v38, 4  ;;  %v2494_v49 = vrot.slane %v2492_v39, 5  ;;  %v6214_v36 = vld [vmem:[%s7273_s23 + $0x48] sm:$0xf] }
  0x7b   : > { %6939 = vmatmul.mubr.msk.bf16.gmra.mrb[44].mxu0 %vm361_vm1, %v6117_v35  ;;  %v2499_v50 = vrot.slane %v2497_v40, 4  ;;  %v2502_v51 = vrot.slane %v2500_v41, 5  ;;  %v2480_v52 = vrot.slane %v2479_v43, 4  ;;  %v2508_v55 = vrot.slane %v2506_v44, 5  ;;  %v6213_v35 = vld [vmem:[%s7273_s23 + $0x44] sm:$0x1] }
  0x7c   : > { %v2512_v56 = vrot.slane %v2510_v45, 4  ;;  %v2518_v57 = vrot.slane %v2516_v46, 5  ;;  %v2489_v59 = vor.u32 %v2488_v48, %v2484_v37  ;;  %v3976_v62 = vsel %vm410_vm0, %v7558_v5, 0  ;;  %v7187_v40 = vld [vmem:[%s7273_s23 + $0x30] sm:$0xff]   ;;  %v7188_v46 = vld [vmem:[%s7273_s23 + $0x3c] sm:$0xff]  }
  0x7d   : > { %v2503_v61 = vor.u32 %v2502_v51, %v2499_v50  ;;  %v2521_v0 = vshrl.u32 %v6205_v42, 16  ;;  %v2485_v1 = vsel %vm7345_vm7, %v2480_v52, %v2484_v37  ;;  %v2524_v3 = vshll.u32 %v6205_v42, 16 }
  0x7e   : > { %v2513_v2 = vor.u32 %v2512_v56, %v2508_v55  ;;  %v2530_v4 = vshll.u32 %v6206_v47, 16  ;;  %v2490_v7 = vrot.slane %v2489_v59, 4  ;;  %v2534_v10 = vshrl.u32 %v6206_v47, 16  ;;  %v6215_v56 = vld [vmem:[%s7273_s23 + $0x4c] sm:$0xf] }
  0x7f   : > { %v2504_v8 = vrot.slane %v2503_v61, 4  ;;  %v2523_v9 = vrot.slane %v2521_v0, 4  ;;  %v2526_v12 = vrot.slane %v2524_v3, 5  ;;  %v2540_v5 = vshll.u32 %v6207_v63, 16  ;;  %v6216_v0 = vld [vmem:[%s7273_s23 + $0x50] sm:$0x1] }
  0x80   : > { %v2514_v11 = vrot.slane %v2513_v2, 4  ;;  %v2532_v13 = vrot.slane %v2530_v4, 5  ;;  %v2495_v19 = vsel %vm7345_vm7, %v2490_v7, %v2494_v49  ;;  %v2536_v16 = vrot.slane %v2534_v10, 4  ;;  %v6217_v7 = vld [vmem:[%s7273_s23 + $0x54] sm:$0xf] }
  0x81   : > { %v2509_v15 = vsel %vm7345_vm7, %v2504_v8, %v2508_v55  ;;  %v2545_v20 = vshrl.u32 %v6208_v6, 16  ;;  %6945 = vmatmul.mubr.msk.bf16.vlgmr.msra.gmra.mrb[48].mxu1 %vm361_vm1, %v7185_v58  ;;  %v6248_v23 = vcombine.low %v2485_v1, %v2495_v19  ;;  %v2527_v26 = vor.u32 %v2526_v12, %v2523_v9  ;;  %v7189_v9 = vld [vmem:[%s7273_s23 + $0x48] sm:$0xff]  }
  0x82   : > { %v2519_v25 = vsel %vm7345_vm7, %v2514_v11, %v2518_v57  ;;  %v2542_v18 = vrot.slane %v2540_v5, 5  ;;  %7011 = vmatpush3.bf16.msra.mxu1 %v7321_v24  ;;  %6948 = vmatprep.mubr.msk.bf16.mxu1 %vm361_vm1, %v7186_v60  ;;  %v2537_v27 = vor.u32 %v2536_v16, %v2532_v13  ;;  %v2548_v29 = vshll.u32 %v6208_v6, 16  ;;  %v6219_v16 = vld [vmem:[%s7273_s23 + $0x5c] sm:$0x1] }
  0x83   : > { %v6249_v21 = vcombine.low %v2509_v15, %v2519_v25  ;;  %v2547_v28 = vrot.slane %v2545_v20, 4  ;;  %6978 = vmatprep.mubr.msk.bf16.mxu0 %vm361_vm1, %v6248_v23  ;;  %v2528_v31 = vrot.slane %v2527_v26, 4  ;;  %v2554_v32 = vshll.u32 %v6209_v14, 16  ;;  %v7190_v20 = vld [vmem:[%s7273_s23 + $0x54] sm:$0xff]   ;;  %v6220_v26 = vld [vmem:[%s7273_s23 + $0x60] sm:$0xf] }
  0x84   : > { %v2558_v33 = vshrl.u32 %v6209_v14, 16  ;;  %v2564_v34 = vshll.u32 %v6210_v17, 16  ;;  %v2538_v24 = vrot.slane %v2537_v27, 4  ;;  %v2550_v37 = vrot.slane %v2548_v29, 5  ;;  %v6221_v29 = vld [vmem:[%s7273_s23 + $0x64] sm:$0xf] }
  0x85   : > { %6979 = vmatmul.mubr.msk.bf16.vlgmr.msra.gmra.mrb[48].mxu0 %vm361_vm1, %v6249_v21  ;;  %v2569_v38 = vshrl.u32 %v6211_v22, 16  ;;  %v2572_v39 = vshll.u32 %v6211_v22, 16  ;;  %v2533_v41 = vsel %vm7345_vm7, %v2528_v31, %v2532_v13  ;;  %v2556_v42 = vrot.slane %v2554_v32, 5  ;;  %v6218_v13 = vld [vmem:[%s7273_s23 + $0x58] sm:$0xf] }
  0x86   : > { %7045 = vmatpush3.bf16.msra.mxu0 %v3976_v62  ;;  %v2560_v43 = vrot.slane %v2558_v33, 4  ;;  %v2566_v44 = vrot.slane %v2564_v34, 5  ;;  %v2543_v45 = vsel %vm7345_vm7, %v2538_v24, %v2542_v18  ;;  %v2551_v47 = vor.u32 %v2550_v37, %v2547_v28 }
  0x87   : > { %v2571_v48 = vrot.slane %v2569_v38, 4  ;;  %v2574_v49 = vrot.slane %v2572_v39, 5  ;;  %v6250_v50 = vcombine.low %v2533_v41, %v2543_v45  ;;  %v2578_v52 = vshll.u32 %v6212_v30, 16 }
  0x88   : > { %v2561_v51 = vor.u32 %v2560_v43, %v2556_v42  ;;  %v2582_v55 = vshrl.u32 %v6212_v30, 16  ;;  %v2552_v57 = vrot.slane %v2551_v47, 4  ;;  %v2588_v59 = vshll.u32 %v6213_v35, 16  ;;  %v6222_v43 = vld [vmem:[%s7273_s23 + $0x68] sm:$0x1] }
  0x89   : > { %v2575_v58 = vor.u32 %v2574_v49, %v2571_v48  ;;  %v2593_v60 = vshrl.u32 %v6214_v36, 16  ;;  %6949 = vmatmul.mubr.msk.bf16.gmra.mrb[52].mxu1 %vm361_vm1, %v7187_v40  ;;  %6982 = vmatprep.mubr.msk.bf16.mxu0 %vm361_vm1, %v6250_v50  ;;  %v2580_v62 = vrot.slane %v2578_v52, 5  ;;  %v2596_v1 = vshll.u32 %v6214_v36, 16  ;;  %v6223_v50 = vld [vmem:[%s7273_s23 + $0x6c] sm:$0xf] }
  0x8a   : > { %v2562_v61 = vrot.slane %v2561_v51, 4  ;;  %v2584_v63 = vrot.slane %v2582_v55, 4  ;;  %6952 = vmatprep.mubr.msk.bf16.mxu1 %vm361_vm1, %v7188_v46  ;;  %v2557_v2 = vsel %vm7345_vm7, %v2552_v57, %v2556_v42  ;;  %v2590_v4 = vrot.slane %v2588_v59, 5  ;;  %v6224_v57 = vld [vmem:[%s7273_s23 + $0x70] sm:$0xf]  ;;  %v7191_v59 = vld [vmem:[%s7273_s23 + $0x60] sm:$0xff]  }
  0x8b   : > { %v2576_v3 = vrot.slane %v2575_v58, 4  ;;  %v2595_v6 = vrot.slane %v2593_v60, 4  ;;  %v2598_v11 = vrot.slane %v2596_v1, 5  ;;  %v2602_v12 = vshll.u32 %v6215_v56, 16 }
  0x8c   : > { %v2567_v8 = vsel %vm7345_vm7, %v2562_v61, %v2566_v44  ;;  %v2585_v10 = vor.u32 %v2584_v63, %v2580_v62  ;;  %v2606_v19 = vshrl.u32 %v6215_v56, 16  ;;  %v2612_v15 = vshll.u32 %v6216_v0, 16  ;;  %v7192_v0 = vld [vmem:[%s7273_s23 + $0x6c] sm:$0xff]  }
  0x8d   : > { %v6251_v5 = vcombine.low %v2557_v2, %v2567_v8  ;;  %v2581_v14 = vsel %vm7345_vm7, %v2576_v3, %v2580_v62  ;;  %v2599_v22 = vor.u32 %v2598_v11, %v2595_v6  ;;  %v2604_v23 = vrot.slane %v2602_v12, 5  ;;  %v6225_v2 = vld [vmem:[%s7273_s23 + $0x74] sm:$0x1]  ;;  %v7695_v11 = vld [vmem:[%s9058_s1 + $0x7] sm:$0x1] }
  0x8e   : > { %v2586_v17 = vrot.slane %v2585_v10, 4  ;;  %v2617_v25 = vshrl.u32 %v6217_v7, 16  ;;  %v2608_v18 = vrot.slane %v2606_v19, 4  ;;  %v2614_v21 = vrot.slane %v2612_v15, 5  ;;  %v6226_v10 = vld [vmem:[%s7273_s23 + $0x78] sm:$0xf]  ;;  %7156 = vmatprep.subr.msk.bf16.mxu1 %vm410_vm0, %v7695_v11 }
  0x8f   : > { %6983 = vmatmul.mubr.msk.bf16.gmra.mrb[52].mxu0 %vm361_vm1, %v6251_v5  ;;  %v2620_v27 = vshll.u32 %v6217_v7, 16  ;;  %v2626_v28 = vshll.u32 %v6218_v13, 16  ;;  %v2600_v31 = vrot.slane %v2599_v22, 4  ;;  %v2630_v33 = vshrl.u32 %v6218_v13, 16  ;;  %v6227_v19 = vld [vmem:[%s7273_s23 + $0x7c] sm:$0xf] }
  0x90   : > { %v2591_v30 = vsel %vm7345_vm7, %v2586_v17, %v2590_v4  ;;  %v2619_v32 = vrot.slane %v2617_v25, 4  ;;  %v2609_v35 = vor.u32 %v2608_v18, %v2604_v23  ;;  %v2636_v39 = vshll.u32 %v6219_v16, 16  ;;  %v6228_v22 = vld [vmem:[%s7273_s23 + $0x80] sm:$0x1] }
  0x91   : > { %v6252_v34 = vcombine.low %v2581_v14, %v2591_v30  ;;  %v2622_v36 = vrot.slane %v2620_v27, 5  ;;  %v2628_v24 = vrot.slane %v2626_v28, 5  ;;  %6953 = vmatmul.mubr.msk.bf16.gmra.mrb[56].mxu1 %vm361_vm1, %v7189_v9  ;;  %v2605_v37 = vsel %vm7345_vm7, %v2600_v31, %v2604_v23 }
  0x92   : > { %v2632_v38 = vrot.slane %v2630_v33, 4  ;;  %v2641_v40 = vshrl.u32 %v6220_v26, 16  ;;  %6956 = vmatprep.mubr.msk.bf16.mxu1 %vm361_vm1, %v7190_v20  ;;  %v2610_v41 = vrot.slane %v2609_v35, 4  ;;  %v2644_v44 = vshll.u32 %v6220_v26, 16  ;;  %v6230_v35 = vld [vmem:[%s7273_s23 + $0x88] sm:$0xf] }
  0x93   : > { %6986 = vmatprep.mubr.msk.bf16.mxu0 %vm361_vm1, %v6252_v34  ;;  %v2623_v42 = vor.u32 %v2622_v36, %v2619_v32  ;;  %v2650_v45 = vshll.u32 %v6221_v29, 16  ;;  %v2638_v47 = vrot.slane %v2636_v39, 5  ;;  %v2654_v49 = vshrl.u32 %v6221_v29, 16  ;;  %v7193_v36 = vld [vmem:[%s7273_s23 + $0x78] sm:$0xff]  }
  0x94   : > { %v2633_v46 = vor.u32 %v2632_v38, %v2628_v24  ;;  %v2643_v48 = vrot.slane %v2641_v40, 4  ;;  %v2615_v51 = vsel %vm7345_vm7, %v2610_v41, %v2614_v21  ;;  %v2646_v55 = vrot.slane %v2644_v44, 5  ;;  %v6229_v21 = vld [vmem:[%s7273_s23 + $0x84] sm:$0xf] }
  0x95   : > { %v2624_v52 = vrot.slane %v2623_v42, 4  ;;  %v2652_v56 = vrot.slane %v2650_v45, 5  ;;  %v6253_v58 = vcombine.low %v2605_v37, %v2615_v51  ;;  %v2656_v61 = vrot.slane %v2654_v49, 4  ;;  %v7194_v37 = vld [vmem:[%s7273_s23 + $0x84] sm:$0xff]  }
  0x96   : > { %v2634_v60 = vrot.slane %v2633_v46, 4  ;;  %v2660_v62 = vshll.u32 %v6222_v43, 16  ;;  %v2647_v1 = vor.u32 %v2646_v55, %v2643_v48  ;;  %v2665_v3 = vshrl.u32 %v6223_v50, 16  ;;  %v6231_v43 = vld [vmem:[%s7273_s23 + $0x8c] sm:$0x1] }
  0x97   : > { %v2629_v63 = vsel %vm7345_vm7, %v2624_v52, %v2628_v24  ;;  %v2668_v4 = vshll.u32 %v6223_v50, 16  ;;  %6987 = vmatmul.mubr.msk.bf16.gmra.mrb[56].mxu0 %vm361_vm1, %v6253_v58  ;;  %v2657_v7 = vor.u32 %v2656_v61, %v2652_v56  ;;  %v2674_v9 = vshll.u32 %v6224_v57, 16  ;;  %v6233_v61 = vld [vmem:[%s7273_s23 + $0x94] sm:$0xf] }
  0x98   : > { %v2639_v6 = vsel %vm7345_vm7, %v2634_v60, %v2638_v47  ;;  %v2662_v8 = vrot.slane %v2660_v62, 5  ;;  %v2648_v13 = vrot.slane %v2647_v1, 4  ;;  %v2667_v5 = vrot.slane %v2665_v3, 4  ;;  %v6234_v62 = vld [vmem:[%s7273_s23 + $0x98] sm:$0x1] }
  0x99   : > { %v6254_v12 = vcombine.low %v2629_v63, %v2639_v6  ;;  %v2670_v14 = vrot.slane %v2668_v4, 5  ;;  %6957 = vmatmul.mubr.msk.bf16.gmra.mrb[60].mxu1 %vm361_vm1, %v7191_v59  ;;  %v2658_v15 = vrot.slane %v2657_v7, 4  ;;  %v2676_v16 = vrot.slane %v2674_v9, 5  ;;  %v7728_v3 = vld [vmem:[%s9058_s1 + $0x8] sm:$0x1]  ;;  %v7195_v9 = vld [vmem:[%s7273_s23 + $0x90] sm:$0xff]  }
  0x9a   : > { %v2678_v17 = vshrl.u32 %v6224_v57, 16  ;;  %v2684_v20 = vshll.u32 %v6225_v2, 16  ;;  %6960 = vmatprep.mubr.msk.bf16.mxu1 %vm361_vm1, %v7192_v0  ;;  %v2653_v23 = vsel %vm7345_vm7, %v2648_v13, %v2652_v56  ;;  %v2689_v26 = vshrl.u32 %v6226_v10, 16  ;;  %v6232_v56 = vld [vmem:[%s7273_s23 + $0x90] sm:$0xf]  ;;  %7157 = vmatprep.subr.msk.bf16.mxu0 %vm410_vm0, %v7728_v3 }
  0x9b   : > { %6990 = vmatprep.mubr.msk.bf16.mxu0 %vm361_vm1, %v6254_v12  ;;  %v2671_v25 = vor.u32 %v2670_v14, %v2667_v5  ;;  %v2692_v18 = vshll.u32 %v6226_v10, 16  ;;  %v2663_v27 = vsel %vm7345_vm7, %v2658_v15, %v2662_v8  ;;  %v2698_v30 = vshll.u32 %v6227_v19, 16  ;;  %v6235_v14 = vld [vmem:[%s7273_s23 + $0x9c] sm:$0xf] }
  0x9c   : > { %v2680_v28 = vrot.slane %v2678_v17, 4  ;;  %v2686_v29 = vrot.slane %v2684_v20, 5  ;;  %v6255_v31 = vcombine.low %v2653_v23, %v2663_v27  ;;  %v2691_v33 = vrot.slane %v2689_v26, 4  ;;  %v7196_v15 = vld [vmem:[%s7273_s23 + $0x9c] sm:$0xff]  }
  0x9d   : > { %v2672_v32 = vrot.slane %v2671_v25, 4  ;;  %v2694_v34 = vrot.slane %v2692_v18, 5  ;;  %v2700_v38 = vrot.slane %v2698_v30, 5  ;;  %v2702_v39 = vshrl.u32 %v6227_v19, 16 }
  0x9e   : > { %v2681_v24 = vor.u32 %v2680_v28, %v2676_v16  ;;  %v2708_v40 = vshll.u32 %v6228_v22, 16  ;;  %v2713_v44 = vshrl.u32 %v6229_v21, 16  ;;  %v2716_v45 = vshll.u32 %v6229_v21, 16  ;;  %v6236_v22 = vld [vmem:[%s7273_s23 + $0xa0] sm:$0xf] }
  0x9f   : > { %v2677_v41 = vsel %vm7345_vm7, %v2672_v32, %v2676_v16  ;;  %v2695_v42 = vor.u32 %v2694_v34, %v2691_v33  ;;  %6991 = vmatmul.mubr.msk.bf16.gmra.mrb[60].mxu0 %vm361_vm1, %v6255_v31  ;;  %v2704_v47 = vrot.slane %v2702_v39, 4  ;;  %v2722_v49 = vshll.u32 %v6230_v35, 16  ;;  %v6237_v21 = vld [vmem:[%s7273_s23 + $0xa4] sm:$0x1]  ;;  %v6239_v39 = vld [vmem:[%s7273_s23 + $0xac] sm:$0xf] }
  0xa0   : > { %v2682_v46 = vrot.slane %v2681_v24, 4  ;;  %v2710_v48 = vrot.slane %v2708_v40, 5  ;;  %v2715_v51 = vrot.slane %v2713_v44, 4  ;;  %v2718_v52 = vrot.slane %v2716_v45, 5 }
  0xa1   : > { %v2696_v50 = vrot.slane %v2695_v42, 4  ;;  %v2726_v55 = vshrl.u32 %v6230_v35, 16  ;;  %6961 = vmatmul.mubr.msk.bf16.gmra.mrb[64].mxu1 %vm361_vm1, %v7193_v36  ;;  %v2705_v58 = vor.u32 %v2704_v47, %v2700_v38  ;;  %v2724_v59 = vrot.slane %v2722_v49, 5  ;;  %v6238_v35 = vld [vmem:[%s7273_s23 + $0xa8] sm:$0xf] }
  0xa2   : > { %v2687_v57 = vsel %vm7345_vm7, %v2682_v46, %v2686_v29  ;;  %v2732_v60 = vshll.u32 %v6231_v43, 16  ;;  %6964 = vmatprep.mubr.msk.bf16.mxu1 %vm361_vm1, %v7194_v37  ;;  %v2719_v1 = vor.u32 %v2718_v52, %v2715_v51  ;;  %v2737_v7 = vshrl.u32 %v6232_v56, 16  ;;  %v6240_v51 = vld [vmem:[%s7273_s23 + $0xb0] sm:$0x1] }
  0xa3   : > { %v6256_v63 = vcombine.low %v2677_v41, %v2687_v57  ;;  %v2701_v0 = vsel %vm7345_vm7, %v2696_v50, %v2700_v38  ;;  %v2728_v2 = vrot.slane %v2726_v55, 4  ;;  %v2706_v4 = vrot.slane %v2705_v58, 4  ;;  %v6241_v55 = vld [vmem:[%s7273_s23 + $0xb4] sm:$0xf]  ;;  %v7197_v57 = vld [vmem:[%s7273_s23 + $0xa8] sm:$0xff]  }
  0xa4   : > { %v2734_v6 = vrot.slane %v2732_v60, 5  ;;  %v2740_v8 = vshll.u32 %v6232_v56, 16  ;;  %v2720_v10 = vrot.slane %v2719_v1, 4  ;;  %v2746_v13 = vshll.u32 %v6233_v61, 16  ;;  %v7198_v1 = vld [vmem:[%s7273_s23 + $0xb4] sm:$0xff]  }
  0xa5   : > { %6994 = vmatprep.mubr.msk.bf16.mxu0 %vm361_vm1, %v6256_v63  ;;  %v2729_v12 = vor.u32 %v2728_v2, %v2724_v59  ;;  %v2750_v5 = vshrl.u32 %v6233_v61, 16  ;;  %v2711_v19 = vsel %vm7345_vm7, %v2706_v4, %v2710_v48  ;;  %v2739_v16 = vrot.slane %v2737_v7, 4  ;;  %v6242_v61 = vld [vmem:[%s7273_s23 + $0xb8] sm:$0xf] }
  0xa6   : > { %v2742_v17 = vrot.slane %v2740_v8, 5  ;;  %v2756_v20 = vshll.u32 %v6234_v62, 16  ;;  %v6257_v23 = vcombine.low %v2701_v0, %v2711_v19  ;;  %v2725_v25 = vsel %vm7345_vm7, %v2720_v10, %v2724_v59 }
  0xa7   : > { %v2730_v26 = vrot.slane %v2729_v12, 4  ;;  %v2748_v18 = vrot.slane %v2746_v13, 5  ;;  %v2752_v28 = vrot.slane %v2750_v5, 4  ;;  %v2761_v30 = vshrl.u32 %v6235_v14, 16  ;;  %v6243_v12 = vld [vmem:[%s7273_s23 + $0xbc] sm:$0x1] }
  0xa8   : > { %v2743_v27 = vor.u32 %v2742_v17, %v2739_v16  ;;  %v2758_v29 = vrot.slane %v2756_v20, 5  ;;  %6995 = vmatmul.mubr.msk.bf16.gmra.mrb[64].mxu0 %vm361_vm1, %v6257_v23  ;;  %v2764_v32 = vshll.u32 %v6235_v14, 16  ;;  %v2770_v33 = vshll.u32 %v6236_v22, 16  ;;  %v6244_v14 = vld [vmem:[%s7273_s23 + $0xc0] sm:$0xf] }
  0xa9   : > { %v2735_v31 = vsel %vm7345_vm7, %v2730_v26, %v2734_v6  ;;  %v2774_v34 = vshrl.u32 %v6236_v22, 16  ;;  %6965 = vmatmul.mubr.msk.bf16.gmra.mrb[68].mxu1 %vm361_vm1, %v7195_v9  ;;  %v2753_v37 = vor.u32 %v2752_v28, %v2748_v18  ;;  %v2763_v38 = vrot.slane %v2761_v30, 4  ;;  %v6245_v20 = vld [vmem:[%s7273_s23 + $0xc4] sm:$0xf] }
  0xaa   : > { %v6258_v36 = vcombine.low %v2725_v25, %v2735_v31  ;;  %v2744_v24 = vrot.slane %v2743_v27, 4  ;;  %6968 = vmatprep.mubr.msk.bf16.mxu1 %vm361_vm1, %v7196_v15  ;;  %v2766_v40 = vrot.slane %v2764_v32, 5  ;;  %v2772_v41 = vrot.slane %v2770_v33, 5  ;;  %v6281_v31 = vld [vmem:[%s7273_s23 + $0x10] sm:$0xf] }
  0xab   : > { %v2776_v42 = vrot.slane %v2774_v34, 4  ;;  %v2780_v43 = vshll.u32 %v6237_v21, 16  ;;  %v2754_v45 = vrot.slane %v2753_v37, 4  ;;  %v2785_v46 = vshrl.u32 %v6238_v35, 16  ;;  %v6280_v21 = vld [vmem:[%s7273_s23 + $0xc] sm:$0xe] }
  0xac   : > { %6998 = vmatprep.mubr.msk.bf16.mxu0 %vm361_vm1, %v6258_v36  ;;  %v2749_v44 = vsel %vm7345_vm7, %v2744_v24, %v2748_v18  ;;  %v2788_v47 = vshll.u32 %v6238_v35, 16  ;;  %v2767_v48 = vor.u32 %v2766_v40, %v2763_v38  ;;  %v2794_v52 = vshll.u32 %v6239_v39, 16  ;;  %v6246_v18 = vld [vmem:[%s7273_s23 + $0xc8] sm:$0x1]  ;;  %v6282_v36 = vld [vmem:[%s7273_s23 + $0x14] sm:$0x1] }
  0xad   : > { %v2777_v49 = vor.u32 %v2776_v42, %v2772_v41  ;;  %v2782_v50 = vrot.slane %v2780_v43, 5  ;;  %v2759_v56 = vsel %vm7345_vm7, %v2754_v45, %v2758_v29  ;;  %v2787_v58 = vrot.slane %v2785_v46, 4  ;;  %v7199_v37 = vld [vmem:[%s7273_s23 + $0xc0] sm:$0xff]  }
  0xae   : > { %v2790_v59 = vrot.slane %v2788_v47, 5  ;;  %v2798_v60 = vshrl.u32 %v6239_v39, 16  ;;  %v6259_v62 = vcombine.low %v2749_v44, %v2759_v56  ;;  %v2768_v63 = vrot.slane %v2767_v48, 4 }
  0xaf   : > { %v2778_v0 = vrot.slane %v2777_v49, 4  ;;  %v2796_v2 = vrot.slane %v2794_v52, 5  ;;  %v2804_v7 = vshll.u32 %v6240_v51, 16  ;;  %v2809_v8 = vshrl.u32 %v6241_v55, 16 }
  0xb0   : > { %v2791_v4 = vor.u32 %v2790_v59, %v2787_v58  ;;  %v2800_v6 = vrot.slane %v2798_v60, 4  ;;  %6999 = vmatmul.mubr.msk.bf16.gmra.mrb[68].mxu0 %vm361_vm1, %v6259_v62  ;;  %v2773_v9 = vsel %vm7345_vm7, %v2768_v63, %v2772_v41  ;;  %v2812_v13 = vshll.u32 %v6241_v55, 16  ;;  %v6283_v41 = vld [vmem:[%s7273_s23 + $0x18] sm:$0xe]  ;;  %v6286_v58 = vld [vmem:[%s7273_s23 + $0x24] sm:$0xe] }
  0xb1   : > { %v2783_v10 = vsel %vm7345_vm7, %v2778_v0, %v2782_v50  ;;  %v2818_v5 = vshll.u32 %v6242_v61, 16  ;;  %6969 = vmatmul.mubr.msk.bf16.gmra.mrb[72].mxu1 %vm361_vm1, %v7197_v57  ;;  %v2806_v17 = vrot.slane %v2804_v7, 5  ;;  %v2811_v22 = vrot.slane %v2809_v8, 4  ;;  %v6284_v50 = vld [vmem:[%s7273_s23 + $0x1c] sm:$0xf] }
  0xb2   : > { %v6260_v19 = vcombine.low %v2773_v9, %v2783_v10  ;;  %v2792_v15 = vrot.slane %v2791_v4, 4  ;;  %v2801_v16 = vor.u32 %v2800_v6, %v2796_v2  ;;  %6972 = vmatprep.mubr.msk.bf16.mxu1 %vm361_vm1, %v7198_v1  ;;  %v2814_v23 = vrot.slane %v2812_v13, 5  ;;  %v6285_v57 = vld [vmem:[%s7273_s23 + $0x20] sm:$0x1]  ;;  %v6287_v63 = vld [vmem:[%s7273_s23 + $0x28] sm:$0xf] }
  0xb3   : > { %v2820_v25 = vrot.slane %v2818_v5, 5  ;;  %v2822_v26 = vshrl.u32 %v6242_v61, 16  ;;  %v2828_v29 = vshll.u32 %v6243_v12, 16  ;;  %v2833_v30 = vshrl.u32 %v6244_v14, 16  ;;  %v6288_v0 = vld [vmem:[%s7273_s23 + $0x2c] sm:$0x1] }
  0xb4   : > { %7002 = vmatprep.mubr.msk.bf16.mxu0 %vm361_vm1, %v6260_v19  ;;  %v2797_v27 = vsel %vm7345_vm7, %v2792_v15, %v2796_v2  ;;  %v2802_v28 = vrot.slane %v2801_v16, 4  ;;  %v2815_v32 = vor.u32 %v2814_v23, %v2811_v22  ;;  %v2836_v34 = vshll.u32 %v6244_v14, 16  ;;  %v6289_v7 = vld [vmem:[%s7273_s23 + $0x30] sm:$0xe]  ;;  %v6290_v8 = vld [vmem:[%s7273_s23 + $0x34] sm:$0xf] }
  0xb5   : > { %v2824_v33 = vrot.slane %v2822_v26, 4  ;;  %v2842_v35 = vshll.u32 %v6245_v20, 16  ;;  %v2830_v38 = vrot.slane %v2828_v29, 5  ;;  %v2835_v39 = vrot.slane %v2833_v30, 4  ;;  %v6291_v9 = vld [vmem:[%s7273_s23 + $0x38] sm:$0x1] }
  0xb6   : > { %v2807_v24 = vsel %vm7345_vm7, %v2802_v28, %v2806_v17  ;;  %v2846_v40 = vshrl.u32 %v6245_v20, 16  ;;  %v2816_v43 = vrot.slane %v2815_v32, 4  ;;  %v2838_v45 = vrot.slane %v2836_v34, 5  ;;  %v6292_v14 = vld [vmem:[%s7273_s23 + $0x3c] sm:$0xe] }
  0xb7   : > { %v6261_v42 = vcombine.low %v2797_v27, %v2807_v24  ;;  %v2825_v44 = vor.u32 %v2824_v33, %v2820_v25  ;;  %v2844_v46 = vrot.slane %v2842_v35, 5  ;;  %v2852_v48 = vshll.u32 %v6246_v18, 16  ;;  %v6293_v17 = vld [vmem:[%s7273_s23 + $0x40] sm:$0xf]  ;;  %v7200_v26 = vld [vmem:[%s7273_s23 + $0x18] sm:$0xff]  }
  0xb8   : > { %v2848_v47 = vrot.slane %v2846_v40, 4  ;;  %v6328_v49 = vrot.slane %v6280_v21, 9  ;;  %v2821_v51 = vsel %vm7345_vm7, %v2816_v43, %v2820_v25  ;;  %v2839_v55 = vor.u32 %v2838_v45, %v2835_v39  ;;  %v6294_v18 = vld [vmem:[%s7273_s23 + $0x44] sm:$0x1]  ;;  %v6296_v30 = vld [vmem:[%s7273_s23 + $0x4c] sm:$0xf] }
  0xb9   : > { %7003 = vmatmul.mubr.msk.bf16.gmra.mrb[72].mxu0 %vm361_vm1, %v6261_v42  ;;  %v2826_v52 = vrot.slane %v2825_v44, 4  ;;  %v3312_v56 = vrot.slane %v6281_v31, 5  ;;  %6973 = vmatmul.mubr.msk.bf16.gmra.mrb[76].mxu1 %vm361_vm1, %v7199_v37  ;;  %v2854_v60 = vrot.slane %v2852_v48, 5  ;;  %v3315_v61 = vrot.slane %v6282_v36, 5  ;;  %v6295_v35 = vld [vmem:[%s7273_s23 + $0x48] sm:$0xe] }
  0xba   : > { %v2849_v59 = vor.u32 %v2848_v47, %v2844_v46  ;;  %v6329_v62 = vrot.slane %v6283_v41, 9  ;;  %v2840_v2 = vrot.slane %v2839_v55, 4  ;;  %v3319_v13 = vrot.slane %v6284_v50, 5  ;;  %v6297_v36 = vld [vmem:[%s7273_s23 + $0x50] sm:$0x1] }
  0xbb   : > { %v2831_v1 = vsel %vm7345_vm7, %v2826_v52, %v2830_v38  ;;  %v3313_v4 = vsel %vm7338_vm6, %v6328_v49, %v3312_v56  ;;  %v3314_v6 = vrot.slane %v3312_v56, 4  ;;  %v3322_v5 = vrot.slane %v6285_v57, 5  ;;  %v6298_v39 = vld [vmem:[%s7273_s23 + $0x54] sm:$0xe]  ;;  %v6299_v40 = vld [vmem:[%s7273_s23 + $0x58] sm:$0xf] }
  0xbc   : > { %v6262_v10 = vcombine.low %v2821_v51, %v2831_v1  ;;  %v2850_v12 = vrot.slane %v2849_v59, 4  ;;  %v2845_v19 = vsel %vm7345_vm7, %v2840_v2, %v2844_v46  ;;  %v6330_v16 = vrot.slane %v6286_v58, 9  ;;  %v6300_v44 = vld [vmem:[%s7273_s23 + $0x5c] sm:$0x1]  ;;  %v6301_v45 = vld [vmem:[%s7273_s23 + $0x60] sm:$0xe] }
  0xbd   : > { %v3316_v15 = vsel %vm7338_vm6, %v3314_v6, %v3315_v61  ;;  %v3320_v23 = vsel %vm7338_vm6, %v6329_v62, %v3319_v13  ;;  %v3321_v25 = vrot.slane %v3319_v13, 4  ;;  %v4766_v27 = vsel %vm410_vm0, %v7695_v11, 0  ;;  %v6302_v46 = vld [vmem:[%s7273_s23 + $0x64] sm:$0xf]  ;;  %v6303_v49 = vld [vmem:[%s7273_s23 + $0x68] sm:$0x1] }
  0xbe   : > { %7006 = vmatprep.mubr.msk.bf16.mxu0 %vm361_vm1, %v6262_v10  ;;  %v2855_v20 = vsel %vm7345_vm7, %v2850_v12, %v2854_v60  ;;  %v6345_v22 = vcombine.low %v3313_v4, %v3316_v15  ;;  %v3326_v28 = vrot.slane %v6287_v63, 5  ;;  %v3329_v29 = vrot.slane %v6288_v0, 5  ;;  %v6304_v50 = vld [vmem:[%s7273_s23 + $0x6c] sm:$0xe]  ;;  %v6305_v57 = vld [vmem:[%s7273_s23 + $0x70] sm:$0xf] }
  0xbf   : > { %v6263_v21 = vcombine.low %v2845_v19, %v2855_v20  ;;  %v3323_v31 = vsel %vm7338_vm6, %v3321_v25, %v3322_v5  ;;  %v6331_v32 = vrot.slane %v6289_v7, 9  ;;  %v3333_v33 = vrot.slane %v6290_v8, 5  ;;  %v6306_v58 = vld [vmem:[%s7273_s23 + $0x74] sm:$0x1]  ;;  %v7201_v59 = vld [vmem:[%s7273_s23 + $0x24] sm:$0xff]  }
  0xc0   : > { %7012 = vmatprep.mubr.msk.bf16.mxu1 %vm361_vm1, %v6345_v22  ;;  %v3336_v34 = vrot.slane %v6291_v9, 5  ;;  %v6346_v11 = vcombine.low %v3320_v23, %v3323_v31  ;;  %v3327_v24 = vsel %vm7338_vm6, %v6330_v16, %v3326_v28  ;;  %v3328_v37 = vrot.slane %v3326_v28, 4  ;;  %v7843_v0 = vld [vmem:[%s7273_s23 + $0x78] sm:$0xe]  ;;  %v7846_v1 = vld [vmem:[%s7273_s23 + $0x7c] sm:$0xf] }
  0xc1   : > { %7007 = vmatmul.mubr.msk.bf16.gmra.mrb[76].mxu0 %vm361_vm1, %v6263_v21  ;;  %v6332_v38 = vrot.slane %v6292_v14, 9  ;;  %v3335_v41 = vrot.slane %v3333_v33, 4  ;;  %v3340_v42 = vrot.slane %v6293_v17, 5  ;;  %v3343_v43 = vrot.slane %v6294_v18, 5  ;;  %v7202_v2 = vld [vmem:[%s7273_s23 + $0x30] sm:$0xff]  }
  0xc2   : > { %7046 = vmatprep.mubr.msk.bf16.mxu0 %vm361_vm1, %v7200_v26  ;;  %7013 = vmatmul.mubr.msk.bf16.vlgmr.msra.gmra.mrb[80].mxu1 %vm361_vm1, %v6346_v11  ;;  %v3330_v47 = vsel %vm7338_vm6, %v3328_v37, %v3329_v29  ;;  %v3347_v48 = vrot.slane %v6296_v30, 5  ;;  %v3334_v52 = vsel %vm7338_vm6, %v6331_v32, %v3333_v33  ;;  %v5332_v60 = vsel %vm410_vm0, %v7728_v3, 0  ;;  %v6309_v8 = vld [vmem:[%s7273_s23 + $0x80] sm:$0x1]  ;;  %v6310_v5 = vld [vmem:[%s7273_s23 + $0x84] sm:$0xe] }
  0xc3   : > { %7079 = vmatpush3.bf16.msra.mxu1 %v4766_v27  ;;  %v6347_v51 = vcombine.low %v3327_v24, %v3330_v47  ;;  %v3337_v55 = vsel %vm7338_vm6, %v3335_v41, %v3336_v34  ;;  %v3342_v56 = vrot.slane %v3340_v42, 4  ;;  %v3341_v61 = vsel %vm7338_vm6, %v6332_v38, %v3340_v42  ;;  %v6311_v17 = vld [vmem:[%s7273_s23 + $0x88] sm:$0xf]  ;;  %v6312_v20 = vld [vmem:[%s7273_s23 + $0x8c] sm:$0x1]  ;;  %v7203_v32 = vld [vmem:[%s7273_s23 + $0x3c] sm:$0xff]  }
  0xc4   : > { %v6333_v62 = vrot.slane %v6295_v35, 9  ;;  %v3350_v63 = vrot.slane %v6297_v36, 5  ;;  %v3349_v6 = vrot.slane %v3347_v48, 4  ;;  %v6334_v3 = vrot.slane %v6298_v39, 9  ;;  %v6313_v18 = vld [vmem:[%s7273_s23 + $0x90] sm:$0xe] }
  0xc5   : > { %7016 = vmatprep.mubr.msk.bf16.mxu1 %vm361_vm1, %v6347_v51  ;;  %v3344_v4 = vsel %vm7338_vm6, %v3342_v56, %v3343_v43  ;;  %v3354_v7 = vrot.slane %v6299_v40, 5  ;;  %v6348_v9 = vcombine.low %v3334_v52, %v3337_v55  ;;  %v3357_v10 = vrot.slane %v6300_v44, 5  ;;  %v6314_v30 = vld [vmem:[%s7273_s23 + $0x94] sm:$0xf]  ;;  %v6315_v31 = vld [vmem:[%s7273_s23 + $0x98] sm:$0x1] }
  0xc6   : > { %v6335_v12 = vrot.slane %v6301_v45, 9  ;;  %v3361_v13 = vrot.slane %v6302_v46, 5  ;;  %v6349_v14 = vcombine.low %v3341_v61, %v3344_v4  ;;  %v3364_v15 = vrot.slane %v6303_v49, 5  ;;  %v6316_v39 = vld [vmem:[%s7273_s23 + $0x9c] sm:$0xe]  ;;  %v7204_v42 = vld [vmem:[%s7273_s23 + $0x48] sm:$0xff]  }
  0xc7   : > { %v3356_v19 = vrot.slane %v3354_v7, 4  ;;  %v6336_v16 = vrot.slane %v6304_v50, 9  ;;  %v7859_v22 = vsel %vm7338_vm6, %v6333_v62, %v3347_v48  ;;  %v3368_v25 = vrot.slane %v6305_v57, 5  ;;  %v6317_v40 = vld [vmem:[%s7273_s23 + $0xa0] sm:$0xf] }
  0xc8   : > { %v3363_v23 = vrot.slane %v3361_v13, 4  ;;  %v3371_v26 = vrot.slane %v6306_v58, 5  ;;  %v3351_v21 = vsel %vm7338_vm6, %v3349_v6, %v3350_v63  ;;  %v3355_v27 = vsel %vm7338_vm6, %v6334_v3, %v3354_v7  ;;  %v6319_v41 = vld [vmem:[%s7273_s23 + $0xa8] sm:$0xe]  ;;  %v7897_v47 = vld [vmem:[%s7273_s23 + $0xa4] sm:$0x1] }
  0xc9   : > { %7047 = vmatmul.mubr.msk.bf16.vlgmr.msra.gmra.mrb[80].mxu0 %vm361_vm1, %v7201_v59  ;;  %v6337_v28 = vrot.slane %v7843_v0, 9  ;;  %v3375_v29 = vrot.slane %v7846_v1, 5  ;;  %v3358_v33 = vsel %vm7338_vm6, %v3356_v19, %v3357_v10  ;;  %v7877_v34 = vsel %vm7338_vm6, %v6335_v12, %v3361_v13  ;;  %v6320_v48 = vld [vmem:[%s7273_s23 + $0xac] sm:$0xf]  ;;  %v7902_v55 = vld [vmem:[%s7273_s23 + $0xb0] sm:$0x1] }
  0xca   : > { %7113 = vmatpush3.bf16.msra.mxu0 %v5332_v60  ;;  %7050 = vmatprep.mubr.msk.bf16.mxu0 %vm361_vm1, %v7202_v2  ;;  %v3370_v35 = vrot.slane %v3368_v25, 4  ;;  %v3378_v36 = vrot.slane %v6309_v8, 5  ;;  %v7882_v11 = vsel %vm7338_vm6, %v3363_v23, %v3364_v15  ;;  %v7886_v24 = vsel %vm7338_vm6, %v6336_v16, %v3368_v25  ;;  %v7921_v0 = vld [vmem:[%s7273_s23 + $0xb4] sm:$0xe]  ;;  %v7924_v1 = vld [vmem:[%s7273_s23 + $0xb8] sm:$0xf] }
  0xcb   : > { %7017 = vmatmul.mubr.msk.bf16.gmra.mrb[84].mxu1 %vm361_vm1, %v6348_v9  ;;  %v3377_v37 = vrot.slane %v3375_v29, 4  ;;  %v6338_v38 = vrot.slane %v6310_v5, 9  ;;  %v3382_v44 = vrot.slane %v6311_v17, 5  ;;  %v3385_v45 = vrot.slane %v6312_v20, 5  ;;  %v7932_v7 = vld [vmem:[%s7273_s23 + $0xbc] sm:$0x1] }
  0xcc   : > { %7020 = vmatprep.mubr.msk.bf16.mxu1 %vm361_vm1, %v6349_v14  ;;  %v7894_v43 = vsel %vm7338_vm6, %v3370_v35, %v3371_v26  ;;  %v6339_v46 = vrot.slane %v6313_v18, 9  ;;  %v6350_v49 = vcombine.low %v7859_v22, %v3351_v21  ;;  %v6351_v50 = vcombine.low %v3355_v27, %v3358_v33  ;;  %v7945_v13 = vld [vmem:[%s7273_s23 + $0xc0] sm:$0xe]  ;;  %v7948_v5 = vld [vmem:[%s7273_s23 + $0xc4] sm:$0xf]  ;;  %v7205_v26 = vld [vmem:[%s7273_s23 + $0x54] sm:$0xff]  }
  0xcd   : > { %v3389_v51 = vrot.slane %v6314_v30, 5  ;;  %v3392_v52 = vrot.slane %v6315_v31, 5  ;;  %v6352_v56 = vcombine.low %v7877_v34, %v7882_v11  ;;  %v6353_v57 = vcombine.low %v7886_v24, %v7894_v43  ;;  %v7957_v16 = vld [vmem:[%s7273_s23 + $0xc8] sm:$0x1]  ;;  %v7960_v17 = vld [vmem:[%s7273_s23 + $0x18] sm:$0xf] }
  0xce   : > { %v7910_v58 = vsel %vm7338_vm6, %v6337_v28, %v3375_v29  ;;  %v3384_v59 = vrot.slane %v3382_v44, 4  ;;  %v7914_v60 = vsel %vm7338_vm6, %v3377_v37, %v3378_v36  ;;  %v7918_v61 = vsel %vm7338_vm6, %v6338_v38, %v3382_v44  ;;  %v7966_v25 = vld [vmem:[%s7273_s23 + $0x1c] sm:$0xf]  ;;  %v7206_v30 = vld [vmem:[%s7273_s23 + $0x60] sm:$0xff]  }
  0xcf   : > { %v3391_v62 = vrot.slane %v3389_v51, 4  ;;  %v3396_v63 = vrot.slane %v6317_v40, 5  ;;  %v6340_v4 = vrot.slane %v6316_v39, 9  ;;  %v6341_v6 = vrot.slane %v6319_v41, 9  ;;  %v6444_v36 = vld [vmem:[%s7273_s23 + $0x20] sm:$0x1] }
  0xd0   : > { %v7929_v2 = vsel %vm7338_vm6, %v3384_v59, %v3385_v45  ;;  %v3403_v3 = vrot.slane %v6320_v48, 5  ;;  %v7937_v8 = vsel %vm7338_vm6, %v6339_v46, %v3389_v51  ;;  %v3399_v12 = vrot.slane %v7897_v47, 5  ;;  %v6445_v41 = vld [vmem:[%s7273_s23 + $0x24] sm:$0xf]  ;;  %v8035_v47 = vld [vmem:[%s7273_s23 + $0x28] sm:$0xf] }
  0xd1   : > { %7051 = vmatmul.mubr.msk.bf16.gmra.mrb[84].mxu0 %vm361_vm1, %v7203_v32  ;;  %v7941_v9 = vsel %vm7338_vm6, %v3391_v62, %v3392_v52  ;;  %v3398_v10 = vrot.slane %v3396_v63, 4  ;;  %v6354_v14 = vcombine.low %v7910_v58, %v7914_v60  ;;  %v6355_v19 = vcombine.low %v7918_v61, %v7929_v2 }
  0xd2   : > { %7054 = vmatprep.mubr.msk.bf16.mxu0 %vm361_vm1, %v7204_v42  ;;  %v3406_v15 = vrot.slane %v7902_v55, 5  ;;  %v3405_v20 = vrot.slane %v3403_v3, 4  ;;  %v6342_v22 = vrot.slane %v7921_v0, 9  ;;  %v3410_v23 = vrot.slane %v7924_v1, 5 }
  0xd3   : > { %7021 = vmatmul.mubr.msk.bf16.gmra.mrb[88].mxu1 %vm361_vm1, %v6350_v49  ;;  %v6356_v18 = vcombine.low %v7937_v8, %v7941_v9  ;;  %v7973_v21 = vsel %vm7338_vm6, %v6340_v4, %v3396_v63  ;;  %v7977_v27 = vsel %vm7338_vm6, %v6341_v6, %v3403_v3  ;;  %v7224_v28 = vmov 0.0   ;;  %v7207_v63 = vld [vmem:[%s7273_s23 + $0x6c] sm:$0xff]   ;;  %v7208_v3 = vld [vmem:[%s7273_s23 + $0x78] sm:$0xff]  }
  0xd4   : > { %7024 = vmatprep.mubr.msk.bf16.mxu1 %vm361_vm1, %v6351_v50  ;;  %202 = vst.msk [vmem:[#allocation2 + $0x90] sm:$0xff] %vm183_vm8, %v7224_v28  ;;  %184 = vst.msk [vmem:[#allocation2] sm:$0xff] %vm183_vm8, %v7224_v28  ;;  %v3413_v29 = vrot.slane %v7932_v7, 5  ;;  %v8015_v31 = vsel %vm7338_vm6, %v3398_v10, %v3399_v12  ;;  %v3412_v32 = vrot.slane %v3410_v23, 4  ;;  %v6343_v33 = vrot.slane %v7945_v13, 9 }
  0xd5   : > { %185 = vst.msk [vmem:[#allocation2 + $0x8] sm:$0xff] %vm183_vm8, %v7224_v28  ;;  %186 = vst.msk [vmem:[#allocation2 + $0x10] sm:$0xff] %vm183_vm8, %v7224_v28  ;;  %v3417_v35 = vrot.slane %v7948_v5, 5  ;;  %v3420_v37 = vrot.slane %v7957_v16, 5  ;;  %v4252_v38 = vshrl.u32 %v7960_v17, 16  ;;  %v4255_v39 = vshll.u32 %v7960_v17, 16 }
  0xd6   : > { %187 = vst.msk [vmem:[#allocation2 + $0x18] sm:$0xff] %vm183_vm8, %v7224_v28  ;;  %188 = vst.msk [vmem:[#allocation2 + $0x20] sm:$0xff] %vm183_vm8, %v7224_v28  ;;  %v4261_v40 = vshll.u32 %v7966_v25, 16  ;;  %v8027_v42 = vsel %vm7338_vm6, %v3405_v20, %v3406_v15  ;;  %v8031_v44 = vsel %vm7338_vm6, %v6342_v22, %v3410_v23  ;;  %v4265_v46 = vshrl.u32 %v7966_v25, 16  ;;  %v6447_v22 = vld [vmem:[%s7273_s23 + $0x2c] sm:$0x1] }
  0xd7   : > { %189 = vst.msk [vmem:[#allocation2 + $0x28] sm:$0xff] %vm183_vm8, %v7224_v28  ;;  %190 = vst.msk [vmem:[#allocation2 + $0x30] sm:$0xff] %vm183_vm8, %v7224_v28  ;;  %v3419_v45 = vrot.slane %v3417_v35, 4  ;;  %v8040_v48 = vsel %vm7338_vm6, %v3412_v32, %v3413_v29  ;;  %v4254_v49 = vrot.slane %v4252_v38, 4  ;;  %v4257_v50 = vrot.slane %v4255_v39, 5 }
  0xd8   : > { %191 = vst.msk [vmem:[#allocation2 + $0x38] sm:$0xff] %vm183_vm8, %v7224_v28  ;;  %192 = vst.msk [vmem:[#allocation2 + $0x40] sm:$0xff] %vm183_vm8, %v7224_v28  ;;  %v4263_v51 = vrot.slane %v4261_v40, 5  ;;  %v8045_v52 = vsel %vm7338_vm6, %v6343_v33, %v3417_v35  ;;  %v4267_v55 = vrot.slane %v4265_v46, 4  ;;  %v4271_v59 = vshll.u32 %v6444_v36, 16 }
  0xd9   : > { %193 = vst.msk [vmem:[#allocation2 + $0x48] sm:$0xff] %vm183_vm8, %v7224_v28  ;;  %194 = vst.msk [vmem:[#allocation2 + $0x50] sm:$0xff] %vm183_vm8, %v7224_v28  ;;  %7055 = vmatmul.mubr.msk.bf16.gmra.mrb[88].mxu0 %vm361_vm1, %v7205_v26  ;;  %v4276_v62 = vshrl.u32 %v6445_v41, 16  ;;  %v8054_v0 = vsel %vm7338_vm6, %v3419_v45, %v3420_v37  ;;  %v4258_v1 = vor.u32 %v4257_v50, %v4254_v49  ;;  %v4279_v4 = vshll.u32 %v6445_v41, 16  ;;  %v6523_v35 = vld [vmem:[%s7273_s23 + $0x18] sm:$0xe] }
  0xda   : > { %195 = vst.msk [vmem:[#allocation2 + $0x58] sm:$0xff] %vm183_vm8, %v7224_v28  ;;  %196 = vst.msk [vmem:[#allocation2 + $0x60] sm:$0xff] %vm183_vm8, %v7224_v28  ;;  %7058 = vmatprep.mubr.msk.bf16.mxu0 %vm361_vm1, %v7206_v30  ;;  %v4285_v6 = vshll.u32 %v8035_v47, 16  ;;  %v6357_v34 = vcombine.low %v7973_v21, %v8015_v31  ;;  %v4268_v12 = vor.u32 %v4267_v55, %v4263_v51  ;;  %v4273_v13 = vrot.slane %v4271_v59, 5  ;;  %v6524_v46 = vld [vmem:[%s7273_s23 + $0x1c] sm:$0xf] }
  0xdb   : > { %197 = vst.msk [vmem:[#allocation2 + $0x68] sm:$0xff] %vm183_vm8, %v7224_v28  ;;  %198 = vst.msk [vmem:[#allocation2 + $0x70] sm:$0xff] %vm183_vm8, %v7224_v28  ;;  %7025 = vmatmul.mubr.msk.bf16.gmra.mrb[92].mxu1 %vm361_vm1, %v6352_v56  ;;  %v266_v11 = vld [vmem:[#allocation2 + $0x90] sm:$0xff]  ;;  %v4278_v5 = vrot.slane %v4276_v62, 4  ;;  %v6358_v15 = vcombine.low %v7977_v27, %v8027_v42  ;;  %v248_v17 = vld [vmem:[#allocation2] sm:$0xff]  ;;  %v4259_v20 = vrot.slane %v4258_v1, 4  ;;  %v6360_v29 = vcombine.low %v8045_v52, %v8054_v0 }
  0xdc   : > { %199 = vst.msk [vmem:[#allocation2 + $0x78] sm:$0xff] %vm183_vm8, %v7224_v28  ;;  %200 = vst.msk [vmem:[#allocation2 + $0x80] sm:$0xff] %vm183_vm8, %v7224_v28  ;;  %7028 = vmatprep.mubr.msk.bf16.mxu1 %vm361_vm1, %v6353_v57  ;;  %v250_v57 = vld [vmem:[#allocation2 + $0x10] sm:$0xff]  ;;  %v4281_v23 = vrot.slane %v4279_v4, 5  ;;  %v4269_v33 = vrot.slane %v4268_v12, 4  ;;  %v249_v40 = vld [vmem:[#allocation2 + $0x8] sm:$0xff] }
  0xdd   : > { %201 = vst.msk [vmem:[#allocation2 + $0x88] sm:$0xff] %vm183_vm8, %v7224_v28  ;;  %203 = vst.msk [vmem:[#allocation2 + $0x98] sm:$0xff] %vm183_vm8, %v7224_v28  ;;  %v251_v32 = vld [vmem:[#allocation2 + $0x18] sm:$0xff]  ;;  %v4264_v41 = vsel %vm7345_vm7, %v4259_v20, %v4263_v51  ;;  %v8079_v62 = vrot.slane %v4285_v6, 5  ;;  %v6525_v1 = vld [vmem:[%s7273_s23 + $0x20] sm:$0x1] }
  0xde   : > { %204 = vst.msk [vmem:[#allocation2 + $0xa0] sm:$0xff] %vm183_vm8, %v7224_v28  ;;  %205 = vst.msk [vmem:[#allocation2 + $0xa8] sm:$0xff] %vm183_vm8, %v7224_v28  ;;  %v4282_v45 = vor.u32 %v4281_v23, %v4278_v5  ;;  %v4274_v59 = vsel %vm7345_vm7, %v4269_v33, %v4273_v13  ;;  %v6448_v4 = vld [vmem:[%s7273_s23 + $0x30] sm:$0xf]  ;;  %v4295_v12 = vshll.u32 %v6447_v22, 16  ;;  %v6571_v13 = vrot.slane %v6523_v35, 9 }
  0xdf   : > { %206 = vst.msk [vmem:[#allocation2 + $0xb0] sm:$0xff] %vm183_vm8, %v7224_v28  ;;  %207 = vst.msk [vmem:[#allocation2 + $0xb8] sm:$0xff] %vm183_vm8, %v7224_v28  ;;  %v5091_v5 = vrot.slane %v6524_v46, 5  ;;  %v6450_v23 = vld [vmem:[%s7273_s23 + $0x38] sm:$0x1] }
  0xe0   : > { %208 = vst.msk [vmem:[#allocation2 + $0xc0] sm:$0xff] %vm183_vm8, %v7224_v28  ;;  %209 = vst.msk [vmem:[#allocation2 + $0xc8] sm:$0xff] %vm183_vm8, %v7224_v28 }
  0xe1   : > { %210 = vst.msk [vmem:[#allocation2 + $0xd0] sm:$0xff] %vm183_vm8, %v7224_v28  ;;  %211 = vst.msk [vmem:[#allocation2 + $0xd8] sm:$0xff] %vm183_vm8, %v7224_v28  ;;  %7059 = vmatmul.mubr.msk.bf16.gmra.mrb[92].mxu0 %vm361_vm1, %v7207_v63  ;;  %v8111_v20 = vsel %vm7338_vm6, %v6571_v13, %v5091_v5  ;;  %v5093_v22 = vrot.slane %v5091_v5, 4  ;;  %v6528_v13 = vld [vmem:[%s7273_s23 + $0x2c] sm:$0x1] }
  0xe2   : > { %212 = vst.msk [vmem:[#allocation2 + $0xe0] sm:$0xff] %vm183_vm8, %v7224_v28  ;;  %213 = vst.msk [vmem:[#allocation2 + $0xe8] sm:$0xff] %vm183_vm8, %v7224_v28  ;;  %7062 = vmatprep.mubr.msk.bf16.mxu0 %vm361_vm1, %v7208_v3  ;;  %v6451_v5 = vld [vmem:[%s7273_s23 + $0x3c] sm:$0xf] }
  0xe3   : > { %214 = vst.msk [vmem:[#allocation2 + $0xf0] sm:$0xff] %vm183_vm8, %v7224_v28  ;;  %215 = vst.msk [vmem:[#allocation2 + $0xf8] sm:$0xff] %vm183_vm8, %v7224_v28  ;;  %v264_v7 = vld [vmem:[#allocation2 + $0x80] sm:$0xff]  ;;  %v6359_v28 = vcombine.low %v8031_v44, %v8040_v48  ;;  %7029 = vmatmul.mubr.msk.bf16.gmra.mrb[96].mxu1 %vm361_vm1, %v6354_v14  ;;  %v4297_v14 = vrot.slane %v4295_v12, 5 }
  0xe4   : > { %v267_v10 = vld [vmem:[#allocation2 + $0x98] sm:$0xff]  ;;  %v265_v43 = vld [vmem:[#allocation2 + $0x88] sm:$0xff]  ;;  %7032 = vmatprep.mubr.msk.bf16.mxu1 %vm361_vm1, %v6355_v19 }
  0xe5   : > { %v269_v2 = vld [vmem:[#allocation2 + $0xa8] sm:$0xff] }
  0xe6   : > { %v6860_v56 = vpop.f32.mrb[0].mxu1  ;;  %v270_v63 = vld [vmem:[#allocation2 + $0xb0] sm:$0xff]  ;;  %v271_v60 = vld [vmem:[#allocation2 + $0xb8] sm:$0xff] }
  0xe7   : > { %v593_v16 = vadd.f32 %v6860_v56, %v266_v11  ;;  %v512_v24 = vpop.f32.mrb[1].mxu1  ;;  %v6844_v30 = vpop.f32.mrb[0].mxu0  ;;  %v8086_v56 = vcombine.low %v4264_v41, %v4274_v59  ;;  %v255_v41 = vld [vmem:[#allocation2 + $0x38] sm:$0xff]  ;;  %v273_v9 = vld [vmem:[#allocation2 + $0xc8] sm:$0xff] }
  0xe8   : > { %v591_v25 = vadd.f32 %v512_v24, %v264_v7  ;;  %v6861_v26 = vpop.f32.mrb[2].mxu1  ;;  %v577_v38 = vadd.f32 %v6844_v30, %v250_v57  ;;  %v448_v39 = vpop.f32.mrb[1].mxu0  ;;  %v8088_v7 = vrot.slane %v4282_v45, 4  ;;  %v4300_v57 = vshrl.u32 %v6448_v4, 16 }
  0xe9   : > { %625 = vst.msk [vmem:[#allocation2 + $0x90] sm:$0xff] %vm183_vm8, %v593_v16  ;;  %v594_v36 = vadd.f32 %v6861_v26, %v267_v10  ;;  %v515_v37 = vpop.f32.mrb[3].mxu1  ;;  %v575_v50 = vadd.f32 %v448_v39, %v248_v17  ;;  %v6845_v55 = vpop.f32.mrb[2].mxu0  ;;  %v4289_v10 = vshrl.u32 %v8035_v47, 16  ;;  %v6449_v16 = vld [vmem:[%s7273_s23 + $0x34] sm:$0xf] }
  0xea   : > { %623 = vst.msk [vmem:[#allocation2 + $0x80] sm:$0xff] %vm183_vm8, %v591_v25  ;;  %v592_v49 = vadd.f32 %v515_v37, %v265_v43  ;;  %609 = vst.msk [vmem:[#allocation2 + $0x10] sm:$0xff] %vm183_vm8, %v577_v38  ;;  %v578_v51 = vadd.f32 %v6845_v55, %v251_v32  ;;  %v451_v11 = vpop.f32.mrb[3].mxu0  ;;  %v268_v47 = vld [vmem:[#allocation2 + $0xa0] sm:$0xff]  ;;  %v4288_v3 = vsel %vm7345_vm7, %v8088_v7, %v8079_v62  ;;  %v5094_v43 = vrot.slane %v6525_v1, 5  ;;  %v254_v17 = vld [vmem:[#allocation2 + $0x30] sm:$0xff] }
  0xeb   : > { %626 = vst.msk [vmem:[#allocation2 + $0x98] sm:$0xff] %vm183_vm8, %v594_v36  ;;  %607 = vst.msk [vmem:[#allocation2] sm:$0xff] %vm183_vm8, %v575_v50  ;;  %v576_v6 = vadd.f32 %v451_v11, %v249_v40  ;;  %v4291_v24 = vrot.slane %v4289_v10, 4  ;;  %v4303_v25 = vshll.u32 %v6448_v4, 16  ;;  %v7209_v26 = vld [vmem:[%s7273_s23 + $0x84] sm:$0xff]   ;;  %v4302_v33 = vrot.slane %v4300_v57, 4  ;;  %7033 = vmatmul.mubr.msk.bf16.gmra.mrb[100].mxu1 %vm361_vm1, %v6356_v18 }
  0xec   : > { %624 = vst.msk [vmem:[#allocation2 + $0x88] sm:$0xff] %vm183_vm8, %v592_v49  ;;  %610 = vst.msk [vmem:[#allocation2 + $0x18] sm:$0xff] %vm183_vm8, %v578_v51  ;;  %v252_v32 = vld [vmem:[#allocation2 + $0x20] sm:$0xff]  ;;  %v4309_v35 = vshll.u32 %v6449_v16, 16  ;;  %v7210_v37 = vld [vmem:[%s7273_s23 + $0x90] sm:$0xff]   ;;  %v8122_v45 = vsel %vm7338_vm6, %v5093_v22, %v5094_v43  ;;  %v4313_v49 = vshrl.u32 %v6449_v16, 16  ;;  %7063 = vmatmul.mubr.msk.bf16.gmra.mrb[96].mxu0 %vm361_vm1, %v7209_v26  ;;  %7036 = vmatprep.mubr.msk.bf16.mxu1 %vm361_vm1, %v6357_v34 }
  0xed   : > { %608 = vst.msk [vmem:[#allocation2 + $0x8] sm:$0xff] %vm183_vm8, %v576_v6  ;;  %v4292_v19 = vor.u32 %v4291_v24, %v8079_v62  ;;  %v8117_v36 = vld [vmem:[%s7273_s23 + $0x24] sm:$0xe]  ;;  %v4305_v46 = vrot.slane %v4303_v25, 5  ;;  %v253_v4 = vld [vmem:[#allocation2 + $0x28] sm:$0xff]  ;;  %v6588_v51 = vcombine.low %v8111_v20, %v8122_v45  ;;  %v4319_v57 = vshll.u32 %v6450_v23, 16  ;;  %7066 = vmatprep.mubr.msk.bf16.mxu0 %vm361_vm1, %v7210_v37 }
  0xee   : > { %v6864_v58 = vpop.f32.mrb[4].mxu1  ;;  %v6527_v11 = vld [vmem:[%s7273_s23 + $0x28] sm:$0xf]  ;;  %v8129_v12 = vrot.slane %v4309_v35, 5  ;;  %v4315_v43 = vrot.slane %v4313_v49, 4  ;;  %v6572_v25 = vrot.slane %v8117_v36, 9 }
  0xef   : > { %v597_v30 = vadd.f32 %v6864_v58, %v270_v63  ;;  %v528_v61 = vpop.f32.mrb[5].mxu1  ;;  %v6848_v40 = vpop.f32.mrb[4].mxu0  ;;  %v4293_v59 = vrot.slane %v4292_v19, 4  ;;  %v4306_v6 = vor.u32 %v4305_v46, %v4302_v33  ;;  %v6452_v58 = vld [vmem:[%s7273_s23 + $0x40] sm:$0xf]  ;;  %v5101_v19 = vrot.slane %v6528_v13, 5 }
  0xf0   : > { %v595_v38 = vadd.f32 %v528_v61, %v268_v47  ;;  %v6865_v39 = vpop.f32.mrb[6].mxu1  ;;  %v581_v62 = vadd.f32 %v6848_v40, %v254_v17  ;;  %v464_v1 = vpop.f32.mrb[5].mxu0  ;;  %v274_v17 = vld [vmem:[#allocation2 + $0xd0] sm:$0xff]  ;;  %v7211_v23 = vld [vmem:[%s7273_s23 + $0x9c] sm:$0xff]   ;;  %v4321_v61 = vrot.slane %v4319_v57, 5  ;;  %v4324_v35 = vshrl.u32 %v6451_v5, 16 }
  0xf1   : > { %629 = vst.msk [vmem:[#allocation2 + $0xb0] sm:$0xff] %vm183_vm8, %v597_v30  ;;  %v598_v50 = vadd.f32 %v6865_v39, %v271_v60  ;;  %v531_v55 = vpop.f32.mrb[7].mxu1  ;;  %v579_v10 = vadd.f32 %v464_v1, %v252_v32  ;;  %v6849_v63 = vpop.f32.mrb[6].mxu0  ;;  %v4298_v16 = vsel %vm7345_vm7, %v4293_v59, %v4297_v14  ;;  %v4307_v14 = vrot.slane %v4306_v6, 4  ;;  %v272_v26 = vld [vmem:[#allocation2 + $0xc0] sm:$0xff]  ;;  %v7212_v32 = vld [vmem:[%s7273_s23 + $0xa8] sm:$0xff]  }
  0xf2   : > { %627 = vst.msk [vmem:[#allocation2 + $0xa0] sm:$0xff] %vm183_vm8, %v595_v38  ;;  %v596_v7 = vadd.f32 %v531_v55, %v269_v2  ;;  %613 = vst.msk [vmem:[#allocation2 + $0x30] sm:$0xff] %vm183_vm8, %v581_v62  ;;  %v582_v47 = vadd.f32 %v6849_v63, %v255_v41  ;;  %v467_v24 = vpop.f32.mrb[7].mxu0  ;;  %v8141_v60 = vcombine.low %v4288_v3, %v4298_v16  ;;  %v275_v3 = vld [vmem:[#allocation2 + $0xd8] sm:$0xff]  ;;  %v5098_v2 = vrot.slane %v6527_v11, 5  ;;  %v258_v38 = vld [vmem:[#allocation2 + $0x50] sm:$0xff] }
  0xf3   : > { %630 = vst.msk [vmem:[#allocation2 + $0xb8] sm:$0xff] %vm183_vm8, %v598_v50  ;;  %611 = vst.msk [vmem:[#allocation2 + $0x20] sm:$0xff] %vm183_vm8, %v579_v10  ;;  %v580_v22 = vadd.f32 %v467_v24, %v253_v4  ;;  %v4316_v30 = vor.u32 %v4315_v43, %v8129_v12  ;;  %v4312_v18 = vsel %vm7345_vm7, %v4307_v14, %v8129_v12  ;;  %v6453_v33 = vld [vmem:[%s7273_s23 + $0x44] sm:$0x1]  ;;  %v4327_v36 = vshll.u32 %v6451_v5, 16  ;;  %v259_v4 = vld [vmem:[#allocation2 + $0x58] sm:$0xff] }
  0xf4   : > { %628 = vst.msk [vmem:[#allocation2 + $0xa8] sm:$0xff] %vm183_vm8, %v596_v7  ;;  %614 = vst.msk [vmem:[#allocation2 + $0x38] sm:$0xff] %vm183_vm8, %v582_v47  ;;  %v4333_v37 = vshll.u32 %v6452_v58, 16  ;;  %v8164_v31 = vsel %vm7338_vm6, %v6572_v25, %v5098_v2  ;;  %v5100_v34 = vrot.slane %v5098_v2, 4  ;;  %v256_v41 = vld [vmem:[#allocation2 + $0x40] sm:$0xff]  ;;  %v4326_v55 = vrot.slane %v4324_v35, 4  ;;  %7067 = vmatmul.mubr.msk.bf16.gmra.mrb[100].mxu0 %vm361_vm1, %v7211_v23  ;;  %7037 = vmatmul.mubr.msk.bf16.gmra.mrb[104].mxu1 %vm361_vm1, %v6358_v15 }
  0xf5   : > { %612 = vst.msk [vmem:[#allocation2 + $0x28] sm:$0xff] %vm183_vm8, %v580_v22  ;;  %v4317_v21 = vrot.slane %v4316_v30, 4  ;;  %v8167_v46 = vld [vmem:[%s7273_s23 + $0x30] sm:$0xe]  ;;  %v4329_v59 = vrot.slane %v4327_v36, 5  ;;  %v4337_v6 = vshrl.u32 %v6452_v58, 16  ;;  %7070 = vmatprep.mubr.msk.bf16.mxu0 %vm361_vm1, %v7212_v32  ;;  %7040 = vmatprep.mubr.msk.bf16.mxu1 %vm361_vm1, %v6359_v28 }
  0xf6   : > { %v6868_v8 = vpop.f32.mrb[8].mxu1  ;;  %v8169_v62 = vrot.slane %v4333_v37, 5  ;;  %v8176_v63 = vsel %vm7338_vm6, %v5100_v34, %v5101_v19  ;;  %v257_v13 = vld [vmem:[#allocation2 + $0x48] sm:$0xff]  ;;  %v6530_v5 = vld [vmem:[%s7273_s23 + $0x34] sm:$0xf]  ;;  %v4343_v14 = vshll.u32 %v6453_v33, 16 }
  0xf7   : > { %v601_v39 = vadd.f32 %v6868_v8, %v274_v17  ;;  %v544_v40 = vpop.f32.mrb[9].mxu1  ;;  %v6852_v1 = vpop.f32.mrb[8].mxu0  ;;  %v4322_v10 = vsel %vm7345_vm7, %v4317_v21, %v4321_v61  ;;  %v6589_v24 = vcombine.low %v8164_v31, %v8176_v63  ;;  %v4330_v43 = vor.u32 %v4329_v59, %v4326_v55  ;;  %v6531_v17 = vld [vmem:[%s7273_s23 + $0x38] sm:$0x1]  ;;  %v6454_v22 = vld [vmem:[%s7273_s23 + $0x48] sm:$0xf] }
  0xf8   : > { %v599_v49 = vadd.f32 %v544_v40, %v272_v26  ;;  %v6869_v50 = vpop.f32.mrb[10].mxu1  ;;  %v480_v12 = vpop.f32.mrb[9].mxu0  ;;  %v8180_v47 = vcombine.low %v4312_v18, %v4322_v10  ;;  %v4339_v58 = vrot.slane %v4337_v6, 4  ;;  %v585_v25 = vadd.f32 %v6852_v1, %v258_v38  ;;  %v6455_v30 = vld [vmem:[%s7273_s23 + $0x4c] sm:$0xf]  ;;  %v278_v2 = vld [vmem:[#allocation2 + $0xf0] sm:$0xff] }
  0xf9   : > { %633 = vst.msk [vmem:[#allocation2 + $0xd0] sm:$0xff] %vm183_vm8, %v601_v39  ;;  %v602_v11 = vadd.f32 %v6869_v50, %v275_v3  ;;  %v547_v7 = vpop.f32.mrb[11].mxu1  ;;  %v6853_v57 = vpop.f32.mrb[10].mxu0  ;;  %v583_v26 = vadd.f32 %v480_v12, %v256_v41  ;;  %v4331_v61 = vrot.slane %v4330_v43, 4  ;;  %v7213_v23 = vld [vmem:[%s7273_s23 + $0xb4] sm:$0xff]   ;;  %v4345_v33 = vrot.slane %v4343_v14, 5 }
  0xfa   : > { %631 = vst.msk [vmem:[#allocation2 + $0xc0] sm:$0xff] %vm183_vm8, %v599_v49  ;;  %v600_v16 = vadd.f32 %v547_v7, %v273_v9  ;;  %v483_v3 = vpop.f32.mrb[11].mxu0  ;;  %v586_v19 = vadd.f32 %v6853_v57, %v259_v4  ;;  %v6573_v9 = vrot.slane %v8167_v46, 9  ;;  %v4340_v18 = vor.u32 %v4339_v58, %v8169_v62  ;;  %617 = vst.msk [vmem:[#allocation2 + $0x50] sm:$0xff] %vm183_vm8, %v585_v25  ;;  %v276_v32 = vld [vmem:[#allocation2 + $0xe0] sm:$0xff]  ;;  %v279_v35 = vld [vmem:[#allocation2 + $0xf8] sm:$0xff] }
  0xfb   : > { %634 = vst.msk [vmem:[#allocation2 + $0xd8] sm:$0xff] %vm183_vm8, %v602_v11  ;;  %v584_v8 = vadd.f32 %v483_v3, %v257_v13  ;;  %615 = vst.msk [vmem:[#allocation2 + $0x40] sm:$0xff] %vm183_vm8, %v583_v26  ;;  %v5105_v36 = vrot.slane %v6530_v5, 5  ;;  %v5108_v37 = vrot.slane %v6531_v17, 5  ;;  %v4336_v27 = vsel %vm7345_vm7, %v4331_v61, %v8169_v62  ;;  %v6456_v15 = vld [vmem:[%s7273_s23 + $0x50] sm:$0x1] }
  0xfc   : > { %632 = vst.msk [vmem:[#allocation2 + $0xc8] sm:$0xff] %vm183_vm8, %v600_v16  ;;  %618 = vst.msk [vmem:[#allocation2 + $0x58] sm:$0xff] %vm183_vm8, %v586_v19  ;;  %v4348_v38 = vshrl.u32 %v6454_v22, 16  ;;  %v4351_v39 = vshll.u32 %v6454_v22, 16  ;;  %v4357_v40 = vshll.u32 %v6455_v30, 16  ;;  %v4341_v44 = vrot.slane %v4340_v18, 4  ;;  %7071 = vmatmul.mubr.msk.bf16.gmra.mrb[104].mxu0 %vm361_vm1, %v7213_v23  ;;  %7041 = vmatmul.mubr.msk.bf16.gmra.mrb[108].mxu1 %vm361_vm1, %v6360_v29 }
  0xfd   : > { %616 = vst.msk [vmem:[#allocation2 + $0x48] sm:$0xff] %vm183_vm8, %v584_v8  ;;  %v6532_v21 = vld [vmem:[%s7273_s23 + $0x3c] sm:$0xe]  ;;  %v6533_v34 = vld [vmem:[%s7273_s23 + $0x40] sm:$0xf]  ;;  %v277_v41 = vld [vmem:[#allocation2 + $0xe8] sm:$0xff]  ;;  %v8214_v46 = vsel %vm7338_vm6, %v6573_v9, %v5105_v36  ;;  %7080 = vmatprep.mubr.msk.bf16.mxu1 %vm361_vm1, %v8086_v56 }
  0xfe   : > { %v6872_v42 = vpop.f32.mrb[12].mxu1  ;;  %v5107_v49 = vrot.slane %v5105_v36, 4  ;;  %v6534_v50 = vld [vmem:[%s7273_s23 + $0x44] sm:$0x1]  ;;  %v4350_v1 = vrot.slane %v4348_v38, 4  ;;  %v4353_v4 = vrot.slane %v4351_v39, 5  ;;  %v4346_v10 = vsel %vm7345_vm7, %v4341_v44, %v4345_v33 }
  0xff   : > { %v605_v48 = vadd.f32 %v6872_v42, %v278_v2  ;;  %v560_v28 = vpop.f32.mrb[13].mxu1  ;;  %v7214_v55 = vld [vmem:[%s7273_s23 + $0xc0] sm:$0xff]   ;;  %v8218_v11 = vrot.slane %v4357_v40, 5  ;;  %v6856_v7 = vpop.f32.mrb[12].mxu0  ;;  %v4361_v5 = vshrl.u32 %v6455_v30, 16  ;;  %v8228_v57 = vcombine.low %v4336_v27, %v4346_v10  ;;  %v7215_v27 = vld [vmem:[%s7273_s23 + $0xcc] sm:$0xff]  }
 0x100   : > { %v603_v59 = vadd.f32 %v560_v28, %v276_v32  ;;  %v6873_v62 = vpop.f32.mrb[14].mxu1  ;;  %v8225_v13 = vsel %vm7338_vm6, %v5107_v49, %v5108_v37  ;;  %v6457_v16 = vld [vmem:[%s7273_s23 + $0x54] sm:$0xf]  ;;  %v496_v43 = vpop.f32.mrb[13].mxu0  ;;  %v4354_v58 = vor.u32 %v4353_v4, %v4350_v1  ;;  %v6458_v14 = vld [vmem:[%s7273_s23 + $0x58] sm:$0xf]  ;;  %7074 = vmatprep.mubr.msk.bf16.mxu0 %vm361_vm1, %v7214_v55 }
 0x101   : > { %637 = vst.msk [vmem:[#allocation2 + $0xf0] sm:$0xff] %vm183_vm8, %v605_v48  ;;  %v606_v6 = vadd.f32 %v6873_v62, %v279_v35  ;;  %v563_v12 = vpop.f32.mrb[15].mxu1  ;;  %v6590_v22 = vcombine.low %v8214_v46, %v8225_v13  ;;  %v6857_v25 = vpop.f32.mrb[14].mxu0  ;;  %v4363_v26 = vrot.slane %v4361_v5, 4  ;;  %v4367_v3 = vshll.u32 %v6456_v15, 16  ;;  %v262_v37 = vld [vmem:[#allocation2 + $0x70] sm:$0xff] }
 0x102   : > { %635 = vst.msk [vmem:[#allocation2 + $0xe0] sm:$0xff] %vm183_vm8, %v603_v59  ;;  %v604_v17 = vadd.f32 %v563_v12, %v277_v41  ;;  %v6574_v30 = vrot.slane %v6532_v21, 9  ;;  %v5112_v61 = vrot.slane %v6533_v34, 5  ;;  %v499_v2 = vpop.f32.mrb[15].mxu0  ;;  %v4355_v19 = vrot.slane %v4354_v58, 4  ;;  %v260_v15 = vld [vmem:[#allocation2 + $0x60] sm:$0xff] }
 0x103   : > { %638 = vst.msk [vmem:[#allocation2 + $0xf8] sm:$0xff] %vm183_vm8, %v606_v6  ;;  %v5115_v8 = vrot.slane %v6534_v50, 5  ;;  %v6459_v9 = vld [vmem:[%s7273_s23 + $0x5c] sm:$0x1]  ;;  %v4372_v18 = vshrl.u32 %v6457_v16, 16  ;;  %v4375_v33 = vshll.u32 %v6457_v16, 16  ;;  %v4364_v23 = vor.u32 %v4363_v26, %v8218_v11 }
 0x104   : > { %636 = vst.msk [vmem:[#allocation2 + $0xe8] sm:$0xff] %vm183_vm8, %v604_v17  ;;  %v4369_v32 = vrot.slane %v4367_v3, 5  ;;  %v8246_v35 = vsel %vm7338_vm6, %v6574_v30, %v5112_v61  ;;  %v5114_v36 = vrot.slane %v5112_v61, 4  ;;  %v4360_v42 = vsel %vm7345_vm7, %v4355_v19, %v8218_v11  ;;  %v1076_v44 = vld [vmem:[#allocation2 + $0x10] sm:$0xff]  ;;  %v263_v48 = vld [vmem:[#allocation2 + $0x78] sm:$0xff]  ;;  %v261_v28 = vld [vmem:[#allocation2 + $0x68] sm:$0xff]  ;;  %7075 = vmatmul.mubr.msk.bf16.gmra.mrb[108].mxu0 %vm361_vm1, %v7215_v27  ;;  %7081 = vmatmul.mubr.msk.bf16.vlgmr.msra.gmra.mrb[112].mxu1 %vm361_vm1, %v8141_v60 }
 0x105   : > { %v4374_v52 = vrot.slane %v4372_v18, 4  ;;  %v4377_v0 = vrot.slane %v4375_v33, 5  ;;  %v4381_v29 = vshll.u32 %v6458_v14, 16  ;;  %v4365_v39 = vrot.slane %v4364_v23, 4  ;;  %v1074_v59 = vld [vmem:[#allocation2] sm:$0xff]  ;;  %v1077_v62 = vld [vmem:[#allocation2 + $0x18] sm:$0xff]  ;;  %7114 = vmatprep.mubr.msk.bf16.mxu0 %vm361_vm1, %v6588_v51  ;;  %7084 = vmatprep.mubr.msk.bf16.mxu1 %vm361_vm1, %v8180_v47 }
 0x106   : > { %v6878_v38 = vpop.f32.mrb[16].mxu1  ;;  %v8256_v40 = vsel %vm7338_vm6, %v5114_v36, %v5115_v8  ;;  %v4385_v21 = vshrl.u32 %v6458_v14, 16  ;;  %v4391_v34 = vshll.u32 %v6459_v9, 16  ;;  %v589_v55 = vadd.f32 %v6856_v7, %v262_v37  ;;  %v6535_v4 = vld [vmem:[%s7273_s23 + $0x48] sm:$0xe]  ;;  %v1080_v13 = vld [vmem:[#allocation2 + $0x30] sm:$0xff] }
 0x107   : > { %v1241_v56 = vpop.f32.mrb[17].mxu1  ;;  %v6591_v41 = vcombine.low %v8246_v35, %v8256_v40  ;;  %v4378_v49 = vor.u32 %v4377_v0, %v4374_v52  ;;  %v8260_v50 = vrot.slane %v4381_v29, 5  ;;  %v8263_v11 = vpop.f32.mrb[16].mxu0  ;;  %v4370_v10 = vsel %vm7345_vm7, %v4365_v39, %v4369_v32  ;;  %v6536_v17 = vld [vmem:[%s7273_s23 + $0x4c] sm:$0xf] }
 0x108   : > { %v6879_v1 = vpop.f32.mrb[18].mxu1  ;;  %v4387_v6 = vrot.slane %v4385_v21, 4  ;;  %v4393_v12 = vrot.slane %v4391_v34, 5  ;;  %v587_v5 = vadd.f32 %v496_v43, %v260_v15  ;;  %v8268_v58 = vpop.f32.mrb[17].mxu0  ;;  %v8270_v7 = vcombine.low %v4360_v42, %v4370_v10  ;;  %621 = vst.msk [vmem:[#allocation2 + $0x70] sm:$0xff] %vm183_vm8, %v589_v55  ;;  %v1075_v33 = vld [vmem:[#allocation2 + $0x8] sm:$0xff] }
 0x109   : > { %v1244_v16 = vpop.f32.mrb[19].mxu1  ;;  %v4379_v14 = vrot.slane %v4378_v49, 4  ;;  %v1370_v26 = vadd.f32 %v6878_v38, %v1076_v44  ;;  %v590_v3 = vadd.f32 %v6857_v25, %v263_v48  ;;  %v6537_v30 = vld [vmem:[%s7273_s23 + $0x50] sm:$0x1]  ;;  %v6460_v61 = vld [vmem:[%s7273_s23 + $0x60] sm:$0xf]  ;;  %v1368_v8 = vadd.f32 %v1241_v56, %v1074_v59 }
 0x10a   : > { %v8275_v19 = vpop.f32.mrb[18].mxu0  ;;  %v4388_v43 = vor.u32 %v4387_v6, %v8260_v50  ;;  %619 = vst.msk [vmem:[#allocation2 + $0x60] sm:$0xff] %vm183_vm8, %v587_v5  ;;  %v588_v9 = vadd.f32 %v499_v2, %v261_v28  ;;  %v1371_v18 = vadd.f32 %v6879_v1, %v1077_v62  ;;  %v6461_v23 = vld [vmem:[%s7273_s23 + $0x64] sm:$0xf]  ;;  %v1369_v2 = vadd.f32 %v1244_v16, %v1075_v33  ;;  %v6462_v27 = vld [vmem:[%s7273_s23 + $0x68] sm:$0x1] }
 0x10b   : > { %v8281_v32 = vpop.f32.mrb[19].mxu0  ;;  %v4384_v25 = vsel %vm7345_vm7, %v4379_v14, %v8260_v50  ;;  %1402 = vst.msk [vmem:[#allocation2 + $0x10] sm:$0xff] %vm183_vm8, %v1370_v26  ;;  %622 = vst.msk [vmem:[#allocation2 + $0x78] sm:$0xff] %vm183_vm8, %v590_v3  ;;  %v6575_v36 = vrot.slane %v6535_v4, 9  ;;  %v5119_v37 = vrot.slane %v6536_v17, 5  ;;  %v5122_v45 = vrot.slane %v6537_v30, 5 }
 0x10c   : > { %v6538_v42 = vld [vmem:[%s7273_s23 + $0x54] sm:$0xe]  ;;  %v4389_v20 = vrot.slane %v4388_v43, 4  ;;  %1400 = vst.msk [vmem:[#allocation2] sm:$0xff] %vm183_vm8, %v1368_v8  ;;  %620 = vst.msk [vmem:[#allocation2 + $0x68] sm:$0xff] %vm183_vm8, %v588_v9  ;;  %v4396_v51 = vshrl.u32 %v6460_v61, 16  ;;  %7115 = vmatmul.mubr.msk.bf16.vlgmr.msra.gmra.mrb[112].mxu0 %vm361_vm1, %v6589_v24  ;;  %7085 = vmatmul.mubr.msk.bf16.gmra.mrb[116].mxu1 %vm361_vm1, %v8228_v57 }
 0x10d   : > { %1403 = vst.msk [vmem:[#allocation2 + $0x18] sm:$0xff] %vm183_vm8, %v1371_v18  ;;  %v4399_v52 = vshll.u32 %v6460_v61, 16  ;;  %v6539_v0 = vld [vmem:[%s7273_s23 + $0x58] sm:$0xf]  ;;  %1401 = vst.msk [vmem:[#allocation2 + $0x8] sm:$0xff] %vm183_vm8, %v1369_v2  ;;  %v8305_v60 = vsel %vm7338_vm6, %v6575_v36, %v5119_v37  ;;  %v5121_v29 = vrot.slane %v5119_v37, 4  ;;  %7118 = vmatprep.mubr.msk.bf16.mxu0 %vm361_vm1, %v6590_v22  ;;  %7088 = vmatprep.mubr.msk.bf16.mxu1 %vm361_vm1, %v8270_v7 }
 0x10e   : > { %v4405_v15 = vshll.u32 %v6461_v23, 16  ;;  %v4409_v38 = vshrl.u32 %v6461_v23, 16  ;;  %v6540_v39 = vld [vmem:[%s7273_s23 + $0x5c] sm:$0x1]  ;;  %v4394_v21 = vsel %vm7345_vm7, %v4389_v20, %v4393_v12  ;;  %v4398_v34 = vrot.slane %v4396_v51, 4  ;;  %v6882_v47 = vpop.f32.mrb[20].mxu1 }
 0x10f   : > { %v4401_v44 = vrot.slane %v4399_v52, 5  ;;  %v4415_v48 = vshll.u32 %v6462_v27, 16  ;;  %v6463_v56 = vld [vmem:[%s7273_s23 + $0x6c] sm:$0xf]  ;;  %v8311_v28 = vcombine.low %v4384_v25, %v4394_v21  ;;  %v8315_v49 = vsel %vm7338_vm6, %v5121_v29, %v5122_v45  ;;  %v6464_v59 = vld [vmem:[%s7273_s23 + $0x70] sm:$0xf] }
 0x110   : > { %v4407_v50 = vrot.slane %v4405_v15, 5  ;;  %v4411_v55 = vrot.slane %v4409_v38, 4  ;;  %v1257_v62 = vpop.f32.mrb[21].mxu1  ;;  %v6592_v1 = vcombine.low %v8305_v60, %v8315_v49  ;;  %v6576_v6 = vrot.slane %v6538_v42, 9  ;;  %v6465_v14 = vld [vmem:[%s7273_s23 + $0x74] sm:$0x1] }
 0x111   : > { %v4402_v4 = vor.u32 %v4401_v44, %v4398_v34  ;;  %v4417_v10 = vrot.slane %v4415_v48, 5  ;;  %v6883_v12 = vpop.f32.mrb[22].mxu1  ;;  %v5126_v16 = vrot.slane %v6539_v0, 5  ;;  %v5129_v17 = vrot.slane %v6540_v39, 5  ;;  %v8333_v31 = vpop.f32.mrb[20].mxu0  ;;  %v1078_v20 = vld [vmem:[#allocation2 + $0x20] sm:$0xff] }
 0x112   : > { %v4412_v5 = vor.u32 %v4411_v55, %v4407_v50  ;;  %v4420_v26 = vshrl.u32 %v6463_v56, 16  ;;  %v1260_v3 = vpop.f32.mrb[23].mxu1  ;;  %v4423_v61 = vshll.u32 %v6463_v56, 16  ;;  %v4429_v43 = vshll.u32 %v6464_v59, 16  ;;  %v1645_v9 = vld [vmem:[#allocation2 + $0x10] sm:$0xff]  ;;  %v8339_v36 = vpop.f32.mrb[21].mxu0 }
 0x113   : > { %v4403_v30 = vrot.slane %v4402_v4, 4  ;;  %v4433_v8 = vshrl.u32 %v6464_v59, 16  ;;  %v8331_v33 = vsel %vm7338_vm6, %v6576_v6, %v5126_v16  ;;  %v5128_v23 = vrot.slane %v5126_v16, 4  ;;  %v1643_v22 = vld [vmem:[#allocation2] sm:$0xff]  ;;  %v1081_v51 = vld [vmem:[#allocation2 + $0x38] sm:$0xff]  ;;  %v8350_v52 = vpop.f32.mrb[22].mxu0 }
 0x114   : > { %v4413_v18 = vrot.slane %v4412_v5, 4  ;;  %v4422_v25 = vrot.slane %v4420_v26, 4  ;;  %v4425_v24 = vrot.slane %v4423_v61, 5  ;;  %v4431_v2 = vrot.slane %v4429_v43, 5  ;;  %v1646_v45 = vld [vmem:[#allocation2 + $0x18] sm:$0xff]  ;;  %v1644_v38 = vld [vmem:[#allocation2 + $0x8] sm:$0xff]  ;;  %7119 = vmatmul.mubr.msk.bf16.gmra.mrb[116].mxu0 %vm361_vm1, %v6591_v41  ;;  %7089 = vmatmul.mubr.msk.bf16.gmra.mrb[120].mxu1 %vm361_vm1, %v8311_v28 }
 0x115   : > { %v4408_v63 = vsel %vm7345_vm7, %v4403_v30, %v4407_v50  ;;  %v4435_v46 = vrot.slane %v4433_v8, 4  ;;  %v8347_v57 = vsel %vm7338_vm6, %v5128_v23, %v5129_v17  ;;  %v4439_v27 = vshll.u32 %v6465_v14, 16  ;;  %v6541_v39 = vld [vmem:[%s7273_s23 + $0x60] sm:$0xe]  ;;  %v6542_v21 = vld [vmem:[%s7273_s23 + $0x64] sm:$0xf]  ;;  %7122 = vmatprep.mubr.msk.bf16.mxu0 %vm361_vm1, %v6592_v1 }
 0x116   : > { %v4418_v37 = vsel %vm7345_vm7, %v4413_v18, %v4417_v10  ;;  %v1939_v42 = vadd.f32 %v8263_v11, %v1645_v9  ;;  %v6593_v7 = vcombine.low %v8331_v33, %v8347_v57  ;;  %v4426_v29 = vor.u32 %v4425_v24, %v4422_v25  ;;  %v8356_v34 = vpop.f32.mrb[23].mxu0  ;;  %v1079_v50 = vld [vmem:[#allocation2 + $0x28] sm:$0xff]  ;;  %v6466_v59 = vld [vmem:[%s7273_s23 + $0x78] sm:$0xf]  ;;  %v6467_v16 = vld [vmem:[%s7273_s23 + $0x7c] sm:$0xf] }
 0x117   : > { %v6497_v0 = vcombine.low %v4408_v63, %v4418_v37  ;;  %v4436_v15 = vor.u32 %v4435_v46, %v4431_v2  ;;  %v4441_v11 = vrot.slane %v4439_v27, 5  ;;  %v1374_v44 = vadd.f32 %v6882_v47, %v1080_v13  ;;  %v6543_v55 = vld [vmem:[%s7273_s23 + $0x68] sm:$0x1]  ;;  %v6468_v17 = vld [vmem:[%s7273_s23 + $0x80] sm:$0x1]  ;;  %v8382_v43 = vpop.f32.mrb[24].mxu1 }
 0x118   : > { %1971 = vst.msk [vmem:[#allocation2 + $0x10] sm:$0xff] %vm183_vm8, %v1939_v42  ;;  %v1937_v48 = vadd.f32 %v8268_v58, %v1643_v22  ;;  %v1372_v56 = vadd.f32 %v1257_v62, %v1078_v20  ;;  %v4427_v4 = vrot.slane %v4426_v29, 4  ;;  %v1940_v6 = vadd.f32 %v8275_v19, %v1646_v45  ;;  %v6544_v26 = vld [vmem:[%s7273_s23 + $0x6c] sm:$0xe]  ;;  %v6545_v30 = vld [vmem:[%s7273_s23 + $0x70] sm:$0xf] }
 0x119   : > { %v4437_v10 = vrot.slane %v4436_v15, 4  ;;  %v1375_v5 = vadd.f32 %v6883_v12, %v1081_v51  ;;  %1406 = vst.msk [vmem:[#allocation2 + $0x30] sm:$0xff] %vm183_vm8, %v1374_v44  ;;  %v1938_v58 = vadd.f32 %v8281_v32, %v1644_v38  ;;  %v1373_v47 = vadd.f32 %v1260_v3, %v1079_v50  ;;  %v6546_v61 = vld [vmem:[%s7273_s23 + $0x74] sm:$0x1]  ;;  %v6469_v9 = vld [vmem:[%s7273_s23 + $0x84] sm:$0xf]  ;;  %7092 = vmatprep.mubr.msk.bf16.mxu1 %vm361_vm1, %v6497_v0 }
 0x11a   : > { %1969 = vst.msk [vmem:[#allocation2] sm:$0xff] %vm183_vm8, %v1937_v48  ;;  %1404 = vst.msk [vmem:[#allocation2 + $0x20] sm:$0xff] %vm183_vm8, %v1372_v56  ;;  %v6577_v62 = vrot.slane %v6541_v39, 9  ;;  %v5133_v14 = vrot.slane %v6542_v21, 5  ;;  %v4432_v19 = vsel %vm7345_vm7, %v4427_v4, %v4431_v2  ;;  %v5136_v32 = vrot.slane %v6543_v55, 5  ;;  %v1273_v18 = vpop.f32.mrb[25].mxu1 }
 0x11b   : > { %v4442_v12 = vsel %vm7345_vm7, %v4437_v10, %v4441_v11  ;;  %1972 = vst.msk [vmem:[#allocation2 + $0x18] sm:$0xff] %vm183_vm8, %v1940_v6  ;;  %1407 = vst.msk [vmem:[#allocation2 + $0x38] sm:$0xff] %vm183_vm8, %v1375_v5  ;;  %v4444_v3 = vshrl.u32 %v6466_v59, 16  ;;  %v4447_v8 = vshll.u32 %v6466_v59, 16  ;;  %v4453_v60 = vshll.u32 %v6467_v16, 16  ;;  %v8395_v25 = vpop.f32.mrb[26].mxu1 }
 0x11c   : > { %v6498_v35 = vcombine.low %v4432_v19, %v4442_v12  ;;  %1970 = vst.msk [vmem:[#allocation2 + $0x8] sm:$0xff] %vm183_vm8, %v1938_v58  ;;  %1405 = vst.msk [vmem:[#allocation2 + $0x28] sm:$0xff] %vm183_vm8, %v1373_v47  ;;  %v5134_v40 = vsel %vm7338_vm6, %v6577_v62, %v5133_v14  ;;  %v5135_v41 = vrot.slane %v5133_v14, 4  ;;  %v4457_v49 = vshrl.u32 %v6467_v16, 16  ;;  %v6470_v13 = vld [vmem:[%s7273_s23 + $0x88] sm:$0xf]  ;;  %7123 = vmatmul.mubr.msk.bf16.gmra.mrb[120].mxu0 %vm361_vm1, %v6593_v7 }
 0x11d   : > { %v4446_v23 = vrot.slane %v4444_v3, 4  ;;  %v4463_v1 = vshll.u32 %v6468_v17, 16  ;;  %v4449_v24 = vrot.slane %v4447_v8, 5  ;;  %v6578_v2 = vrot.slane %v6544_v26, 9  ;;  %v8401_v22 = vpop.f32.mrb[27].mxu1  ;;  %v8408_v15 = vpop.f32.mrb[24].mxu0 }
 0x11e   : > { %v5137_v63 = vsel %vm7338_vm6, %v5135_v41, %v5136_v32  ;;  %v5140_v46 = vrot.slane %v6545_v30, 5  ;;  %v4455_v28 = vrot.slane %v4453_v60, 5  ;;  %v4459_v27 = vrot.slane %v4457_v49, 4  ;;  %v6471_v20 = vld [vmem:[%s7273_s23 + $0x8c] sm:$0x1]  ;;  %v8410_v44 = vpop.f32.mrb[25].mxu0  ;;  %7093 = vmatmul.mubr.msk.bf16.gmra.mrb[124].mxu1 %vm361_vm1, %v6498_v35 }
 0x11f   : > { %v6594_v37 = vcombine.low %v5134_v40, %v5137_v63  ;;  %v4465_v42 = vrot.slane %v4463_v1, 5  ;;  %v4450_v45 = vor.u32 %v4449_v24, %v4446_v23  ;;  %v5143_v29 = vrot.slane %v6546_v61, 5  ;;  %v8416_v4 = vpop.f32.mrb[26].mxu0  ;;  %v1084_v17 = vld [vmem:[#allocation2 + $0x50] sm:$0xff]  ;;  %v1082_v14 = vld [vmem:[#allocation2 + $0x40] sm:$0xff]  ;;  %v1085_v61 = vld [vmem:[#allocation2 + $0x58] sm:$0xff] }
 0x120   : > { %v8406_v51 = vsel %vm7338_vm6, %v6578_v2, %v5140_v46  ;;  %v5142_v0 = vrot.slane %v5140_v46, 4  ;;  %v4460_v38 = vor.u32 %v4459_v27, %v4455_v28  ;;  %v4468_v39 = vshrl.u32 %v6469_v9, 16  ;;  %v1649_v59 = vld [vmem:[#allocation2 + $0x30] sm:$0xff]  ;;  %v8424_v47 = vpop.f32.mrb[27].mxu0  ;;  %v6547_v40 = vld [vmem:[%s7273_s23 + $0x78] sm:$0xe] }
 0x121   : > { %v4471_v21 = vshll.u32 %v6469_v9, 16  ;;  %v4477_v11 = vshll.u32 %v6470_v13, 16  ;;  %v4451_v48 = vrot.slane %v4450_v45, 4  ;;  %v4481_v50 = vshrl.u32 %v6470_v13, 16  ;;  %v1647_v58 = vld [vmem:[#allocation2 + $0x20] sm:$0xff]  ;;  %7126 = vmatprep.mubr.msk.bf16.mxu0 %vm361_vm1, %v6594_v37  ;;  %v1083_v49 = vld [vmem:[#allocation2 + $0x48] sm:$0xff] }
 0x122   : > { %v8414_v56 = vsel %vm7338_vm6, %v5142_v0, %v5143_v29  ;;  %v4487_v55 = vshll.u32 %v6471_v20, 16  ;;  %v4461_v10 = vrot.slane %v4460_v38, 4  ;;  %v4470_v5 = vrot.slane %v4468_v39, 4  ;;  %v1650_v26 = vld [vmem:[#allocation2 + $0x38] sm:$0xff]  ;;  %v6549_v35 = vld [vmem:[%s7273_s23 + $0x80] sm:$0x1] }
 0x123   : > { %v6595_v6 = vcombine.low %v8406_v51, %v8414_v56  ;;  %v4473_v16 = vrot.slane %v4471_v21, 5  ;;  %v4456_v62 = vsel %vm7345_vm7, %v4451_v48, %v4455_v28  ;;  %v4479_v33 = vrot.slane %v4477_v11, 5  ;;  %v1648_v30 = vld [vmem:[#allocation2 + $0x28] sm:$0xff]  ;;  %v6548_v41 = vld [vmem:[%s7273_s23 + $0x7c] sm:$0xf]  ;;  %v8446_v13 = vpop.f32.mrb[28].mxu1 }
 0x124   : > { %v4483_v57 = vrot.slane %v4481_v50, 4  ;;  %v4489_v7 = vrot.slane %v4487_v55, 5  ;;  %v4466_v19 = vsel %vm7345_vm7, %v4461_v10, %v4465_v42  ;;  %v1943_v32 = vadd.f32 %v8333_v31, %v1649_v59  ;;  %v6472_v1 = vld [vmem:[%s7273_s23 + $0x90] sm:$0xf]  ;;  %v6473_v2 = vld [vmem:[%s7273_s23 + $0x94] sm:$0xf] }
 0x125   : > { %v4474_v12 = vor.u32 %v4473_v16, %v4470_v5  ;;  %v1378_v3 = vadd.f32 %v8382_v43, %v1084_v17  ;;  %v6499_v8 = vcombine.low %v4456_v62, %v4466_v19  ;;  %v1941_v23 = vadd.f32 %v8339_v36, %v1647_v58  ;;  %v6474_v46 = vld [vmem:[%s7273_s23 + $0x98] sm:$0x1]  ;;  %v6550_v28 = vld [vmem:[%s7273_s23 + $0x84] sm:$0xe]  ;;  %v6552_v21 = vld [vmem:[%s7273_s23 + $0x8c] sm:$0x1]  ;;  %7127 = vmatmul.mubr.msk.bf16.gmra.mrb[124].mxu0 %vm361_vm1, %v6595_v6 }
 0x126   : > { %v4484_v9 = vor.u32 %v4483_v57, %v4479_v33  ;;  %v1376_v60 = vadd.f32 %v1273_v18, %v1082_v14  ;;  %1975 = vst.msk [vmem:[#allocation2 + $0x30] sm:$0xff] %vm183_vm8, %v1943_v32  ;;  %v1944_v31 = vadd.f32 %v8350_v52, %v1650_v26  ;;  %v1379_v43 = vadd.f32 %v8395_v25, %v1085_v61  ;;  %v8453_v25 = vpop.f32.mrb[29].mxu1  ;;  %v6475_v10 = vld [vmem:[%s7273_s23 + $0x9c] sm:$0xf]  ;;  %v6476_v62 = vld [vmem:[%s7273_s23 + $0xa0] sm:$0xf] }
 0x127   : > { %v4475_v63 = vrot.slane %v4474_v12, 4  ;;  %1410 = vst.msk [vmem:[#allocation2 + $0x50] sm:$0xff] %vm183_vm8, %v1378_v3  ;;  %v1942_v24 = vadd.f32 %v8356_v34, %v1648_v30  ;;  %7096 = vmatprep.mubr.msk.bf16.mxu1 %vm361_vm1, %v6499_v8  ;;  %1973 = vst.msk [vmem:[#allocation2 + $0x20] sm:$0xff] %vm183_vm8, %v1941_v23  ;;  %v1377_v18 = vadd.f32 %v8401_v22, %v1083_v49  ;;  %v6579_v37 = vrot.slane %v6547_v40, 9  ;;  %v6551_v22 = vld [vmem:[%s7273_s23 + $0x88] sm:$0xf] }
 0x128   : > { %v4485_v36 = vrot.slane %v4484_v9, 4  ;;  %1408 = vst.msk [vmem:[#allocation2 + $0x40] sm:$0xff] %vm183_vm8, %v1376_v60  ;;  %v5147_v52 = vrot.slane %v6548_v41, 5  ;;  %1976 = vst.msk [vmem:[#allocation2 + $0x38] sm:$0xff] %vm183_vm8, %v1944_v31  ;;  %v5150_v27 = vrot.slane %v6549_v35, 5  ;;  %v4492_v42 = vshrl.u32 %v6472_v1, 16 }
 0x129   : > { %v4480_v34 = vsel %vm7345_vm7, %v4475_v63, %v4479_v33  ;;  %1411 = vst.msk [vmem:[#allocation2 + $0x58] sm:$0xff] %vm183_vm8, %v1379_v43  ;;  %1974 = vst.msk [vmem:[#allocation2 + $0x28] sm:$0xff] %vm183_vm8, %v1942_v24  ;;  %v4495_v20 = vshll.u32 %v6472_v1, 16  ;;  %v8461_v45 = vpop.f32.mrb[30].mxu1  ;;  %v4501_v39 = vshll.u32 %v6473_v2, 16  ;;  %v4505_v59 = vshrl.u32 %v6473_v2, 16 }
 0x12a   : > { %v4490_v0 = vsel %vm7345_vm7, %v4485_v36, %v4489_v7  ;;  %1409 = vst.msk [vmem:[#allocation2 + $0x48] sm:$0xff] %vm183_vm8, %v1377_v18  ;;  %v5148_v29 = vsel %vm7338_vm6, %v6579_v37, %v5147_v52  ;;  %v5149_v38 = vrot.slane %v5147_v52, 4  ;;  %v8469_v11 = vpop.f32.mrb[31].mxu1  ;;  %v4494_v50 = vrot.slane %v4492_v42, 4  ;;  %v8479_v33 = vpop.f32.mrb[28].mxu0  ;;  %v1088_v24 = vld [vmem:[#allocation2 + $0x70] sm:$0xff] }
 0x12b   : > { %v6500_v48 = vcombine.low %v4480_v34, %v4490_v0  ;;  %v4497_v55 = vrot.slane %v4495_v20, 5  ;;  %v4503_v16 = vrot.slane %v4501_v39, 5  ;;  %v4511_v17 = vshll.u32 %v6474_v46, 16  ;;  %v6477_v7 = vld [vmem:[%s7273_s23 + $0xa4] sm:$0x1]  ;;  %v8483_v14 = vpop.f32.mrb[29].mxu0 }
 0x12c   : > { %v5151_v5 = vsel %vm7338_vm6, %v5149_v38, %v5150_v27  ;;  %v6580_v58 = vrot.slane %v6550_v28, 9  ;;  %v4507_v6 = vrot.slane %v4505_v59, 4  ;;  %v5154_v57 = vrot.slane %v6551_v22, 5  ;;  %v8485_v32 = vpop.f32.mrb[30].mxu0  ;;  %v1086_v52 = vld [vmem:[#allocation2 + $0x60] sm:$0xff]  ;;  %v1089_v34 = vld [vmem:[#allocation2 + $0x78] sm:$0xff] }
 0x12d   : > { %7097 = vmatmul.mubr.msk.bf16.gmra.mrb[128].mxu1 %vm361_vm1, %v6500_v48  ;;  %v6596_v51 = vcombine.low %v5148_v29, %v5151_v5  ;;  %v4498_v56 = vor.u32 %v4497_v55, %v4494_v50  ;;  %v4513_v26 = vrot.slane %v4511_v17, 5  ;;  %v5157_v30 = vrot.slane %v6552_v21, 5  ;;  %v8490_v8 = vpop.f32.mrb[31].mxu0  ;;  %v6553_v29 = vld [vmem:[%s7273_s23 + $0x90] sm:$0xe]  ;;  %v8502_v39 = vpop.f32.mrb[32].mxu1 }
 0x12e   : > { %v4516_v19 = vshrl.u32 %v6475_v10, 16  ;;  %v4519_v12 = vshll.u32 %v6475_v10, 16  ;;  %v4508_v61 = vor.u32 %v4507_v6, %v4503_v16  ;;  %v5155_v40 = vsel %vm7338_vm6, %v6580_v58, %v5154_v57  ;;  %v1653_v35 = vld [vmem:[#allocation2 + $0x50] sm:$0xff]  ;;  %v6555_v59 = vld [vmem:[%s7273_s23 + $0x98] sm:$0x1]  ;;  %v8508_v5 = vpop.f32.mrb[33].mxu1 }
 0x12f   : > { %7130 = vmatprep.mubr.msk.bf16.mxu0 %vm361_vm1, %v6596_v51  ;;  %v4499_v3 = vrot.slane %v4498_v56, 4  ;;  %v5156_v41 = vrot.slane %v5154_v57, 4  ;;  %v4525_v60 = vshll.u32 %v6476_v62, 16  ;;  %v4529_v49 = vshrl.u32 %v6476_v62, 16  ;;  %v1651_v2 = vld [vmem:[#allocation2 + $0x40] sm:$0xff]  ;;  %v1087_v58 = vld [vmem:[#allocation2 + $0x68] sm:$0xff] }
 0x130   : > { %v4518_v9 = vrot.slane %v4516_v19, 4  ;;  %v4521_v23 = vrot.slane %v4519_v12, 5  ;;  %v4509_v63 = vrot.slane %v4508_v61, 4  ;;  %v4535_v43 = vshll.u32 %v6477_v7, 16  ;;  %v1654_v28 = vld [vmem:[#allocation2 + $0x58] sm:$0xff]  ;;  %v8518_v51 = vpop.f32.mrb[34].mxu1 }
 0x131   : > { %v4504_v1 = vsel %vm7345_vm7, %v4499_v3, %v4503_v16  ;;  %v5158_v31 = vsel %vm7338_vm6, %v5156_v41, %v5157_v30  ;;  %v4527_v18 = vrot.slane %v4525_v60, 5  ;;  %v4531_v37 = vrot.slane %v4529_v49, 4  ;;  %v1652_v27 = vld [vmem:[#allocation2 + $0x48] sm:$0xff]  ;;  %v6554_v38 = vld [vmem:[%s7273_s23 + $0x94] sm:$0xf] }
 0x132   : > { %v6597_v46 = vcombine.low %v5155_v40, %v5158_v31  ;;  %v4522_v36 = vor.u32 %v4521_v23, %v4518_v9  ;;  %v4514_v42 = vsel %vm7345_vm7, %v4509_v63, %v4513_v26  ;;  %v4537_v20 = vrot.slane %v4535_v43, 5  ;;  %v6478_v10 = vld [vmem:[%s7273_s23 + $0xa8] sm:$0xf]  ;;  %v6480_v62 = vld [vmem:[%s7273_s23 + $0xb0] sm:$0x1]  ;;  %v8538_v9 = vpop.f32.mrb[32].mxu0 }
 0x133   : > { %v1947_v22 = vadd.f32 %v8408_v15, %v1653_v35  ;;  %v1382_v0 = vadd.f32 %v8446_v13, %v1088_v24  ;;  %v6501_v21 = vcombine.low %v4504_v1, %v4514_v42  ;;  %v4532_v50 = vor.u32 %v4531_v37, %v4527_v18  ;;  %v6557_v57 = vld [vmem:[%s7273_s23 + $0xa0] sm:$0xf]  ;;  %v6481_v41 = vld [vmem:[%s7273_s23 + $0xb4] sm:$0xf]  ;;  %v6482_v1 = vld [vmem:[%s7273_s23 + $0xb8] sm:$0xf] }
 0x134   : > { %7131 = vmatmul.mubr.msk.bf16.gmra.mrb[128].mxu0 %vm361_vm1, %v6597_v46  ;;  %v4523_v48 = vrot.slane %v4522_v36, 4  ;;  %v1945_v55 = vadd.f32 %v8410_v44, %v1651_v2  ;;  %v1380_v15 = vadd.f32 %v8453_v25, %v1086_v52  ;;  %v1948_v13 = vadd.f32 %v8416_v4, %v1654_v28  ;;  %v6479_v44 = vld [vmem:[%s7273_s23 + $0xac] sm:$0xf]  ;;  %v8543_v63 = vpop.f32.mrb[33].mxu0 }
 0x135   : > { %1979 = vst.msk [vmem:[#allocation2 + $0x50] sm:$0xff] %vm183_vm8, %v1947_v22  ;;  %1414 = vst.msk [vmem:[#allocation2 + $0x70] sm:$0xff] %vm183_vm8, %v1382_v0  ;;  %v1383_v16 = vadd.f32 %v8461_v45, %v1089_v34  ;;  %v1946_v17 = vadd.f32 %v8424_v47, %v1652_v27  ;;  %7100 = vmatprep.mubr.msk.bf16.mxu1 %vm361_vm1, %v6501_v21  ;;  %v4533_v6 = vrot.slane %v4532_v50, 4  ;;  %v6581_v25 = vrot.slane %v6553_v29, 9  ;;  %v6556_v45 = vld [vmem:[%s7273_s23 + $0x9c] sm:$0xe] }
 0x136   : > { %v4528_v56 = vsel %vm7345_vm7, %v4523_v48, %v4527_v18  ;;  %1977 = vst.msk [vmem:[#allocation2 + $0x40] sm:$0xff] %vm183_vm8, %v1945_v55  ;;  %v1381_v4 = vadd.f32 %v8469_v11, %v1087_v58  ;;  %v8527_v47 = vpop.f32.mrb[35].mxu1  ;;  %1412 = vst.msk [vmem:[#allocation2 + $0x60] sm:$0xff] %vm183_vm8, %v1380_v15  ;;  %v5161_v7 = vrot.slane %v6554_v38, 5  ;;  %v5164_v26 = vrot.slane %v6555_v59, 5  ;;  %v8545_v46 = vpop.f32.mrb[34].mxu0 }
 0x137   : > { %1980 = vst.msk [vmem:[#allocation2 + $0x58] sm:$0xff] %vm183_vm8, %v1948_v13  ;;  %1415 = vst.msk [vmem:[#allocation2 + $0x78] sm:$0xff] %vm183_vm8, %v1383_v16  ;;  %v4540_v30 = vshrl.u32 %v6478_v10, 16  ;;  %v4543_v19 = vshll.u32 %v6478_v10, 16  ;;  %v6558_v11 = vld [vmem:[%s7273_s23 + $0xa4] sm:$0x1]  ;;  %v4538_v12 = vsel %vm7345_vm7, %v4533_v6, %v4537_v20 }
 0x138   : > { %1978 = vst.msk [vmem:[#allocation2 + $0x48] sm:$0xff] %vm183_vm8, %v1946_v17  ;;  %1413 = vst.msk [vmem:[#allocation2 + $0x68] sm:$0xff] %vm183_vm8, %v1381_v4  ;;  %v4549_v3 = vshll.u32 %v6479_v44, 16  ;;  %v4553_v61 = vshrl.u32 %v6479_v44, 16  ;;  %v4559_v40 = vshll.u32 %v6480_v62, 16  ;;  %v6502_v23 = vcombine.low %v4528_v56, %v4538_v12  ;;  %v8550_v28 = vpop.f32.mrb[35].mxu0 }
 0x139   : > { %v5162_v60 = vsel %vm7338_vm6, %v6581_v25, %v5161_v7  ;;  %v5163_v49 = vrot.slane %v5161_v7, 4  ;;  %v4542_v35 = vrot.slane %v4540_v30, 4  ;;  %v4545_v31 = vrot.slane %v4543_v19, 5  ;;  %v6483_v20 = vld [vmem:[%s7273_s23 + $0xbc] sm:$0x1]  ;;  %v1092_v58 = vld [vmem:[#allocation2 + $0x90] sm:$0xff] }
 0x13a   : > { %v4551_v43 = vrot.slane %v4549_v3, 5  ;;  %v4555_v24 = vrot.slane %v4553_v61, 4  ;;  %v4561_v2 = vrot.slane %v4559_v40, 5  ;;  %7101 = vmatmul.mubr.msk.bf16.gmra.mrb[132].mxu1 %vm361_vm1, %v6502_v23  ;;  %v6582_v18 = vrot.slane %v6556_v45, 9  ;;  %v8560_v62 = vpop.f32.mrb[36].mxu1  ;;  %v1090_v45 = vld [vmem:[#allocation2 + $0x80] sm:$0xff] }
 0x13b   : > { %v5165_v36 = vsel %vm7338_vm6, %v5163_v49, %v5164_v26  ;;  %v5168_v37 = vrot.slane %v6557_v57, 5  ;;  %v5171_v52 = vrot.slane %v6558_v11, 5  ;;  %v4546_v27 = vor.u32 %v4545_v31, %v4542_v35  ;;  %v8566_v26 = vpop.f32.mrb[37].mxu1  ;;  %v6559_v3 = vld [vmem:[%s7273_s23 + $0xa8] sm:$0xe]  ;;  %v1093_v35 = vld [vmem:[#allocation2 + $0x98] sm:$0xff] }
 0x13c   : > { %v6598_v34 = vcombine.low %v5162_v60, %v5165_v36  ;;  %v4556_v42 = vor.u32 %v4555_v24, %v4551_v43  ;;  %v4564_v22 = vshrl.u32 %v6481_v41, 16  ;;  %v4567_v38 = vshll.u32 %v6481_v41, 16  ;;  %v1657_v10 = vld [vmem:[#allocation2 + $0x70] sm:$0xff]  ;;  %v6560_v61 = vld [vmem:[%s7273_s23 + $0xac] sm:$0xf]  ;;  %v8571_v40 = vpop.f32.mrb[38].mxu1 }
 0x13d   : > { %v5169_v0 = vsel %vm7338_vm6, %v6582_v18, %v5168_v37  ;;  %v5170_v29 = vrot.slane %v5168_v37, 4  ;;  %v4573_v21 = vshll.u32 %v6482_v1, 16  ;;  %v4547_v48 = vrot.slane %v4546_v27, 4  ;;  %v1655_v44 = vld [vmem:[#allocation2 + $0x60] sm:$0xff] }
 0x13e   : > { %7134 = vmatprep.mubr.msk.bf16.mxu0 %vm361_vm1, %v6598_v34  ;;  %v4557_v50 = vrot.slane %v4556_v42, 4  ;;  %v4566_v55 = vrot.slane %v4564_v22, 4  ;;  %v4577_v59 = vshrl.u32 %v6482_v1, 16  ;;  %v4569_v13 = vrot.slane %v4567_v38, 5  ;;  %v1658_v57 = vld [vmem:[#allocation2 + $0x78] sm:$0xff] }
 0x13f   : > { %v5172_v15 = vsel %vm7338_vm6, %v5170_v29, %v5171_v52  ;;  %v8558_v16 = vrot.slane %v4573_v21, 5  ;;  %v4583_v17 = vshll.u32 %v6483_v20, 16  ;;  %v4552_v56 = vsel %vm7345_vm7, %v4547_v48, %v4551_v43  ;;  %v1656_v7 = vld [vmem:[#allocation2 + $0x68] sm:$0xff]  ;;  %v6561_v1 = vld [vmem:[%s7273_s23 + $0xb0] sm:$0x1] }
 0x140   : > { %v4562_v6 = vsel %vm7345_vm7, %v4557_v50, %v4561_v2  ;;  %v6599_v4 = vcombine.low %v5169_v0, %v5172_v15  ;;  %v4579_v25 = vrot.slane %v4577_v59, 4  ;;  %v4570_v19 = vor.u32 %v4569_v13, %v4566_v55  ;;  %v6484_v31 = vld [vmem:[%s7273_s23 + $0xc0] sm:$0xf]  ;;  %v6485_v36 = vld [vmem:[%s7273_s23 + $0xc4] sm:$0xf] }
 0x141   : > { %v6503_v30 = vcombine.low %v4552_v56, %v4562_v6  ;;  %v4585_v11 = vrot.slane %v4583_v17, 5  ;;  %v1951_v12 = vadd.f32 %v8479_v33, %v1657_v10  ;;  %v1386_v23 = vadd.f32 %v8502_v39, %v1092_v58  ;;  %v8580_v33 = vpop.f32.mrb[39].mxu1  ;;  %v6563_v20 = vld [vmem:[%s7273_s23 + $0xb8] sm:$0xf]  ;;  %v6564_v48 = vld [vmem:[%s7273_s23 + $0xbc] sm:$0x1] }
 0x142   : > { %7135 = vmatmul.mubr.msk.bf16.gmra.mrb[132].mxu0 %vm361_vm1, %v6599_v4  ;;  %v4580_v41 = vor.u32 %v4579_v25, %v8558_v16  ;;  %v1949_v60 = vadd.f32 %v8483_v14, %v1655_v44  ;;  %v1384_v49 = vadd.f32 %v8508_v5, %v1090_v45  ;;  %v4571_v43 = vrot.slane %v4570_v19, 4  ;;  %v1091_v14 = vld [vmem:[#allocation2 + $0x88] sm:$0xff]  ;;  %v6489_v19 = vld [vmem:[%s7273_s23 + $0xd4] sm:$0x1] }
 0x143   : > { %7104 = vmatprep.mubr.msk.bf16.mxu1 %vm361_vm1, %v6503_v30  ;;  %1983 = vst.msk [vmem:[#allocation2 + $0x70] sm:$0xff] %vm183_vm8, %v1951_v12  ;;  %v1952_v24 = vadd.f32 %v8485_v32, %v1658_v57  ;;  %v1387_v2 = vadd.f32 %v8518_v51, %v1093_v35  ;;  %v1950_v39 = vadd.f32 %v8490_v8, %v1656_v7  ;;  %v6486_v5 = vld [vmem:[%s7273_s23 + $0xc8] sm:$0x1]  ;;  %1418 = vst.msk [vmem:[#allocation2 + $0x90] sm:$0xff] %vm183_vm8, %v1386_v23  ;;  %v6562_v32 = vld [vmem:[%s7273_s23 + $0xb4] sm:$0xe] }
 0x144   : > { %v4581_v18 = vrot.slane %v4580_v41, 4  ;;  %1981 = vst.msk [vmem:[#allocation2 + $0x60] sm:$0xff] %vm183_vm8, %v1949_v60  ;;  %1416 = vst.msk [vmem:[#allocation2 + $0x80] sm:$0xff] %vm183_vm8, %v1384_v49  ;;  %v1385_v37 = vadd.f32 %v8527_v47, %v1091_v14  ;;  %v6583_v52 = vrot.slane %v6559_v3, 9  ;;  %v5175_v34 = vrot.slane %v6560_v61, 5  ;;  %v8594_v51 = vpop.f32.mrb[36].mxu0 }
 0x145   : > { %v4576_v8 = vsel %vm7345_vm7, %v4571_v43, %v8558_v16  ;;  %1984 = vst.msk [vmem:[#allocation2 + $0x78] sm:$0xff] %vm183_vm8, %v1952_v24  ;;  %1419 = vst.msk [vmem:[#allocation2 + $0x98] sm:$0xff] %vm183_vm8, %v1387_v2  ;;  %v5178_v27 = vrot.slane %v6561_v1, 5  ;;  %v4588_v42 = vshrl.u32 %v6484_v31, 16  ;;  %v4591_v47 = vshll.u32 %v6484_v31, 16  ;;  %v8603_v22 = vpop.f32.mrb[37].mxu0 }
 0x146   : > { %1982 = vst.msk [vmem:[#allocation2 + $0x68] sm:$0xff] %vm183_vm8, %v1950_v39  ;;  %v4586_v0 = vsel %vm7345_vm7, %v4581_v18, %v4585_v11  ;;  %1417 = vst.msk [vmem:[#allocation2 + $0x88] sm:$0xff] %vm183_vm8, %v1385_v37  ;;  %v5176_v29 = vsel %vm7338_vm6, %v6583_v52, %v5175_v34  ;;  %v5177_v38 = vrot.slane %v5175_v34, 4  ;;  %v4597_v21 = vshll.u32 %v6485_v36, 16  ;;  %v8611_v50 = vpop.f32.mrb[38].mxu0  ;;  %v8624_v60 = vpop.f32.mrb[40].mxu1 }
 0x147   : > { %v6504_v55 = vcombine.low %v4576_v8, %v4586_v0  ;;  %v4590_v59 = vrot.slane %v4588_v42, 4  ;;  %v4593_v10 = vrot.slane %v4591_v47, 5  ;;  %v4601_v15 = vshrl.u32 %v6485_v36, 16  ;;  %v6487_v13 = vld [vmem:[%s7273_s23 + $0xcc] sm:$0xf]  ;;  %v8614_v16 = vpop.f32.mrb[39].mxu0 }
 0x148   : > { %v5179_v17 = vsel %vm7338_vm6, %v5177_v38, %v5178_v27  ;;  %v4599_v58 = vrot.slane %v4597_v21, 5  ;;  %v4607_v44 = vshll.u32 %v6486_v5, 16  ;;  %v6584_v56 = vrot.slane %v6562_v32, 9  ;;  %v6488_v57 = vld [vmem:[%s7273_s23 + $0xd0] sm:$0xf]  ;;  %v1337_v2 = vpop.f32.mrb[41].mxu1 }
 0x149   : > { %7105 = vmatmul.mubr.msk.bf16.gmra.mrb[136].mxu1 %vm361_vm1, %v6504_v55  ;;  %v6600_v6 = vcombine.low %v5176_v29, %v5179_v17  ;;  %v4594_v4 = vor.u32 %v4593_v10, %v4590_v59  ;;  %v4603_v25 = vrot.slane %v4601_v15, 4  ;;  %v5182_v45 = vrot.slane %v6563_v20, 5  ;;  %v1096_v24 = vld [vmem:[#allocation2 + $0xb0] sm:$0xff]  ;;  %v6565_v37 = vld [vmem:[%s7273_s23 + $0xc0] sm:$0xe]  ;;  %v8631_v52 = vpop.f32.mrb[42].mxu1 }
 0x14a   : > { %v4609_v7 = vrot.slane %v4607_v44, 5  ;;  %v5185_v30 = vrot.slane %v6564_v48, 5  ;;  %v4612_v11 = vshrl.u32 %v6487_v13, 16  ;;  %v4615_v12 = vshll.u32 %v6487_v13, 16  ;;  %v1661_v43 = vld [vmem:[#allocation2 + $0x90] sm:$0xff]  ;;  %v1094_v42 = vld [vmem:[#allocation2 + $0xa0] sm:$0xff] }
 0x14b   : > { %7138 = vmatprep.mubr.msk.bf16.mxu0 %vm361_vm1, %v6600_v6  ;;  %v4595_v3 = vrot.slane %v4594_v4, 4  ;;  %v4604_v61 = vor.u32 %v4603_v25, %v4599_v58  ;;  %v5183_v41 = vsel %vm7338_vm6, %v6584_v56, %v5182_v45  ;;  %v5184_v23 = vrot.slane %v5182_v45, 4  ;;  %v1659_v18 = vld [vmem:[#allocation2 + $0x80] sm:$0xff]  ;;  %v1340_v0 = vpop.f32.mrb[43].mxu1  ;;  %v1097_v55 = vld [vmem:[#allocation2 + $0xb8] sm:$0xff]  ;;  %v8643_v6 = vpop.f32.mrb[40].mxu0 }
 0x14c   : > { %v4614_v49 = vrot.slane %v4612_v11, 4  ;;  %v4617_v35 = vrot.slane %v4615_v12, 5  ;;  %v4621_v1 = vshll.u32 %v6488_v57, 16  ;;  %v4625_v31 = vshrl.u32 %v6488_v57, 16  ;;  %v1662_v47 = vld [vmem:[#allocation2 + $0x98] sm:$0xff]  ;;  %v1095_v45 = vld [vmem:[#allocation2 + $0xa8] sm:$0xff] }
 0x14d   : > { %v4600_v39 = vsel %vm7345_vm7, %v4595_v3, %v4599_v58  ;;  %v4605_v14 = vrot.slane %v4604_v61, 4  ;;  %v5186_v36 = vsel %vm7338_vm6, %v5184_v23, %v5185_v30  ;;  %v4631_v5 = vshll.u32 %v6489_v19, 16  ;;  %v1660_v20 = vld [vmem:[#allocation2 + $0x88] sm:$0xff]  ;;  %v6566_v59 = vld [vmem:[%s7273_s23 + $0xc4] sm:$0xf] }
 0x14e   : > { %v6601_v34 = vcombine.low %v5183_v41, %v5186_v36  ;;  %v4618_v32 = vor.u32 %v4617_v35, %v4614_v49  ;;  %v4623_v8 = vrot.slane %v4621_v1, 5  ;;  %v4627_v27 = vrot.slane %v4625_v31, 4  ;;  %v6567_v10 = vld [vmem:[%s7273_s23 + $0xc8] sm:$0x1]  ;;  %v6568_v44 = vld [vmem:[%s7273_s23 + $0xcc] sm:$0xe] }
 0x14f   : > { %v4610_v29 = vsel %vm7345_vm7, %v4605_v14, %v4609_v7  ;;  %v4633_v38 = vrot.slane %v4631_v5, 5  ;;  %v1955_v21 = vadd.f32 %v8538_v9, %v1661_v43  ;;  %v1390_v48 = vadd.f32 %v8560_v62, %v1096_v24  ;;  %v6569_v56 = vld [vmem:[%s7273_s23 + $0xd0] sm:$0xf]  ;;  %v6570_v57 = vld [vmem:[%s7273_s23 + $0xd4] sm:$0x1]  ;;  %v8652_v7 = vpop.f32.mrb[41].mxu0 }
 0x150   : > { %v6505_v15 = vcombine.low %v4600_v39, %v4610_v29  ;;  %7139 = vmatmul.mubr.msk.bf16.gmra.mrb[136].mxu0 %vm361_vm1, %v6601_v34  ;;  %v4619_v13 = vrot.slane %v4618_v32, 4  ;;  %v4628_v17 = vor.u32 %v4627_v27, %v4623_v8  ;;  %v1953_v58 = vadd.f32 %v8543_v63, %v1659_v18  ;;  %v8659_v11 = vpop.f32.mrb[42].mxu0  ;;  %v1098_v61 = vld [vmem:[#allocation2 + $0xc0] sm:$0xff]  ;;  %v1101_v24 = vld [vmem:[#allocation2 + $0xd8] sm:$0xff]  ;;  %v1099_v39 = vld [vmem:[#allocation2 + $0xc8] sm:$0xff]  ;;  %v6906_v18 = vpop.f32.mrb[44].mxu1 }
 0x151   : > { %1987 = vst.msk [vmem:[#allocation2 + $0x90] sm:$0xff] %vm183_vm8, %v1955_v21  ;;  %1422 = vst.msk [vmem:[#allocation2 + $0xb0] sm:$0xff] %vm183_vm8, %v1390_v48  ;;  %v1388_v9 = vadd.f32 %v8566_v26, %v1094_v42  ;;  %v1956_v62 = vadd.f32 %v8545_v46, %v1662_v47  ;;  %v1391_v4 = vadd.f32 %v8571_v40, %v1097_v55  ;;  %v6585_v19 = vrot.slane %v6565_v37, 9  ;;  %v1100_v46 = vld [vmem:[#allocation2 + $0xd0] sm:$0xff]  ;;  %v8665_v41 = vpop.f32.mrb[43].mxu0  ;;  %v1102_v27 = vld [vmem:[#allocation2 + $0xe0] sm:$0xff] }
 0x152   : > { %v1954_v25 = vadd.f32 %v8550_v28, %v1660_v20  ;;  %7108 = vmatprep.mubr.msk.bf16.mxu1 %vm361_vm1, %v6505_v15  ;;  %v4624_v63 = vsel %vm7345_vm7, %v4619_v13, %v4623_v8  ;;  %v4629_v30 = vrot.slane %v4628_v17, 4  ;;  %1985 = vst.msk [vmem:[#allocation2 + $0x80] sm:$0xff] %vm183_vm8, %v1953_v58  ;;  %v1389_v26 = vadd.f32 %v8580_v33, %v1095_v45  ;;  %v6940_v42 = vpop.f32.mrb[44].mxu0  ;;  %v1105_v29 = vld [vmem:[#allocation2 + $0xf8] sm:$0xff]  ;;  %v2036_v45 = vld [vmem:[#allocation2 + $0x10] sm:$0xff] }
 0x153   : > { %1420 = vst.msk [vmem:[#allocation2 + $0xa0] sm:$0xff] %vm183_vm8, %v1388_v9  ;;  %1988 = vst.msk [vmem:[#allocation2 + $0x98] sm:$0xff] %vm183_vm8, %v1956_v62  ;;  %v5189_v28 = vrot.slane %v6566_v59, 5  ;;  %v5192_v40 = vrot.slane %v6567_v10, 5  ;;  %v6586_v12 = vrot.slane %v6568_v44, 9  ;;  %v5196_v3 = vrot.slane %v6569_v56, 5 }
 0x154   : > { %1423 = vst.msk [vmem:[#allocation2 + $0xb8] sm:$0xff] %vm183_vm8, %v1391_v4  ;;  %1986 = vst.msk [vmem:[#allocation2 + $0x88] sm:$0xff] %vm183_vm8, %v1954_v25  ;;  %v4634_v33 = vsel %vm7345_vm7, %v4629_v30, %v4633_v38  ;;  %v5199_v23 = vrot.slane %v6570_v57, 5  ;;  %v1394_v49 = vadd.f32 %v8624_v60, %v1100_v46  ;;  %v1392_v35 = vadd.f32 %v1337_v2, %v1098_v61  ;;  %v1104_v2 = vld [vmem:[#allocation2 + $0xf0] sm:$0xff]  ;;  %v1922_v21 = vpop.f32.mrb[45].mxu0  ;;  %v1103_v59 = vld [vmem:[#allocation2 + $0xe8] sm:$0xff] }
 0x155   : > { %1421 = vst.msk [vmem:[#allocation2 + $0xa8] sm:$0xff] %vm183_vm8, %v1389_v26  ;;  %v6506_v1 = vcombine.low %v4624_v63, %v4634_v33  ;;  %v5190_v31 = vsel %vm7338_vm6, %v6585_v19, %v5189_v28  ;;  %v5191_v43 = vrot.slane %v5189_v28, 4  ;;  %v5197_v14 = vsel %vm7338_vm6, %v6586_v12, %v5196_v3  ;;  %v6941_v15 = vpop.f32.mrb[46].mxu0  ;;  %v2034_v26 = vld [vmem:[#allocation2] sm:$0xff]  ;;  %v2035_v61 = vld [vmem:[#allocation2 + $0x8] sm:$0xff] }
 0x156   : > { %v5198_v36 = vrot.slane %v5196_v3, 4  ;;  %1426 = vst.msk [vmem:[#allocation2 + $0xd0] sm:$0xff] %vm183_vm8, %v1394_v49  ;;  %1424 = vst.msk [vmem:[#allocation2 + $0xc0] sm:$0xff] %vm183_vm8, %v1392_v35  ;;  %v1395_v54 = vadd.f32 %v8631_v52, %v1101_v24  ;;  %v1393_v5 = vadd.f32 %v1340_v0, %v1099_v39  ;;  %v1398_v8 = vadd.f32 %v6906_v18, %v1104_v2  ;;  %v1353_v52 = vpop.f32.mrb[45].mxu1  ;;  %v1925_v44 = vpop.f32.mrb[47].mxu0 }
 0x157   : > { %7109 = vmatmul.mubr.msk.bf16.gmra.mrb[140].mxu1 %vm361_vm1, %v6506_v1  ;;  %v5193_v60 = vsel %vm7338_vm6, %v5191_v43, %v5192_v40  ;;  %v1396_v0 = vadd.f32 %v1353_v52, %v1102_v27  ;;  %v6907_v38 = vpop.f32.mrb[46].mxu1  ;;  %v2039_v52 = vld [vmem:[#allocation2 + $0x28] sm:$0xff] }
 0x158   : > { %v6602_v37 = vcombine.low %v5190_v31, %v5193_v60  ;;  %v5200_v34 = vsel %vm7338_vm6, %v5198_v36, %v5199_v23  ;;  %v1665_v32 = vld [vmem:[#allocation2 + $0xb0] sm:$0xff]  ;;  %1427 = vst.msk [vmem:[#allocation2 + $0xd8] sm:$0xff] %vm183_vm8, %v1395_v54  ;;  %1425 = vst.msk [vmem:[#allocation2 + $0xc8] sm:$0xff] %vm183_vm8, %v1393_v5  ;;  %v1399_v55 = vadd.f32 %v6907_v38, %v1105_v29  ;;  %v1356_v10 = vpop.f32.mrb[47].mxu1  ;;  %v6980_v33 = vpop.f32.mrb[48].mxu0  ;;  %v2038_v5 = vld [vmem:[#allocation2 + $0x20] sm:$0xff] }
 0x159   : > { %v6603_v47 = vcombine.low %v5197_v14, %v5200_v34  ;;  %v1959_v20 = vadd.f32 %v8594_v51, %v1665_v32  ;;  %1430 = vst.msk [vmem:[#allocation2 + $0xf0] sm:$0xff] %vm183_vm8, %v1398_v8  ;;  %1428 = vst.msk [vmem:[#allocation2 + $0xe0] sm:$0xff] %vm183_vm8, %v1396_v0  ;;  %v1397_v58 = vadd.f32 %v1356_v10, %v1103_v59  ;;  %v3023_v35 = vpop.f32.mrb[49].mxu0  ;;  %v2040_v14 = vld [vmem:[#allocation2 + $0x30] sm:$0xff] }
 0x15a   : > { %7142 = vmatprep.mubr.msk.bf16.mxu0 %vm361_vm1, %v6602_v37  ;;  %v1663_v53 = vld [vmem:[#allocation2 + $0xa0] sm:$0xff]  ;;  %1431 = vst.msk [vmem:[#allocation2 + $0xf8] sm:$0xff] %vm183_vm8, %v1399_v55  ;;  %v6981_v43 = vpop.f32.mrb[50].mxu0  ;;  %v2041_v37 = vld [vmem:[#allocation2 + $0x38] sm:$0xff]  ;;  %v2044_v59 = vld [vmem:[#allocation2 + $0x50] sm:$0xff] }
 0x15b   : > { %v1666_v48 = vld [vmem:[#allocation2 + $0xb8] sm:$0xff]  ;;  %7143 = vmatmul.mubr.msk.bf16.gmra.mrb[140].mxu0 %vm361_vm1, %v6603_v47  ;;  %1991 = vst.msk [vmem:[#allocation2 + $0xb0] sm:$0xff] %vm183_vm8, %v1959_v20  ;;  %v1957_v51 = vadd.f32 %v8603_v22, %v1663_v53  ;;  %1429 = vst.msk [vmem:[#allocation2 + $0xe8] sm:$0xff] %vm183_vm8, %v1397_v58  ;;  %v3026_v39 = vpop.f32.mrb[51].mxu0 }
 0x15c   : > { %v1960_v13 = vadd.f32 %v8611_v50, %v1666_v48  ;;  %v1664_v17 = vld [vmem:[#allocation2 + $0xa8] sm:$0xff] }
 0x15d   : > { %v1958_v56 = vadd.f32 %v8614_v16, %v1664_v17  ;;  %1989 = vst.msk [vmem:[#allocation2 + $0xa0] sm:$0xff] %vm183_vm8, %v1957_v51  ;;  %v1669_v9 = vld [vmem:[#allocation2 + $0xd0] sm:$0xff]  ;;  %v1667_v62 = vld [vmem:[#allocation2 + $0xc0] sm:$0xff]  ;;  %v6946_v16 = vpop.f32.mrb[48].mxu1 }
 0x15e   : > { %1992 = vst.msk [vmem:[#allocation2 + $0xb8] sm:$0xff] %vm183_vm8, %v1960_v13  ;;  %v1963_v22 = vadd.f32 %v8643_v6, %v1669_v9  ;;  %v1961_v50 = vadd.f32 %v8652_v7, %v1667_v62  ;;  %v2362_v30 = vadd.f32 %v6946_v16, %v2036_v45  ;;  %v2233_v19 = vpop.f32.mrb[49].mxu1  ;;  %v2037_v6 = vld [vmem:[#allocation2 + $0x18] sm:$0xff]  ;;  %v2042_v13 = vld [vmem:[#allocation2 + $0x40] sm:$0xff] }
 0x15f   : > { %1990 = vst.msk [vmem:[#allocation2 + $0xa8] sm:$0xff] %vm183_vm8, %v1958_v56  ;;  %v1670_v4 = vld [vmem:[#allocation2 + $0xd8] sm:$0xff]  ;;  %v1668_v25 = vld [vmem:[#allocation2 + $0xc8] sm:$0xff]  ;;  %v2360_v28 = vadd.f32 %v2233_v19, %v2034_v26  ;;  %v6947_v40 = vpop.f32.mrb[50].mxu1 }
 0x160   : > { %1995 = vst.msk [vmem:[#allocation2 + $0xd0] sm:$0xff] %vm183_vm8, %v1963_v22  ;;  %1993 = vst.msk [vmem:[#allocation2 + $0xc0] sm:$0xff] %vm183_vm8, %v1961_v50  ;;  %v1964_v57 = vadd.f32 %v8659_v11, %v1670_v4  ;;  %v1962_v63 = vadd.f32 %v8665_v41, %v1668_v25  ;;  %v1673_v46 = vld [vmem:[#allocation2 + $0xf0] sm:$0xff]  ;;  %v1671_v12 = vld [vmem:[#allocation2 + $0xe0] sm:$0xff]  ;;  %v2363_v3 = vadd.f32 %v6947_v40, %v2037_v6  ;;  %v2236_v11 = vpop.f32.mrb[51].mxu1 }
 0x161   : > { %v1967_v7 = vadd.f32 %v6940_v42, %v1673_v46  ;;  %2394 = vst.msk [vmem:[#allocation2 + $0x10] sm:$0xff] %vm183_vm8, %v2362_v30  ;;  %v1965_v41 = vadd.f32 %v1922_v21, %v1671_v12  ;;  %v1674_v23 = vld [vmem:[#allocation2 + $0xf8] sm:$0xff]  ;;  %2392 = vst.msk [vmem:[#allocation2] sm:$0xff] %vm183_vm8, %v2360_v28  ;;  %v2361_v49 = vadd.f32 %v2236_v11, %v2035_v61  ;;  %v6950_v36 = vpop.f32.mrb[52].mxu1  ;;  %v2043_v4 = vld [vmem:[#allocation2 + $0x48] sm:$0xff] }
 0x162   : > { %1996 = vst.msk [vmem:[#allocation2 + $0xd8] sm:$0xff] %vm183_vm8, %v1964_v57  ;;  %1994 = vst.msk [vmem:[#allocation2 + $0xc8] sm:$0xff] %vm183_vm8, %v1962_v63  ;;  %v1968_v1 = vadd.f32 %v6941_v15, %v1674_v23  ;;  %v1672_v31 = vld [vmem:[#allocation2 + $0xe8] sm:$0xff]  ;;  %v2366_v54 = vadd.f32 %v6950_v36, %v2040_v14  ;;  %v2249_v60 = vpop.f32.mrb[53].mxu1  ;;  %v6984_v21 = vpop.f32.mrb[52].mxu0  ;;  %v2045_v56 = vld [vmem:[#allocation2 + $0x58] sm:$0xff] }
 0x163   : > { %1999 = vst.msk [vmem:[#allocation2 + $0xf0] sm:$0xff] %vm183_vm8, %v1967_v7  ;;  %2395 = vst.msk [vmem:[#allocation2 + $0x18] sm:$0xff] %vm183_vm8, %v2363_v3  ;;  %v1966_v24 = vadd.f32 %v1925_v44, %v1672_v31  ;;  %v2364_v18 = vadd.f32 %v2249_v60, %v2038_v5  ;;  %v6951_v34 = vpop.f32.mrb[54].mxu1  ;;  %v3039_v48 = vpop.f32.mrb[53].mxu0  ;;  %v2048_v28 = vld [vmem:[#allocation2 + $0x70] sm:$0xff]  ;;  %v2046_v12 = vld [vmem:[#allocation2 + $0x60] sm:$0xff] }
 0x164   : > { %1997 = vst.msk [vmem:[#allocation2 + $0xe0] sm:$0xff] %vm183_vm8, %v1965_v41  ;;  %2393 = vst.msk [vmem:[#allocation2 + $0x8] sm:$0xff] %vm183_vm8, %v2361_v49  ;;  %v2367_v27 = vadd.f32 %v6951_v34, %v2041_v37  ;;  %v2252_v42 = vpop.f32.mrb[55].mxu1  ;;  %v6985_v55 = vpop.f32.mrb[54].mxu0  ;;  %v2049_v41 = vld [vmem:[#allocation2 + $0x78] sm:$0xff]  ;;  %v2047_v31 = vld [vmem:[#allocation2 + $0x68] sm:$0xff] }
 0x165   : > { %2000 = vst.msk [vmem:[#allocation2 + $0xf8] sm:$0xff] %vm183_vm8, %v1968_v1  ;;  %1998 = vst.msk [vmem:[#allocation2 + $0xe8] sm:$0xff] %vm183_vm8, %v1966_v24  ;;  %v2365_v0 = vadd.f32 %v2252_v42, %v2039_v52  ;;  %v6954_v10 = vpop.f32.mrb[56].mxu1  ;;  %v3042_v15 = vpop.f32.mrb[55].mxu0 }
 0x166   : > { %2398 = vst.msk [vmem:[#allocation2 + $0x30] sm:$0xff] %vm183_vm8, %v2366_v54  ;;  %2396 = vst.msk [vmem:[#allocation2 + $0x20] sm:$0xff] %vm183_vm8, %v2364_v18  ;;  %v2370_v51 = vadd.f32 %v6954_v10, %v2044_v59  ;;  %v2265_v17 = vpop.f32.mrb[57].mxu1  ;;  %v2052_v18 = vld [vmem:[#allocation2 + $0x90] sm:$0xff] }
 0x167   : > { %2399 = vst.msk [vmem:[#allocation2 + $0x38] sm:$0xff] %vm183_vm8, %v2367_v27  ;;  %2397 = vst.msk [vmem:[#allocation2 + $0x28] sm:$0xff] %vm183_vm8, %v2365_v0  ;;  %v2368_v44 = vadd.f32 %v2265_v17, %v2042_v13  ;;  %v6955_v9 = vpop.f32.mrb[58].mxu1 }
 0x168   : > { %v2858_v2 = vld [vmem:[#allocation2 + $0x10] sm:$0xff]  ;;  %v2856_v8 = vld [vmem:[#allocation2] sm:$0xff]  ;;  %2402 = vst.msk [vmem:[#allocation2 + $0x50] sm:$0xff] %vm183_vm8, %v2370_v51  ;;  %v2371_v50 = vadd.f32 %v6955_v9, %v2045_v56  ;;  %v2268_v25 = vpop.f32.mrb[59].mxu1 }
 0x169   : > { %v3152_v32 = vadd.f32 %v6980_v33, %v2858_v2  ;;  %v3150_v47 = vadd.f32 %v3023_v35, %v2856_v8  ;;  %2400 = vst.msk [vmem:[#allocation2 + $0x40] sm:$0xff] %vm183_vm8, %v2368_v44  ;;  %v2369_v57 = vadd.f32 %v2268_v25, %v2043_v4  ;;  %v2050_v8 = vld [vmem:[#allocation2 + $0x80] sm:$0xff] }
 0x16a   : > { %v2859_v20 = vld [vmem:[#allocation2 + $0x18] sm:$0xff]  ;;  %2403 = vst.msk [vmem:[#allocation2 + $0x58] sm:$0xff] %vm183_vm8, %v2371_v50  ;;  %v6988_v19 = vpop.f32.mrb[56].mxu0 }
 0x16b   : > { %3184 = vst.msk [vmem:[#allocation2 + $0x10] sm:$0xff] %vm183_vm8, %v3152_v32  ;;  %v3153_v29 = vadd.f32 %v6981_v43, %v2859_v20  ;;  %v2857_v38 = vld [vmem:[#allocation2 + $0x8] sm:$0xff]  ;;  %3182 = vst.msk [vmem:[#allocation2] sm:$0xff] %vm183_vm8, %v3150_v47  ;;  %v3055_v46 = vpop.f32.mrb[57].mxu0  ;;  %v2053_v20 = vld [vmem:[#allocation2 + $0x98] sm:$0xff] }
 0x16c   : > { %v3151_v53 = vadd.f32 %v3026_v39, %v2857_v38  ;;  %2401 = vst.msk [vmem:[#allocation2 + $0x48] sm:$0xff] %vm183_vm8, %v2369_v57  ;;  %v6958_v6 = vpop.f32.mrb[60].mxu1  ;;  %v6989_v40 = vpop.f32.mrb[58].mxu0 }
 0x16d   : > { %3185 = vst.msk [vmem:[#allocation2 + $0x18] sm:$0xff] %vm183_vm8, %v3153_v29  ;;  %v2862_v58 = vld [vmem:[#allocation2 + $0x30] sm:$0xff]  ;;  %v2860_v22 = vld [vmem:[#allocation2 + $0x20] sm:$0xff]  ;;  %v2374_v7 = vadd.f32 %v6958_v6, %v2048_v28  ;;  %v2281_v3 = vpop.f32.mrb[61].mxu1  ;;  %v3058_v61 = vpop.f32.mrb[59].mxu0 }
 0x16e   : > { %3183 = vst.msk [vmem:[#allocation2 + $0x8] sm:$0xff] %vm183_vm8, %v3151_v53  ;;  %v3156_v62 = vadd.f32 %v6984_v21, %v2862_v58  ;;  %v3154_v45 = vadd.f32 %v3039_v48, %v2860_v22  ;;  %v2863_v16 = vld [vmem:[#allocation2 + $0x38] sm:$0xff]  ;;  %v2861_v30 = vld [vmem:[#allocation2 + $0x28] sm:$0xff]  ;;  %v2372_v33 = vadd.f32 %v2281_v3, %v2046_v12  ;;  %v6959_v23 = vpop.f32.mrb[62].mxu1  ;;  %v2056_v58 = vld [vmem:[#allocation2 + $0xb0] sm:$0xff] }
 0x16f   : > { %v3157_v63 = vadd.f32 %v6985_v55, %v2863_v16  ;;  %v3155_v26 = vadd.f32 %v3042_v15, %v2861_v30  ;;  %v2866_v11 = vld [vmem:[#allocation2 + $0x50] sm:$0xff]  ;;  %2406 = vst.msk [vmem:[#allocation2 + $0x70] sm:$0xff] %vm183_vm8, %v2374_v7  ;;  %v2375_v1 = vadd.f32 %v6959_v23, %v2049_v41  ;;  %v2284_v43 = vpop.f32.mrb[63].mxu1  ;;  %v2051_v53 = vld [vmem:[#allocation2 + $0x88] sm:$0xff] }
 0x170   : > { %3188 = vst.msk [vmem:[#allocation2 + $0x30] sm:$0xff] %vm183_vm8, %v3156_v62  ;;  %3186 = vst.msk [vmem:[#allocation2 + $0x20] sm:$0xff] %vm183_vm8, %v3154_v45  ;;  %v3160_v49 = vadd.f32 %v6988_v19, %v2866_v11  ;;  %v2864_v35 = vld [vmem:[#allocation2 + $0x40] sm:$0xff]  ;;  %v2373_v14 = vadd.f32 %v2284_v43, %v2047_v31  ;;  %v2057_v45 = vld [vmem:[#allocation2 + $0xb8] sm:$0xff] }
 0x171   : > { %3189 = vst.msk [vmem:[#allocation2 + $0x38] sm:$0xff] %vm183_vm8, %v3157_v63  ;;  %3187 = vst.msk [vmem:[#allocation2 + $0x28] sm:$0xff] %vm183_vm8, %v3155_v26  ;;  %v3158_v24 = vadd.f32 %v3055_v46, %v2864_v35  ;;  %v2867_v39 = vld [vmem:[#allocation2 + $0x58] sm:$0xff]  ;;  %v2054_v62 = vld [vmem:[#allocation2 + $0xa0] sm:$0xff] }
 0x172   : > { %2404 = vst.msk [vmem:[#allocation2 + $0x60] sm:$0xff] %vm183_vm8, %v2372_v33  ;;  %3192 = vst.msk [vmem:[#allocation2 + $0x50] sm:$0xff] %vm183_vm8, %v3160_v49  ;;  %v3161_v36 = vadd.f32 %v6989_v40, %v2867_v39  ;;  %v6992_v60 = vpop.f32.mrb[60].mxu0  ;;  %v2055_v19 = vld [vmem:[#allocation2 + $0xa8] sm:$0xff]  ;;  %v2060_v11 = vld [vmem:[#allocation2 + $0xd0] sm:$0xff] }
 0x173   : > { %2407 = vst.msk [vmem:[#allocation2 + $0x78] sm:$0xff] %vm183_vm8, %v2375_v1  ;;  %v2865_v54 = vld [vmem:[#allocation2 + $0x48] sm:$0xff]  ;;  %3190 = vst.msk [vmem:[#allocation2 + $0x40] sm:$0xff] %vm183_vm8, %v3158_v24  ;;  %v3071_v2 = vpop.f32.mrb[61].mxu0  ;;  %v2058_v49 = vld [vmem:[#allocation2 + $0xc0] sm:$0xff] }
 0x174   : > { %v3159_v5 = vadd.f32 %v3058_v61, %v2865_v54  ;;  %2405 = vst.msk [vmem:[#allocation2 + $0x68] sm:$0xff] %vm183_vm8, %v2373_v14  ;;  %3193 = vst.msk [vmem:[#allocation2 + $0x58] sm:$0xff] %vm183_vm8, %v3161_v36  ;;  %v6962_v37 = vpop.f32.mrb[64].mxu1  ;;  %v6993_v34 = vpop.f32.mrb[62].mxu0  ;;  %v2061_v24 = vld [vmem:[#allocation2 + $0xd8] sm:$0xff] }
 0x175   : > { %v2378_v32 = vadd.f32 %v6962_v37, %v2052_v18  ;;  %v2297_v27 = vpop.f32.mrb[65].mxu1  ;;  %v3074_v52 = vpop.f32.mrb[63].mxu0 }
 0x176   : > { %3191 = vst.msk [vmem:[#allocation2 + $0x48] sm:$0xff] %vm183_vm8, %v3159_v5  ;;  %v2870_v42 = vld [vmem:[#allocation2 + $0x70] sm:$0xff]  ;;  %v2376_v47 = vadd.f32 %v2297_v27, %v2050_v8  ;;  %v6963_v0 = vpop.f32.mrb[66].mxu1 }
 0x177   : > { %v3164_v29 = vadd.f32 %v6992_v60, %v2870_v42  ;;  %2410 = vst.msk [vmem:[#allocation2 + $0x90] sm:$0xff] %vm183_vm8, %v2378_v32  ;;  %v2379_v21 = vadd.f32 %v6963_v0, %v2053_v20  ;;  %v2300_v48 = vpop.f32.mrb[67].mxu1  ;;  %v2059_v60 = vld [vmem:[#allocation2 + $0xc8] sm:$0xff]  ;;  %v2064_v42 = vld [vmem:[#allocation2 + $0xf0] sm:$0xff] }
 0x178   : > { %2408 = vst.msk [vmem:[#allocation2 + $0x80] sm:$0xff] %vm183_vm8, %v2376_v47  ;;  %v2377_v10 = vadd.f32 %v2300_v48, %v2051_v53 }
 0x179   : > { %v2868_v38 = vld [vmem:[#allocation2 + $0x60] sm:$0xff]  ;;  %3196 = vst.msk [vmem:[#allocation2 + $0x70] sm:$0xff] %vm183_vm8, %v3164_v29  ;;  %2411 = vst.msk [vmem:[#allocation2 + $0x98] sm:$0xff] %vm183_vm8, %v2379_v21 }
 0x17a   : > { %v3162_v55 = vadd.f32 %v3071_v2, %v2868_v38  ;;  %v2871_v59 = vld [vmem:[#allocation2 + $0x78] sm:$0xff]  ;;  %2409 = vst.msk [vmem:[#allocation2 + $0x88] sm:$0xff] %vm183_vm8, %v2377_v10  ;;  %v2062_v29 = vld [vmem:[#allocation2 + $0xe0] sm:$0xff] }
 0x17b   : > { %v3165_v15 = vadd.f32 %v6993_v34, %v2871_v59  ;;  %v2869_v51 = vld [vmem:[#allocation2 + $0x68] sm:$0xff]  ;;  %v6996_v17 = vpop.f32.mrb[64].mxu0 }
 0x17c   : > { %3194 = vst.msk [vmem:[#allocation2 + $0x60] sm:$0xff] %vm183_vm8, %v3162_v55  ;;  %v3163_v13 = vadd.f32 %v3074_v52, %v2869_v51  ;;  %v6966_v44 = vpop.f32.mrb[68].mxu1  ;;  %v3087_v56 = vpop.f32.mrb[65].mxu0  ;;  %v2065_v55 = vld [vmem:[#allocation2 + $0xf8] sm:$0xff] }
 0x17d   : > { %3197 = vst.msk [vmem:[#allocation2 + $0x78] sm:$0xff] %vm183_vm8, %v3165_v15  ;;  %v2382_v9 = vadd.f32 %v6966_v44, %v2056_v58  ;;  %v2313_v22 = vpop.f32.mrb[69].mxu1  ;;  %v6997_v50 = vpop.f32.mrb[66].mxu0 }
 0x17e   : > { %3195 = vst.msk [vmem:[#allocation2 + $0x68] sm:$0xff] %vm183_vm8, %v3163_v13  ;;  %v2874_v4 = vld [vmem:[#allocation2 + $0x90] sm:$0xff]  ;;  %v2380_v25 = vadd.f32 %v2313_v22, %v2054_v62  ;;  %v6967_v16 = vpop.f32.mrb[70].mxu1  ;;  %v3090_v57 = vpop.f32.mrb[67].mxu0 }
 0x17f   : > { %v3168_v63 = vadd.f32 %v6996_v17, %v2874_v4  ;;  %2414 = vst.msk [vmem:[#allocation2 + $0xb0] sm:$0xff] %vm183_vm8, %v2382_v9  ;;  %v2872_v30 = vld [vmem:[#allocation2 + $0x80] sm:$0xff]  ;;  %v2383_v26 = vadd.f32 %v6967_v16, %v2057_v45  ;;  %v2316_v46 = vpop.f32.mrb[71].mxu1  ;;  %v2063_v17 = vld [vmem:[#allocation2 + $0xe8] sm:$0xff]  ;;  %v3424_v45 = vld [vmem:[#allocation2 + $0x10] sm:$0xff] }
 0x180   : > { %v3166_v28 = vadd.f32 %v3087_v56, %v2872_v30  ;;  %2412 = vst.msk [vmem:[#allocation2 + $0xa0] sm:$0xff] %vm183_vm8, %v2380_v25  ;;  %v2875_v6 = vld [vmem:[#allocation2 + $0x98] sm:$0xff]  ;;  %v2381_v40 = vadd.f32 %v2316_v46, %v2055_v19 }
 0x181   : > { %3200 = vst.msk [vmem:[#allocation2 + $0x90] sm:$0xff] %vm183_vm8, %v3168_v63  ;;  %v3169_v7 = vadd.f32 %v6997_v50, %v2875_v6  ;;  %2415 = vst.msk [vmem:[#allocation2 + $0xb8] sm:$0xff] %vm183_vm8, %v2383_v26  ;;  %v2873_v12 = vld [vmem:[#allocation2 + $0x88] sm:$0xff]  ;;  %v3422_v26 = vld [vmem:[#allocation2] sm:$0xff] }
 0x182   : > { %3198 = vst.msk [vmem:[#allocation2 + $0x80] sm:$0xff] %vm183_vm8, %v3166_v28  ;;  %v3167_v3 = vadd.f32 %v3090_v57, %v2873_v12  ;;  %2413 = vst.msk [vmem:[#allocation2 + $0xa8] sm:$0xff] %vm183_vm8, %v2381_v40 }
 0x183   : > { %3201 = vst.msk [vmem:[#allocation2 + $0x98] sm:$0xff] %vm183_vm8, %v3169_v7  ;;  %v7000_v61 = vpop.f32.mrb[68].mxu0  ;;  %v3425_v7 = vld [vmem:[#allocation2 + $0x18] sm:$0xff] }
 0x184   : > { %3199 = vst.msk [vmem:[#allocation2 + $0x88] sm:$0xff] %vm183_vm8, %v3167_v3  ;;  %v6970_v33 = vpop.f32.mrb[72].mxu1  ;;  %v3103_v41 = vpop.f32.mrb[69].mxu0 }
 0x185   : > { %v2386_v23 = vadd.f32 %v6970_v33, %v2060_v11  ;;  %v2329_v35 = vpop.f32.mrb[73].mxu1  ;;  %v7001_v1 = vpop.f32.mrb[70].mxu0  ;;  %v3423_v33 = vld [vmem:[#allocation2 + $0x8] sm:$0xff] }
 0x186   : > { %v2878_v31 = vld [vmem:[#allocation2 + $0xb0] sm:$0xff]  ;;  %v2384_v43 = vadd.f32 %v2329_v35, %v2058_v49  ;;  %v6971_v39 = vpop.f32.mrb[74].mxu1  ;;  %v3106_v14 = vpop.f32.mrb[71].mxu0 }
 0x187   : > { %v3172_v36 = vadd.f32 %v7000_v61, %v2878_v31  ;;  %2418 = vst.msk [vmem:[#allocation2 + $0xd0] sm:$0xff] %vm183_vm8, %v2386_v23  ;;  %v2876_v54 = vld [vmem:[#allocation2 + $0xa0] sm:$0xff]  ;;  %v2387_v5 = vadd.f32 %v6971_v39, %v2061_v24  ;;  %v2332_v2 = vpop.f32.mrb[75].mxu1  ;;  %v3428_v24 = vld [vmem:[#allocation2 + $0x30] sm:$0xff] }
 0x188   : > { %v3170_v18 = vadd.f32 %v3103_v41, %v2876_v54  ;;  %2416 = vst.msk [vmem:[#allocation2 + $0xc0] sm:$0xff] %vm183_vm8, %v2384_v43  ;;  %v2879_v37 = vld [vmem:[#allocation2 + $0xb8] sm:$0xff]  ;;  %v2385_v34 = vadd.f32 %v2332_v2, %v2059_v60  ;;  %v3426_v54 = vld [vmem:[#allocation2 + $0x20] sm:$0xff] }
 0x189   : > { %3204 = vst.msk [vmem:[#allocation2 + $0xb0] sm:$0xff] %vm183_vm8, %v3172_v36  ;;  %v3173_v32 = vadd.f32 %v7001_v1, %v2879_v37  ;;  %2419 = vst.msk [vmem:[#allocation2 + $0xd8] sm:$0xff] %vm183_vm8, %v2387_v5  ;;  %v2877_v8 = vld [vmem:[#allocation2 + $0xa8] sm:$0xff]  ;;  %v3429_v37 = vld [vmem:[#allocation2 + $0x38] sm:$0xff] }
 0x18a   : > { %3202 = vst.msk [vmem:[#allocation2 + $0xa0] sm:$0xff] %vm183_vm8, %v3170_v18  ;;  %v3171_v27 = vadd.f32 %v3106_v14, %v2877_v8  ;;  %2417 = vst.msk [vmem:[#allocation2 + $0xc8] sm:$0xff] %vm183_vm8, %v2385_v34 }
 0x18b   : > { %3205 = vst.msk [vmem:[#allocation2 + $0xb8] sm:$0xff] %vm183_vm8, %v3173_v32 }
 0x18c   : > { %v7004_v52 = vpop.f32.mrb[72].mxu0  ;;  %3203 = vst.msk [vmem:[#allocation2 + $0xa8] sm:$0xff] %vm183_vm8, %v3171_v27  ;;  %v6974_v47 = vpop.f32.mrb[76].mxu1 }
 0x18d   : > { %v3119_v20 = vpop.f32.mrb[73].mxu0  ;;  %v2390_v0 = vadd.f32 %v6974_v47, %v2064_v42  ;;  %v2345_v38 = vpop.f32.mrb[77].mxu1 }
 0x18e   : > { %v7005_v21 = vpop.f32.mrb[74].mxu0  ;;  %v2882_v53 = vld [vmem:[#allocation2 + $0xd0] sm:$0xff]  ;;  %v2388_v48 = vadd.f32 %v2345_v38, %v2062_v29  ;;  %v6975_v59 = vpop.f32.mrb[78].mxu1 }
 0x18f   : > { %v3122_v10 = vpop.f32.mrb[75].mxu0  ;;  %v3176_v15 = vadd.f32 %v7004_v52, %v2882_v53  ;;  %2422 = vst.msk [vmem:[#allocation2 + $0xf0] sm:$0xff] %vm183_vm8, %v2390_v0  ;;  %v2880_v51 = vld [vmem:[#allocation2 + $0xc0] sm:$0xff]  ;;  %v2391_v13 = vadd.f32 %v6975_v59, %v2065_v55  ;;  %v2348_v58 = vpop.f32.mrb[79].mxu1  ;;  %v3427_v52 = vld [vmem:[#allocation2 + $0x28] sm:$0xff]  ;;  %v3432_v55 = vld [vmem:[#allocation2 + $0x50] sm:$0xff] }
 0x190   : > { %v3174_v44 = vadd.f32 %v3119_v20, %v2880_v51  ;;  %2420 = vst.msk [vmem:[#allocation2 + $0xe0] sm:$0xff] %vm183_vm8, %v2388_v48  ;;  %v2883_v56 = vld [vmem:[#allocation2 + $0xd8] sm:$0xff]  ;;  %v2389_v9 = vadd.f32 %v2348_v58, %v2063_v17  ;;  %v3430_v51 = vld [vmem:[#allocation2 + $0x40] sm:$0xff] }
 0x191   : > { %3208 = vst.msk [vmem:[#allocation2 + $0xd0] sm:$0xff] %vm183_vm8, %v3176_v15  ;;  %v3177_v62 = vadd.f32 %v7005_v21, %v2883_v56  ;;  %2423 = vst.msk [vmem:[#allocation2 + $0xf8] sm:$0xff] %vm183_vm8, %v2391_v13  ;;  %v2881_v22 = vld [vmem:[#allocation2 + $0xc8] sm:$0xff]  ;;  %v3433_v56 = vld [vmem:[#allocation2 + $0x58] sm:$0xff] }
 0x192   : > { %3206 = vst.msk [vmem:[#allocation2 + $0xc0] sm:$0xff] %vm183_vm8, %v3174_v44  ;;  %v3175_v50 = vadd.f32 %v3122_v10, %v2881_v22  ;;  %2421 = vst.msk [vmem:[#allocation2 + $0xe8] sm:$0xff] %vm183_vm8, %v2389_v9 }
 0x193   : > { %3209 = vst.msk [vmem:[#allocation2 + $0xd8] sm:$0xff] %vm183_vm8, %v3177_v62 }
 0x194   : > { %v7008_v4 = vpop.f32.mrb[76].mxu0  ;;  %3207 = vst.msk [vmem:[#allocation2 + $0xc8] sm:$0xff] %vm183_vm8, %v3175_v50 }
 0x195   : > { %v3135_v25 = vpop.f32.mrb[77].mxu0  ;;  %v7014_v16 = vpop.f32.mrb[80].mxu1 }
 0x196   : > { %v7009_v57 = vpop.f32.mrb[78].mxu0  ;;  %v2886_v63 = vld [vmem:[#allocation2 + $0xf0] sm:$0xff]  ;;  %v3718_v30 = vadd.f32 %v7014_v16, %v3424_v45  ;;  %v3589_v19 = vpop.f32.mrb[81].mxu1 }
 0x197   : > { %v3138_v46 = vpop.f32.mrb[79].mxu0  ;;  %v3180_v28 = vadd.f32 %v7008_v4, %v2886_v63  ;;  %v2884_v6 = vld [vmem:[#allocation2 + $0xe0] sm:$0xff]  ;;  %v3716_v40 = vadd.f32 %v3589_v19, %v3422_v26  ;;  %v7015_v12 = vpop.f32.mrb[82].mxu1  ;;  %v3431_v4 = vld [vmem:[#allocation2 + $0x48] sm:$0xff] }
 0x198   : > { %v3178_v3 = vadd.f32 %v3135_v25, %v2884_v6  ;;  %3750 = vst.msk [vmem:[#allocation2 + $0x10] sm:$0xff] %vm183_vm8, %v3718_v30  ;;  %v2887_v61 = vld [vmem:[#allocation2 + $0xf8] sm:$0xff]  ;;  %v3719_v11 = vadd.f32 %v7015_v12, %v3425_v7  ;;  %v3592_v41 = vpop.f32.mrb[83].mxu1  ;;  %v3434_v12 = vld [vmem:[#allocation2 + $0x60] sm:$0xff] }
 0x199   : > { %3212 = vst.msk [vmem:[#allocation2 + $0xf0] sm:$0xff] %vm183_vm8, %v3180_v28  ;;  %v3181_v23 = vadd.f32 %v7009_v57, %v2887_v61  ;;  %3748 = vst.msk [vmem:[#allocation2] sm:$0xff] %vm183_vm8, %v3716_v40  ;;  %v2885_v49 = vld [vmem:[#allocation2 + $0xe8] sm:$0xff]  ;;  %v3717_v35 = vadd.f32 %v3592_v41, %v3423_v33  ;;  %v3436_v28 = vld [vmem:[#allocation2 + $0x70] sm:$0xff] }
 0x19a   : > { %3210 = vst.msk [vmem:[#allocation2 + $0xe0] sm:$0xff] %vm183_vm8, %v3178_v3  ;;  %v3179_v1 = vadd.f32 %v3138_v46, %v2885_v49  ;;  %3751 = vst.msk [vmem:[#allocation2 + $0x18] sm:$0xff] %vm183_vm8, %v3719_v11  ;;  %v3437_v41 = vld [vmem:[#allocation2 + $0x78] sm:$0xff] }
 0x19b   : > { %3213 = vst.msk [vmem:[#allocation2 + $0xf8] sm:$0xff] %vm183_vm8, %v3181_v23  ;;  %3749 = vst.msk [vmem:[#allocation2 + $0x8] sm:$0xff] %vm183_vm8, %v3717_v35 }
 0x19c   : > { %v7048_v31 = vpop.f32.mrb[80].mxu0  ;;  %3211 = vst.msk [vmem:[#allocation2 + $0xe8] sm:$0xff] %vm183_vm8, %v3179_v1 }
 0x19d   : > { %v4012_v43 = vpop.f32.mrb[81].mxu0 }
 0x19e   : > { %v7018_v39 = vpop.f32.mrb[84].mxu1  ;;  %v7049_v14 = vpop.f32.mrb[82].mxu0 }
 0x19f   : > { %v3722_v36 = vadd.f32 %v7018_v39, %v3428_v24  ;;  %v3605_v5 = vpop.f32.mrb[85].mxu1  ;;  %v4015_v60 = vpop.f32.mrb[83].mxu0  ;;  %v3815_v2 = vld [vmem:[#allocation2 + $0x10] sm:$0xff] }
 0x1a0   : > { %v3720_v18 = vadd.f32 %v3605_v5, %v3426_v54  ;;  %v7019_v34 = vpop.f32.mrb[86].mxu1  ;;  %v4141_v32 = vadd.f32 %v7048_v31, %v3815_v2  ;;  %v3813_v8 = vld [vmem:[#allocation2] sm:$0xff]  ;;  %v3435_v31 = vld [vmem:[#allocation2 + $0x68] sm:$0xff] }
 0x1a1   : > { %3754 = vst.msk [vmem:[#allocation2 + $0x30] sm:$0xff] %vm183_vm8, %v3722_v36  ;;  %v3723_v27 = vadd.f32 %v7019_v34, %v3429_v37  ;;  %v3608_v42 = vpop.f32.mrb[87].mxu1  ;;  %v4139_v47 = vadd.f32 %v4012_v43, %v3813_v8  ;;  %v3816_v20 = vld [vmem:[#allocation2 + $0x18] sm:$0xff]  ;;  %v3438_v8 = vld [vmem:[#allocation2 + $0x80] sm:$0xff] }
 0x1a2   : > { %3752 = vst.msk [vmem:[#allocation2 + $0x20] sm:$0xff] %vm183_vm8, %v3720_v18  ;;  %v3721_v0 = vadd.f32 %v3608_v42, %v3427_v52  ;;  %4173 = vst.msk [vmem:[#allocation2 + $0x10] sm:$0xff] %vm183_vm8, %v4141_v32  ;;  %v4142_v29 = vadd.f32 %v7049_v14, %v3816_v20  ;;  %v3814_v38 = vld [vmem:[#allocation2 + $0x8] sm:$0xff]  ;;  %v3440_v18 = vld [vmem:[#allocation2 + $0x90] sm:$0xff] }
 0x1a3   : > { %3755 = vst.msk [vmem:[#allocation2 + $0x38] sm:$0xff] %vm183_vm8, %v3723_v27  ;;  %4171 = vst.msk [vmem:[#allocation2] sm:$0xff] %vm183_vm8, %v4139_v47  ;;  %v4140_v21 = vadd.f32 %v4015_v60, %v3814_v38  ;;  %v3441_v20 = vld [vmem:[#allocation2 + $0x98] sm:$0xff] }
 0x1a4   : > { %3753 = vst.msk [vmem:[#allocation2 + $0x28] sm:$0xff] %vm183_vm8, %v3721_v0  ;;  %v7052_v53 = vpop.f32.mrb[84].mxu0  ;;  %4174 = vst.msk [vmem:[#allocation2 + $0x18] sm:$0xff] %vm183_vm8, %v4142_v29 }
 0x1a5   : > { %v4028_v48 = vpop.f32.mrb[85].mxu0  ;;  %4172 = vst.msk [vmem:[#allocation2 + $0x8] sm:$0xff] %vm183_vm8, %v4140_v21 }
 0x1a6   : > { %v7022_v59 = vpop.f32.mrb[88].mxu1  ;;  %v7053_v10 = vpop.f32.mrb[86].mxu0 }
 0x1a7   : > { %v3726_v15 = vadd.f32 %v7022_v59, %v3432_v55  ;;  %v3621_v13 = vpop.f32.mrb[89].mxu1  ;;  %v4031_v17 = vpop.f32.mrb[87].mxu0 }
 0x1a8   : > { %v3819_v58 = vld [vmem:[#allocation2 + $0x30] sm:$0xff]  ;;  %v3724_v44 = vadd.f32 %v3621_v13, %v3430_v51  ;;  %v7023_v9 = vpop.f32.mrb[90].mxu1 }
 0x1a9   : > { %v4145_v62 = vadd.f32 %v7052_v53, %v3819_v58  ;;  %3758 = vst.msk [vmem:[#allocation2 + $0x50] sm:$0xff] %vm183_vm8, %v3726_v15  ;;  %v3817_v22 = vld [vmem:[#allocation2 + $0x20] sm:$0xff]  ;;  %v3727_v50 = vadd.f32 %v7023_v9, %v3433_v56  ;;  %v3624_v25 = vpop.f32.mrb[91].mxu1  ;;  %v3439_v53 = vld [vmem:[#allocation2 + $0x88] sm:$0xff] }
 0x1aa   : > { %v4143_v45 = vadd.f32 %v4028_v48, %v3817_v22  ;;  %3756 = vst.msk [vmem:[#allocation2 + $0x40] sm:$0xff] %vm183_vm8, %v3724_v44  ;;  %v3820_v16 = vld [vmem:[#allocation2 + $0x38] sm:$0xff]  ;;  %v3725_v57 = vadd.f32 %v3624_v25, %v3431_v4  ;;  %v3444_v44 = vld [vmem:[#allocation2 + $0xb0] sm:$0xff]  ;;  %v3442_v22 = vld [vmem:[#allocation2 + $0xa0] sm:$0xff] }
 0x1ab   : > { %4177 = vst.msk [vmem:[#allocation2 + $0x30] sm:$0xff] %vm183_vm8, %v4145_v62  ;;  %v4146_v63 = vadd.f32 %v7053_v10, %v3820_v16  ;;  %3759 = vst.msk [vmem:[#allocation2 + $0x58] sm:$0xff] %vm183_vm8, %v3727_v50  ;;  %v3818_v30 = vld [vmem:[#allocation2 + $0x28] sm:$0xff]  ;;  %v3445_v16 = vld [vmem:[#allocation2 + $0xb8] sm:$0xff] }
 0x1ac   : > { %4175 = vst.msk [vmem:[#allocation2 + $0x20] sm:$0xff] %vm183_vm8, %v4143_v45  ;;  %v4144_v26 = vadd.f32 %v4031_v17, %v3818_v30  ;;  %3757 = vst.msk [vmem:[#allocation2 + $0x48] sm:$0xff] %vm183_vm8, %v3725_v57  ;;  %v7056_v19 = vpop.f32.mrb[88].mxu0 }
 0x1ad   : > { %4178 = vst.msk [vmem:[#allocation2 + $0x38] sm:$0xff] %vm183_vm8, %v4146_v63  ;;  %v4044_v46 = vpop.f32.mrb[89].mxu0 }
 0x1ae   : > { %4176 = vst.msk [vmem:[#allocation2 + $0x28] sm:$0xff] %vm183_vm8, %v4144_v26  ;;  %v7026_v6 = vpop.f32.mrb[92].mxu1  ;;  %v7057_v40 = vpop.f32.mrb[90].mxu0 }
 0x1af   : > { %v3730_v7 = vadd.f32 %v7026_v6, %v3436_v28  ;;  %v3637_v3 = vpop.f32.mrb[93].mxu1  ;;  %v4047_v61 = vpop.f32.mrb[91].mxu0 }
 0x1b0   : > { %v3823_v11 = vld [vmem:[#allocation2 + $0x50] sm:$0xff]  ;;  %v3728_v33 = vadd.f32 %v3637_v3, %v3434_v12  ;;  %v7027_v23 = vpop.f32.mrb[94].mxu1 }
 0x1b1   : > { %v4149_v49 = vadd.f32 %v7056_v19, %v3823_v11  ;;  %3762 = vst.msk [vmem:[#allocation2 + $0x70] sm:$0xff] %vm183_vm8, %v3730_v7  ;;  %v3821_v35 = vld [vmem:[#allocation2 + $0x40] sm:$0xff]  ;;  %v3731_v1 = vadd.f32 %v7027_v23, %v3437_v41  ;;  %v3640_v43 = vpop.f32.mrb[95].mxu1  ;;  %v3443_v19 = vld [vmem:[#allocation2 + $0xa8] sm:$0xff] }
 0x1b2   : > { %v4147_v24 = vadd.f32 %v4044_v46, %v3821_v35  ;;  %3760 = vst.msk [vmem:[#allocation2 + $0x60] sm:$0xff] %vm183_vm8, %v3728_v33  ;;  %v3824_v39 = vld [vmem:[#allocation2 + $0x58] sm:$0xff]  ;;  %v3729_v14 = vadd.f32 %v3640_v43, %v3435_v31  ;;  %v3448_v33 = vld [vmem:[#allocation2 + $0xd0] sm:$0xff]  ;;  %v3446_v35 = vld [vmem:[#allocation2 + $0xc0] sm:$0xff] }
 0x1b3   : > { %4181 = vst.msk [vmem:[#allocation2 + $0x50] sm:$0xff] %vm183_vm8, %v4149_v49  ;;  %v4150_v36 = vadd.f32 %v7057_v40, %v3824_v39  ;;  %3763 = vst.msk [vmem:[#allocation2 + $0x78] sm:$0xff] %vm183_vm8, %v3731_v1  ;;  %v3822_v54 = vld [vmem:[#allocation2 + $0x48] sm:$0xff]  ;;  %v3449_v39 = vld [vmem:[#allocation2 + $0xd8] sm:$0xff] }
 0x1b4   : > { %4179 = vst.msk [vmem:[#allocation2 + $0x40] sm:$0xff] %vm183_vm8, %v4147_v24  ;;  %v4148_v5 = vadd.f32 %v4047_v61, %v3822_v54  ;;  %3761 = vst.msk [vmem:[#allocation2 + $0x68] sm:$0xff] %vm183_vm8, %v3729_v14  ;;  %v7060_v60 = vpop.f32.mrb[92].mxu0 }
 0x1b5   : > { %4182 = vst.msk [vmem:[#allocation2 + $0x58] sm:$0xff] %vm183_vm8, %v4150_v36  ;;  %v4060_v2 = vpop.f32.mrb[93].mxu0 }
 0x1b6   : > { %4180 = vst.msk [vmem:[#allocation2 + $0x48] sm:$0xff] %vm183_vm8, %v4148_v5  ;;  %v7030_v37 = vpop.f32.mrb[96].mxu1  ;;  %v7061_v34 = vpop.f32.mrb[94].mxu0 }
 0x1b7   : > { %v3734_v32 = vadd.f32 %v7030_v37, %v3440_v18  ;;  %v3653_v27 = vpop.f32.mrb[97].mxu1  ;;  %v4063_v52 = vpop.f32.mrb[95].mxu0 }
 0x1b8   : > { %v3827_v42 = vld [vmem:[#allocation2 + $0x70] sm:$0xff]  ;;  %v3732_v47 = vadd.f32 %v3653_v27, %v3438_v8  ;;  %v7031_v0 = vpop.f32.mrb[98].mxu1 }
 0x1b9   : > { %v4153_v29 = vadd.f32 %v7060_v60, %v3827_v42  ;;  %3766 = vst.msk [vmem:[#allocation2 + $0x90] sm:$0xff] %vm183_vm8, %v3734_v32  ;;  %v3825_v38 = vld [vmem:[#allocation2 + $0x60] sm:$0xff]  ;;  %v3735_v21 = vadd.f32 %v7031_v0, %v3441_v20  ;;  %v3656_v48 = vpop.f32.mrb[99].mxu1  ;;  %v3447_v60 = vld [vmem:[#allocation2 + $0xc8] sm:$0xff] }
 0x1ba   : > { %v4151_v55 = vadd.f32 %v4060_v2, %v3825_v38  ;;  %3764 = vst.msk [vmem:[#allocation2 + $0x80] sm:$0xff] %vm183_vm8, %v3732_v47  ;;  %v3828_v59 = vld [vmem:[#allocation2 + $0x78] sm:$0xff]  ;;  %v3733_v10 = vadd.f32 %v3656_v48, %v3439_v53  ;;  %v3452_v47 = vld [vmem:[#allocation2 + $0xf0] sm:$0xff]  ;;  %v3450_v38 = vld [vmem:[#allocation2 + $0xe0] sm:$0xff] }
 0x1bb   : > { %4185 = vst.msk [vmem:[#allocation2 + $0x70] sm:$0xff] %vm183_vm8, %v4153_v29  ;;  %v4154_v15 = vadd.f32 %v7061_v34, %v3828_v59  ;;  %3767 = vst.msk [vmem:[#allocation2 + $0x98] sm:$0xff] %vm183_vm8, %v3735_v21  ;;  %v3826_v51 = vld [vmem:[#allocation2 + $0x68] sm:$0xff]  ;;  %v3453_v59 = vld [vmem:[#allocation2 + $0xf8] sm:$0xff] }
 0x1bc   : > { %4183 = vst.msk [vmem:[#allocation2 + $0x60] sm:$0xff] %vm183_vm8, %v4151_v55  ;;  %v4152_v13 = vadd.f32 %v4063_v52, %v3826_v51  ;;  %3765 = vst.msk [vmem:[#allocation2 + $0x88] sm:$0xff] %vm183_vm8, %v3733_v10 }
 0x1bd   : > { %4186 = vst.msk [vmem:[#allocation2 + $0x78] sm:$0xff] %vm183_vm8, %v4154_v15 }
 0x1be   : > { %4184 = vst.msk [vmem:[#allocation2 + $0x68] sm:$0xff] %vm183_vm8, %v4152_v13  ;;  %v7034_v56 = vpop.f32.mrb[100].mxu1 }
 0x1bf   : > { %v7064_v17 = vpop.f32.mrb[96].mxu0  ;;  %v3738_v62 = vadd.f32 %v7034_v56, %v3444_v44  ;;  %v3669_v50 = vpop.f32.mrb[101].mxu1 }
 0x1c0   : > { %v4076_v58 = vpop.f32.mrb[97].mxu0  ;;  %v3831_v25 = vld [vmem:[#allocation2 + $0x90] sm:$0xff]  ;;  %v3736_v45 = vadd.f32 %v3669_v50, %v3442_v22  ;;  %v7035_v57 = vpop.f32.mrb[102].mxu1 }
 0x1c1   : > { %v7065_v9 = vpop.f32.mrb[98].mxu0  ;;  %v4157_v63 = vadd.f32 %v7064_v17, %v3831_v25  ;;  %3770 = vst.msk [vmem:[#allocation2 + $0xb0] sm:$0xff] %vm183_vm8, %v3738_v62  ;;  %v3829_v30 = vld [vmem:[#allocation2 + $0x80] sm:$0xff]  ;;  %v3739_v26 = vadd.f32 %v7035_v57, %v3445_v16  ;;  %v3672_v46 = vpop.f32.mrb[103].mxu1  ;;  %v3451_v17 = vld [vmem:[#allocation2 + $0xe8] sm:$0xff] }
 0x1c2   : > { %v4079_v4 = vpop.f32.mrb[99].mxu0  ;;  %v4155_v28 = vadd.f32 %v4076_v58, %v3829_v30  ;;  %3768 = vst.msk [vmem:[#allocation2 + $0xa0] sm:$0xff] %vm183_vm8, %v3736_v45  ;;  %v3832_v6 = vld [vmem:[#allocation2 + $0x98] sm:$0xff]  ;;  %v3737_v40 = vadd.f32 %v3672_v46, %v3443_v19  ;;  %v4637_v45 = vld [vmem:[#allocation2 + $0x10] sm:$0xff]  ;;  %v4635_v30 = vld [vmem:[#allocation2] sm:$0xff] }
 0x1c3   : > { %4189 = vst.msk [vmem:[#allocation2 + $0x90] sm:$0xff] %vm183_vm8, %v4157_v63  ;;  %v4158_v7 = vadd.f32 %v7065_v9, %v3832_v6  ;;  %3771 = vst.msk [vmem:[#allocation2 + $0xb8] sm:$0xff] %vm183_vm8, %v3739_v26  ;;  %v3830_v12 = vld [vmem:[#allocation2 + $0x88] sm:$0xff]  ;;  %v4638_v6 = vld [vmem:[#allocation2 + $0x18] sm:$0xff] }
 0x1c4   : > { %4187 = vst.msk [vmem:[#allocation2 + $0x80] sm:$0xff] %vm183_vm8, %v4155_v28  ;;  %v4156_v3 = vadd.f32 %v4079_v4, %v3830_v12  ;;  %3769 = vst.msk [vmem:[#allocation2 + $0xa8] sm:$0xff] %vm183_vm8, %v3737_v40 }
 0x1c5   : > { %4190 = vst.msk [vmem:[#allocation2 + $0x98] sm:$0xff] %vm183_vm8, %v4158_v7 }
 0x1c6   : > { %4188 = vst.msk [vmem:[#allocation2 + $0x88] sm:$0xff] %vm183_vm8, %v4156_v3 }
 0x1c7   : > { %v7068_v61 = vpop.f32.mrb[100].mxu0  ;;  %v7038_v41 = vpop.f32.mrb[104].mxu1 }
 0x1c8   : > { %v4092_v11 = vpop.f32.mrb[101].mxu0  ;;  %v3742_v49 = vadd.f32 %v7038_v41, %v3448_v33  ;;  %v3685_v1 = vpop.f32.mrb[105].mxu1  ;;  %v3835_v43 = vld [vmem:[#allocation2 + $0xb0] sm:$0xff] }
 0x1c9   : > { %v7069_v23 = vpop.f32.mrb[102].mxu0  ;;  %v3740_v24 = vadd.f32 %v3685_v1, %v3446_v35  ;;  %v7039_v14 = vpop.f32.mrb[106].mxu1  ;;  %v4161_v36 = vadd.f32 %v7068_v61, %v3835_v43  ;;  %v3833_v54 = vld [vmem:[#allocation2 + $0xa0] sm:$0xff]  ;;  %v4636_v61 = vld [vmem:[#allocation2 + $0x8] sm:$0xff] }
 0x1ca   : > { %v4095_v31 = vpop.f32.mrb[103].mxu0  ;;  %3774 = vst.msk [vmem:[#allocation2 + $0xd0] sm:$0xff] %vm183_vm8, %v3742_v49  ;;  %v3743_v5 = vadd.f32 %v7039_v14, %v3449_v39  ;;  %v3688_v2 = vpop.f32.mrb[107].mxu1  ;;  %v4159_v18 = vadd.f32 %v4092_v11, %v3833_v54  ;;  %v3836_v37 = vld [vmem:[#allocation2 + $0xb8] sm:$0xff]  ;;  %v4639_v54 = vld [vmem:[#allocation2 + $0x20] sm:$0xff] }
 0x1cb   : > { %3772 = vst.msk [vmem:[#allocation2 + $0xc0] sm:$0xff] %vm183_vm8, %v3740_v24  ;;  %v3741_v34 = vadd.f32 %v3688_v2, %v3447_v60  ;;  %4193 = vst.msk [vmem:[#allocation2 + $0xb0] sm:$0xff] %vm183_vm8, %v4161_v36  ;;  %v4162_v32 = vadd.f32 %v7069_v23, %v3836_v37  ;;  %v3834_v8 = vld [vmem:[#allocation2 + $0xa8] sm:$0xff]  ;;  %v4641_v24 = vld [vmem:[#allocation2 + $0x30] sm:$0xff] }
 0x1cc   : > { %3775 = vst.msk [vmem:[#allocation2 + $0xd8] sm:$0xff] %vm183_vm8, %v3743_v5  ;;  %4191 = vst.msk [vmem:[#allocation2 + $0xa0] sm:$0xff] %vm183_vm8, %v4159_v18  ;;  %v4160_v27 = vadd.f32 %v4095_v31, %v3834_v8  ;;  %v4642_v37 = vld [vmem:[#allocation2 + $0x38] sm:$0xff] }
 0x1cd   : > { %3773 = vst.msk [vmem:[#allocation2 + $0xc8] sm:$0xff] %vm183_vm8, %v3741_v34  ;;  %4194 = vst.msk [vmem:[#allocation2 + $0xb8] sm:$0xff] %vm183_vm8, %v4162_v32 }
 0x1ce   : > { %4192 = vst.msk [vmem:[#allocation2 + $0xa8] sm:$0xff] %vm183_vm8, %v4160_v27 }
 0x1cf   : > { %v7072_v52 = vpop.f32.mrb[104].mxu0  ;;  %v7042_v20 = vpop.f32.mrb[108].mxu1 }
 0x1d0   : > { %v4108_v42 = vpop.f32.mrb[105].mxu0  ;;  %v3746_v29 = vadd.f32 %v7042_v20, %v3452_v47  ;;  %v3701_v21 = vpop.f32.mrb[109].mxu1 }
 0x1d1   : > { %v7073_v0 = vpop.f32.mrb[106].mxu0  ;;  %v3839_v48 = vld [vmem:[#allocation2 + $0xd0] sm:$0xff]  ;;  %v3744_v55 = vadd.f32 %v3701_v21, %v3450_v38  ;;  %v7043_v10 = vpop.f32.mrb[110].mxu1 }
 0x1d2   : > { %v4111_v53 = vpop.f32.mrb[107].mxu0  ;;  %v4165_v15 = vadd.f32 %v7072_v52, %v3839_v48  ;;  %3778 = vst.msk [vmem:[#allocation2 + $0xf0] sm:$0xff] %vm183_vm8, %v3746_v29  ;;  %v3837_v51 = vld [vmem:[#allocation2 + $0xc0] sm:$0xff]  ;;  %v3747_v13 = vadd.f32 %v7043_v10, %v3453_v59  ;;  %v3704_v58 = vpop.f32.mrb[111].mxu1  ;;  %v4640_v52 = vld [vmem:[#allocation2 + $0x28] sm:$0xff] }
 0x1d3   : > { %v4163_v44 = vadd.f32 %v4108_v42, %v3837_v51  ;;  %3776 = vst.msk [vmem:[#allocation2 + $0xe0] sm:$0xff] %vm183_vm8, %v3744_v55  ;;  %v3840_v56 = vld [vmem:[#allocation2 + $0xd8] sm:$0xff]  ;;  %v3745_v9 = vadd.f32 %v3704_v58, %v3451_v17  ;;  %v4645_v55 = vld [vmem:[#allocation2 + $0x50] sm:$0xff]  ;;  %v4643_v51 = vld [vmem:[#allocation2 + $0x40] sm:$0xff] }
 0x1d4   : > { %4197 = vst.msk [vmem:[#allocation2 + $0xd0] sm:$0xff] %vm183_vm8, %v4165_v15  ;;  %v4166_v62 = vadd.f32 %v7073_v0, %v3840_v56  ;;  %3779 = vst.msk [vmem:[#allocation2 + $0xf8] sm:$0xff] %vm183_vm8, %v3747_v13  ;;  %v3838_v22 = vld [vmem:[#allocation2 + $0xc8] sm:$0xff]  ;;  %v4646_v56 = vld [vmem:[#allocation2 + $0x58] sm:$0xff] }
 0x1d5   : > { %4195 = vst.msk [vmem:[#allocation2 + $0xc0] sm:$0xff] %vm183_vm8, %v4163_v44  ;;  %v4164_v50 = vadd.f32 %v4111_v53, %v3838_v22  ;;  %3777 = vst.msk [vmem:[#allocation2 + $0xe8] sm:$0xff] %vm183_vm8, %v3745_v9 }
 0x1d6   : > { %4198 = vst.msk [vmem:[#allocation2 + $0xd8] sm:$0xff] %vm183_vm8, %v4166_v62 }
 0x1d7   : > { %v7076_v4 = vpop.f32.mrb[108].mxu0  ;;  %4196 = vst.msk [vmem:[#allocation2 + $0xc8] sm:$0xff] %vm183_vm8, %v4164_v50  ;;  %v7082_v16 = vpop.f32.mrb[112].mxu1 }
 0x1d8   : > { %v4124_v25 = vpop.f32.mrb[109].mxu0  ;;  %v4931_v63 = vadd.f32 %v7082_v16, %v4637_v45  ;;  %v4802_v26 = vpop.f32.mrb[113].mxu1 }
 0x1d9   : > { %v7077_v57 = vpop.f32.mrb[110].mxu0  ;;  %v3843_v46 = vld [vmem:[#allocation2 + $0xf0] sm:$0xff]  ;;  %v4929_v28 = vadd.f32 %v4802_v26, %v4635_v30  ;;  %v7083_v40 = vpop.f32.mrb[114].mxu1 }
 0x1da   : > { %v4127_v19 = vpop.f32.mrb[111].mxu0  ;;  %v4169_v7 = vadd.f32 %v7076_v4, %v3843_v46  ;;  %v3841_v12 = vld [vmem:[#allocation2 + $0xe0] sm:$0xff]  ;;  %4963 = vst.msk [vmem:[#allocation2 + $0x10] sm:$0xff] %vm183_vm8, %v4931_v63  ;;  %v4932_v3 = vadd.f32 %v7083_v40, %v4638_v6  ;;  %v4805_v11 = vpop.f32.mrb[115].mxu1  ;;  %v4644_v4 = vld [vmem:[#allocation2 + $0x48] sm:$0xff] }
 0x1db   : > { %v4167_v33 = vadd.f32 %v4124_v25, %v3841_v12  ;;  %v3844_v41 = vld [vmem:[#allocation2 + $0xf8] sm:$0xff]  ;;  %4961 = vst.msk [vmem:[#allocation2] sm:$0xff] %vm183_vm8, %v4929_v28  ;;  %v4930_v23 = vadd.f32 %v4805_v11, %v4636_v61 }
 0x1dc   : > { %4201 = vst.msk [vmem:[#allocation2 + $0xf0] sm:$0xff] %vm183_vm8, %v4169_v7  ;;  %v4170_v49 = vadd.f32 %v7077_v57, %v3844_v41  ;;  %v3842_v35 = vld [vmem:[#allocation2 + $0xe8] sm:$0xff]  ;;  %4964 = vst.msk [vmem:[#allocation2 + $0x18] sm:$0xff] %vm183_vm8, %v4932_v3 }
 0x1dd   : > { %4199 = vst.msk [vmem:[#allocation2 + $0xe0] sm:$0xff] %vm183_vm8, %v4167_v33  ;;  %v4168_v1 = vadd.f32 %v4127_v19, %v3842_v35  ;;  %4962 = vst.msk [vmem:[#allocation2 + $0x8] sm:$0xff] %vm183_vm8, %v4930_v23 }
 0x1de   : > { %4202 = vst.msk [vmem:[#allocation2 + $0xf8] sm:$0xff] %vm183_vm8, %v4170_v49 }
 0x1df   : > { %v7116_v31 = vpop.f32.mrb[112].mxu0  ;;  %4200 = vst.msk [vmem:[#allocation2 + $0xe8] sm:$0xff] %vm183_vm8, %v4168_v1  ;;  %v7086_v39 = vpop.f32.mrb[116].mxu1  ;;  %v4649_v1 = vld [vmem:[#allocation2 + $0x70] sm:$0xff] }
 0x1e0   : > { %v5368_v43 = vpop.f32.mrb[113].mxu0  ;;  %v4935_v36 = vadd.f32 %v7086_v39, %v4641_v24  ;;  %v4818_v5 = vpop.f32.mrb[117].mxu1 }
 0x1e1   : > { %v7117_v14 = vpop.f32.mrb[114].mxu0  ;;  %v5203_v2 = vld [vmem:[#allocation2 + $0x10] sm:$0xff]  ;;  %v4933_v18 = vadd.f32 %v4818_v5, %v4639_v54  ;;  %v7087_v34 = vpop.f32.mrb[118].mxu1 }
 0x1e2   : > { %v5371_v60 = vpop.f32.mrb[115].mxu0  ;;  %v5497_v32 = vadd.f32 %v7116_v31, %v5203_v2  ;;  %4967 = vst.msk [vmem:[#allocation2 + $0x30] sm:$0xff] %vm183_vm8, %v4935_v36  ;;  %v5201_v8 = vld [vmem:[#allocation2] sm:$0xff]  ;;  %v4936_v27 = vadd.f32 %v7087_v34, %v4642_v37  ;;  %v4821_v42 = vpop.f32.mrb[119].mxu1 }
 0x1e3   : > { %v5495_v47 = vadd.f32 %v5368_v43, %v5201_v8  ;;  %4965 = vst.msk [vmem:[#allocation2 + $0x20] sm:$0xff] %vm183_vm8, %v4933_v18  ;;  %v5204_v20 = vld [vmem:[#allocation2 + $0x18] sm:$0xff]  ;;  %v4934_v0 = vadd.f32 %v4821_v42, %v4640_v52  ;;  %v4647_v36 = vld [vmem:[#allocation2 + $0x60] sm:$0xff] }
 0x1e4   : > { %5529 = vst.msk [vmem:[#allocation2 + $0x10] sm:$0xff] %vm183_vm8, %v5497_v32  ;;  %v5498_v29 = vadd.f32 %v7117_v14, %v5204_v20  ;;  %4968 = vst.msk [vmem:[#allocation2 + $0x38] sm:$0xff] %vm183_vm8, %v4936_v27  ;;  %v5202_v38 = vld [vmem:[#allocation2 + $0x8] sm:$0xff]  ;;  %v4650_v32 = vld [vmem:[#allocation2 + $0x78] sm:$0xff] }
 0x1e5   : > { %5527 = vst.msk [vmem:[#allocation2] sm:$0xff] %vm183_vm8, %v5495_v47  ;;  %v5496_v21 = vadd.f32 %v5371_v60, %v5202_v38  ;;  %4966 = vst.msk [vmem:[#allocation2 + $0x28] sm:$0xff] %vm183_vm8, %v4934_v0  ;;  %v4648_v0 = vld [vmem:[#allocation2 + $0x68] sm:$0xff] }
 0x1e6   : > { %5530 = vst.msk [vmem:[#allocation2 + $0x18] sm:$0xff] %vm183_vm8, %v5498_v29 }
 0x1e7   : > { %v7120_v53 = vpop.f32.mrb[116].mxu0  ;;  %5528 = vst.msk [vmem:[#allocation2 + $0x8] sm:$0xff] %vm183_vm8, %v5496_v21  ;;  %v7090_v59 = vpop.f32.mrb[120].mxu1 }
 0x1e8   : > { %v5384_v48 = vpop.f32.mrb[117].mxu0  ;;  %v4939_v15 = vadd.f32 %v7090_v59, %v4645_v55  ;;  %v4834_v13 = vpop.f32.mrb[121].mxu1 }
 0x1e9   : > { %v7121_v10 = vpop.f32.mrb[118].mxu0  ;;  %v5207_v58 = vld [vmem:[#allocation2 + $0x30] sm:$0xff]  ;;  %v4937_v44 = vadd.f32 %v4834_v13, %v4643_v51  ;;  %v7091_v9 = vpop.f32.mrb[122].mxu1 }
 0x1ea   : > { %v5387_v17 = vpop.f32.mrb[119].mxu0  ;;  %v5501_v62 = vadd.f32 %v7120_v53, %v5207_v58  ;;  %4971 = vst.msk [vmem:[#allocation2 + $0x50] sm:$0xff] %vm183_vm8, %v4939_v15  ;;  %v5205_v22 = vld [vmem:[#allocation2 + $0x20] sm:$0xff]  ;;  %v4940_v50 = vadd.f32 %v7091_v9, %v4646_v56  ;;  %v4837_v25 = vpop.f32.mrb[123].mxu1 }
 0x1eb   : > { %v5561_v45 = vld [vmem:[#allocation2 + $0x10] sm:$0xff]  ;;  %v5499_v16 = vadd.f32 %v5384_v48, %v5205_v22  ;;  %4969 = vst.msk [vmem:[#allocation2 + $0x40] sm:$0xff] %vm183_vm8, %v4937_v44  ;;  %v5208_v57 = vld [vmem:[#allocation2 + $0x38] sm:$0xff]  ;;  %v4938_v63 = vadd.f32 %v4837_v25, %v4644_v4 }
 0x1ec   : > { %v6657_v30 = vpack.c.bf16 %v5561_v45, %v5561_v45  ;;  %v5559_v26 = vld [vmem:[#allocation2] sm:$0xff]  ;;  %5533 = vst.msk [vmem:[#allocation2 + $0x30] sm:$0xff] %vm183_vm8, %v5501_v62  ;;  %v5502_v19 = vadd.f32 %v7121_v10, %v5208_v57  ;;  %4972 = vst.msk [vmem:[#allocation2 + $0x58] sm:$0xff] %vm183_vm8, %v4940_v50  ;;  %v5206_v46 = vld [vmem:[#allocation2 + $0x28] sm:$0xff]  ;;  %v5825_v3 = vmul.f32 %v5561_v45, %v5561_v45  ;;  %v5755_v60 = vsel %vm183_vm8, %v5561_v45, 0.0 }
 0x1ed   : > { %v6655_v28 = vpack.c.bf16 %v5559_v26, %v5559_v26  ;;  %v5823_v6 = vmul.f32 %v5559_v26, %v5559_v26  ;;  %v5562_v40 = vld [vmem:[#allocation2 + $0x18] sm:$0xff]  ;;  %5531 = vst.msk [vmem:[#allocation2 + $0x20] sm:$0xff] %vm183_vm8, %v5499_v16  ;;  %v5500_v7 = vadd.f32 %v5387_v17, %v5206_v46  ;;  %4970 = vst.msk [vmem:[#allocation2 + $0x48] sm:$0xff] %vm183_vm8, %v4938_v63  ;;  %v5752_v41 = vsel %vm183_vm8, %v5559_v26, 0.0 }
 0x1ee   : > { %5722 = vst.msk [vmem:[%s8856_s14 + $0x8] sm:$0xf] %vm5719_vm9, %v6657_v30  ;;  %v6658_v61 = vpack.c.bf16 %v5562_v40, %v5562_v40  ;;  %v5560_v11 = vld [vmem:[#allocation2 + $0x8] sm:$0xff]  ;;  %v5826_v24 = vmul.f32 %v5562_v40, %v5562_v40  ;;  %v5858_v38 = vsel %vm183_vm8, %v5825_v3, 0.0  ;;  %v5757_v55 = vsel %vm183_vm8, %v5562_v40, 0.0 }
 0x1ef   : > { %v7124_v12 = vpop.f32.mrb[120].mxu0  ;;  %5534 = vst.msk [vmem:[#allocation2 + $0x38] sm:$0xff] %vm183_vm8, %v5502_v19  ;;  %v6656_v23 = vpack.c.bf16 %v5560_v11, %v5560_v11  ;;  %v5753_v49 = vsel %vm183_vm8, %v5560_v11, 0.0  ;;  %v5824_v35 = vmul.f32 %v5560_v11, %v5560_v11  ;;  %5532 = vst.msk [vmem:[#allocation2 + $0x28] sm:$0xff] %vm183_vm8, %v5500_v7  ;;  %v5855_v2 = vsel %vm183_vm8, %v5823_v6, 0.0 }
 0x1f0   : > { %v5400_v33 = vpop.f32.mrb[121].mxu0  ;;  %5720 = vst.msk [vmem:[%s8856_s14] sm:$0xf] %vm5719_vm9, %v6655_v28  ;;  %5723 = vst.msk [vmem:[%s8856_s14 + $0xc] sm:$0xf] %vm5719_vm9, %v6658_v61  ;;  %v5754_v39 = vadd.f32 %v5753_v49, %v5752_v41  ;;  %v5860_v59 = vsel %vm183_vm8, %v5826_v24, 0.0 }
 0x1f1   : > { %v7094_v31 = vpop.f32.mrb[124].mxu1  ;;  %v8871_v43 = vpop.f32.mrb[122].mxu0  ;;  %5721 = vst.msk [vmem:[%s8856_s14 + $0x4] sm:$0xf] %vm5719_vm9, %v6656_v23  ;;  %v5856_v18 = vsel %vm183_vm8, %v5824_v35, 0.0  ;;  %v5211_v37 = vld [vmem:[#allocation2 + $0x50] sm:$0xff] }
 0x1f2   : > { %v4943_v14 = vadd.f32 %v7094_v31, %v4649_v1  ;;  %v4850_v54 = vpop.f32.mrb[125].mxu1  ;;  %v8875_v5 = vpop.f32.mrb[123].mxu0  ;;  %v5756_v27 = vadd.f32 %v5755_v60, %v5754_v39  ;;  %v5857_v52 = vadd.f32 %v5856_v18, %v5855_v2  ;;  %v5505_v42 = vadd.f32 %v7124_v12, %v5211_v37  ;;  %v5209_v47 = vld [vmem:[#allocation2 + $0x40] sm:$0xff]  ;;  %v4653_v12 = vld [vmem:[#allocation2 + $0x90] sm:$0xff]  ;;  %v4654_v1 = vld [vmem:[#allocation2 + $0x98] sm:$0xff] }
 0x1f3   : > { %v4941_v34 = vadd.f32 %v4850_v54, %v4647_v36  ;;  %v7095_v8 = vpop.f32.mrb[126].mxu1  ;;  %v5565_v21 = vld [vmem:[#allocation2 + $0x30] sm:$0xff]  ;;  %v5503_v53 = vadd.f32 %v5400_v33, %v5209_v47  ;;  %v5212_v9 = vld [vmem:[#allocation2 + $0x58] sm:$0xff]  ;;  %v4651_v35 = vld [vmem:[#allocation2 + $0x80] sm:$0xff] }
 0x1f4   : > { %4975 = vst.msk [vmem:[#allocation2 + $0x70] sm:$0xff] %vm183_vm8, %v4943_v14  ;;  %v4944_v20 = vadd.f32 %v7095_v8, %v4650_v32  ;;  %v4853_v29 = vpop.f32.mrb[127].mxu1  ;;  %v5859_v10 = vadd.f32 %v5858_v38, %v5857_v52  ;;  %v6661_v15 = vpack.c.bf16 %v5565_v21, %v5565_v21  ;;  %v5563_v51 = vld [vmem:[#allocation2 + $0x20] sm:$0xff]  ;;  %5537 = vst.msk [vmem:[#allocation2 + $0x50] sm:$0xff] %vm183_vm8, %v5505_v42  ;;  %v5763_v22 = vsel %vm183_vm8, %v5565_v21, 0.0  ;;  %v5210_v45 = vld [vmem:[#allocation2 + $0x48] sm:$0xff] }
 0x1f5   : > { %4973 = vst.msk [vmem:[#allocation2 + $0x60] sm:$0xff] %vm183_vm8, %v4941_v34  ;;  %v4942_v48 = vadd.f32 %v4853_v29, %v4648_v0  ;;  %v6659_v13 = vpack.c.bf16 %v5563_v51, %v5563_v51  ;;  %v5758_v17 = vadd.f32 %v5757_v55, %v5756_v27  ;;  %v5759_v58 = vsel %vm183_vm8, %v5563_v51, 0.0  ;;  %5535 = vst.msk [vmem:[#allocation2 + $0x40] sm:$0xff] %vm183_vm8, %v5503_v53  ;;  %v4652_v54 = vld [vmem:[#allocation2 + $0x88] sm:$0xff] }
 0x1f6   : > { %4976 = vst.msk [vmem:[#allocation2 + $0x78] sm:$0xff] %vm183_vm8, %v4944_v20  ;;  %v5827_v44 = vmul.f32 %v5563_v51, %v5563_v51  ;;  %v5566_v56 = vld [vmem:[#allocation2 + $0x38] sm:$0xff]  ;;  %v5861_v50 = vadd.f32 %v5860_v59, %v5859_v10  ;;  %v5564_v25 = vld [vmem:[#allocation2 + $0x28] sm:$0xff]  ;;  %v5829_v57 = vmul.f32 %v5565_v21, %v5565_v21  ;;  %v5506_v7 = vadd.f32 %v8871_v43, %v5212_v9 }
 0x1f7   : > { %4974 = vst.msk [vmem:[#allocation2 + $0x68] sm:$0xff] %vm183_vm8, %v4942_v48  ;;  %v6662_v4 = vpack.c.bf16 %v5566_v56, %v5566_v56  ;;  %v5760_v63 = vadd.f32 %v5759_v58, %v5758_v17  ;;  %v6660_v26 = vpack.c.bf16 %v5564_v25, %v5564_v25  ;;  %v5761_v6 = vsel %vm183_vm8, %v5564_v25, 0.0 }
 0x1f8   : > { %v7128_v62 = vpop.f32.mrb[124].mxu0  ;;  %5726 = vst.msk [vmem:[%s8856_s14 + $0x18] sm:$0xf] %vm5719_vm9, %v6661_v15  ;;  %5724 = vst.msk [vmem:[%s8856_s14 + $0x10] sm:$0xf] %vm5719_vm9, %v6659_v13  ;;  %v5862_v30 = vsel %vm183_vm8, %v5827_v44, 0.0  ;;  %v5828_v40 = vmul.f32 %v5564_v25, %v5564_v25  ;;  %v5830_v11 = vmul.f32 %v5566_v56, %v5566_v56  ;;  %v5504_v41 = vadd.f32 %v8875_v5, %v5210_v45 }
 0x1f9   : > { %v5416_v16 = vpop.f32.mrb[125].mxu0  ;;  %v5863_v28 = vadd.f32 %v5862_v30, %v5861_v50  ;;  %5727 = vst.msk [vmem:[%s8856_s14 + $0x1c] sm:$0xf] %vm5719_vm9, %v6662_v4  ;;  %5725 = vst.msk [vmem:[%s8856_s14 + $0x14] sm:$0xf] %vm5719_vm9, %v6660_v26  ;;  %v5762_v33 = vadd.f32 %v5761_v6, %v5760_v63  ;;  %v5866_v8 = vsel %vm183_vm8, %v5829_v57, 0.0 }
 0x1fa   : > { %v7129_v46 = vpop.f32.mrb[126].mxu0  ;;  %v5864_v24 = vsel %vm183_vm8, %v5828_v40, 0.0  ;;  %5538 = vst.msk [vmem:[#allocation2 + $0x58] sm:$0xff] %vm183_vm8, %v5506_v7  ;;  %5536 = vst.msk [vmem:[#allocation2 + $0x48] sm:$0xff] %vm183_vm8, %v5504_v41  ;;  %v5765_v27 = vsel %vm183_vm8, %v5566_v56, 0.0  ;;  %v5868_v53 = vsel %vm183_vm8, %v5830_v11, 0.0 }
 0x1fb   : > { %v5419_v61 = vpop.f32.mrb[127].mxu0  ;;  %v5215_v23 = vld [vmem:[#allocation2 + $0x70] sm:$0xff]  ;;  %v5764_v2 = vadd.f32 %v5763_v22, %v5762_v33  ;;  %v5865_v18 = vadd.f32 %v5864_v24, %v5863_v28 }
 0x1fc   : > { %v5509_v39 = vadd.f32 %v7128_v62, %v5215_v23  ;;  %v5213_v43 = vld [vmem:[#allocation2 + $0x60] sm:$0xff]  ;;  %v5569_v37 = vld [vmem:[#allocation2 + $0x50] sm:$0xff] }
 0x1fd   : > { %v5507_v5 = vadd.f32 %v5416_v16, %v5213_v43  ;;  %v5216_v34 = vld [vmem:[#allocation2 + $0x78] sm:$0xff]  ;;  %v6665_v52 = vpack.c.bf16 %v5569_v37, %v5569_v37  ;;  %v5567_v42 = vld [vmem:[#allocation2 + $0x40] sm:$0xff]  ;;  %v5867_v0 = vadd.f32 %v5866_v8, %v5865_v18  ;;  %v5766_v38 = vadd.f32 %v5765_v27, %v5764_v2  ;;  %v4657_v41 = vld [vmem:[#allocation2 + $0xb0] sm:$0xff] }
 0x1fe   : > { %5541 = vst.msk [vmem:[#allocation2 + $0x70] sm:$0xff] %vm183_vm8, %v5509_v39  ;;  %v5510_v47 = vadd.f32 %v7129_v46, %v5216_v34  ;;  %v5214_v20 = vld [vmem:[#allocation2 + $0x68] sm:$0xff]  ;;  %v6663_v29 = vpack.c.bf16 %v5567_v42, %v5567_v42  ;;  %v5767_v21 = vsel %vm183_vm8, %v5567_v42, 0.0  ;;  %v5831_v48 = vmul.f32 %v5567_v42, %v5567_v42  ;;  %v4655_v27 = vld [vmem:[#allocation2 + $0xa0] sm:$0xff] }
 0x1ff   : > { %5539 = vst.msk [vmem:[#allocation2 + $0x60] sm:$0xff] %vm183_vm8, %v5507_v5  ;;  %v5508_v55 = vadd.f32 %v5419_v61, %v5214_v20  ;;  %v5869_v10 = vadd.f32 %v5868_v53, %v5867_v0  ;;  %v5768_v51 = vadd.f32 %v5767_v21, %v5766_v38  ;;  %v5833_v58 = vmul.f32 %v5569_v37, %v5569_v37  ;;  %v4658_v0 = vld [vmem:[#allocation2 + $0xb8] sm:$0xff] }
 0x200   : > { %v7098_v19 = vpop.f32.mrb[128].mxu1  ;;  %5730 = vst.msk [vmem:[%s8856_s14 + $0x28] sm:$0xf] %vm5719_vm9, %v6665_v52  ;;  %5728 = vst.msk [vmem:[%s8856_s14 + $0x20] sm:$0xf] %vm5719_vm9, %v6663_v29  ;;  %v5870_v13 = vsel %vm183_vm8, %v5831_v48, 0.0 }
 0x201   : > { %v4866_v3 = vpop.f32.mrb[129].mxu1  ;;  %v4947_v49 = vadd.f32 %v7098_v19, %v4653_v12  ;;  %5542 = vst.msk [vmem:[#allocation2 + $0x78] sm:$0xff] %vm183_vm8, %v5510_v47  ;;  %5540 = vst.msk [vmem:[#allocation2 + $0x68] sm:$0xff] %vm183_vm8, %v5508_v55  ;;  %v5570_v44 = vld [vmem:[#allocation2 + $0x58] sm:$0xff]  ;;  %v5871_v9 = vadd.f32 %v5870_v13, %v5869_v10  ;;  %v5568_v50 = vld [vmem:[#allocation2 + $0x48] sm:$0xff]  ;;  %v5771_v46 = vsel %vm183_vm8, %v5569_v37, 0.0 }
 0x202   : > { %v7099_v31 = vpop.f32.mrb[130].mxu1  ;;  %v4945_v14 = vadd.f32 %v4866_v3, %v4651_v35  ;;  %v6666_v62 = vpack.c.bf16 %v5570_v44, %v5570_v44  ;;  %v5834_v22 = vmul.f32 %v5570_v44, %v5570_v44  ;;  %v6664_v25 = vpack.c.bf16 %v5568_v50, %v5568_v50  ;;  %v4656_v29 = vld [vmem:[#allocation2 + $0xa8] sm:$0xff] }
 0x203   : > { %v4948_v36 = vadd.f32 %v7099_v31, %v4654_v1  ;;  %v4869_v60 = vpop.f32.mrb[131].mxu1  ;;  %4979 = vst.msk [vmem:[#allocation2 + $0x90] sm:$0xff] %vm183_vm8, %v4947_v49  ;;  %v5769_v45 = vsel %vm183_vm8, %v5568_v50, 0.0  ;;  %v5832_v16 = vmul.f32 %v5568_v50, %v5568_v50  ;;  %v5874_v28 = vsel %vm183_vm8, %v5833_v58, 0.0 }
 0x204   : > { %v4946_v32 = vadd.f32 %v4869_v60, %v4652_v54  ;;  %4977 = vst.msk [vmem:[#allocation2 + $0x80] sm:$0xff] %vm183_vm8, %v4945_v14  ;;  %v5770_v30 = vadd.f32 %v5769_v45, %v5768_v51  ;;  %v5773_v35 = vsel %vm183_vm8, %v5570_v44, 0.0  ;;  %v5876_v1 = vsel %vm183_vm8, %v5834_v22, 0.0 }
 0x205   : > { %4980 = vst.msk [vmem:[#allocation2 + $0x98] sm:$0xff] %vm183_vm8, %v4948_v36  ;;  %v5573_v57 = vld [vmem:[#allocation2 + $0x70] sm:$0xff]  ;;  %v5872_v6 = vsel %vm183_vm8, %v5832_v16, 0.0 }
 0x206   : > { %4978 = vst.msk [vmem:[#allocation2 + $0x88] sm:$0xff] %vm183_vm8, %v4946_v32  ;;  %v6669_v26 = vpack.c.bf16 %v5573_v57, %v5573_v57  ;;  %v5571_v19 = vld [vmem:[#allocation2 + $0x60] sm:$0xff]  ;;  %v5772_v3 = vadd.f32 %v5771_v46, %v5770_v30  ;;  %v5873_v61 = vadd.f32 %v5872_v6, %v5871_v9  ;;  %v5837_v54 = vmul.f32 %v5573_v57, %v5573_v57 }
 0x207   : > { %v7132_v59 = vpop.f32.mrb[128].mxu0  ;;  %5731 = vst.msk [vmem:[%s8856_s14 + $0x2c] sm:$0xf] %vm5719_vm9, %v6666_v62  ;;  %5729 = vst.msk [vmem:[%s8856_s14 + $0x24] sm:$0xf] %vm5719_vm9, %v6664_v25  ;;  %v6667_v40 = vpack.c.bf16 %v5571_v19, %v5571_v19  ;;  %v5835_v11 = vmul.f32 %v5571_v19, %v5571_v19  ;;  %v5775_v31 = vsel %vm183_vm8, %v5571_v19, 0.0 }
 0x208   : > { %v5432_v15 = vpop.f32.mrb[129].mxu0  ;;  %v5574_v7 = vld [vmem:[#allocation2 + $0x78] sm:$0xff]  ;;  %5734 = vst.msk [vmem:[%s8856_s14 + $0x38] sm:$0xf] %vm5719_vm9, %v6669_v26  ;;  %v5572_v24 = vld [vmem:[#allocation2 + $0x68] sm:$0xff]  ;;  %v5875_v36 = vadd.f32 %v5874_v28, %v5873_v61  ;;  %v5774_v60 = vadd.f32 %v5773_v35, %v5772_v3  ;;  %v5779_v51 = vsel %vm183_vm8, %v5573_v57, 0.0 }
 0x209   : > { %v7133_v17 = vpop.f32.mrb[130].mxu0  ;;  %v6670_v33 = vpack.c.bf16 %v5574_v7, %v5574_v7  ;;  %5732 = vst.msk [vmem:[%s8856_s14 + $0x30] sm:$0xf] %vm5719_vm9, %v6667_v40  ;;  %v6668_v2 = vpack.c.bf16 %v5572_v24, %v5572_v24  ;;  %v5878_v5 = vsel %vm183_vm8, %v5835_v11, 0.0  ;;  %v5777_v34 = vsel %vm183_vm8, %v5572_v24, 0.0  ;;  %v4661_v35 = vld [vmem:[#allocation2 + $0xd0] sm:$0xff] }
 0x20a   : > { %v5435_v56 = vpop.f32.mrb[131].mxu0  ;;  %v5219_v4 = vld [vmem:[#allocation2 + $0x90] sm:$0xff]  ;;  %v5836_v32 = vmul.f32 %v5572_v24, %v5572_v24  ;;  %v5776_v52 = vadd.f32 %v5775_v31, %v5774_v60  ;;  %v5877_v42 = vadd.f32 %v5876_v1, %v5875_v36  ;;  %v5838_v13 = vmul.f32 %v5574_v7, %v5574_v7  ;;  %v4659_v36 = vld [vmem:[#allocation2 + $0xc0] sm:$0xff] }
 0x20b   : > { %v5513_v63 = vadd.f32 %v7132_v59, %v5219_v4  ;;  %v5217_v23 = vld [vmem:[#allocation2 + $0x80] sm:$0xff]  ;;  %5735 = vst.msk [vmem:[%s8856_s14 + $0x3c] sm:$0xf] %vm5719_vm9, %v6670_v33  ;;  %5733 = vst.msk [vmem:[%s8856_s14 + $0x34] sm:$0xf] %vm5719_vm9, %v6668_v2  ;;  %v5882_v62 = vsel %vm183_vm8, %v5837_v54, 0.0 }
 0x20c   : > { %v5220_v43 = vld [vmem:[#allocation2 + $0x98] sm:$0xff]  ;;  %v5511_v8 = vadd.f32 %v5432_v15, %v5217_v23  ;;  %v5880_v38 = vsel %vm183_vm8, %v5836_v32, 0.0  ;;  %v5879_v55 = vadd.f32 %v5878_v5, %v5877_v42  ;;  %v5778_v59 = vadd.f32 %v5777_v34, %v5776_v52 }
 0x20d   : > { %5545 = vst.msk [vmem:[#allocation2 + $0x90] sm:$0xff] %vm183_vm8, %v5513_v63  ;;  %v7102_v12 = vpop.f32.mrb[132].mxu1  ;;  %v5218_v18 = vld [vmem:[#allocation2 + $0x88] sm:$0xff]  ;;  %v5514_v20 = vadd.f32 %v7133_v17, %v5220_v43  ;;  %v5781_v22 = vsel %vm183_vm8, %v5574_v7, 0.0  ;;  %v5884_v16 = vsel %vm183_vm8, %v5838_v13, 0.0  ;;  %v4662_v5 = vld [vmem:[#allocation2 + $0xd8] sm:$0xff] }
 0x20e   : > { %v4882_v49 = vpop.f32.mrb[133].mxu1  ;;  %v4951_v39 = vadd.f32 %v7102_v12, %v4657_v41  ;;  %5543 = vst.msk [vmem:[#allocation2 + $0x80] sm:$0xff] %vm183_vm8, %v5511_v8  ;;  %v5512_v53 = vadd.f32 %v5435_v56, %v5218_v18  ;;  %v5780_v44 = vadd.f32 %v5779_v51, %v5778_v59  ;;  %v5881_v56 = vadd.f32 %v5880_v38, %v5879_v55 }
 0x20f   : > { %v7103_v14 = vpop.f32.mrb[134].mxu1  ;;  %v4949_v47 = vadd.f32 %v4882_v49, %v4655_v27  ;;  %5546 = vst.msk [vmem:[#allocation2 + $0x98] sm:$0xff] %vm183_vm8, %v5514_v20  ;;  %v4660_v27 = vld [vmem:[#allocation2 + $0xc8] sm:$0xff] }
 0x210   : > { %v4885_v37 = vpop.f32.mrb[135].mxu1  ;;  %4983 = vst.msk [vmem:[#allocation2 + $0xb0] sm:$0xff] %vm183_vm8, %v4951_v39  ;;  %v4952_v21 = vadd.f32 %v7103_v14, %v4658_v0  ;;  %5544 = vst.msk [vmem:[#allocation2 + $0x88] sm:$0xff] %vm183_vm8, %v5512_v53  ;;  %v5883_v4 = vadd.f32 %v5882_v62, %v5881_v56  ;;  %v5782_v25 = vadd.f32 %v5781_v22, %v5780_v44 }
 0x211   : > { %v4950_v48 = vadd.f32 %v4885_v37, %v4656_v29  ;;  %4981 = vst.msk [vmem:[#allocation2 + $0xa0] sm:$0xff] %vm183_vm8, %v4949_v47 }
 0x212   : > { %4984 = vst.msk [vmem:[#allocation2 + $0xb8] sm:$0xff] %vm183_vm8, %v4952_v21  ;;  %v5885_v30 = vadd.f32 %v5884_v16, %v5883_v4 }
 0x213   : > { %4982 = vst.msk [vmem:[#allocation2 + $0xa8] sm:$0xff] %vm183_vm8, %v4950_v48 }
 0x214   : > { %v8950_v10 = vld [vmem:[#allocation2 + $0x90] sm:$0xff] }
 0x215   : > { %v7136_v15 = vpop.f32.mrb[132].mxu0  ;;  %v6673_v17 = vpack.c.bf16 %v8950_v10, %v8950_v10  ;;  %v5575_v63 = vld [vmem:[#allocation2 + $0x80] sm:$0xff]  ;;  %v5841_v24 = vmul.f32 %v8950_v10, %v8950_v10  ;;  %v5787_v52 = vsel %vm183_vm8, %v8950_v10, 0.0 }
 0x216   : > { %v5448_v58 = vpop.f32.mrb[133].mxu0  ;;  %v6671_v26 = vpack.c.bf16 %v5575_v63, %v5575_v63  ;;  %v5783_v19 = vsel %vm183_vm8, %v5575_v63, 0.0  ;;  %v5839_v46 = vmul.f32 %v5575_v63, %v5575_v63  ;;  %v5578_v28 = vld [vmem:[#allocation2 + $0x98] sm:$0xff]  ;;  %v4665_v63 = vld [vmem:[#allocation2 + $0xf0] sm:$0xff] }
 0x217   : > { %v7137_v9 = vpop.f32.mrb[134].mxu0  ;;  %5738 = vst.msk [vmem:[%s8856_s14 + $0x48] sm:$0xf] %vm5719_vm9, %v6673_v17  ;;  %v5223_v45 = vld [vmem:[#allocation2 + $0xb0] sm:$0xff]  ;;  %v5784_v40 = vadd.f32 %v5783_v19, %v5782_v25  ;;  %v6674_v7 = vpack.c.bf16 %v5578_v28, %v5578_v28  ;;  %v5576_v12 = vld [vmem:[#allocation2 + $0x88] sm:$0xff]  ;;  %v5890_v29 = vsel %vm183_vm8, %v5841_v24, 0.0  ;;  %v5842_v38 = vmul.f32 %v5578_v28, %v5578_v28 }
 0x218   : > { %v5451_v50 = vpop.f32.mrb[135].mxu0  ;;  %v5517_v57 = vadd.f32 %v7136_v15, %v5223_v45  ;;  %v5221_v3 = vld [vmem:[#allocation2 + $0xa0] sm:$0xff]  ;;  %5736 = vst.msk [vmem:[%s8856_s14 + $0x40] sm:$0xf] %vm5719_vm9, %v6671_v26  ;;  %v5886_v33 = vsel %vm183_vm8, %v5839_v46, 0.0  ;;  %v6672_v41 = vpack.c.bf16 %v5576_v12, %v5576_v12  ;;  %v5785_v23 = vsel %vm183_vm8, %v5576_v12, 0.0 }
 0x219   : > { %v5224_v11 = vld [vmem:[#allocation2 + $0xb8] sm:$0xff]  ;;  %v5840_v49 = vmul.f32 %v5576_v12, %v5576_v12  ;;  %v5887_v39 = vadd.f32 %v5886_v33, %v5885_v30  ;;  %5739 = vst.msk [vmem:[%s8856_s14 + $0x4c] sm:$0xf] %vm5719_vm9, %v6674_v7  ;;  %v5786_v43 = vadd.f32 %v5785_v23, %v5784_v40  ;;  %v5515_v2 = vadd.f32 %v5448_v58, %v5221_v3  ;;  %v4663_v33 = vld [vmem:[#allocation2 + $0xe0] sm:$0xff]  ;;  %v4664_v24 = vld [vmem:[#allocation2 + $0xe8] sm:$0xff] }
 0x21a   : > { %5549 = vst.msk [vmem:[#allocation2 + $0xb0] sm:$0xff] %vm183_vm8, %v5517_v57  ;;  %v5222_v31 = vld [vmem:[#allocation2 + $0xa8] sm:$0xff]  ;;  %v5518_v37 = vadd.f32 %v7137_v9, %v5224_v11  ;;  %v5789_v59 = vsel %vm183_vm8, %v5578_v28, 0.0  ;;  %v5892_v51 = vsel %vm183_vm8, %v5842_v38, 0.0 }
 0x21b   : > { %5737 = vst.msk [vmem:[%s8856_s14 + $0x44] sm:$0xf] %vm5719_vm9, %v6672_v41  ;;  %v5888_v60 = vsel %vm183_vm8, %v5840_v49, 0.0  ;;  %v5516_v8 = vadd.f32 %v5451_v50, %v5222_v31  ;;  %v5788_v47 = vadd.f32 %v5787_v52, %v5786_v43  ;;  %v4666_v41 = vld [vmem:[#allocation2 + $0xf8] sm:$0xff] }
 0x21c   : > { %v7106_v6 = vpop.f32.mrb[136].mxu1  ;;  %v5889_v34 = vadd.f32 %v5888_v60, %v5887_v39  ;;  %5547 = vst.msk [vmem:[#allocation2 + $0xa0] sm:$0xff] %vm183_vm8, %v5515_v2  ;;  %5550 = vst.msk [vmem:[#allocation2 + $0xb8] sm:$0xff] %vm183_vm8, %v5518_v37 }
 0x21d   : > { %v4898_v61 = vpop.f32.mrb[137].mxu1  ;;  %v4955_v14 = vadd.f32 %v7106_v6, %v4661_v35  ;;  %5548 = vst.msk [vmem:[#allocation2 + $0xa8] sm:$0xff] %vm183_vm8, %v5516_v8  ;;  %v5790_v15 = vadd.f32 %v5789_v59, %v5788_v47 }
 0x21e   : > { %v7107_v1 = vpop.f32.mrb[138].mxu1  ;;  %v4953_v18 = vadd.f32 %v4898_v61, %v4659_v36  ;;  %v5891_v48 = vadd.f32 %v5890_v29, %v5889_v34 }
 0x21f   : > { %v4901_v54 = vpop.f32.mrb[139].mxu1  ;;  %4987 = vst.msk [vmem:[#allocation2 + $0xd0] sm:$0xff] %vm183_vm8, %v4955_v14  ;;  %v4956_v32 = vadd.f32 %v7107_v1, %v4662_v5 }
 0x220   : > { %4985 = vst.msk [vmem:[#allocation2 + $0xc0] sm:$0xff] %vm183_vm8, %v4953_v18  ;;  %v4954_v42 = vadd.f32 %v4901_v54, %v4660_v27  ;;  %v5893_v58 = vadd.f32 %v5892_v51, %v5891_v48 }
 0x221   : > { %v5581_v20 = vld [vmem:[#allocation2 + $0xb0] sm:$0xff]  ;;  %4988 = vst.msk [vmem:[#allocation2 + $0xd8] sm:$0xff] %vm183_vm8, %v4956_v32 }
 0x222   : > { %v6677_v21 = vpack.c.bf16 %v5581_v20, %v5581_v20  ;;  %4986 = vst.msk [vmem:[#allocation2 + $0xc8] sm:$0xff] %vm183_vm8, %v4954_v42  ;;  %v5845_v12 = vmul.f32 %v5581_v20, %v5581_v20  ;;  %v5795_v43 = vsel %vm183_vm8, %v5581_v20, 0.0 }
 0x223   : > { %v7140_v0 = vpop.f32.mrb[136].mxu0  ;;  %v5579_v17 = vld [vmem:[#allocation2 + $0xa0] sm:$0xff]  ;;  %v5582_v44 = vld [vmem:[#allocation2 + $0xb8] sm:$0xff] }
 0x224   : > { %v5464_v53 = vpop.f32.mrb[137].mxu0  ;;  %5742 = vst.msk [vmem:[%s8856_s14 + $0x58] sm:$0xf] %vm5719_vm9, %v6677_v21  ;;  %v6675_v9 = vpack.c.bf16 %v5579_v17, %v5579_v17  ;;  %v5791_v62 = vsel %vm183_vm8, %v5579_v17, 0.0  ;;  %v5843_v22 = vmul.f32 %v5579_v17, %v5579_v17  ;;  %v6678_v50 = vpack.c.bf16 %v5582_v44, %v5582_v44  ;;  %v5580_v4 = vld [vmem:[#allocation2 + $0xa8] sm:$0xff] }
 0x225   : > { %v7141_v55 = vpop.f32.mrb[138].mxu0  ;;  %v5792_v16 = vadd.f32 %v5791_v62, %v5790_v15  ;;  %v6676_v57 = vpack.c.bf16 %v5580_v4, %v5580_v4  ;;  %v5793_v46 = vsel %vm183_vm8, %v5580_v4, 0.0  ;;  %v5844_v28 = vmul.f32 %v5580_v4, %v5580_v4 }
 0x226   : > { %v5467_v10 = vpop.f32.mrb[139].mxu0  ;;  %v5227_v13 = vld [vmem:[#allocation2 + $0xd0] sm:$0xff]  ;;  %5740 = vst.msk [vmem:[%s8856_s14 + $0x50] sm:$0xf] %vm5719_vm9, %v6675_v9  ;;  %v5894_v19 = vsel %vm183_vm8, %v5843_v22, 0.0  ;;  %v5898_v37 = vsel %vm183_vm8, %v5845_v12, 0.0  ;;  %v5846_v5 = vmul.f32 %v5582_v44, %v5582_v44 }
 0x227   : > { %v5521_v56 = vadd.f32 %v7140_v0, %v5227_v13  ;;  %v5225_v45 = vld [vmem:[#allocation2 + $0xc0] sm:$0xff]  ;;  %5743 = vst.msk [vmem:[%s8856_s14 + $0x5c] sm:$0xf] %vm5719_vm9, %v6678_v50  ;;  %v5895_v3 = vadd.f32 %v5894_v19, %v5893_v58  ;;  %5741 = vst.msk [vmem:[%s8856_s14 + $0x54] sm:$0xf] %vm5719_vm9, %v6676_v57  ;;  %v5794_v61 = vadd.f32 %v5793_v46, %v5792_v16  ;;  %v5896_v49 = vsel %vm183_vm8, %v5844_v28, 0.0 }
 0x228   : > { %v5228_v26 = vld [vmem:[#allocation2 + $0xd8] sm:$0xff]  ;;  %v5519_v11 = vadd.f32 %v5464_v53, %v5225_v45  ;;  %v5797_v27 = vsel %vm183_vm8, %v5582_v44, 0.0  ;;  %v5900_v47 = vsel %vm183_vm8, %v5846_v5, 0.0 }
 0x229   : > { %5553 = vst.msk [vmem:[#allocation2 + $0xd0] sm:$0xff] %vm183_vm8, %v5521_v56  ;;  %v5226_v7 = vld [vmem:[#allocation2 + $0xc8] sm:$0xff]  ;;  %v5522_v1 = vadd.f32 %v7141_v55, %v5228_v26  ;;  %v5897_v14 = vadd.f32 %v5896_v49, %v5895_v3  ;;  %v5796_v2 = vadd.f32 %v5795_v43, %v5794_v61 }
 0x22a   : > { %v7110_v25 = vpop.f32.mrb[140].mxu1  ;;  %5551 = vst.msk [vmem:[#allocation2 + $0xc0] sm:$0xff] %vm183_vm8, %v5519_v11  ;;  %v5520_v36 = vadd.f32 %v5467_v10, %v5226_v7 }
 0x22b   : > { %v4914_v30 = vpop.f32.mrb[141].mxu1  ;;  %v4959_v6 = vadd.f32 %v7110_v25, %v4665_v63  ;;  %5554 = vst.msk [vmem:[#allocation2 + $0xd8] sm:$0xff] %vm183_vm8, %v5522_v1  ;;  %v5899_v32 = vadd.f32 %v5898_v37, %v5897_v14  ;;  %v5798_v42 = vadd.f32 %v5797_v27, %v5796_v2 }
 0x22c   : > { %v7111_v40 = vpop.f32.mrb[142].mxu1  ;;  %v4957_v35 = vadd.f32 %v4914_v30, %v4663_v33  ;;  %5552 = vst.msk [vmem:[#allocation2 + $0xc8] sm:$0xff] %vm183_vm8, %v5520_v36 }
 0x22d   : > { %v4917_v23 = vpop.f32.mrb[143].mxu1  ;;  %4991 = vst.msk [vmem:[#allocation2 + $0xf0] sm:$0xff] %vm183_vm8, %v4959_v6  ;;  %v4960_v31 = vadd.f32 %v7111_v40, %v4666_v41  ;;  %v5901_v29 = vadd.f32 %v5900_v47, %v5899_v32 }
 0x22e   : > { %v7144_v39 = vpop.f32.mrb[140].mxu0  ;;  %v4958_v54 = vadd.f32 %v4917_v23, %v4664_v24  ;;  %4989 = vst.msk [vmem:[#allocation2 + $0xe0] sm:$0xff] %vm183_vm8, %v4957_v35 }
 0x22f   : > { %v5480_v60 = vpop.f32.mrb[141].mxu0  ;;  %4992 = vst.msk [vmem:[#allocation2 + $0xf8] sm:$0xff] %vm183_vm8, %v4960_v31 }
 0x230   : > { %v7145_v18 = vpop.f32.mrb[142].mxu0  ;;  %4990 = vst.msk [vmem:[#allocation2 + $0xe8] sm:$0xff] %vm183_vm8, %v4958_v54  ;;  %v5585_v8 = vld [vmem:[#allocation2 + $0xd0] sm:$0xff] }
 0x231   : > { %v5483_v34 = vpop.f32.mrb[143].mxu0  ;;  %v6681_v52 = vpack.c.bf16 %v5585_v8, %v5585_v8  ;;  %v5583_v0 = vld [vmem:[#allocation2 + $0xc0] sm:$0xff]  ;;  %v5849_v62 = vmul.f32 %v5585_v8, %v5585_v8  ;;  %v5803_v57 = vsel %vm183_vm8, %v5585_v8, 0.0 }
 0x232   : > { %v6679_v21 = vpack.c.bf16 %v5583_v0, %v5583_v0  ;;  %v5799_v53 = vsel %vm183_vm8, %v5583_v0, 0.0  ;;  %v5847_v48 = vmul.f32 %v5583_v0, %v5583_v0  ;;  %v5586_v55 = vld [vmem:[#allocation2 + $0xd8] sm:$0xff] }
 0x233   : > { %5746 = vst.msk [vmem:[%s8856_s14 + $0x68] sm:$0xf] %vm5719_vm9, %v6681_v52  ;;  %v5800_v10 = vadd.f32 %v5799_v53, %v5798_v42  ;;  %v6682_v15 = vpack.c.bf16 %v5586_v55, %v5586_v55  ;;  %v5584_v51 = vld [vmem:[#allocation2 + $0xc8] sm:$0xff]  ;;  %v5906_v26 = vsel %vm183_vm8, %v5849_v62, 0.0  ;;  %v5850_v19 = vmul.f32 %v5586_v55, %v5586_v55 }
 0x234   : > { %v5231_v20 = vld [vmem:[#allocation2 + $0xf0] sm:$0xff]  ;;  %5744 = vst.msk [vmem:[%s8856_s14 + $0x60] sm:$0xf] %vm5719_vm9, %v6679_v21  ;;  %v5902_v58 = vsel %vm183_vm8, %v5847_v48, 0.0  ;;  %v6680_v44 = vpack.c.bf16 %v5584_v51, %v5584_v51  ;;  %v5801_v56 = vsel %vm183_vm8, %v5584_v51, 0.0  ;;  %v5848_v9 = vmul.f32 %v5584_v51, %v5584_v51 }
 0x235   : > { %v5525_v38 = vadd.f32 %v7144_v39, %v5231_v20  ;;  %v5229_v59 = vld [vmem:[#allocation2 + $0xe0] sm:$0xff]  ;;  %v5903_v22 = vadd.f32 %v5902_v58, %v5901_v29  ;;  %5747 = vst.msk [vmem:[%s8856_s14 + $0x6c] sm:$0xf] %vm5719_vm9, %v6682_v15  ;;  %v5802_v50 = vadd.f32 %v5801_v56, %v5800_v10  ;;  %v5805_v6 = vsel %vm183_vm8, %v5586_v55, 0.0 }
 0x236   : > { %v5232_v13 = vld [vmem:[#allocation2 + $0xf8] sm:$0xff]  ;;  %v5523_v4 = vadd.f32 %v5480_v60, %v5229_v59  ;;  %5745 = vst.msk [vmem:[%s8856_s14 + $0x64] sm:$0xf] %vm5719_vm9, %v6680_v44  ;;  %v5904_v25 = vsel %vm183_vm8, %v5848_v9, 0.0  ;;  %v5908_v12 = vsel %vm183_vm8, %v5850_v19, 0.0 }
 0x237   : > { %5557 = vst.msk [vmem:[#allocation2 + $0xf0] sm:$0xff] %vm183_vm8, %v5525_v38  ;;  %v5230_v17 = vld [vmem:[#allocation2 + $0xe8] sm:$0xff]  ;;  %v5526_v45 = vadd.f32 %v7145_v18, %v5232_v13  ;;  %v5905_v63 = vadd.f32 %v5904_v25, %v5903_v22  ;;  %v5804_v30 = vadd.f32 %v5803_v57, %v5802_v50 }
 0x238   : > { %v5524_v16 = vadd.f32 %v5483_v34, %v5230_v17  ;;  %5555 = vst.msk [vmem:[#allocation2 + $0xe0] sm:$0xff] %vm183_vm8, %v5523_v4 }
 0x239   : > { %5558 = vst.msk [vmem:[#allocation2 + $0xf8] sm:$0xff] %vm183_vm8, %v5526_v45  ;;  %v5907_v46 = vadd.f32 %v5906_v26, %v5905_v63  ;;  %v5806_v7 = vadd.f32 %v5805_v6, %v5804_v30 }
 0x23a   : > { %5556 = vst.msk [vmem:[#allocation2 + $0xe8] sm:$0xff] %vm183_vm8, %v5524_v16 }
 0x23b   : > { %v5909_v61 = vadd.f32 %v5908_v12, %v5907_v46 }
 0x23e   : > { %v5589_v28 = vld [vmem:[#allocation2 + $0xf0] sm:$0xff] }
 0x23f   : > { %v6685_v40 = vpack.c.bf16 %v5589_v28, %v5589_v28  ;;  %v5587_v3 = vld [vmem:[#allocation2 + $0xe0] sm:$0xff]  ;;  %v5853_v35 = vmul.f32 %v5589_v28, %v5589_v28  ;;  %v5811_v60 = vsel %vm183_vm8, %v5589_v28, 0.0 }
 0x240   : > { %v6683_v11 = vpack.c.bf16 %v5587_v3, %v5587_v3  ;;  %v5807_v33 = vsel %vm183_vm8, %v5587_v3, 0.0  ;;  %v5851_v41 = vmul.f32 %v5587_v3, %v5587_v3  ;;  %v5590_v23 = vld [vmem:[#allocation2 + $0xf8] sm:$0xff] }
 0x241   : > { %5750 = vst.msk [vmem:[%s8856_s14 + $0x78] sm:$0xf] %vm5719_vm9, %v6685_v40  ;;  %v5588_v49 = vld [vmem:[#allocation2 + $0xe8] sm:$0xff]  ;;  %v5808_v1 = vadd.f32 %v5807_v33, %v5806_v7  ;;  %v6686_v31 = vpack.c.bf16 %v5590_v23, %v5590_v23  ;;  %v5854_v2 = vmul.f32 %v5590_v23, %v5590_v23  ;;  %v5914_v34 = vsel %vm183_vm8, %v5853_v35, 0.0 }
 0x242   : > { %5748 = vst.msk [vmem:[%s8856_s14 + $0x70] sm:$0xf] %vm5719_vm9, %v6683_v11  ;;  %v5910_v24 = vsel %vm183_vm8, %v5851_v41, 0.0  ;;  %v6684_v39 = vpack.c.bf16 %v5588_v49, %v5588_v49  ;;  %v5809_v43 = vsel %vm183_vm8, %v5588_v49, 0.0  ;;  %v5852_v14 = vmul.f32 %v5588_v49, %v5588_v49 }
 0x243   : > { %v5911_v36 = vadd.f32 %v5910_v24, %v5909_v61  ;;  %5751 = vst.msk [vmem:[%s8856_s14 + $0x7c] sm:$0xf] %vm5719_vm9, %v6686_v31  ;;  %v5810_v54 = vadd.f32 %v5809_v43, %v5808_v1  ;;  %v5813_v32 = vsel %vm183_vm8, %v5590_v23, 0.0  ;;  %v5916_v52 = vsel %vm183_vm8, %v5854_v2, 0.0 }
 0x244   : > { %5749 = vst.msk [vmem:[%s8856_s14 + $0x74] sm:$0xf] %vm5719_vm9, %v6684_v39  ;;  %v5912_v18 = vsel %vm183_vm8, %v5852_v14, 0.0 }
 0x245   : > { %v5812_v37 = vadd.f32 %v5811_v60, %v5810_v54  ;;  %v5913_v5 = vadd.f32 %v5912_v18, %v5911_v36 }
 0x247   : > { %v5814_v8 = vadd.f32 %v5813_v32, %v5812_v37  ;;  %v5915_v27 = vadd.f32 %v5914_v34, %v5913_v5 }
 0x249   : > { %v5815_v42 = vrot.slane %v5814_v8, 4  ;;  %v5917_v47 = vadd.f32 %v5916_v52, %v5915_v27 }
 0x24b   : > { %v5816_v20 = vadd.f32 %v5815_v42, %v5814_v8  ;;  %v5918_v0 = vrot.slane %v5917_v47, 4 }
 0x24d   : > { %v5817_v29 = vrot.slane %v5816_v20, 2  ;;  %v5919_v38 = vadd.f32 %v5918_v0, %v5917_v47 }
 0x24f   : > { %v5818_v21 = vadd.f32 %v5817_v29, %v5816_v20  ;;  %v5920_v53 = vrot.slane %v5919_v38, 2 }
 0x251   : > { %v5819_v48 = vrot.slane %v5818_v21, 1  ;;  %v5921_v55 = vadd.f32 %v5920_v53, %v5919_v38 }
 0x253   : > { %v5820_v59 = vadd.f32 %v5819_v48, %v5818_v21  ;;  %v5922_v10 = vrot.slane %v5921_v55, 1 }
 0x255   : > { %5822 = vst.msk [vmem:[%s181_s18] sm:$0x1] %vm5821_vm10, %v5820_v59  ;;  %v5923_v15 = vadd.f32 %v5922_v10, %v5921_v55 }
 0x257   : > { %5924 = vst.msk [vmem:[%s181_s18 + $0x1] sm:$0x1] %vm5821_vm10, %v5923_v15 }
 0x258 PF: > { %s14_s12 = sadd.s32 1, %s7222_s12  }
 0x259   : > { %p11_p4 = scmp.ge.s32.totalorder %s14_s12, 4  }
 0x25b   :  { %13 = sbr.rel (!%p11_p4) target bundleno = 1 (0x1), region = 80 }

</bundles_post_ra>
